<compile_context>
chip_gen: v7x
topology: tpu7x:2x2x1
jax: 0.10.0
libtpu: 0.0.40
codegen_flags: <defaults>
</compile_context>

<pallas_src>
import functools

import jax
import jax.numpy as jnp
from jax import lax
from jax.experimental import pallas as pl
from jax.experimental.pallas import tpu as pltpu

_LANE = 128
_HALO = 6  # vertical receptive-field halo of the deepest branch (two stacked (7,1) convs)


def _round_up(c, m=_LANE):
    return ((c + m - 1) // m) * m


# ---------------------------------------------------------------------------
# In-kernel helpers: 7-tap separable convs as 7 per-tap MXU matmuls (K = Ci),
# bf16 operands, f32 accumulation, folded-BN bias + ReLU epilogue.
# ---------------------------------------------------------------------------

def _conv7_w_same(t, w_ref, b_ref):
    """(1,7) conv along W ('same', zero pad 3) + bias + ReLU.

    t: (R, W, Ci) bf16; w_ref: (7, Ci, Co) bf16 (tap-major); b_ref: (1, Co) f32.
    Returns (R, W, Co) f32.
    """
    R, W, Ci = t.shape
    Co = w_ref.shape[2]
    z = jnp.zeros((R, 3, Ci), t.dtype)
    tp = jnp.concatenate([z, t, z], axis=1)                       # (R, W+6, Ci) bf16
    acc = jnp.zeros((R * W, Co), jnp.float32)
    for k in range(7):                                            # static unroll: 7 MXU dots
        acc = acc + jnp.dot(tp[:, k:k + W, :].reshape(R * W, Ci), w_ref[k],
                            preferred_element_type=jnp.float32)
    return jnp.maximum(acc + b_ref[...], 0.0).reshape(R, W, Co)


def _conv7_h_valid(t, w_ref, b_ref, r_out):
    """(7,1) conv along H in 'valid' mode (the 6 halo rows are already in t) + bias + ReLU.

    t: (r_out + 6, W, Ci) bf16.  Returns (r_out, W, Co) f32.
    """
    _, W, Ci = t.shape
    Co = w_ref.shape[2]
    acc = jnp.zeros((r_out * W, Co), jnp.float32)
    for k in range(7):
        acc = acc + jnp.dot(t[k:k + r_out].reshape(r_out * W, Ci), w_ref[k],
                            preferred_element_type=jnp.float32)
    return jnp.maximum(acc + b_ref[...], 0.0).reshape(r_out, W, Co)


# ---------------------------------------------------------------------------
# Fused _InceptionB kernel: one (batch, h-tile) per grid step.
# ---------------------------------------------------------------------------

def _inception_b_kernel(x_ref,
                        wr_ref, br_ref,              # fused 1x1: conv1 | conv3_r | conv5_r
                        w3a_ref, b3a_ref,            # conv3_branch (1,7)
                        w3b_ref, b3b_ref,            # conv3_branch (7,1)
                        w5a_ref, b5a_ref,            # conv5_branch (7,1)
                        w5b_ref, b5b_ref,            # conv5_branch (1,7)
                        w5c_ref, b5c_ref,            # conv5_branch (7,1)
                        w5d_ref, b5d_ref,            # conv5_branch (1,7)
                        wp_ref, bp_ref,              # pool_branch 1x1
                        o_ref, *, c1, c3r, c5r, g3, g5):
    Hp, W, Cin = x_ref.shape          # Hp = H + 2*HALO (input pre-padded with zero rows)
    H = Hp - 2 * _HALO
    TH = o_ref.shape[0]               # output rows per grid step
    RW = TH + 2 * _HALO               # halo window rows

    r0 = pl.program_id(1) * TH
    # Padded-input rows [r0, r0+RW) == image rows [r0-6, r0+TH+6), zero outside the image.
    xw = x_ref[pl.ds(r0, RW), :, :]                               # (RW, W, Cin) bf16

    # Rows outside the image must be exactly zero between stages so that each (7,1) conv
    # sees the same boundary zero padding as the unfused reference (ReLU(bias) != 0 there).
    vrow = lax.broadcasted_iota(jnp.int32, (RW, 1, 1), 0) + (r0 - _HALO)
    valid_full = (vrow >= 0) & (vrow < H)                         # (RW, 1, 1)
    valid_mid = valid_full[3:3 + TH + 6]                          # (TH+6, 1, 1)

    # ---- fused 1x1 reduce convs (one MXU matmul for three branches) ------------
    t_all = jnp.dot(xw.reshape(RW * W, Cin), wr_ref[...],
                    preferred_element_type=jnp.float32)
    t_all = jnp.maximum(t_all + br_ref[...], 0.0).reshape(RW, W, -1)

    # conv1 branch: centre rows of the first (lane-aligned) column group, stored directly.
    o_ref[:, :, 0:c1] = t_all[_HALO:_HALO + TH, :, 0:c1].astype(o_ref.dtype)

    # ---- conv3 branch: (1,7) -> (7,1) -------------------------------------------
    t3 = t_all[3:3 + TH + 6, :, g3:g3 + c3r].astype(jnp.bfloat16)
    y3 = _conv7_w_same(t3, w3a_ref, b3a_ref)                      # (TH+6, W, c3_1) f32
    y3 = jnp.where(valid_mid, y3.astype(jnp.bfloat16), 0.0)       # boundary zero padding
    x3 = _conv7_h_valid(y3, w3b_ref, b3b_ref, TH)                 # (TH, W, c3) f32
    c3 = x3.shape[-1]
    o_ref[:, :, c1:c1 + c3] = x3.astype(o_ref.dtype)

    # ---- conv5 branch: (7,1) -> (1,7) -> (7,1) -> (1,7) --------------------------
    t5 = jnp.where(valid_full, t_all[:, :, g5:g5 + c5r].astype(jnp.bfloat16), 0.0)
    y5 = _conv7_h_valid(t5, w5a_ref, b5a_ref, TH + 6)             # (TH+6, W, c5_12) f32
    y5 = _conv7_w_same(y5.astype(jnp.bfloat16), w5b_ref, b5b_ref)  # (TH+6, W, c5_34) f32
    y5 = jnp.where(valid_mid, y5.astype(jnp.bfloat16), 0.0)       # boundary zero padding
    y5 = _conv7_h_valid(y5, w5c_ref, b5c_ref, TH)                 # (TH, W, c5_34) f32
    x5 = _conv7_w_same(y5.astype(jnp.bfloat16), w5d_ref, b5d_ref)  # (TH, W, c5) f32
    c5 = x5.shape[-1]
    o_ref[:, :, c1 + c3:c1 + c3 + c5] = x5.astype(o_ref.dtype)

    # ---- pool branch: separable 3x3 avg pool (count_include_pad) + 1x1 -----------
    xh = xw[_HALO - 1:_HALO + TH + 1].astype(jnp.float32)         # (TH+2, W, Cin) f32 sums
    rs = xh[0:TH] + xh[1:TH + 1] + xh[2:TH + 2]                   # row sums
    zw = jnp.zeros((TH, 1, Cin), jnp.float32)
    rw = jnp.concatenate([zw, rs, zw], axis=1)                    # (TH, W+2, Cin)
    pooled = (rw[:, 0:W] + rw[:, 1:W + 1] + rw[:, 2:W + 2]) * (1.0 / 9.0)
    pp = jnp.dot(pooled.reshape(TH * W, Cin).astype(jnp.bfloat16), wp_ref[...],
                 preferred_element_type=jnp.float32)
    xp = jnp.maximum(pp + bp_ref[...], 0.0)
    cp = wp_ref.shape[1]
    o_ref[:, :, c1 + c3 + c5:c1 + c3 + c5 + cp] = (
        xp.reshape(TH, W, cp).astype(o_ref.dtype))


# ---------------------------------------------------------------------------
# Wrappers
# ---------------------------------------------------------------------------

def inception_b_forward_nhwc(params, x_nhwc, *, tile_h=None):
    """_InceptionB forward, NHWC native: (N, H, W, Cin) -> (N, H, W, C_total) f32."""
    N, H, W, Cin = x_nhwc.shape

    # Output-row tile (halo is recomputed per tile).  Full height for small H.
    if tile_h is not None and H % tile_h == 0:
        TH = tile_h
    elif H <= 32:
        TH = H
    else:
        TH = next((t for t in range(32, 0, -1) if H % t == 0), H)

    # bf16 activations into the kernel (halves input HBM traffic); pad H by the halo once
    # in HBM (fused with the cast) so each grid step reads an overlapping window via pl.ds.
    x = jnp.pad(x_nhwc.astype(jnp.bfloat16),
                ((0, 0), (_HALO, _HALO), (0, 0), (0, 0)))

    def w1x1(p):   # (1,1,Ci,Co) -> (Ci,Co)
        return p["w"].reshape(p["w"].shape[2], p["w"].shape[3])

    def w7(p):     # (7,1,Ci,Co) or (1,7,Ci,Co) -> (7, Ci, Co) bf16, tap-major
        _, _, ci, co = p["w"].shape
        return p["w"].reshape(7, ci, co).astype(jnp.bfloat16)

    def b2(p):
        return p["b"][None, :].astype(jnp.float32)

    c1 = params["conv1"]["w"].shape[3]
    c3r = params["conv3_r"]["w"].shape[3]
    c5r = params["conv5_r"]["w"].shape[3]
    c3 = params["conv3_2"]["w"].shape[3]
    c5 = params["conv5_d"]["w"].shape[3]
    cp = params["pool"]["w"].shape[3]
    c_total = c1 + c3 + c5 + cp

    # Fuse the three 1x1 reduce convs that read x into one weight matrix; zero-pad each
    # column group so it starts on a 128-lane boundary (aligned in-kernel group slices).
    a1, a3, a5 = _round_up(c1), _round_up(c3r), _round_up(c5r)

    def pad_group(p, a):
        w, b = w1x1(p), p["b"]
        return (jnp.pad(w, ((0, 0), (0, a - w.shape[1]))),
                jnp.pad(b, (0, a - b.shape[0])))

    (w1p, b1p) = pad_group(params["conv1"], a1)
    (w3p, b3p) = pad_group(params["conv3_r"], a3)
    (w5p, b5p) = pad_group(params["conv5_r"], a5)
    wr = jnp.concatenate([w1p, w3p, w5p], axis=1).astype(jnp.bfloat16)
    br = jnp.concatenate([b1p, b3p, b5p])[None, :].astype(jnp.float32)

    flat = [
        wr, br,
        w7(params["conv3_1"]), b2(params["conv3_1"]),
        w7(params["conv3_2"]), b2(params["conv3_2"]),
        w7(params["conv5_a"]), b2(params["conv5_a"]),
        w7(params["conv5_b"]), b2(params["conv5_b"]),
        w7(params["conv5_c"]), b2(params["conv5_c"]),
        w7(params["conv5_d"]), b2(params["conv5_d"]),
        w1x1(params["pool"]).astype(jnp.bfloat16), b2(params["pool"]),
    ]

    def weight_spec(a):
        idx = lambda n, t, _nd=a.ndim: (0,) * _nd
        # Grid-invariant operands: single-buffer to halve their VMEM footprint.
        if hasattr(pl, "Buffered"):
            try:
                return pl.BlockSpec(a.shape, idx, pipeline_mode=pl.Buffered(1))
            except TypeError:
                pass
        return pl.BlockSpec(a.shape, idx)

    # Rough per-step VMEM footprint -> scoped-VMEM limit (v5e default is only 16 MiB).
    weight_bytes = sum(int(a.size) * a.dtype.itemsize for a in flat)
    io_bytes = (2 * 2 * (H + 2 * _HALO) * W * Cin          # bf16 input, double-buffered
                + 2 * 4 * TH * W * c_total)                # f32 output, double-buffered
    inter_bytes = 4 * (TH + 2 * _HALO) * W * (
        a1 + a3 + a5 + 6 * max(Cin, c3r, c5r, c3, c5, cp))
    vmem_limit = int(min(max(2 * (weight_bytes + io_bytes + inter_bytes),
                             32 * 1024 * 1024), 64 * 1024 * 1024))

    kernel = functools.partial(_inception_b_kernel, c1=c1, c3r=c3r, c5r=c5r,
                               g3=a1, g5=a1 + a3)

    out = pl.pallas_call(
        kernel,
        out_shape=jax.ShapeDtypeStruct((N, H, W, c_total), jnp.float32),
        grid=(N, H // TH),
        in_specs=[pl.BlockSpec((None, H + 2 * _HALO, W, Cin),
                               lambda n, t: (n, 0, 0, 0))]
                + [weight_spec(a) for a in flat],
        out_specs=pl.BlockSpec((None, TH, W, c_total), lambda n, t: (n, t, 0, 0)),
        compiler_params=pltpu.CompilerParams(
            dimension_semantics=("parallel", "parallel"),
            vmem_limit_bytes=vmem_limit),
    )(x, *flat)
    return out


def inception_b_forward(params, x_nchw, *, tile_h=None):
    """NCHW adapter kept only for parity with the PyTorch module interface; inside an
    NHWC network call inception_b_forward_nhwc directly and skip both transposes."""
    x = jnp.transpose(x_nchw, (0, 2, 3, 1))                       # NCHW -> NHWC
    out = inception_b_forward_nhwc(params, x, tile_h=tile_h)
    return jnp.transpose(out, (0, 3, 1, 2))                       # NHWC -> NCHW


# ---------------------------------------------------------------------------
# Synthetic parameters (BN folded into the conv: w_folded = w * scale, b = beta - mean*scale)
# ---------------------------------------------------------------------------

def make_basic_conv_params(key, in_dim, out_dim, kh, kw, eps=0.001):
    kw_, kg, kb, km, kv = jax.random.split(key, 5)
    w = 0.1 * jax.random.normal(kw_, (kh, kw, in_dim, out_dim), jnp.float32)   # HWIO
    gamma = 0.5 + jax.random.uniform(kg, (out_dim,), jnp.float32)
    beta = 0.1 * jax.random.normal(kb, (out_dim,), jnp.float32)
    mean = 0.1 * jax.random.normal(km, (out_dim,), jnp.float32)
    var = 0.5 + jax.random.uniform(kv, (out_dim,), jnp.float32)
    scale = gamma / jnp.sqrt(var + eps)
    return {"w": w * scale, "b": beta - mean * scale}


def make_inception_b_params(key, in_dim, conv1, conv3_r, conv3_1, conv3_2,
                            conv5_12, conv5_34, conv5, pool):
    ks = jax.random.split(key, 10)
    return {
        "conv1":   make_basic_conv_params(ks[0], in_dim, conv1, 1, 1),
        "conv3_r": make_basic_conv_params(ks[1], in_dim, conv3_r, 1, 1),
        "conv3_1": make_basic_conv_params(ks[2], conv3_r, conv3_1, 1, 7),
        "conv3_2": make_basic_conv_params(ks[3], conv3_1, conv3_2, 7, 1),
        "conv5_r": make_basic_conv_params(ks[4], in_dim, conv5_12, 1, 1),
        "conv5_a": make_basic_conv_params(ks[5], conv5_12, conv5_12, 7, 1),
        "conv5_b": make_basic_conv_params(ks[6], conv5_12, conv5_34, 1, 7),
        "conv5_c": make_basic_conv_params(ks[7], conv5_34, conv5_34, 7, 1),
        "conv5_d": make_basic_conv_params(ks[8], conv5_34, conv5, 1, 7),
        "pool":    make_basic_conv_params(ks[9], in_dim, pool, 1, 1),
    }


# ---------------------------------------------------------------------------
# Pure-JAX reference (same bf16-activation / f32-accumulate numerics; no torch)
# ---------------------------------------------------------------------------

def _ref_conv_bn_relu(x, p, padding):
    y = lax.conv_general_dilated(
        x.astype(jnp.bfloat16), p["w"].astype(jnp.bfloat16), (1, 1), padding,
        dimension_numbers=("NHWC", "HWIO", "NHWC"),
        preferred_element_type=jnp.float32)
    return jnp.maximum(y + p["b"], 0.0)


def _ref_avgpool3(x):
    s = lax.reduce_window(x, 0.0, lax.add, (1, 3, 3, 1), (1, 1, 1, 1),
                          [(0, 0), (1, 1), (1, 1), (0, 0)])
    return s * (1.0 / 9.0)


def inception_b_reference(params, x_nchw):
    x = jnp.transpose(x_nchw, (0, 2, 3, 1))
    # Match the kernel's bf16 activation feed (the kernel quantizes x once at the input).
    x = x.astype(jnp.bfloat16).astype(jnp.float32)
    x1 = _ref_conv_bn_relu(x, params["conv1"], "VALID")
    t = _ref_conv_bn_relu(x, params["conv3_r"], "VALID")
    t = _ref_conv_bn_relu(t, params["conv3_1"], [(0, 0), (3, 3)])
    x3 = _ref_conv_bn_relu(t, params["conv3_2"], [(3, 3), (0, 0)])
    t = _ref_conv_bn_relu(x, params["conv5_r"], "VALID")
    t = _ref_conv_bn_relu(t, params["conv5_a"], [(3, 3), (0, 0)])
    t = _ref_conv_bn_relu(t, params["conv5_b"], [(0, 0), (3, 3)])
    t = _ref_conv_bn_relu(t, params["conv5_c"], [(3, 3), (0, 0)])
    x5 = _ref_conv_bn_relu(t, params["conv5_d"], [(0, 0), (3, 3)])
    xp = _ref_conv_bn_relu(_ref_avgpool3(x), params["pool"], "VALID")
    out = jnp.concatenate([x1, x3, x5, xp], axis=-1)
    return jnp.transpose(out, (0, 3, 1, 2))


# ---------------------------------------------------------------------------

if __name__ == "__main__":
    key = jax.random.PRNGKey(0)
    k_x, k_p = jax.random.split(key)

    # Small shapes consistent with the module: batch=2, in_dim=4, spatial 16x16 (NCHW).
    N, C, H, W = 2, 4, 16, 16
    x = jax.random.normal(k_x, (N, C, H, W), jnp.float32)

    params = make_inception_b_params(
        k_p, in_dim=C, conv1=8, conv3_r=6, conv3_1=6, conv3_2=8,
        conv5_12=6, conv5_34=6, conv5=8, pool=8)

    # tile_h=8 exercises the H-tiled halo path (2 row-tiles per image, both image edges).
    fwd = jax.jit(functools.partial(inception_b_forward, params, tile_h=8))
    out = fwd(x)
    jax.block_until_ready(out)

    assert out.shape == (N, 8 + 8 + 8 + 8, H, W), out.shape

    ref = inception_b_reference(params, x)
    jax.block_until_ready(ref)
    max_diff = jnp.max(jnp.abs(out - ref))
    assert jnp.allclose(out, ref, atol=1e-2, rtol=1e-2), f"max abs diff {max_diff}"

    print("KERNEL_OK")
</pallas_src>

<mosaic_0001>
module attributes {stable_mosaic.version = 11 : i64} {
  func.func @_inception_b_kernel(%arg0: i32, %arg1: i32, %arg2: memref<1x28x16x4xbf16, #tpu.memory_space<vmem>>, %arg3: memref<4x384xbf16, #tpu.memory_space<vmem>>, %arg4: memref<1x384xf32, #tpu.memory_space<vmem>>, %arg5: memref<7x6x6xbf16, #tpu.memory_space<vmem>>, %arg6: memref<1x6xf32, #tpu.memory_space<vmem>>, %arg7: memref<7x6x8xbf16, #tpu.memory_space<vmem>>, %arg8: memref<1x8xf32, #tpu.memory_space<vmem>>, %arg9: memref<7x6x6xbf16, #tpu.memory_space<vmem>>, %arg10: memref<1x6xf32, #tpu.memory_space<vmem>>, %arg11: memref<7x6x6xbf16, #tpu.memory_space<vmem>>, %arg12: memref<1x6xf32, #tpu.memory_space<vmem>>, %arg13: memref<7x6x6xbf16, #tpu.memory_space<vmem>>, %arg14: memref<1x6xf32, #tpu.memory_space<vmem>>, %arg15: memref<7x6x8xbf16, #tpu.memory_space<vmem>>, %arg16: memref<1x8xf32, #tpu.memory_space<vmem>>, %arg17: memref<4x8xbf16, #tpu.memory_space<vmem>>, %arg18: memref<1x8xf32, #tpu.memory_space<vmem>>, %arg19: memref<1x8x16x32xf32, #tpu.memory_space<vmem>>) attributes {dimension_semantics = [#tpu.dimension_semantics<parallel>, #tpu.dimension_semantics<parallel>], iteration_bounds = array<i64: 2, 2>, scalar_prefetch = 0 : i64, scratch_operands = 0 : i64, tpu.core_type = #tpu.core_type<tc>, window_params = [{transform_indices = @transform_0, window_bounds = array<i64: 1, 28, 16, 4>}, {pipeline_mode = #tpu.pipeline_mode<synchronous>, transform_indices = @transform_1, window_bounds = array<i64: 4, 384>}, {pipeline_mode = #tpu.pipeline_mode<synchronous>, transform_indices = @transform_2, window_bounds = array<i64: 1, 384>}, {pipeline_mode = #tpu.pipeline_mode<synchronous>, transform_indices = @transform_3, window_bounds = array<i64: 7, 6, 6>}, {pipeline_mode = #tpu.pipeline_mode<synchronous>, transform_indices = @transform_4, window_bounds = array<i64: 1, 6>}, {pipeline_mode = #tpu.pipeline_mode<synchronous>, transform_indices = @transform_5, window_bounds = array<i64: 7, 6, 8>}, {pipeline_mode = #tpu.pipeline_mode<synchronous>, transform_indices = @transform_6, window_bounds = array<i64: 1, 8>}, {pipeline_mode = #tpu.pipeline_mode<synchronous>, transform_indices = @transform_7, window_bounds = array<i64: 7, 6, 6>}, {pipeline_mode = #tpu.pipeline_mode<synchronous>, transform_indices = @transform_8, window_bounds = array<i64: 1, 6>}, {pipeline_mode = #tpu.pipeline_mode<synchronous>, transform_indices = @transform_9, window_bounds = array<i64: 7, 6, 6>}, {pipeline_mode = #tpu.pipeline_mode<synchronous>, transform_indices = @transform_10, window_bounds = array<i64: 1, 6>}, {pipeline_mode = #tpu.pipeline_mode<synchronous>, transform_indices = @transform_11, window_bounds = array<i64: 7, 6, 6>}, {pipeline_mode = #tpu.pipeline_mode<synchronous>, transform_indices = @transform_12, window_bounds = array<i64: 1, 6>}, {pipeline_mode = #tpu.pipeline_mode<synchronous>, transform_indices = @transform_13, window_bounds = array<i64: 7, 6, 8>}, {pipeline_mode = #tpu.pipeline_mode<synchronous>, transform_indices = @transform_14, window_bounds = array<i64: 1, 8>}, {pipeline_mode = #tpu.pipeline_mode<synchronous>, transform_indices = @transform_15, window_bounds = array<i64: 4, 8>}, {pipeline_mode = #tpu.pipeline_mode<synchronous>, transform_indices = @transform_16, window_bounds = array<i64: 1, 8>}, {transform_indices = @transform_17, window_bounds = array<i64: 1, 8, 16, 32>}]} {
    %c8_i32 = arith.constant 8 : i32
    %0 = arith.muli %arg1, %c8_i32 : i32
    %c0 = arith.constant 0 : index
    %1 = arith.index_cast %0 : i32 to index
    %c0_0 = arith.constant 0 : index
    %c0_1 = arith.constant 0 : index
    %2 = vector.load %arg2[%c0, %1, %c0_0, %c0_1] : memref<1x28x16x4xbf16, #tpu.memory_space<vmem>>, vector<1x20x16x4xbf16>
    %3 = vector.shape_cast %2 : vector<1x20x16x4xbf16> to vector<20x16x4xbf16>
    %4 = tpu.iota {dimensions = array<i32: 0>} : vector<20x1x1xi32>
    %c6_i32 = arith.constant 6 : i32
    %5 = arith.subi %0, %c6_i32 : i32
    %6 = vector.broadcast %5 : i32 to vector<20x1x1xi32>
    %7 = arith.addi %4, %6 : vector<20x1x1xi32>
    %c0_i32 = arith.constant 0 : i32
    %8 = vector.broadcast %c0_i32 : i32 to vector<20x1x1xi32>
    %9 = arith.cmpi sge, %7, %8 : vector<20x1x1xi32>
    %c16_i32 = arith.constant 16 : i32
    %10 = vector.broadcast %c16_i32 : i32 to vector<20x1x1xi32>
    %11 = arith.cmpi slt, %7, %10 : vector<20x1x1xi32>
    %12 = arith.andi %9, %11 : vector<20x1x1xi1>
    %13 = vector.extract_strided_slice %12 {offsets = [3, 0, 0], sizes = [14, 1, 1], strides = [1, 1, 1]} : vector<20x1x1xi1> to vector<14x1x1xi1>
    %14 = vector.shape_cast %3 : vector<20x16x4xbf16> to vector<320x4xbf16>
    %c0_2 = arith.constant 0 : index
    %c0_3 = arith.constant 0 : index
    %15 = vector.load %arg3[%c0_2, %c0_3] : memref<4x384xbf16, #tpu.memory_space<vmem>>, vector<4x384xbf16>
    %cst = arith.constant dense<0.000000e+00> : vector<320x384xf32>
    %16 = tpu.matmul %14, %15, %cst {dimension_numbers = #tpu.dot_dimension_numbers<[1], [0], [0], [1], [0, 0, 1, 1], [], []>} : vector<320x4xbf16>, vector<4x384xbf16>, vector<320x384xf32> -> vector<320x384xf32>
    %c0_4 = arith.constant 0 : index
    %c0_5 = arith.constant 0 : index
    %17 = vector.load %arg4[%c0_4, %c0_5] : memref<1x384xf32, #tpu.memory_space<vmem>>, vector<1x384xf32>
    %18 = vector.broadcast %17 : vector<1x384xf32> to vector<320x384xf32>
    %19 = arith.addf %16, %18 : vector<320x384xf32>
    %cst_6 = arith.constant 0.000000e+00 : f32
    %20 = vector.broadcast %cst_6 : f32 to vector<320x384xf32>
    %21 = arith.maximumf %19, %20 : vector<320x384xf32>
    %22 = vector.shape_cast %21 : vector<320x384xf32> to vector<20x16x384xf32>
    %23 = vector.extract_strided_slice %22 {offsets = [6, 0, 0], sizes = [8, 16, 8], strides = [1, 1, 1]} : vector<20x16x384xf32> to vector<8x16x8xf32>
    %c0_7 = arith.constant 0 : index
    %c0_8 = arith.constant 0 : index
    %c0_9 = arith.constant 0 : index
    %c0_10 = arith.constant 0 : index
    %24 = vector.load %arg19[%c0_7, %c0_8, %c0_9, %c0_10] : memref<1x8x16x32xf32, #tpu.memory_space<vmem>>, vector<1x8x16x8xf32>
    %25 = vector.shape_cast %24 : vector<1x8x16x8xf32> to vector<8x16x8xf32>
    %26 = vector.shape_cast %23 : vector<8x16x8xf32> to vector<1x8x16x8xf32>
    tpu.vector_store %arg19[%c0_7, %c0_8, %c0_9, %c0_10], %26 {strides = array<i32>} : memref<1x8x16x32xf32, #tpu.memory_space<vmem>>, vector<1x8x16x8xf32>,
    %27 = vector.extract_strided_slice %22 {offsets = [3, 0, 128], sizes = [14, 16, 6], strides = [1, 1, 1]} : vector<20x16x384xf32> to vector<14x16x6xf32>
    %28 = arith.truncf %27 : vector<14x16x6xf32> to vector<14x16x6xbf16>
    %cst_11 = arith.constant 0.000000e+00 : bf16
    %29 = vector.broadcast %cst_11 : bf16 to vector<14x3x6xbf16>
    %30 = tpu.concatenate %29, %28, %29 in 1 : vector<14x3x6xbf16>, vector<14x16x6xbf16>, vector<14x3x6xbf16> -> vector<14x22x6xbf16>
    %cst_12 = arith.constant 0.000000e+00 : f32
    %31 = vector.broadcast %cst_12 : f32 to vector<224x6xf32>
    %32 = vector.extract_strided_slice %30 {offsets = [0, 0, 0], sizes = [14, 16, 6], strides = [1, 1, 1]} : vector<14x22x6xbf16> to vector<14x16x6xbf16>
    %33 = vector.shape_cast %32 : vector<14x16x6xbf16> to vector<224x6xbf16>
    %c0_13 = arith.constant 0 : index
    %c0_14 = arith.constant 0 : index
    %c0_15 = arith.constant 0 : index
    %34 = vector.load %arg5[%c0_13, %c0_14, %c0_15] : memref<7x6x6xbf16, #tpu.memory_space<vmem>>, vector<1x6x6xbf16>
    %35 = vector.shape_cast %34 : vector<1x6x6xbf16> to vector<6x6xbf16>
    %cst_16 = arith.constant dense<0.000000e+00> : vector<224x6xf32>
    %36 = tpu.matmul %33, %35, %cst_16 {dimension_numbers = #tpu.dot_dimension_numbers<[1], [0], [0], [1], [0, 0, 1, 1], [], []>} : vector<224x6xbf16>, vector<6x6xbf16>, vector<224x6xf32> -> vector<224x6xf32>
    %37 = arith.addf %31, %36 : vector<224x6xf32>
    %38 = vector.extract_strided_slice %30 {offsets = [0, 1, 0], sizes = [14, 16, 6], strides = [1, 1, 1]} : vector<14x22x6xbf16> to vector<14x16x6xbf16>
    %39 = vector.shape_cast %38 : vector<14x16x6xbf16> to vector<224x6xbf16>
    %c1 = arith.constant 1 : index
    %c0_17 = arith.constant 0 : index
    %c0_18 = arith.constant 0 : index
    %40 = vector.load %arg5[%c1, %c0_17, %c0_18] : memref<7x6x6xbf16, #tpu.memory_space<vmem>>, vector<1x6x6xbf16>
    %41 = vector.shape_cast %40 : vector<1x6x6xbf16> to vector<6x6xbf16>
    %cst_19 = arith.constant dense<0.000000e+00> : vector<224x6xf32>
    %42 = tpu.matmul %39, %41, %cst_19 {dimension_numbers = #tpu.dot_dimension_numbers<[1], [0], [0], [1], [0, 0, 1, 1], [], []>} : vector<224x6xbf16>, vector<6x6xbf16>, vector<224x6xf32> -> vector<224x6xf32>
    %43 = arith.addf %37, %42 : vector<224x6xf32>
    %44 = vector.extract_strided_slice %30 {offsets = [0, 2, 0], sizes = [14, 16, 6], strides = [1, 1, 1]} : vector<14x22x6xbf16> to vector<14x16x6xbf16>
    %45 = vector.shape_cast %44 : vector<14x16x6xbf16> to vector<224x6xbf16>
    %c2 = arith.constant 2 : index
    %c0_20 = arith.constant 0 : index
    %c0_21 = arith.constant 0 : index
    %46 = vector.load %arg5[%c2, %c0_20, %c0_21] : memref<7x6x6xbf16, #tpu.memory_space<vmem>>, vector<1x6x6xbf16>
    %47 = vector.shape_cast %46 : vector<1x6x6xbf16> to vector<6x6xbf16>
    %cst_22 = arith.constant dense<0.000000e+00> : vector<224x6xf32>
    %48 = tpu.matmul %45, %47, %cst_22 {dimension_numbers = #tpu.dot_dimension_numbers<[1], [0], [0], [1], [0, 0, 1, 1], [], []>} : vector<224x6xbf16>, vector<6x6xbf16>, vector<224x6xf32> -> vector<224x6xf32>
    %49 = arith.addf %43, %48 : vector<224x6xf32>
    %50 = vector.extract_strided_slice %30 {offsets = [0, 3, 0], sizes = [14, 16, 6], strides = [1, 1, 1]} : vector<14x22x6xbf16> to vector<14x16x6xbf16>
    %51 = vector.shape_cast %50 : vector<14x16x6xbf16> to vector<224x6xbf16>
    %c3 = arith.constant 3 : index
    %c0_23 = arith.constant 0 : index
    %c0_24 = arith.constant 0 : index
    %52 = vector.load %arg5[%c3, %c0_23, %c0_24] : memref<7x6x6xbf16, #tpu.memory_space<vmem>>, vector<1x6x6xbf16>
    %53 = vector.shape_cast %52 : vector<1x6x6xbf16> to vector<6x6xbf16>
    %cst_25 = arith.constant dense<0.000000e+00> : vector<224x6xf32>
    %54 = tpu.matmul %51, %53, %cst_25 {dimension_numbers = #tpu.dot_dimension_numbers<[1], [0], [0], [1], [0, 0, 1, 1], [], []>} : vector<224x6xbf16>, vector<6x6xbf16>, vector<224x6xf32> -> vector<224x6xf32>
    %55 = arith.addf %49, %54 : vector<224x6xf32>
    %56 = vector.extract_strided_slice %30 {offsets = [0, 4, 0], sizes = [14, 16, 6], strides = [1, 1, 1]} : vector<14x22x6xbf16> to vector<14x16x6xbf16>
    %57 = vector.shape_cast %56 : vector<14x16x6xbf16> to vector<224x6xbf16>
    %c4 = arith.constant 4 : index
    %c0_26 = arith.constant 0 : index
    %c0_27 = arith.constant 0 : index
    %58 = vector.load %arg5[%c4, %c0_26, %c0_27] : memref<7x6x6xbf16, #tpu.memory_space<vmem>>, vector<1x6x6xbf16>
    %59 = vector.shape_cast %58 : vector<1x6x6xbf16> to vector<6x6xbf16>
    %cst_28 = arith.constant dense<0.000000e+00> : vector<224x6xf32>
    %60 = tpu.matmul %57, %59, %cst_28 {dimension_numbers = #tpu.dot_dimension_numbers<[1], [0], [0], [1], [0, 0, 1, 1], [], []>} : vector<224x6xbf16>, vector<6x6xbf16>, vector<224x6xf32> -> vector<224x6xf32>
    %61 = arith.addf %55, %60 : vector<224x6xf32>
    %62 = vector.extract_strided_slice %30 {offsets = [0, 5, 0], sizes = [14, 16, 6], strides = [1, 1, 1]} : vector<14x22x6xbf16> to vector<14x16x6xbf16>
    %63 = vector.shape_cast %62 : vector<14x16x6xbf16> to vector<224x6xbf16>
    %c5 = arith.constant 5 : index
    %c0_29 = arith.constant 0 : index
    %c0_30 = arith.constant 0 : index
    %64 = vector.load %arg5[%c5, %c0_29, %c0_30] : memref<7x6x6xbf16, #tpu.memory_space<vmem>>, vector<1x6x6xbf16>
    %65 = vector.shape_cast %64 : vector<1x6x6xbf16> to vector<6x6xbf16>
    %cst_31 = arith.constant dense<0.000000e+00> : vector<224x6xf32>
    %66 = tpu.matmul %63, %65, %cst_31 {dimension_numbers = #tpu.dot_dimension_numbers<[1], [0], [0], [1], [0, 0, 1, 1], [], []>} : vector<224x6xbf16>, vector<6x6xbf16>, vector<224x6xf32> -> vector<224x6xf32>
    %67 = arith.addf %61, %66 : vector<224x6xf32>
    %68 = vector.extract_strided_slice %30 {offsets = [0, 6, 0], sizes = [14, 16, 6], strides = [1, 1, 1]} : vector<14x22x6xbf16> to vector<14x16x6xbf16>
    %69 = vector.shape_cast %68 : vector<14x16x6xbf16> to vector<224x6xbf16>
    %c6 = arith.constant 6 : index
    %c0_32 = arith.constant 0 : index
    %c0_33 = arith.constant 0 : index
    %70 = vector.load %arg5[%c6, %c0_32, %c0_33] : memref<7x6x6xbf16, #tpu.memory_space<vmem>>, vector<1x6x6xbf16>
    %71 = vector.shape_cast %70 : vector<1x6x6xbf16> to vector<6x6xbf16>
    %cst_34 = arith.constant dense<0.000000e+00> : vector<224x6xf32>
    %72 = tpu.matmul %69, %71, %cst_34 {dimension_numbers = #tpu.dot_dimension_numbers<[1], [0], [0], [1], [0, 0, 1, 1], [], []>} : vector<224x6xbf16>, vector<6x6xbf16>, vector<224x6xf32> -> vector<224x6xf32>
    %73 = arith.addf %67, %72 : vector<224x6xf32>
    %c0_35 = arith.constant 0 : index
    %c0_36 = arith.constant 0 : index
    %74 = vector.load %arg6[%c0_35, %c0_36] : memref<1x6xf32, #tpu.memory_space<vmem>>, vector<1x6xf32>
    %75 = vector.broadcast %74 : vector<1x6xf32> to vector<224x6xf32>
    %76 = arith.addf %73, %75 : vector<224x6xf32>
    %cst_37 = arith.constant 0.000000e+00 : f32
    %77 = vector.broadcast %cst_37 : f32 to vector<224x6xf32>
    %78 = arith.maximumf %76, %77 : vector<224x6xf32>
    %79 = vector.shape_cast %78 : vector<224x6xf32> to vector<14x16x6xf32>
    %80 = arith.truncf %79 : vector<14x16x6xf32> to vector<14x16x6xbf16>
    %cst_38 = arith.constant 0.000000e+00 : f32
    %81 = arith.truncf %cst_38 : f32 to bf16
    %82 = vector.shape_cast %13 : vector<14x1x1xi1> to vector<14x1x1xi1>
    %83 = vector.broadcast %82 : vector<14x1x1xi1> to vector<14x16x6xi1>
    %84 = vector.broadcast %81 : bf16 to vector<14x16x6xbf16>
    %85 = arith.select %83, %80, %84 : vector<14x16x6xi1>, vector<14x16x6xbf16>
    %cst_39 = arith.constant 0.000000e+00 : f32
    %86 = vector.broadcast %cst_39 : f32 to vector<128x8xf32>
    %87 = vector.extract_strided_slice %85 {offsets = [0, 0, 0], sizes = [8, 16, 6], strides = [1, 1, 1]} : vector<14x16x6xbf16> to vector<8x16x6xbf16>
    %88 = vector.shape_cast %87 : vector<8x16x6xbf16> to vector<128x6xbf16>
    %c0_40 = arith.constant 0 : index
    %c0_41 = arith.constant 0 : index
    %c0_42 = arith.constant 0 : index
    %89 = vector.load %arg7[%c0_40, %c0_41, %c0_42] : memref<7x6x8xbf16, #tpu.memory_space<vmem>>, vector<1x6x8xbf16>
    %90 = vector.shape_cast %89 : vector<1x6x8xbf16> to vector<6x8xbf16>
    %cst_43 = arith.constant dense<0.000000e+00> : vector<128x8xf32>
    %91 = tpu.matmul %88, %90, %cst_43 {dimension_numbers = #tpu.dot_dimension_numbers<[1], [0], [0], [1], [0, 0, 1, 1], [], []>} : vector<128x6xbf16>, vector<6x8xbf16>, vector<128x8xf32> -> vector<128x8xf32>
    %92 = arith.addf %86, %91 : vector<128x8xf32>
    %93 = vector.extract_strided_slice %85 {offsets = [1, 0, 0], sizes = [8, 16, 6], strides = [1, 1, 1]} : vector<14x16x6xbf16> to vector<8x16x6xbf16>
    %94 = vector.shape_cast %93 : vector<8x16x6xbf16> to vector<128x6xbf16>
    %c1_44 = arith.constant 1 : index
    %c0_45 = arith.constant 0 : index
    %c0_46 = arith.constant 0 : index
    %95 = vector.load %arg7[%c1_44, %c0_45, %c0_46] : memref<7x6x8xbf16, #tpu.memory_space<vmem>>, vector<1x6x8xbf16>
    %96 = vector.shape_cast %95 : vector<1x6x8xbf16> to vector<6x8xbf16>
    %cst_47 = arith.constant dense<0.000000e+00> : vector<128x8xf32>
    %97 = tpu.matmul %94, %96, %cst_47 {dimension_numbers = #tpu.dot_dimension_numbers<[1], [0], [0], [1], [0, 0, 1, 1], [], []>} : vector<128x6xbf16>, vector<6x8xbf16>, vector<128x8xf32> -> vector<128x8xf32>
    %98 = arith.addf %92, %97 : vector<128x8xf32>
    %99 = vector.extract_strided_slice %85 {offsets = [2, 0, 0], sizes = [8, 16, 6], strides = [1, 1, 1]} : vector<14x16x6xbf16> to vector<8x16x6xbf16>
    %100 = vector.shape_cast %99 : vector<8x16x6xbf16> to vector<128x6xbf16>
    %c2_48 = arith.constant 2 : index
    %c0_49 = arith.constant 0 : index
    %c0_50 = arith.constant 0 : index
    %101 = vector.load %arg7[%c2_48, %c0_49, %c0_50] : memref<7x6x8xbf16, #tpu.memory_space<vmem>>, vector<1x6x8xbf16>
    %102 = vector.shape_cast %101 : vector<1x6x8xbf16> to vector<6x8xbf16>
    %cst_51 = arith.constant dense<0.000000e+00> : vector<128x8xf32>
    %103 = tpu.matmul %100, %102, %cst_51 {dimension_numbers = #tpu.dot_dimension_numbers<[1], [0], [0], [1], [0, 0, 1, 1], [], []>} : vector<128x6xbf16>, vector<6x8xbf16>, vector<128x8xf32> -> vector<128x8xf32>
    %104 = arith.addf %98, %103 : vector<128x8xf32>
    %105 = vector.extract_strided_slice %85 {offsets = [3, 0, 0], sizes = [8, 16, 6], strides = [1, 1, 1]} : vector<14x16x6xbf16> to vector<8x16x6xbf16>
    %106 = vector.shape_cast %105 : vector<8x16x6xbf16> to vector<128x6xbf16>
    %c3_52 = arith.constant 3 : index
    %c0_53 = arith.constant 0 : index
    %c0_54 = arith.constant 0 : index
    %107 = vector.load %arg7[%c3_52, %c0_53, %c0_54] : memref<7x6x8xbf16, #tpu.memory_space<vmem>>, vector<1x6x8xbf16>
    %108 = vector.shape_cast %107 : vector<1x6x8xbf16> to vector<6x8xbf16>
    %cst_55 = arith.constant dense<0.000000e+00> : vector<128x8xf32>
    %109 = tpu.matmul %106, %108, %cst_55 {dimension_numbers = #tpu.dot_dimension_numbers<[1], [0], [0], [1], [0, 0, 1, 1], [], []>} : vector<128x6xbf16>, vector<6x8xbf16>, vector<128x8xf32> -> vector<128x8xf32>
    %110 = arith.addf %104, %109 : vector<128x8xf32>
    %111 = vector.extract_strided_slice %85 {offsets = [4, 0, 0], sizes = [8, 16, 6], strides = [1, 1, 1]} : vector<14x16x6xbf16> to vector<8x16x6xbf16>
    %112 = vector.shape_cast %111 : vector<8x16x6xbf16> to vector<128x6xbf16>
    %c4_56 = arith.constant 4 : index
    %c0_57 = arith.constant 0 : index
    %c0_58 = arith.constant 0 : index
    %113 = vector.load %arg7[%c4_56, %c0_57, %c0_58] : memref<7x6x8xbf16, #tpu.memory_space<vmem>>, vector<1x6x8xbf16>
    %114 = vector.shape_cast %113 : vector<1x6x8xbf16> to vector<6x8xbf16>
    %cst_59 = arith.constant dense<0.000000e+00> : vector<128x8xf32>
    %115 = tpu.matmul %112, %114, %cst_59 {dimension_numbers = #tpu.dot_dimension_numbers<[1], [0], [0], [1], [0, 0, 1, 1], [], []>} : vector<128x6xbf16>, vector<6x8xbf16>, vector<128x8xf32> -> vector<128x8xf32>
    %116 = arith.addf %110, %115 : vector<128x8xf32>
    %117 = vector.extract_strided_slice %85 {offsets = [5, 0, 0], sizes = [8, 16, 6], strides = [1, 1, 1]} : vector<14x16x6xbf16> to vector<8x16x6xbf16>
    %118 = vector.shape_cast %117 : vector<8x16x6xbf16> to vector<128x6xbf16>
    %c5_60 = arith.constant 5 : index
    %c0_61 = arith.constant 0 : index
    %c0_62 = arith.constant 0 : index
    %119 = vector.load %arg7[%c5_60, %c0_61, %c0_62] : memref<7x6x8xbf16, #tpu.memory_space<vmem>>, vector<1x6x8xbf16>
    %120 = vector.shape_cast %119 : vector<1x6x8xbf16> to vector<6x8xbf16>
    %cst_63 = arith.constant dense<0.000000e+00> : vector<128x8xf32>
    %121 = tpu.matmul %118, %120, %cst_63 {dimension_numbers = #tpu.dot_dimension_numbers<[1], [0], [0], [1], [0, 0, 1, 1], [], []>} : vector<128x6xbf16>, vector<6x8xbf16>, vector<128x8xf32> -> vector<128x8xf32>
    %122 = arith.addf %116, %121 : vector<128x8xf32>
    %123 = vector.extract_strided_slice %85 {offsets = [6, 0, 0], sizes = [8, 16, 6], strides = [1, 1, 1]} : vector<14x16x6xbf16> to vector<8x16x6xbf16>
    %124 = vector.shape_cast %123 : vector<8x16x6xbf16> to vector<128x6xbf16>
    %c6_64 = arith.constant 6 : index
    %c0_65 = arith.constant 0 : index
    %c0_66 = arith.constant 0 : index
    %125 = vector.load %arg7[%c6_64, %c0_65, %c0_66] : memref<7x6x8xbf16, #tpu.memory_space<vmem>>, vector<1x6x8xbf16>
    %126 = vector.shape_cast %125 : vector<1x6x8xbf16> to vector<6x8xbf16>
    %cst_67 = arith.constant dense<0.000000e+00> : vector<128x8xf32>
    %127 = tpu.matmul %124, %126, %cst_67 {dimension_numbers = #tpu.dot_dimension_numbers<[1], [0], [0], [1], [0, 0, 1, 1], [], []>} : vector<128x6xbf16>, vector<6x8xbf16>, vector<128x8xf32> -> vector<128x8xf32>
    %128 = arith.addf %122, %127 : vector<128x8xf32>
    %c0_68 = arith.constant 0 : index
    %c0_69 = arith.constant 0 : index
    %129 = vector.load %arg8[%c0_68, %c0_69] : memref<1x8xf32, #tpu.memory_space<vmem>>, vector<1x8xf32>
    %130 = vector.broadcast %129 : vector<1x8xf32> to vector<128x8xf32>
    %131 = arith.addf %128, %130 : vector<128x8xf32>
    %cst_70 = arith.constant 0.000000e+00 : f32
    %132 = vector.broadcast %cst_70 : f32 to vector<128x8xf32>
    %133 = arith.maximumf %131, %132 : vector<128x8xf32>
    %134 = vector.shape_cast %133 : vector<128x8xf32> to vector<8x16x8xf32>
    %c0_71 = arith.constant 0 : index
    %c0_72 = arith.constant 0 : index
    %c0_73 = arith.constant 0 : index
    %c8 = arith.constant 8 : index
    %135 = vector.load %arg19[%c0_71, %c0_72, %c0_73, %c8] : memref<1x8x16x32xf32, #tpu.memory_space<vmem>>, vector<1x8x16x8xf32>
    %136 = vector.shape_cast %135 : vector<1x8x16x8xf32> to vector<8x16x8xf32>
    %137 = vector.shape_cast %134 : vector<8x16x8xf32> to vector<1x8x16x8xf32>
    tpu.vector_store %arg19[%c0_71, %c0_72, %c0_73, %c8], %137 {strides = array<i32>} : memref<1x8x16x32xf32, #tpu.memory_space<vmem>>, vector<1x8x16x8xf32>,
    %138 = vector.extract_strided_slice %22 {offsets = [0, 0, 256], sizes = [20, 16, 6], strides = [1, 1, 1]} : vector<20x16x384xf32> to vector<20x16x6xf32>
    %139 = arith.truncf %138 : vector<20x16x6xf32> to vector<20x16x6xbf16>
    %cst_74 = arith.constant 0.000000e+00 : f32
    %140 = arith.truncf %cst_74 : f32 to bf16
    %141 = vector.shape_cast %12 : vector<20x1x1xi1> to vector<20x1x1xi1>
    %142 = vector.broadcast %141 : vector<20x1x1xi1> to vector<20x16x6xi1>
    %143 = vector.broadcast %140 : bf16 to vector<20x16x6xbf16>
    %144 = arith.select %142, %139, %143 : vector<20x16x6xi1>, vector<20x16x6xbf16>
    %cst_75 = arith.constant 0.000000e+00 : f32
    %145 = vector.broadcast %cst_75 : f32 to vector<224x6xf32>
    %146 = vector.extract_strided_slice %144 {offsets = [0, 0, 0], sizes = [14, 16, 6], strides = [1, 1, 1]} : vector<20x16x6xbf16> to vector<14x16x6xbf16>
    %147 = vector.shape_cast %146 : vector<14x16x6xbf16> to vector<224x6xbf16>
    %c0_76 = arith.constant 0 : index
    %c0_77 = arith.constant 0 : index
    %c0_78 = arith.constant 0 : index
    %148 = vector.load %arg9[%c0_76, %c0_77, %c0_78] : memref<7x6x6xbf16, #tpu.memory_space<vmem>>, vector<1x6x6xbf16>
    %149 = vector.shape_cast %148 : vector<1x6x6xbf16> to vector<6x6xbf16>
    %cst_79 = arith.constant dense<0.000000e+00> : vector<224x6xf32>
    %150 = tpu.matmul %147, %149, %cst_79 {dimension_numbers = #tpu.dot_dimension_numbers<[1], [0], [0], [1], [0, 0, 1, 1], [], []>} : vector<224x6xbf16>, vector<6x6xbf16>, vector<224x6xf32> -> vector<224x6xf32>
    %151 = arith.addf %145, %150 : vector<224x6xf32>
    %152 = vector.extract_strided_slice %144 {offsets = [1, 0, 0], sizes = [14, 16, 6], strides = [1, 1, 1]} : vector<20x16x6xbf16> to vector<14x16x6xbf16>
    %153 = vector.shape_cast %152 : vector<14x16x6xbf16> to vector<224x6xbf16>
    %c1_80 = arith.constant 1 : index
    %c0_81 = arith.constant 0 : index
    %c0_82 = arith.constant 0 : index
    %154 = vector.load %arg9[%c1_80, %c0_81, %c0_82] : memref<7x6x6xbf16, #tpu.memory_space<vmem>>, vector<1x6x6xbf16>
    %155 = vector.shape_cast %154 : vector<1x6x6xbf16> to vector<6x6xbf16>
    %cst_83 = arith.constant dense<0.000000e+00> : vector<224x6xf32>
    %156 = tpu.matmul %153, %155, %cst_83 {dimension_numbers = #tpu.dot_dimension_numbers<[1], [0], [0], [1], [0, 0, 1, 1], [], []>} : vector<224x6xbf16>, vector<6x6xbf16>, vector<224x6xf32> -> vector<224x6xf32>
    %157 = arith.addf %151, %156 : vector<224x6xf32>
    %158 = vector.extract_strided_slice %144 {offsets = [2, 0, 0], sizes = [14, 16, 6], strides = [1, 1, 1]} : vector<20x16x6xbf16> to vector<14x16x6xbf16>
    %159 = vector.shape_cast %158 : vector<14x16x6xbf16> to vector<224x6xbf16>
    %c2_84 = arith.constant 2 : index
    %c0_85 = arith.constant 0 : index
    %c0_86 = arith.constant 0 : index
    %160 = vector.load %arg9[%c2_84, %c0_85, %c0_86] : memref<7x6x6xbf16, #tpu.memory_space<vmem>>, vector<1x6x6xbf16>
    %161 = vector.shape_cast %160 : vector<1x6x6xbf16> to vector<6x6xbf16>
    %cst_87 = arith.constant dense<0.000000e+00> : vector<224x6xf32>
    %162 = tpu.matmul %159, %161, %cst_87 {dimension_numbers = #tpu.dot_dimension_numbers<[1], [0], [0], [1], [0, 0, 1, 1], [], []>} : vector<224x6xbf16>, vector<6x6xbf16>, vector<224x6xf32> -> vector<224x6xf32>
    %163 = arith.addf %157, %162 : vector<224x6xf32>
    %164 = vector.extract_strided_slice %144 {offsets = [3, 0, 0], sizes = [14, 16, 6], strides = [1, 1, 1]} : vector<20x16x6xbf16> to vector<14x16x6xbf16>
    %165 = vector.shape_cast %164 : vector<14x16x6xbf16> to vector<224x6xbf16>
    %c3_88 = arith.constant 3 : index
    %c0_89 = arith.constant 0 : index
    %c0_90 = arith.constant 0 : index
    %166 = vector.load %arg9[%c3_88, %c0_89, %c0_90] : memref<7x6x6xbf16, #tpu.memory_space<vmem>>, vector<1x6x6xbf16>
    %167 = vector.shape_cast %166 : vector<1x6x6xbf16> to vector<6x6xbf16>
    %cst_91 = arith.constant dense<0.000000e+00> : vector<224x6xf32>
    %168 = tpu.matmul %165, %167, %cst_91 {dimension_numbers = #tpu.dot_dimension_numbers<[1], [0], [0], [1], [0, 0, 1, 1], [], []>} : vector<224x6xbf16>, vector<6x6xbf16>, vector<224x6xf32> -> vector<224x6xf32>
    %169 = arith.addf %163, %168 : vector<224x6xf32>
    %170 = vector.extract_strided_slice %144 {offsets = [4, 0, 0], sizes = [14, 16, 6], strides = [1, 1, 1]} : vector<20x16x6xbf16> to vector<14x16x6xbf16>
    %171 = vector.shape_cast %170 : vector<14x16x6xbf16> to vector<224x6xbf16>
    %c4_92 = arith.constant 4 : index
    %c0_93 = arith.constant 0 : index
    %c0_94 = arith.constant 0 : index
    %172 = vector.load %arg9[%c4_92, %c0_93, %c0_94] : memref<7x6x6xbf16, #tpu.memory_space<vmem>>, vector<1x6x6xbf16>
    %173 = vector.shape_cast %172 : vector<1x6x6xbf16> to vector<6x6xbf16>
    %cst_95 = arith.constant dense<0.000000e+00> : vector<224x6xf32>
    %174 = tpu.matmul %171, %173, %cst_95 {dimension_numbers = #tpu.dot_dimension_numbers<[1], [0], [0], [1], [0, 0, 1, 1], [], []>} : vector<224x6xbf16>, vector<6x6xbf16>, vector<224x6xf32> -> vector<224x6xf32>
    %175 = arith.addf %169, %174 : vector<224x6xf32>
    %176 = vector.extract_strided_slice %144 {offsets = [5, 0, 0], sizes = [14, 16, 6], strides = [1, 1, 1]} : vector<20x16x6xbf16> to vector<14x16x6xbf16>
    %177 = vector.shape_cast %176 : vector<14x16x6xbf16> to vector<224x6xbf16>
    %c5_96 = arith.constant 5 : index
    %c0_97 = arith.constant 0 : index
    %c0_98 = arith.constant 0 : index
    %178 = vector.load %arg9[%c5_96, %c0_97, %c0_98] : memref<7x6x6xbf16, #tpu.memory_space<vmem>>, vector<1x6x6xbf16>
    %179 = vector.shape_cast %178 : vector<1x6x6xbf16> to vector<6x6xbf16>
    %cst_99 = arith.constant dense<0.000000e+00> : vector<224x6xf32>
    %180 = tpu.matmul %177, %179, %cst_99 {dimension_numbers = #tpu.dot_dimension_numbers<[1], [0], [0], [1], [0, 0, 1, 1], [], []>} : vector<224x6xbf16>, vector<6x6xbf16>, vector<224x6xf32> -> vector<224x6xf32>
    %181 = arith.addf %175, %180 : vector<224x6xf32>
    %182 = vector.extract_strided_slice %144 {offsets = [6, 0, 0], sizes = [14, 16, 6], strides = [1, 1, 1]} : vector<20x16x6xbf16> to vector<14x16x6xbf16>
    %183 = vector.shape_cast %182 : vector<14x16x6xbf16> to vector<224x6xbf16>
    %c6_100 = arith.constant 6 : index
    %c0_101 = arith.constant 0 : index
    %c0_102 = arith.constant 0 : index
    %184 = vector.load %arg9[%c6_100, %c0_101, %c0_102] : memref<7x6x6xbf16, #tpu.memory_space<vmem>>, vector<1x6x6xbf16>
    %185 = vector.shape_cast %184 : vector<1x6x6xbf16> to vector<6x6xbf16>
    %cst_103 = arith.constant dense<0.000000e+00> : vector<224x6xf32>
    %186 = tpu.matmul %183, %185, %cst_103 {dimension_numbers = #tpu.dot_dimension_numbers<[1], [0], [0], [1], [0, 0, 1, 1], [], []>} : vector<224x6xbf16>, vector<6x6xbf16>, vector<224x6xf32> -> vector<224x6xf32>
    %187 = arith.addf %181, %186 : vector<224x6xf32>
    %c0_104 = arith.constant 0 : index
    %c0_105 = arith.constant 0 : index
    %188 = vector.load %arg10[%c0_104, %c0_105] : memref<1x6xf32, #tpu.memory_space<vmem>>, vector<1x6xf32>
    %189 = vector.broadcast %188 : vector<1x6xf32> to vector<224x6xf32>
    %190 = arith.addf %187, %189 : vector<224x6xf32>
    %cst_106 = arith.constant 0.000000e+00 : f32
    %191 = vector.broadcast %cst_106 : f32 to vector<224x6xf32>
    %192 = arith.maximumf %190, %191 : vector<224x6xf32>
    %193 = vector.shape_cast %192 : vector<224x6xf32> to vector<14x16x6xf32>
    %194 = arith.truncf %193 : vector<14x16x6xf32> to vector<14x16x6xbf16>
    %cst_107 = arith.constant 0.000000e+00 : bf16
    %195 = vector.broadcast %cst_107 : bf16 to vector<14x3x6xbf16>
    %196 = tpu.concatenate %195, %194, %195 in 1 : vector<14x3x6xbf16>, vector<14x16x6xbf16>, vector<14x3x6xbf16> -> vector<14x22x6xbf16>
    %cst_108 = arith.constant 0.000000e+00 : f32
    %197 = vector.broadcast %cst_108 : f32 to vector<224x6xf32>
    %198 = vector.extract_strided_slice %196 {offsets = [0, 0, 0], sizes = [14, 16, 6], strides = [1, 1, 1]} : vector<14x22x6xbf16> to vector<14x16x6xbf16>
    %199 = vector.shape_cast %198 : vector<14x16x6xbf16> to vector<224x6xbf16>
    %c0_109 = arith.constant 0 : index
    %c0_110 = arith.constant 0 : index
    %c0_111 = arith.constant 0 : index
    %200 = vector.load %arg11[%c0_109, %c0_110, %c0_111] : memref<7x6x6xbf16, #tpu.memory_space<vmem>>, vector<1x6x6xbf16>
    %201 = vector.shape_cast %200 : vector<1x6x6xbf16> to vector<6x6xbf16>
    %cst_112 = arith.constant dense<0.000000e+00> : vector<224x6xf32>
    %202 = tpu.matmul %199, %201, %cst_112 {dimension_numbers = #tpu.dot_dimension_numbers<[1], [0], [0], [1], [0, 0, 1, 1], [], []>} : vector<224x6xbf16>, vector<6x6xbf16>, vector<224x6xf32> -> vector<224x6xf32>
    %203 = arith.addf %197, %202 : vector<224x6xf32>
    %204 = vector.extract_strided_slice %196 {offsets = [0, 1, 0], sizes = [14, 16, 6], strides = [1, 1, 1]} : vector<14x22x6xbf16> to vector<14x16x6xbf16>
    %205 = vector.shape_cast %204 : vector<14x16x6xbf16> to vector<224x6xbf16>
    %c1_113 = arith.constant 1 : index
    %c0_114 = arith.constant 0 : index
    %c0_115 = arith.constant 0 : index
    %206 = vector.load %arg11[%c1_113, %c0_114, %c0_115] : memref<7x6x6xbf16, #tpu.memory_space<vmem>>, vector<1x6x6xbf16>
    %207 = vector.shape_cast %206 : vector<1x6x6xbf16> to vector<6x6xbf16>
    %cst_116 = arith.constant dense<0.000000e+00> : vector<224x6xf32>
    %208 = tpu.matmul %205, %207, %cst_116 {dimension_numbers = #tpu.dot_dimension_numbers<[1], [0], [0], [1], [0, 0, 1, 1], [], []>} : vector<224x6xbf16>, vector<6x6xbf16>, vector<224x6xf32> -> vector<224x6xf32>
    %209 = arith.addf %203, %208 : vector<224x6xf32>
    %210 = vector.extract_strided_slice %196 {offsets = [0, 2, 0], sizes = [14, 16, 6], strides = [1, 1, 1]} : vector<14x22x6xbf16> to vector<14x16x6xbf16>
    %211 = vector.shape_cast %210 : vector<14x16x6xbf16> to vector<224x6xbf16>
    %c2_117 = arith.constant 2 : index
    %c0_118 = arith.constant 0 : index
    %c0_119 = arith.constant 0 : index
    %212 = vector.load %arg11[%c2_117, %c0_118, %c0_119] : memref<7x6x6xbf16, #tpu.memory_space<vmem>>, vector<1x6x6xbf16>
    %213 = vector.shape_cast %212 : vector<1x6x6xbf16> to vector<6x6xbf16>
    %cst_120 = arith.constant dense<0.000000e+00> : vector<224x6xf32>
    %214 = tpu.matmul %211, %213, %cst_120 {dimension_numbers = #tpu.dot_dimension_numbers<[1], [0], [0], [1], [0, 0, 1, 1], [], []>} : vector<224x6xbf16>, vector<6x6xbf16>, vector<224x6xf32> -> vector<224x6xf32>
    %215 = arith.addf %209, %214 : vector<224x6xf32>
    %216 = vector.extract_strided_slice %196 {offsets = [0, 3, 0], sizes = [14, 16, 6], strides = [1, 1, 1]} : vector<14x22x6xbf16> to vector<14x16x6xbf16>
    %217 = vector.shape_cast %216 : vector<14x16x6xbf16> to vector<224x6xbf16>
    %c3_121 = arith.constant 3 : index
    %c0_122 = arith.constant 0 : index
    %c0_123 = arith.constant 0 : index
    %218 = vector.load %arg11[%c3_121, %c0_122, %c0_123] : memref<7x6x6xbf16, #tpu.memory_space<vmem>>, vector<1x6x6xbf16>
    %219 = vector.shape_cast %218 : vector<1x6x6xbf16> to vector<6x6xbf16>
    %cst_124 = arith.constant dense<0.000000e+00> : vector<224x6xf32>
    %220 = tpu.matmul %217, %219, %cst_124 {dimension_numbers = #tpu.dot_dimension_numbers<[1], [0], [0], [1], [0, 0, 1, 1], [], []>} : vector<224x6xbf16>, vector<6x6xbf16>, vector<224x6xf32> -> vector<224x6xf32>
    %221 = arith.addf %215, %220 : vector<224x6xf32>
    %222 = vector.extract_strided_slice %196 {offsets = [0, 4, 0], sizes = [14, 16, 6], strides = [1, 1, 1]} : vector<14x22x6xbf16> to vector<14x16x6xbf16>
    %223 = vector.shape_cast %222 : vector<14x16x6xbf16> to vector<224x6xbf16>
    %c4_125 = arith.constant 4 : index
    %c0_126 = arith.constant 0 : index
    %c0_127 = arith.constant 0 : index
    %224 = vector.load %arg11[%c4_125, %c0_126, %c0_127] : memref<7x6x6xbf16, #tpu.memory_space<vmem>>, vector<1x6x6xbf16>
    %225 = vector.shape_cast %224 : vector<1x6x6xbf16> to vector<6x6xbf16>
    %cst_128 = arith.constant dense<0.000000e+00> : vector<224x6xf32>
    %226 = tpu.matmul %223, %225, %cst_128 {dimension_numbers = #tpu.dot_dimension_numbers<[1], [0], [0], [1], [0, 0, 1, 1], [], []>} : vector<224x6xbf16>, vector<6x6xbf16>, vector<224x6xf32> -> vector<224x6xf32>
    %227 = arith.addf %221, %226 : vector<224x6xf32>
    %228 = vector.extract_strided_slice %196 {offsets = [0, 5, 0], sizes = [14, 16, 6], strides = [1, 1, 1]} : vector<14x22x6xbf16> to vector<14x16x6xbf16>
    %229 = vector.shape_cast %228 : vector<14x16x6xbf16> to vector<224x6xbf16>
    %c5_129 = arith.constant 5 : index
    %c0_130 = arith.constant 0 : index
    %c0_131 = arith.constant 0 : index
    %230 = vector.load %arg11[%c5_129, %c0_130, %c0_131] : memref<7x6x6xbf16, #tpu.memory_space<vmem>>, vector<1x6x6xbf16>
    %231 = vector.shape_cast %230 : vector<1x6x6xbf16> to vector<6x6xbf16>
    %cst_132 = arith.constant dense<0.000000e+00> : vector<224x6xf32>
    %232 = tpu.matmul %229, %231, %cst_132 {dimension_numbers = #tpu.dot_dimension_numbers<[1], [0], [0], [1], [0, 0, 1, 1], [], []>} : vector<224x6xbf16>, vector<6x6xbf16>, vector<224x6xf32> -> vector<224x6xf32>
    %233 = arith.addf %227, %232 : vector<224x6xf32>
    %234 = vector.extract_strided_slice %196 {offsets = [0, 6, 0], sizes = [14, 16, 6], strides = [1, 1, 1]} : vector<14x22x6xbf16> to vector<14x16x6xbf16>
    %235 = vector.shape_cast %234 : vector<14x16x6xbf16> to vector<224x6xbf16>
    %c6_133 = arith.constant 6 : index
    %c0_134 = arith.constant 0 : index
    %c0_135 = arith.constant 0 : index
    %236 = vector.load %arg11[%c6_133, %c0_134, %c0_135] : memref<7x6x6xbf16, #tpu.memory_space<vmem>>, vector<1x6x6xbf16>
    %237 = vector.shape_cast %236 : vector<1x6x6xbf16> to vector<6x6xbf16>
    %cst_136 = arith.constant dense<0.000000e+00> : vector<224x6xf32>
    %238 = tpu.matmul %235, %237, %cst_136 {dimension_numbers = #tpu.dot_dimension_numbers<[1], [0], [0], [1], [0, 0, 1, 1], [], []>} : vector<224x6xbf16>, vector<6x6xbf16>, vector<224x6xf32> -> vector<224x6xf32>
    %239 = arith.addf %233, %238 : vector<224x6xf32>
    %c0_137 = arith.constant 0 : index
    %c0_138 = arith.constant 0 : index
    %240 = vector.load %arg12[%c0_137, %c0_138] : memref<1x6xf32, #tpu.memory_space<vmem>>, vector<1x6xf32>
    %241 = vector.broadcast %240 : vector<1x6xf32> to vector<224x6xf32>
    %242 = arith.addf %239, %241 : vector<224x6xf32>
    %cst_139 = arith.constant 0.000000e+00 : f32
    %243 = vector.broadcast %cst_139 : f32 to vector<224x6xf32>
    %244 = arith.maximumf %242, %243 : vector<224x6xf32>
    %245 = vector.shape_cast %244 : vector<224x6xf32> to vector<14x16x6xf32>
    %246 = arith.truncf %245 : vector<14x16x6xf32> to vector<14x16x6xbf16>
    %cst_140 = arith.constant 0.000000e+00 : f32
    %247 = arith.truncf %cst_140 : f32 to bf16
    %248 = vector.shape_cast %13 : vector<14x1x1xi1> to vector<14x1x1xi1>
    %249 = vector.broadcast %248 : vector<14x1x1xi1> to vector<14x16x6xi1>
    %250 = vector.broadcast %247 : bf16 to vector<14x16x6xbf16>
    %251 = arith.select %249, %246, %250 : vector<14x16x6xi1>, vector<14x16x6xbf16>
    %cst_141 = arith.constant 0.000000e+00 : f32
    %252 = vector.broadcast %cst_141 : f32 to vector<128x6xf32>
    %253 = vector.extract_strided_slice %251 {offsets = [0, 0, 0], sizes = [8, 16, 6], strides = [1, 1, 1]} : vector<14x16x6xbf16> to vector<8x16x6xbf16>
    %254 = vector.shape_cast %253 : vector<8x16x6xbf16> to vector<128x6xbf16>
    %c0_142 = arith.constant 0 : index
    %c0_143 = arith.constant 0 : index
    %c0_144 = arith.constant 0 : index
    %255 = vector.load %arg13[%c0_142, %c0_143, %c0_144] : memref<7x6x6xbf16, #tpu.memory_space<vmem>>, vector<1x6x6xbf16>
    %256 = vector.shape_cast %255 : vector<1x6x6xbf16> to vector<6x6xbf16>
    %cst_145 = arith.constant dense<0.000000e+00> : vector<128x6xf32>
    %257 = tpu.matmul %254, %256, %cst_145 {dimension_numbers = #tpu.dot_dimension_numbers<[1], [0], [0], [1], [0, 0, 1, 1], [], []>} : vector<128x6xbf16>, vector<6x6xbf16>, vector<128x6xf32> -> vector<128x6xf32>
    %258 = arith.addf %252, %257 : vector<128x6xf32>
    %259 = vector.extract_strided_slice %251 {offsets = [1, 0, 0], sizes = [8, 16, 6], strides = [1, 1, 1]} : vector<14x16x6xbf16> to vector<8x16x6xbf16>
    %260 = vector.shape_cast %259 : vector<8x16x6xbf16> to vector<128x6xbf16>
    %c1_146 = arith.constant 1 : index
    %c0_147 = arith.constant 0 : index
    %c0_148 = arith.constant 0 : index
    %261 = vector.load %arg13[%c1_146, %c0_147, %c0_148] : memref<7x6x6xbf16, #tpu.memory_space<vmem>>, vector<1x6x6xbf16>
    %262 = vector.shape_cast %261 : vector<1x6x6xbf16> to vector<6x6xbf16>
    %cst_149 = arith.constant dense<0.000000e+00> : vector<128x6xf32>
    %263 = tpu.matmul %260, %262, %cst_149 {dimension_numbers = #tpu.dot_dimension_numbers<[1], [0], [0], [1], [0, 0, 1, 1], [], []>} : vector<128x6xbf16>, vector<6x6xbf16>, vector<128x6xf32> -> vector<128x6xf32>
    %264 = arith.addf %258, %263 : vector<128x6xf32>
    %265 = vector.extract_strided_slice %251 {offsets = [2, 0, 0], sizes = [8, 16, 6], strides = [1, 1, 1]} : vector<14x16x6xbf16> to vector<8x16x6xbf16>
    %266 = vector.shape_cast %265 : vector<8x16x6xbf16> to vector<128x6xbf16>
    %c2_150 = arith.constant 2 : index
    %c0_151 = arith.constant 0 : index
    %c0_152 = arith.constant 0 : index
    %267 = vector.load %arg13[%c2_150, %c0_151, %c0_152] : memref<7x6x6xbf16, #tpu.memory_space<vmem>>, vector<1x6x6xbf16>
    %268 = vector.shape_cast %267 : vector<1x6x6xbf16> to vector<6x6xbf16>
    %cst_153 = arith.constant dense<0.000000e+00> : vector<128x6xf32>
    %269 = tpu.matmul %266, %268, %cst_153 {dimension_numbers = #tpu.dot_dimension_numbers<[1], [0], [0], [1], [0, 0, 1, 1], [], []>} : vector<128x6xbf16>, vector<6x6xbf16>, vector<128x6xf32> -> vector<128x6xf32>
    %270 = arith.addf %264, %269 : vector<128x6xf32>
    %271 = vector.extract_strided_slice %251 {offsets = [3, 0, 0], sizes = [8, 16, 6], strides = [1, 1, 1]} : vector<14x16x6xbf16> to vector<8x16x6xbf16>
    %272 = vector.shape_cast %271 : vector<8x16x6xbf16> to vector<128x6xbf16>
    %c3_154 = arith.constant 3 : index
    %c0_155 = arith.constant 0 : index
    %c0_156 = arith.constant 0 : index
    %273 = vector.load %arg13[%c3_154, %c0_155, %c0_156] : memref<7x6x6xbf16, #tpu.memory_space<vmem>>, vector<1x6x6xbf16>
    %274 = vector.shape_cast %273 : vector<1x6x6xbf16> to vector<6x6xbf16>
    %cst_157 = arith.constant dense<0.000000e+00> : vector<128x6xf32>
    %275 = tpu.matmul %272, %274, %cst_157 {dimension_numbers = #tpu.dot_dimension_numbers<[1], [0], [0], [1], [0, 0, 1, 1], [], []>} : vector<128x6xbf16>, vector<6x6xbf16>, vector<128x6xf32> -> vector<128x6xf32>
    %276 = arith.addf %270, %275 : vector<128x6xf32>
    %277 = vector.extract_strided_slice %251 {offsets = [4, 0, 0], sizes = [8, 16, 6], strides = [1, 1, 1]} : vector<14x16x6xbf16> to vector<8x16x6xbf16>
    %278 = vector.shape_cast %277 : vector<8x16x6xbf16> to vector<128x6xbf16>
    %c4_158 = arith.constant 4 : index
    %c0_159 = arith.constant 0 : index
    %c0_160 = arith.constant 0 : index
    %279 = vector.load %arg13[%c4_158, %c0_159, %c0_160] : memref<7x6x6xbf16, #tpu.memory_space<vmem>>, vector<1x6x6xbf16>
    %280 = vector.shape_cast %279 : vector<1x6x6xbf16> to vector<6x6xbf16>
    %cst_161 = arith.constant dense<0.000000e+00> : vector<128x6xf32>
    %281 = tpu.matmul %278, %280, %cst_161 {dimension_numbers = #tpu.dot_dimension_numbers<[1], [0], [0], [1], [0, 0, 1, 1], [], []>} : vector<128x6xbf16>, vector<6x6xbf16>, vector<128x6xf32> -> vector<128x6xf32>
    %282 = arith.addf %276, %281 : vector<128x6xf32>
    %283 = vector.extract_strided_slice %251 {offsets = [5, 0, 0], sizes = [8, 16, 6], strides = [1, 1, 1]} : vector<14x16x6xbf16> to vector<8x16x6xbf16>
    %284 = vector.shape_cast %283 : vector<8x16x6xbf16> to vector<128x6xbf16>
    %c5_162 = arith.constant 5 : index
    %c0_163 = arith.constant 0 : index
    %c0_164 = arith.constant 0 : index
    %285 = vector.load %arg13[%c5_162, %c0_163, %c0_164] : memref<7x6x6xbf16, #tpu.memory_space<vmem>>, vector<1x6x6xbf16>
    %286 = vector.shape_cast %285 : vector<1x6x6xbf16> to vector<6x6xbf16>
    %cst_165 = arith.constant dense<0.000000e+00> : vector<128x6xf32>
    %287 = tpu.matmul %284, %286, %cst_165 {dimension_numbers = #tpu.dot_dimension_numbers<[1], [0], [0], [1], [0, 0, 1, 1], [], []>} : vector<128x6xbf16>, vector<6x6xbf16>, vector<128x6xf32> -> vector<128x6xf32>
    %288 = arith.addf %282, %287 : vector<128x6xf32>
    %289 = vector.extract_strided_slice %251 {offsets = [6, 0, 0], sizes = [8, 16, 6], strides = [1, 1, 1]} : vector<14x16x6xbf16> to vector<8x16x6xbf16>
    %290 = vector.shape_cast %289 : vector<8x16x6xbf16> to vector<128x6xbf16>
    %c6_166 = arith.constant 6 : index
    %c0_167 = arith.constant 0 : index
    %c0_168 = arith.constant 0 : index
    %291 = vector.load %arg13[%c6_166, %c0_167, %c0_168] : memref<7x6x6xbf16, #tpu.memory_space<vmem>>, vector<1x6x6xbf16>
    %292 = vector.shape_cast %291 : vector<1x6x6xbf16> to vector<6x6xbf16>
    %cst_169 = arith.constant dense<0.000000e+00> : vector<128x6xf32>
    %293 = tpu.matmul %290, %292, %cst_169 {dimension_numbers = #tpu.dot_dimension_numbers<[1], [0], [0], [1], [0, 0, 1, 1], [], []>} : vector<128x6xbf16>, vector<6x6xbf16>, vector<128x6xf32> -> vector<128x6xf32>
    %294 = arith.addf %288, %293 : vector<128x6xf32>
    %c0_170 = arith.constant 0 : index
    %c0_171 = arith.constant 0 : index
    %295 = vector.load %arg14[%c0_170, %c0_171] : memref<1x6xf32, #tpu.memory_space<vmem>>, vector<1x6xf32>
    %296 = vector.broadcast %295 : vector<1x6xf32> to vector<128x6xf32>
    %297 = arith.addf %294, %296 : vector<128x6xf32>
    %cst_172 = arith.constant 0.000000e+00 : f32
    %298 = vector.broadcast %cst_172 : f32 to vector<128x6xf32>
    %299 = arith.maximumf %297, %298 : vector<128x6xf32>
    %300 = vector.shape_cast %299 : vector<128x6xf32> to vector<8x16x6xf32>
    %301 = arith.truncf %300 : vector<8x16x6xf32> to vector<8x16x6xbf16>
    %cst_173 = arith.constant 0.000000e+00 : bf16
    %302 = vector.broadcast %cst_173 : bf16 to vector<8x3x6xbf16>
    %303 = tpu.concatenate %302, %301, %302 in 1 : vector<8x3x6xbf16>, vector<8x16x6xbf16>, vector<8x3x6xbf16> -> vector<8x22x6xbf16>
    %cst_174 = arith.constant 0.000000e+00 : f32
    %304 = vector.broadcast %cst_174 : f32 to vector<128x8xf32>
    %305 = vector.extract_strided_slice %303 {offsets = [0, 0, 0], sizes = [8, 16, 6], strides = [1, 1, 1]} : vector<8x22x6xbf16> to vector<8x16x6xbf16>
    %306 = vector.shape_cast %305 : vector<8x16x6xbf16> to vector<128x6xbf16>
    %c0_175 = arith.constant 0 : index
    %c0_176 = arith.constant 0 : index
    %c0_177 = arith.constant 0 : index
    %307 = vector.load %arg15[%c0_175, %c0_176, %c0_177] : memref<7x6x8xbf16, #tpu.memory_space<vmem>>, vector<1x6x8xbf16>
    %308 = vector.shape_cast %307 : vector<1x6x8xbf16> to vector<6x8xbf16>
    %cst_178 = arith.constant dense<0.000000e+00> : vector<128x8xf32>
    %309 = tpu.matmul %306, %308, %cst_178 {dimension_numbers = #tpu.dot_dimension_numbers<[1], [0], [0], [1], [0, 0, 1, 1], [], []>} : vector<128x6xbf16>, vector<6x8xbf16>, vector<128x8xf32> -> vector<128x8xf32>
    %310 = arith.addf %304, %309 : vector<128x8xf32>
    %311 = vector.extract_strided_slice %303 {offsets = [0, 1, 0], sizes = [8, 16, 6], strides = [1, 1, 1]} : vector<8x22x6xbf16> to vector<8x16x6xbf16>
    %312 = vector.shape_cast %311 : vector<8x16x6xbf16> to vector<128x6xbf16>
    %c1_179 = arith.constant 1 : index
    %c0_180 = arith.constant 0 : index
    %c0_181 = arith.constant 0 : index
    %313 = vector.load %arg15[%c1_179, %c0_180, %c0_181] : memref<7x6x8xbf16, #tpu.memory_space<vmem>>, vector<1x6x8xbf16>
    %314 = vector.shape_cast %313 : vector<1x6x8xbf16> to vector<6x8xbf16>
    %cst_182 = arith.constant dense<0.000000e+00> : vector<128x8xf32>
    %315 = tpu.matmul %312, %314, %cst_182 {dimension_numbers = #tpu.dot_dimension_numbers<[1], [0], [0], [1], [0, 0, 1, 1], [], []>} : vector<128x6xbf16>, vector<6x8xbf16>, vector<128x8xf32> -> vector<128x8xf32>
    %316 = arith.addf %310, %315 : vector<128x8xf32>
    %317 = vector.extract_strided_slice %303 {offsets = [0, 2, 0], sizes = [8, 16, 6], strides = [1, 1, 1]} : vector<8x22x6xbf16> to vector<8x16x6xbf16>
    %318 = vector.shape_cast %317 : vector<8x16x6xbf16> to vector<128x6xbf16>
    %c2_183 = arith.constant 2 : index
    %c0_184 = arith.constant 0 : index
    %c0_185 = arith.constant 0 : index
    %319 = vector.load %arg15[%c2_183, %c0_184, %c0_185] : memref<7x6x8xbf16, #tpu.memory_space<vmem>>, vector<1x6x8xbf16>
    %320 = vector.shape_cast %319 : vector<1x6x8xbf16> to vector<6x8xbf16>
    %cst_186 = arith.constant dense<0.000000e+00> : vector<128x8xf32>
    %321 = tpu.matmul %318, %320, %cst_186 {dimension_numbers = #tpu.dot_dimension_numbers<[1], [0], [0], [1], [0, 0, 1, 1], [], []>} : vector<128x6xbf16>, vector<6x8xbf16>, vector<128x8xf32> -> vector<128x8xf32>
    %322 = arith.addf %316, %321 : vector<128x8xf32>
    %323 = vector.extract_strided_slice %303 {offsets = [0, 3, 0], sizes = [8, 16, 6], strides = [1, 1, 1]} : vector<8x22x6xbf16> to vector<8x16x6xbf16>
    %324 = vector.shape_cast %323 : vector<8x16x6xbf16> to vector<128x6xbf16>
    %c3_187 = arith.constant 3 : index
    %c0_188 = arith.constant 0 : index
    %c0_189 = arith.constant 0 : index
    %325 = vector.load %arg15[%c3_187, %c0_188, %c0_189] : memref<7x6x8xbf16, #tpu.memory_space<vmem>>, vector<1x6x8xbf16>
    %326 = vector.shape_cast %325 : vector<1x6x8xbf16> to vector<6x8xbf16>
    %cst_190 = arith.constant dense<0.000000e+00> : vector<128x8xf32>
    %327 = tpu.matmul %324, %326, %cst_190 {dimension_numbers = #tpu.dot_dimension_numbers<[1], [0], [0], [1], [0, 0, 1, 1], [], []>} : vector<128x6xbf16>, vector<6x8xbf16>, vector<128x8xf32> -> vector<128x8xf32>
    %328 = arith.addf %322, %327 : vector<128x8xf32>
    %329 = vector.extract_strided_slice %303 {offsets = [0, 4, 0], sizes = [8, 16, 6], strides = [1, 1, 1]} : vector<8x22x6xbf16> to vector<8x16x6xbf16>
    %330 = vector.shape_cast %329 : vector<8x16x6xbf16> to vector<128x6xbf16>
    %c4_191 = arith.constant 4 : index
    %c0_192 = arith.constant 0 : index
    %c0_193 = arith.constant 0 : index
    %331 = vector.load %arg15[%c4_191, %c0_192, %c0_193] : memref<7x6x8xbf16, #tpu.memory_space<vmem>>, vector<1x6x8xbf16>
    %332 = vector.shape_cast %331 : vector<1x6x8xbf16> to vector<6x8xbf16>
    %cst_194 = arith.constant dense<0.000000e+00> : vector<128x8xf32>
    %333 = tpu.matmul %330, %332, %cst_194 {dimension_numbers = #tpu.dot_dimension_numbers<[1], [0], [0], [1], [0, 0, 1, 1], [], []>} : vector<128x6xbf16>, vector<6x8xbf16>, vector<128x8xf32> -> vector<128x8xf32>
    %334 = arith.addf %328, %333 : vector<128x8xf32>
    %335 = vector.extract_strided_slice %303 {offsets = [0, 5, 0], sizes = [8, 16, 6], strides = [1, 1, 1]} : vector<8x22x6xbf16> to vector<8x16x6xbf16>
    %336 = vector.shape_cast %335 : vector<8x16x6xbf16> to vector<128x6xbf16>
    %c5_195 = arith.constant 5 : index
    %c0_196 = arith.constant 0 : index
    %c0_197 = arith.constant 0 : index
    %337 = vector.load %arg15[%c5_195, %c0_196, %c0_197] : memref<7x6x8xbf16, #tpu.memory_space<vmem>>, vector<1x6x8xbf16>
    %338 = vector.shape_cast %337 : vector<1x6x8xbf16> to vector<6x8xbf16>
    %cst_198 = arith.constant dense<0.000000e+00> : vector<128x8xf32>
    %339 = tpu.matmul %336, %338, %cst_198 {dimension_numbers = #tpu.dot_dimension_numbers<[1], [0], [0], [1], [0, 0, 1, 1], [], []>} : vector<128x6xbf16>, vector<6x8xbf16>, vector<128x8xf32> -> vector<128x8xf32>
    %340 = arith.addf %334, %339 : vector<128x8xf32>
    %341 = vector.extract_strided_slice %303 {offsets = [0, 6, 0], sizes = [8, 16, 6], strides = [1, 1, 1]} : vector<8x22x6xbf16> to vector<8x16x6xbf16>
    %342 = vector.shape_cast %341 : vector<8x16x6xbf16> to vector<128x6xbf16>
    %c6_199 = arith.constant 6 : index
    %c0_200 = arith.constant 0 : index
    %c0_201 = arith.constant 0 : index
    %343 = vector.load %arg15[%c6_199, %c0_200, %c0_201] : memref<7x6x8xbf16, #tpu.memory_space<vmem>>, vector<1x6x8xbf16>
    %344 = vector.shape_cast %343 : vector<1x6x8xbf16> to vector<6x8xbf16>
    %cst_202 = arith.constant dense<0.000000e+00> : vector<128x8xf32>
    %345 = tpu.matmul %342, %344, %cst_202 {dimension_numbers = #tpu.dot_dimension_numbers<[1], [0], [0], [1], [0, 0, 1, 1], [], []>} : vector<128x6xbf16>, vector<6x8xbf16>, vector<128x8xf32> -> vector<128x8xf32>
    %346 = arith.addf %340, %345 : vector<128x8xf32>
    %c0_203 = arith.constant 0 : index
    %c0_204 = arith.constant 0 : index
    %347 = vector.load %arg16[%c0_203, %c0_204] : memref<1x8xf32, #tpu.memory_space<vmem>>, vector<1x8xf32>
    %348 = vector.broadcast %347 : vector<1x8xf32> to vector<128x8xf32>
    %349 = arith.addf %346, %348 : vector<128x8xf32>
    %cst_205 = arith.constant 0.000000e+00 : f32
    %350 = vector.broadcast %cst_205 : f32 to vector<128x8xf32>
    %351 = arith.maximumf %349, %350 : vector<128x8xf32>
    %352 = vector.shape_cast %351 : vector<128x8xf32> to vector<8x16x8xf32>
    %c0_206 = arith.constant 0 : index
    %c0_207 = arith.constant 0 : index
    %c0_208 = arith.constant 0 : index
    %c16 = arith.constant 16 : index
    %353 = vector.load %arg19[%c0_206, %c0_207, %c0_208, %c16] : memref<1x8x16x32xf32, #tpu.memory_space<vmem>>, vector<1x8x16x8xf32>
    %354 = vector.shape_cast %353 : vector<1x8x16x8xf32> to vector<8x16x8xf32>
    %355 = vector.shape_cast %352 : vector<8x16x8xf32> to vector<1x8x16x8xf32>
    tpu.vector_store %arg19[%c0_206, %c0_207, %c0_208, %c16], %355 {strides = array<i32>} : memref<1x8x16x32xf32, #tpu.memory_space<vmem>>, vector<1x8x16x8xf32>,
    %356 = vector.extract_strided_slice %3 {offsets = [5, 0, 0], sizes = [10, 16, 4], strides = [1, 1, 1]} : vector<20x16x4xbf16> to vector<10x16x4xbf16>
    %357 = arith.extf %356 : vector<10x16x4xbf16> to vector<10x16x4xf32>
    %358 = vector.extract_strided_slice %357 {offsets = [0, 0, 0], sizes = [8, 16, 4], strides = [1, 1, 1]} : vector<10x16x4xf32> to vector<8x16x4xf32>
    %359 = vector.extract_strided_slice %357 {offsets = [1, 0, 0], sizes = [8, 16, 4], strides = [1, 1, 1]} : vector<10x16x4xf32> to vector<8x16x4xf32>
    %360 = arith.addf %358, %359 : vector<8x16x4xf32>
    %361 = vector.extract_strided_slice %357 {offsets = [2, 0, 0], sizes = [8, 16, 4], strides = [1, 1, 1]} : vector<10x16x4xf32> to vector<8x16x4xf32>
    %362 = arith.addf %360, %361 : vector<8x16x4xf32>
    %cst_209 = arith.constant 0.000000e+00 : f32
    %363 = vector.broadcast %cst_209 : f32 to vector<8x1x4xf32>
    %364 = tpu.concatenate %363, %362, %363 in 1 : vector<8x1x4xf32>, vector<8x16x4xf32>, vector<8x1x4xf32> -> vector<8x18x4xf32>
    %365 = vector.extract_strided_slice %364 {offsets = [0, 0, 0], sizes = [8, 16, 4], strides = [1, 1, 1]} : vector<8x18x4xf32> to vector<8x16x4xf32>
    %366 = vector.extract_strided_slice %364 {offsets = [0, 1, 0], sizes = [8, 16, 4], strides = [1, 1, 1]} : vector<8x18x4xf32> to vector<8x16x4xf32>
    %367 = arith.addf %365, %366 : vector<8x16x4xf32>
    %368 = vector.extract_strided_slice %364 {offsets = [0, 2, 0], sizes = [8, 16, 4], strides = [1, 1, 1]} : vector<8x18x4xf32> to vector<8x16x4xf32>
    %369 = arith.addf %367, %368 : vector<8x16x4xf32>
    %cst_210 = arith.constant 0.111111112 : f32
    %370 = vector.broadcast %cst_210 : f32 to vector<8x16x4xf32>
    %371 = arith.mulf %369, %370 : vector<8x16x4xf32>
    %372 = vector.shape_cast %371 : vector<8x16x4xf32> to vector<128x4xf32>
    %373 = arith.truncf %372 : vector<128x4xf32> to vector<128x4xbf16>
    %c0_211 = arith.constant 0 : index
    %c0_212 = arith.constant 0 : index
    %374 = vector.load %arg17[%c0_211, %c0_212] : memref<4x8xbf16, #tpu.memory_space<vmem>>, vector<4x8xbf16>
    %cst_213 = arith.constant dense<0.000000e+00> : vector<128x8xf32>
    %375 = tpu.matmul %373, %374, %cst_213 {dimension_numbers = #tpu.dot_dimension_numbers<[1], [0], [0], [1], [0, 0, 1, 1], [], []>} : vector<128x4xbf16>, vector<4x8xbf16>, vector<128x8xf32> -> vector<128x8xf32>
    %c0_214 = arith.constant 0 : index
    %c0_215 = arith.constant 0 : index
    %376 = vector.load %arg18[%c0_214, %c0_215] : memref<1x8xf32, #tpu.memory_space<vmem>>, vector<1x8xf32>
    %377 = vector.broadcast %376 : vector<1x8xf32> to vector<128x8xf32>
    %378 = arith.addf %375, %377 : vector<128x8xf32>
    %cst_216 = arith.constant 0.000000e+00 : f32
    %379 = vector.broadcast %cst_216 : f32 to vector<128x8xf32>
    %380 = arith.maximumf %378, %379 : vector<128x8xf32>
    %381 = vector.shape_cast %380 : vector<128x8xf32> to vector<8x16x8xf32>
    %c0_217 = arith.constant 0 : index
    %c0_218 = arith.constant 0 : index
    %c0_219 = arith.constant 0 : index
    %c24 = arith.constant 24 : index
    %382 = vector.load %arg19[%c0_217, %c0_218, %c0_219, %c24] : memref<1x8x16x32xf32, #tpu.memory_space<vmem>>, vector<1x8x16x8xf32>
    %383 = vector.shape_cast %382 : vector<1x8x16x8xf32> to vector<8x16x8xf32>
    %384 = vector.shape_cast %381 : vector<8x16x8xf32> to vector<1x8x16x8xf32>
    tpu.vector_store %arg19[%c0_217, %c0_218, %c0_219, %c24], %384 {strides = array<i32>} : memref<1x8x16x32xf32, #tpu.memory_space<vmem>>, vector<1x8x16x8xf32>,
    return
  }
  func.func @transform_0(%arg0: i32, %arg1: i32) -> (i32, i32, i32, i32) {
    %c0_i32 = arith.constant 0 : i32
    %c0_i32_0 = arith.constant 0 : i32
    %c0_i32_1 = arith.constant 0 : i32
    %c0_i32_2 = arith.constant 0 : i32
    return %arg0, %c0_i32, %c0_i32_0, %c0_i32_1 : i32, i32, i32, i32
  }
  func.func @transform_1(%arg0: i32, %arg1: i32) -> (i32, i32) {
    %c0_i32 = arith.constant 0 : i32
    %c0_i32_0 = arith.constant 0 : i32
    %c0_i32_1 = arith.constant 0 : i32
    return %c0_i32, %c0_i32_0 : i32, i32
  }
  func.func @transform_2(%arg0: i32, %arg1: i32) -> (i32, i32) {
    %c0_i32 = arith.constant 0 : i32
    %c0_i32_0 = arith.constant 0 : i32
    %c0_i32_1 = arith.constant 0 : i32
    return %c0_i32, %c0_i32_0 : i32, i32
  }
  func.func @transform_3(%arg0: i32, %arg1: i32) -> (i32, i32, i32) {
    %c0_i32 = arith.constant 0 : i32
    %c0_i32_0 = arith.constant 0 : i32
    %c0_i32_1 = arith.constant 0 : i32
    %c0_i32_2 = arith.constant 0 : i32
    return %c0_i32, %c0_i32_0, %c0_i32_1 : i32, i32, i32
  }
  func.func @transform_4(%arg0: i32, %arg1: i32) -> (i32, i32) {
    %c0_i32 = arith.constant 0 : i32
    %c0_i32_0 = arith.constant 0 : i32
    %c0_i32_1 = arith.constant 0 : i32
    return %c0_i32, %c0_i32_0 : i32, i32
  }
  func.func @transform_5(%arg0: i32, %arg1: i32) -> (i32, i32, i32) {
    %c0_i32 = arith.constant 0 : i32
    %c0_i32_0 = arith.constant 0 : i32
    %c0_i32_1 = arith.constant 0 : i32
    %c0_i32_2 = arith.constant 0 : i32
    return %c0_i32, %c0_i32_0, %c0_i32_1 : i32, i32, i32
  }
  func.func @transform_6(%arg0: i32, %arg1: i32) -> (i32, i32) {
    %c0_i32 = arith.constant 0 : i32
    %c0_i32_0 = arith.constant 0 : i32
    %c0_i32_1 = arith.constant 0 : i32
    return %c0_i32, %c0_i32_0 : i32, i32
  }
  func.func @transform_7(%arg0: i32, %arg1: i32) -> (i32, i32, i32) {
    %c0_i32 = arith.constant 0 : i32
    %c0_i32_0 = arith.constant 0 : i32
    %c0_i32_1 = arith.constant 0 : i32
    %c0_i32_2 = arith.constant 0 : i32
    return %c0_i32, %c0_i32_0, %c0_i32_1 : i32, i32, i32
  }
  func.func @transform_8(%arg0: i32, %arg1: i32) -> (i32, i32) {
    %c0_i32 = arith.constant 0 : i32
    %c0_i32_0 = arith.constant 0 : i32
    %c0_i32_1 = arith.constant 0 : i32
    return %c0_i32, %c0_i32_0 : i32, i32
  }
  func.func @transform_9(%arg0: i32, %arg1: i32) -> (i32, i32, i32) {
    %c0_i32 = arith.constant 0 : i32
    %c0_i32_0 = arith.constant 0 : i32
    %c0_i32_1 = arith.constant 0 : i32
    %c0_i32_2 = arith.constant 0 : i32
    return %c0_i32, %c0_i32_0, %c0_i32_1 : i32, i32, i32
  }
  func.func @transform_10(%arg0: i32, %arg1: i32) -> (i32, i32) {
    %c0_i32 = arith.constant 0 : i32
    %c0_i32_0 = arith.constant 0 : i32
    %c0_i32_1 = arith.constant 0 : i32
    return %c0_i32, %c0_i32_0 : i32, i32
  }
  func.func @transform_11(%arg0: i32, %arg1: i32) -> (i32, i32, i32) {
    %c0_i32 = arith.constant 0 : i32
    %c0_i32_0 = arith.constant 0 : i32
    %c0_i32_1 = arith.constant 0 : i32
    %c0_i32_2 = arith.constant 0 : i32
    return %c0_i32, %c0_i32_0, %c0_i32_1 : i32, i32, i32
  }
  func.func @transform_12(%arg0: i32, %arg1: i32) -> (i32, i32) {
    %c0_i32 = arith.constant 0 : i32
    %c0_i32_0 = arith.constant 0 : i32
    %c0_i32_1 = arith.constant 0 : i32
    return %c0_i32, %c0_i32_0 : i32, i32
  }
  func.func @transform_13(%arg0: i32, %arg1: i32) -> (i32, i32, i32) {
    %c0_i32 = arith.constant 0 : i32
    %c0_i32_0 = arith.constant 0 : i32
    %c0_i32_1 = arith.constant 0 : i32
    %c0_i32_2 = arith.constant 0 : i32
    return %c0_i32, %c0_i32_0, %c0_i32_1 : i32, i32, i32
  }
  func.func @transform_14(%arg0: i32, %arg1: i32) -> (i32, i32) {
    %c0_i32 = arith.constant 0 : i32
    %c0_i32_0 = arith.constant 0 : i32
    %c0_i32_1 = arith.constant 0 : i32
    return %c0_i32, %c0_i32_0 : i32, i32
  }
  func.func @transform_15(%arg0: i32, %arg1: i32) -> (i32, i32) {
    %c0_i32 = arith.constant 0 : i32
    %c0_i32_0 = arith.constant 0 : i32
    %c0_i32_1 = arith.constant 0 : i32
    return %c0_i32, %c0_i32_0 : i32, i32
  }
  func.func @transform_16(%arg0: i32, %arg1: i32) -> (i32, i32) {
    %c0_i32 = arith.constant 0 : i32
    %c0_i32_0 = arith.constant 0 : i32
    %c0_i32_1 = arith.constant 0 : i32
    return %c0_i32, %c0_i32_0 : i32, i32
  }
  func.func @transform_17(%arg0: i32, %arg1: i32) -> (i32, i32, i32, i32) {
    %c0_i32 = arith.constant 0 : i32
    %c0_i32_0 = arith.constant 0 : i32
    %c0_i32_1 = arith.constant 0 : i32
    return %arg0, %arg1, %c0_i32, %c0_i32_0 : i32, i32, i32, i32
  }
}

</mosaic_0001>

<bundles_post_ra>
// kernel: inception_b_forward.1
= control target key start
LH: loop header
LB: loop body
LE: loop exit
PB: predicated region body
PF: predicated region fallthrough
CT: control target
= control target key end

     0   :  { %s18462_s0 = inlined_call_operand.vmem [shape: bf16[2,28,16,4], index: 0, kind: input, shape index: {}]   ;;  %s18463_s1 = inlined_call_operand.vmem [shape: bf16[4,384], index: 1, kind: input, shape index: {}]   ;;  %s18464_s2 = inlined_call_operand.vmem [shape: f32[1,384], index: 2, kind: input, shape index: {}]   ;;  %s18465_s3 = inlined_call_operand.vmem [shape: bf16[7,6,6], index: 3, kind: input, shape index: {}]   ;;  %s18466_s4 = inlined_call_operand.vmem [shape: f32[1,6], index: 4, kind: input, shape index: {}]   ;;  %s18467_s5 = inlined_call_operand.vmem [shape: bf16[7,6,8], index: 5, kind: input, shape index: {}]   ;;  %s18468_s6 = inlined_call_operand.vmem [shape: f32[1,8], index: 6, kind: input, shape index: {}]   ;;  %s18469_s7 = inlined_call_operand.vmem [shape: bf16[7,6,6], index: 7, kind: input, shape index: {}]   ;;  %s18470_s8 = inlined_call_operand.vmem [shape: f32[1,6], index: 8, kind: input, shape index: {}]   ;;  %s18471_s9 = inlined_call_operand.vmem [shape: bf16[7,6,6], index: 9, kind: input, shape index: {}]   ;;  %s18472_s10 = inlined_call_operand.vmem [shape: f32[1,6], index: 10, kind: input, shape index: {}]   ;;  %s18473_s11 = inlined_call_operand.vmem [shape: bf16[7,6,6], index: 11, kind: input, shape index: {}]   ;;  %s18474_s12 = inlined_call_operand.vmem [shape: f32[1,6], index: 12, kind: input, shape index: {}]   ;;  %s18475_s13 = inlined_call_operand.vmem [shape: bf16[7,6,8], index: 13, kind: input, shape index: {}]   ;;  %s18476_s14 = inlined_call_operand.vmem [shape: f32[1,8], index: 14, kind: input, shape index: {}]   ;;  %s18477_s15 = inlined_call_operand.vmem [shape: bf16[4,8], index: 15, kind: input, shape index: {}]   ;;  %s18478_s16 = inlined_call_operand.vmem [shape: f32[1,8], index: 16, kind: input, shape index: {}]   ;;  %s18479_s17 = inlined_call_operand.hbm [shape: f32[2,16,16,32], index: 17, kind: output, shape index: {}]  }
   0x1   :  { %18739 = sst [smem:[#allocation77_spill]] %s18462_s0 }
   0x2   :  { %18740 = sst [smem:[#allocation78_spill]] %s18463_s1 }
   0x3   :  { %18741 = sst [smem:[#allocation79_spill]] %s18464_s2 }
   0x4   :  { %18742 = sst [smem:[#allocation80_spill]] %s18465_s3 }
   0x5   :  { %18743 = sst [smem:[#allocation81_spill]] %s18476_s14 }
   0x6   :  { %18744 = sst [smem:[#allocation82_spill]] %s18479_s17 }
   0x7   :  { %22 = vsyncpa [#allocation3], 0 }
   0x8   :  { %24 = vsyncpa [#allocation3 + $0x1], 0  ;;  %s14627_s24 = smov 0   ;;  %s14629_s25 = smov 0  }
   0x9   :  { %s14631_s26 = smov 0   ;;  %s14633_s27 = smov 0  }
   0xa   :  { %s14635_s28 = smov 0   ;;  %s14637_s29 = smov 0  }
   0xb   :  { %s14639_s0 = smov 0   ;;  %s14641_s30 = smov 0  }
   0xc LB: > { %18745 = sst [smem:[#allocation5_spill]] %s14508_s26  ;;  %s11289_s18 = sadd.s32 4294967295, %s14528_s30   ;;  %s14528_s30 = sphi %s14641_s30, %s30_s30   ;;  %s14524_s0 = sphi %s14639_s0, %s19420_s0   ;;  %s14520_s29 = sphi %s14637_s29, %s19419_s29   ;;  %s14516_s28 = sphi %s14635_s28, %s19418_s28   ;;  %s14512_s27 = sphi %s14633_s27, %s19417_s27   ;;  %s14508_s26 = sphi %s14631_s26, %s19416_s26   ;;  %s14504_s25 = sphi %s14629_s25, %s19422_s25   ;;  %s14500_s24 = sphi %s14627_s24, %s19421_s24  }
   0xd   : > { %18746 = sst [smem:[#allocation6_spill]] %s14520_s29  ;;  %s11290_s19 = sadd.s32 4294967294, %s14528_s30  }
   0xe   : > { %18747 = sst [smem:[#allocation7_spill]] %s14524_s0  ;;  %s39_s1 = sadd.s32 1, %s14520_s29 }
   0xf   : > { %p40_p0 = scmp.ge.s32.totalorder %s39_s1, 2  ;;  %s42_s20 = sadd.s32 1, %s14524_s0 }
  0x10   : > { %p423_p1 = scmp.ne.s32.totalorder %s14508_s26, %s14504_s25  ;;  %p424_p2 = scmp.eq.s32.totalorder %s11289_s18, 3 }
  0x11   : > { %s19424_s1 = smov (%p40_p0, %s39_s1), 0  ;;  %s19426_s20 = smov (!%p40_p0, %s42_s20), %s14524_s0 }
  0x12   : > { %18748 = sst [smem:[#allocation8_spill]] %s19424_s1  ;;  %s409_s21 = ssub.s32 %s14520_s29, %s19424_s1 }
  0x13   : > { %p14678_p3 = por %p424_p2, %p423_p1  ;;  %p44_p4 = scmp.ge.s32.totalorder %s19426_s20, 2 }
  0x14   : > { %p429_p5 = scmp.ne.s32.totalorder %s14504_s25, %s14500_s24  ;;  %p430_p6 = scmp.eq.s32.totalorder %s11290_s19, 3 }
  0x15   : > { %p11293_p7 = scmp.ge.s32.totalorder %s14528_s30, 1  ;;  %s19428_s20 = smov (%p44_p4, %s19426_s20), 0 }
  0x16   : > { %18750 = sst [smem:[#allocation9_spill]] %s19428_s20  ;;  %p14687_p8 = por %p430_p6, %p429_p5 }
  0x17   : > { %p504_p9 = scmp.lt.s32.totalorder %s14528_s30, 5  ;;  %s408_s18 = ssub.s32 %s14524_s0, %s19428_s20 }
  0x18   : > { %s413_s17 = sadd.s32 1, %s14508_s26  ;;  %s410_s14 = sor.u32 %s409_s21, %s408_s18 }
  0x19   : > { %p505_p10 = pnand %p11293_p7, %p504_p9  ;;  %p411_p11 = scmp.eq.s32.totalorder %s410_s14, 0 }
  0x1b   : > { %s14696_s1 = scalar_select %p411_p11, %s14508_s26, %s413_s17  }
  0x1c   : > { %508 = sbr.rel (%p505_p10) target bundleno = 3314 (0xcf2), region = 88 }
  0x1d   : > { %18752 = sst [smem:[#allocation10_spill]] %s14696_s1 }
  0x23   : > { %v691_v0 = vlaneseq  ;;  %v14530_v1 = vmov 1983009808   ;;  %p556_p12 = scmp.lt.s32.totalorder %s14516_s28, 1  ;;  %v14531_v5 = vmov 0   ;;  %s18753_s14 = sld [smem:[#allocation78_spill]]  ;;  %vm18586_vm0 = vcmask 1041408  }
  0x24   : > { %v809_v2 = vunpack.c.l.s4 %v14530_v1  ;;  %926 = vmatprep.mubr.bf16.mxu0 %v14531_v5  ;;  %s18754_s2 = sld [smem:[#allocation79_spill]]  ;;  %s11882_s29 = sshll.u32 %s14512_s27, 6  ;;  %vm18584_vm1 = vcmask 31744   ;;  %vm18585_vm2 = vcmask 1040384   ;;  %vm18591_vm3 = vcmask 1046528  }
  0x25   : > { %v14699_v3 = vshrl.u32 %v691_v0, 7  ;;  %s557_s19 = scalar_select %p556_p12, %s14516_s28, 1  ;;  %vm18603_vm4 = vcmask 1042432   ;;  %vm1526_vm5 = vsmask.f32 1280  ;;  %vm1728_vm8 = vcmask 48128  }
  0x26   : > { %v810_v4 = vunpack.c.0.s8 %v809_v2  ;;  %s18776_s3 = sld [smem:[#allocation80_spill]]  ;;  %vm14942_vm6 = vmand %vm18586_vm0, %vm1526_vm5  ;;  %s553_s20 = sand.u32 1, %s14504_s25   ;;  %vm18592_vm7 = vsmask.f32 7424  ;;  %vm1368_vm9 = vcmask 64512   ;;  %vm18589_vm12 = vcmask 1045504  }
  0x27   : > { %v701_v7 = vsub.s32 2, %v14699_v3  ;;  %s14325_s0 = smul.u32 224, %s557_s19  ;;  %s11294_s19 = sshll.u32 %s553_s20, 7  ;;  %vm18588_vm10 = vsmask.f32 5376  ;;  %vm18587_vm13 = vcmask 1044480  }
  0x28   : > { %v14715_v9 = vsub.s32 %v810_v4, %v14699_v3  ;;  %s14999_s17 = scalar_lea.vmem [#allocation2], %s11294_s19  ;;  %vm18590_vm11 = vsmask.f32 6400  ;;  %s14533_s21 = smov 24  }
  0x29   : > { %v14706_v6 = vld [vmem:[%s18753_s14] sm:$0x3f]  ;;  %s18756_s14 = sld [smem:[#allocation77_spill]]  ;;  %s11211_s18 = sshll.u32 %s14999_s17, 4  ;;  %s18396_s18 = int_to_ptr.vmem [resolvable:$true] %s11211_s18 }
  0x2a   : > { %v14712_v8 = vld [vmem:[%s18754_s2] sm:$0x7]  ;;  %v814_v11 = vrot.slane %v14706_v6, %v14715_v9 }
  0x2b   : > { %v14719_v10 = vrot.slane %v14712_v8, %v701_v7 }
  0x2c   : > { %v822_v12 = vcombine.high %v814_v11, %v814_v11  ;;  %v886_v13 = vsel %vm18586_vm0, %v814_v11, 0 }
  0x2d   : > { %18755 = vst [vmem:[#allocation11_spill] sm:$0xff] %v14719_v10 }
  0x2e   : > { %11320 = vmatprep.subr.msk.bf16.mxu0 %vm18586_vm0, %v822_v12 }
  0x2f   : > { %s560_s1 = scalar_lea.vmem %s18756_s14, %s14325_s0  ;;  %895 = vmatpush1.bf16.msra.mxu0 %v886_v13  ;;  %s18738_s14 = smov 8  }
  0x30   : > { %s14726_s26 = scalar_lea.vmem %s560_s1, %s11882_s29  ;;  %s11296_s1 = sshll.u32 %s14512_s27, 3 }
  0x31   : > { %v14731_v14 = vld [vmem:[%s14726_s26] sm:$0xff]   ;;  %v14734_v15 = vld [vmem:[%s14726_s26 + $0x28] sm:$0xff]   ;;  %v14737_v16 = vld [vmem:[%s14726_s26 + $0x30] sm:$0xff]   ;;  %s11299_s19 = sadd.s32 4294967290, %s11296_s1  ;;  %s19411_s0 = sld [smem:[#allocation81_spill]] }
  0x32   : > { %11321 = vmatmul.mubr.msk.bf16.vlgmr.msra.gmra.mrb[0].mxu0 %vm18584_vm1, %v14731_v14  ;;  %v10646_v17 = vunpack.c.l.bf16 %v14734_v15  ;;  %v10647_v18 = vunpack.c.h.bf16 %v14734_v15  ;;  %v14744_v19 = vld [vmem:[%s14726_s26 + $0x38] sm:$0xff]   ;;  %v10648_v20 = vunpack.c.l.bf16 %v14737_v16  ;;  %v10649_v21 = vunpack.c.h.bf16 %v14737_v16  ;;  %v14751_v23 = vld [vmem:[%s14726_s26 + $0x40] sm:$0xff]   ;;  %12432 = vmatprep.mubr.msk.bf16.mxu1 %vm18584_vm1, %v14737_v16  ;;  %v14759_v30 = vld [vmem:[%s14726_s26 + $0x48] sm:$0xff]   ;;  %s11883_s1 = sshll.u32 %s14512_s27, 4 }
  0x33   : > { %932 = vmatprep.mubr.bf16.mxu0 %v14531_v5  ;;  %v10650_v22 = vunpack.c.l.bf16 %v14744_v19  ;;  %v10651_v24 = vunpack.c.h.bf16 %v14744_v19  ;;  %v10652_v25 = vunpack.c.l.bf16 %v14751_v23  ;;  %v10653_v26 = vunpack.c.h.bf16 %v14751_v23  ;;  %v14762_v31 = vld [vmem:[%s14726_s26 + $0x8] sm:$0xff]   ;;  %v14773_v45 = vld [vmem:[%s14726_s26 + $0x50] sm:$0xff]   ;;  %v14786_v51 = vld [vmem:[%s14726_s26 + $0x58] sm:$0xff]  }
  0x34   : > { %v10666_v27 = vadd.f32 %v10648_v20, %v10646_v17  ;;  %v10667_v28 = vadd.f32 %v10649_v21, %v10647_v18  ;;  %v10654_v35 = vunpack.c.l.bf16 %v14759_v30  ;;  %v10655_v39 = vunpack.c.h.bf16 %v14759_v30  ;;  %v14799_v58 = vld [vmem:[%s14726_s26 + $0x10] sm:$0xff]   ;;  %v591_v17 = vld [vmem:[%s14726_s26 + $0x60] sm:$0xff]  }
  0x35   : > { %v10668_v29 = vadd.f32 %v10650_v22, %v10648_v20  ;;  %v10669_v32 = vadd.f32 %v10651_v24, %v10649_v21  ;;  %v10670_v33 = vadd.f32 %v10652_v25, %v10650_v22  ;;  %v10671_v34 = vadd.f32 %v10653_v26, %v10651_v24  ;;  %v593_v21 = vld [vmem:[%s14726_s26 + $0x68] sm:$0xff]  }
  0x36   : > { %v14765_v36 = vadd.f32 %v10666_v27, %v10650_v22  ;;  %v14767_v37 = vadd.f32 %v10667_v28, %v10651_v24  ;;  %v10672_v41 = vadd.f32 %v10654_v35, %v10652_v25  ;;  %v10673_v44 = vadd.f32 %v10655_v39, %v10653_v26 }
  0x37   : > { %v10684_v38 = vadd.f32 %v10668_v29, %v10652_v25  ;;  %v10685_v40 = vadd.f32 %v10669_v32, %v10653_v26  ;;  %v14770_v42 = vadd.f32 %v10670_v33, %v10654_v35  ;;  %v14777_v47 = vadd.f32 %v10671_v34, %v10655_v39  ;;  %v595_v32 = vld [vmem:[%s14726_s26 + $0x70] sm:$0xff]  }
  0x38   : > { %18757 = vst [vmem:[#allocation12_spill] sm:$0xff] %v14765_v36  ;;  %18758 = vst [vmem:[#allocation13_spill] sm:$0xff] %v14767_v37  ;;  %v10656_v48 = vunpack.c.l.bf16 %v14773_v45  ;;  %v10657_v50 = vunpack.c.h.bf16 %v14773_v45  ;;  %v10658_v55 = vunpack.c.l.bf16 %v14786_v51  ;;  %v10659_v1 = vunpack.c.h.bf16 %v14786_v51 }
  0x39   : > { %18759 = vst [vmem:[#allocation14_spill] sm:$0xff] %v14770_v42  ;;  %v10718_v43 = vrot.slane %v10684_v38, 7  ;;  %v10719_v46 = vrot.slane %v10685_v40, 7  ;;  %18760 = vst [vmem:[#allocation15_spill] sm:$0xff] %v14777_v47  ;;  %v10660_v18 = vunpack.c.l.bf16 %v591_v17  ;;  %v10661_v20 = vunpack.c.h.bf16 %v591_v17  ;;  %v14831_v38 = vld [vmem:[%s14726_s26 + $0x18] sm:$0xff]  }
  0x3a   : > { %11322 = vmatmul.mubr.msk.bf16.gmra.mrb[4].mxu0 %vm18584_vm1, %v14762_v31  ;;  %v10674_v59 = vadd.f32 %v10656_v48, %v10654_v35  ;;  %v10675_v60 = vadd.f32 %v10657_v50, %v10655_v39  ;;  %v14801_v61 = vadd.f32 %v10672_v41, %v10656_v48  ;;  %v14805_v0 = vadd.f32 %v10673_v44, %v10657_v50 }
  0x3b   : > { %938 = vmatprep.mubr.bf16.mxu0 %v14531_v5  ;;  %v14782_v49 = vsel %vm18585_vm2, 0.0, %v10718_v43  ;;  %v14789_v52 = vsel %vm18585_vm2, %v10718_v43, %v10719_v46  ;;  %v14792_v53 = vsel %vm18585_vm2, %v10719_v46, 0.0  ;;  %v10676_v7 = vadd.f32 %v10658_v55, %v10656_v48  ;;  %v14408_v48 = vld [vmem:[%s14726_s26 + $0x20] sm:$0xff]  }
  0x3c   : > { %18761 = vst [vmem:[#allocation16_spill] sm:$0xff] %v14782_v49  ;;  %18762 = vst [vmem:[#allocation17_spill] sm:$0xff] %v14789_v52  ;;  %v10801_v54 = vrot.slane %v14782_v49, 1  ;;  %v10802_v56 = vrot.slane %v14789_v52, 1  ;;  %v10804_v57 = vrot.slane %v14792_v53, 1  ;;  %v10677_v11 = vadd.f32 %v10659_v1, %v10657_v50  ;;  %v14420_v50 = vld [vmem:[%s14726_s26 + $0x80] sm:$0xff]  }
  0x3d   : > { %18763 = vst [vmem:[#allocation18_spill] sm:$0xff] %v14792_v53  ;;  %18764 = vst [vmem:[#allocation19_spill] sm:$0xff] %v14801_v61  ;;  %v14814_v12 = vadd.f32 %v10674_v59, %v10658_v55  ;;  %v14816_v13 = vadd.f32 %v10675_v60, %v10659_v1  ;;  %v807_v22 = vcombine.high %v14706_v6, %v14706_v6  ;;  %v10662_v24 = vunpack.c.l.bf16 %v593_v21 }
  0x3e   : > { %v10803_v62 = vsel %vm18591_vm3, %v10801_v54, %v10802_v56  ;;  %v10805_v63 = vsel %vm18591_vm3, %v10802_v56, %v10804_v57  ;;  %18765 = vst [vmem:[#allocation20_spill] sm:$0xff] %v14805_v0  ;;  %v10663_v25 = vunpack.c.h.bf16 %v593_v21  ;;  %v14825_v26 = vadd.f32 %v10676_v7, %v10660_v18 }
  0x3f   : > { %v14809_v2 = vadd.f32 %v10803_v62, %v14782_v49  ;;  %v14812_v4 = vadd.f32 %v10805_v63, %v14789_v52  ;;  %18768 = vst [vmem:[#allocation23_spill] sm:$0xff] %v14814_v12  ;;  %18769 = vst [vmem:[#allocation24_spill] sm:$0xff] %v14816_v13  ;;  %v14827_v27 = vadd.f32 %v10677_v11, %v10661_v20  ;;  %v10664_v35 = vunpack.c.l.bf16 %v595_v32 }
  0x40   : > { %18770 = vst [vmem:[#allocation25_spill] sm:$0xff] %v14825_v26  ;;  %v10678_v28 = vadd.f32 %v10660_v18, %v10658_v55  ;;  %v10679_v29 = vadd.f32 %v10661_v20, %v10659_v1  ;;  %v10680_v33 = vadd.f32 %v10662_v24, %v10660_v18  ;;  %v10681_v34 = vadd.f32 %v10663_v25, %v10661_v20 }
  0x41   : > { %18766 = vst [vmem:[#allocation21_spill] sm:$0xff] %v14809_v2  ;;  %18767 = vst [vmem:[#allocation22_spill] sm:$0xff] %v14812_v4  ;;  %v10665_v40 = vunpack.c.h.bf16 %v595_v32  ;;  %v821_v43 = vrot.slane %v807_v22, %v14715_v9  ;;  %v14419_v9 = vld [vmem:[%s14726_s26 + $0x78] sm:$0xff]  }
  0x42   : > { %11323 = vmatmul.mubr.msk.bf16.gmra.mrb[8].mxu0 %vm18584_vm1, %v14799_v58  ;;  %18771 = vst [vmem:[#allocation26_spill] sm:$0xff] %v14827_v27  ;;  %v14833_v39 = vadd.f32 %v10678_v28, %v10662_v24  ;;  %v14835_v6 = vadd.f32 %v10679_v29, %v10663_v25  ;;  %v14837_v41 = vadd.f32 %v10680_v33, %v10664_v35 }
  0x43   : > { %944 = vmatprep.mubr.bf16.mxu0 %v14531_v5  ;;  %v14840_v44 = vadd.f32 %v10681_v34, %v10665_v40  ;;  %14281 = vmatprep.subr.msk.bf16.mxu1 %vm18586_vm0, %v821_v43  ;;  %v892_v46 = vsel %vm18586_vm0, %v821_v43, 0 }
  0x44   : > { %18772 = vst [vmem:[#allocation27_spill] sm:$0xff] %v14833_v39  ;;  %18773 = vst [vmem:[#allocation28_spill] sm:$0xff] %v14835_v6  ;;  %14280 = vmatprep.subr.msk.bf16.mxu0 %vm18586_vm0, %v821_v43  ;;  %13487 = vmatpush3.bf16.msra.mxu1 %v892_v46 }
  0x45   : > { %18774 = vst [vmem:[#allocation29_spill] sm:$0xff] %v14837_v41  ;;  %18775 = vst [vmem:[#allocation30_spill] sm:$0xff] %v14840_v44  ;;  %12419 = vmatpush3.bf16.msra.mxu0 %v892_v46 }
  0x47   : > { %12433 = vmatmul.mubr.msk.bf16.vlgmr.msra.gmra.mrb[0].mxu1 %vm18584_vm1, %v14744_v19 }
  0x48   : > { %12436 = vmatprep.mubr.msk.bf16.mxu1 %vm18584_vm1, %v14751_v23 }
  0x4a   : > { %11324 = vmatmul.mubr.msk.bf16.gmra.mrb[12].mxu0 %vm18584_vm1, %v14831_v38 }
  0x4b   : > { %952 = vmatprep.mubr.bf16.mxu0 %v14531_v5 }
  0x4f   : > { %12437 = vmatmul.mubr.msk.bf16.gmra.mrb[4].mxu1 %vm18584_vm1, %v14759_v30 }
  0x50   : > { %12440 = vmatprep.mubr.msk.bf16.mxu1 %vm18584_vm1, %v14773_v45 }
  0x52   : > { %11325 = vmatmul.mubr.msk.bf16.gmra.mrb[16].mxu0 %vm18584_vm1, %v14408_v48 }
  0x53   : > { %960 = vmatprep.mubr.bf16.mxu0 %v14531_v5 }
  0x57   : > { %12441 = vmatmul.mubr.msk.bf16.gmra.mrb[8].mxu1 %vm18584_vm1, %v14786_v51 }
  0x58   : > { %12444 = vmatprep.mubr.msk.bf16.mxu1 %vm18584_vm1, %v591_v17 }
  0x5a   : > { %11326 = vmatmul.mubr.msk.bf16.gmra.mrb[20].mxu0 %vm18584_vm1, %v14734_v15 }
  0x5b   : > { %968 = vmatprep.mubr.bf16.mxu0 %v14531_v5 }
  0x5f   : > { %12445 = vmatmul.mubr.msk.bf16.gmra.mrb[12].mxu1 %vm18584_vm1, %v593_v21 }
  0x60   : > { %12448 = vmatprep.mubr.msk.bf16.mxu1 %vm18584_vm1, %v595_v32 }
  0x62   : > { %11327 = vmatmul.mubr.msk.bf16.gmra.mrb[24].mxu0 %vm18584_vm1, %v14737_v16  ;;  %v14421_v16 = vld [vmem:[%s14726_s26 + $0x88] sm:$0xff]  }
  0x63   : > { %978 = vmatprep.mubr.bf16.mxu0 %v14531_v5 }
  0x67   : > { %12449 = vmatmul.mubr.msk.bf16.gmra.mrb[16].mxu1 %vm18584_vm1, %v14419_v9 }
  0x68   : > { %12452 = vmatprep.mubr.msk.bf16.mxu1 %vm18584_vm1, %v14420_v50 }
  0x6a   : > { %11328 = vmatmul.mubr.msk.bf16.gmra.mrb[28].mxu0 %vm18584_vm1, %v14744_v19  ;;  %v14422_v19 = vld [vmem:[%s14726_s26 + $0x90] sm:$0xff]  }
  0x6b   : > { %988 = vmatprep.mubr.bf16.mxu0 %v14531_v5 }
  0x6f   : > { %12453 = vmatmul.mubr.msk.bf16.gmra.mrb[20].mxu1 %vm18584_vm1, %v14421_v16 }
  0x70   : > { %12456 = vmatprep.mubr.msk.bf16.mxu1 %vm18584_vm1, %v14422_v19 }
  0x72   : > { %11329 = vmatmul.mubr.msk.bf16.gmra.mrb[32].mxu0 %vm18584_vm1, %v14751_v23  ;;  %v14423_v23 = vld [vmem:[%s14726_s26 + $0x98] sm:$0xff]   ;;  %s14534_s26 = smov 16  }
  0x73   : > { %998 = vmatprep.mubr.bf16.mxu0 %v14531_v5 }
  0x77   : > { %12457 = vmatmul.mubr.msk.bf16.gmra.mrb[24].mxu1 %vm18584_vm1, %v14423_v23 }
  0x7a   : > { %11330 = vmatmul.mubr.msk.bf16.gmra.mrb[36].mxu0 %vm18584_vm1, %v14759_v30  ;;  %v11361_v30 = vld [vmem:[%s18776_s3 + $0x4] sm:$0x7] }
  0x7b   : > { %1008 = vmatprep.mubr.bf16.mxu0 %v14531_v5  ;;  %14282 = vmatprep.subr.msk.bf16.mxu1 %vm18603_vm4, %v11361_v30 }
  0x82   : > { %11331 = vmatmul.mubr.msk.bf16.gmra.mrb[40].mxu0 %vm18584_vm1, %v14773_v45  ;;  %v1773_v45 = vsel %vm18603_vm4, %v11361_v30, 0 }
  0x83   : > { %1018 = vmatprep.mubr.bf16.mxu0 %v14531_v5  ;;  %12461 = vmatpush3.bf16.msra.mxu1 %v1773_v45 }
  0x8a   : > { %11332 = vmatmul.mubr.msk.bf16.gmra.mrb[44].mxu0 %vm18584_vm1, %v14786_v51 }
  0x8b   : > { %1028 = vmatprep.mubr.bf16.mxu0 %v14531_v5 }
  0x92   : > { %11333 = vmatmul.mubr.msk.bf16.gmra.mrb[48].mxu0 %vm18584_vm1, %v591_v17 }
  0x93   : > { %1038 = vmatprep.mubr.bf16.mxu0 %v14531_v5 }
  0x9a   : > { %11334 = vmatmul.mubr.msk.bf16.gmra.mrb[52].mxu0 %vm18584_vm1, %v593_v21 }
  0x9b   : > { %1048 = vmatprep.mubr.bf16.mxu0 %v14531_v5 }
  0xa2   : > { %11335 = vmatmul.mubr.msk.bf16.gmra.mrb[56].mxu0 %vm18584_vm1, %v595_v32 }
  0xa3   : > { %1056 = vmatprep.mubr.bf16.mxu0 %v14531_v5 }
  0xaa   : > { %11336 = vmatmul.mubr.msk.bf16.gmra.mrb[60].mxu0 %vm18584_vm1, %v14419_v9 }
  0xab   : > { %1064 = vmatprep.mubr.bf16.mxu0 %v14531_v5 }
  0xb2   : > { %11337 = vmatmul.mubr.msk.bf16.gmra.mrb[64].mxu0 %vm18584_vm1, %v14420_v50 }
  0xb3   : > { %1072 = vmatprep.mubr.bf16.mxu0 %v14531_v5 }
  0xba   : > { %11338 = vmatmul.mubr.msk.bf16.gmra.mrb[68].mxu0 %vm18584_vm1, %v14421_v16 }
  0xbb   : > { %1078 = vmatprep.mubr.bf16.mxu0 %v14531_v5 }
  0xc2   : > { %11339 = vmatmul.mubr.msk.bf16.gmra.mrb[72].mxu0 %vm18584_vm1, %v14422_v19 }
  0xc3   : > { %1084 = vmatprep.mubr.bf16.mxu0 %v14531_v5  ;;  %v14929_v5 = vld [vmem:[%s18776_s3] sm:$0x7] }
  0xc4   : > { %14283 = vmatprep.subr.msk.bf16.mxu1 %vm18603_vm4, %v14929_v5 }
  0xca   : > { %11340 = vmatmul.mubr.msk.bf16.gmra.mrb[76].mxu0 %vm18584_vm1, %v14423_v23 }
  0xcb   : > { %12420 = vmatprep.mubr.msk.bf16.mxu0 %vm18584_vm1, %v14731_v14 }
  0xd2   : > { %12421 = vmatmul.mubr.msk.bf16.vlgmr.msra.gmra.mrb[80].mxu0 %vm18584_vm1, %v14762_v31 }
  0xd3   : > { %12424 = vmatprep.mubr.msk.bf16.mxu0 %vm18584_vm1, %v14799_v58 }
  0xda   : > { %12425 = vmatmul.mubr.msk.bf16.gmra.mrb[84].mxu0 %vm18584_vm1, %v14831_v38 }
  0xdb   : > { %12428 = vmatprep.mubr.msk.bf16.mxu0 %vm18584_vm1, %v14408_v48  ;;  %v18777_v48 = vmov 0 }
  0xdc   : > { %v18778_v48 = vsel %vm14942_vm6, 4294967295, %v18777_v48 }
  0xdd   : > { %18779 = vst [vmem:[#allocation31_spill] sm:$0xff] %v18778_v48 }
  0xe2   : > { %12429 = vmatmul.mubr.msk.bf16.gmra.mrb[88].mxu0 %vm18584_vm1, %v14734_v15  ;;  %v697_v15 = vsub.s32 1, %v14699_v3 }
  0xe4   : > { %v14935_v1 = vrot.slane %v14712_v8, %v697_v15 }
 0x105   : > { %v928_v14 = vpop.f32.mrb[0].mxu0 }
 0x106   : > { %v929_v31 = vpop.f32.mrb[1].mxu0  ;;  %v693_v14 = vsub.s32 0, %v14699_v3 }
 0x107   : > { %v930_v51 = vpop.f32.mrb[2].mxu0 }
 0x108   : > { %v931_v54 = vpop.f32.mrb[3].mxu0 }
 0x10d   : > { %v934_v55 = vpop.f32.mrb[4].mxu0 }
 0x10e   : > { %v935_v56 = vpop.f32.mrb[5].mxu0 }
 0x10f   : > { %v936_v57 = vpop.f32.mrb[6].mxu0 }
 0x110   : > { %v937_v58 = vpop.f32.mrb[7].mxu0 }
 0x115   : > { %v940_v59 = vpop.f32.mrb[8].mxu0 }
 0x116   : > { %v941_v60 = vpop.f32.mrb[9].mxu0 }
 0x117   : > { %v942_v62 = vpop.f32.mrb[10].mxu0 }
 0x118   : > { %v943_v63 = vpop.f32.mrb[11].mxu0 }
 0x11d   : > { %v946_v7 = vpop.f32.mrb[12].mxu0 }
 0x11e   : > { %v947_v11 = vpop.f32.mrb[13].mxu0  ;;  %v14969_v7 = vrot.slane %v14712_v8, %v693_v14 }
 0x11f   : > { %v948_v17 = vadd.f32 %v947_v11, %v14935_v1  ;;  %v949_v18 = vpop.f32.mrb[14].mxu0 }
 0x120   : > { %v950_v20 = vpop.f32.mrb[15].mxu0 }
 0x121   : > { %v951_v21 = vadd.f32 %v950_v20, %v14935_v1  ;;  %v1290_v22 = vmax.f32 %v948_v17, 0.0 }
 0x123   : > { %v1292_v24 = vmax.f32 %v951_v21, 0.0 }
 0x125   : > { %v1385_v25 = vpack.c.bf16 %v1292_v24, %v1290_v22  ;;  %v954_v28 = vpop.f32.mrb[16].mxu0 }
 0x126   : > { %v955_v29 = vpop.f32.mrb[17].mxu0 }
 0x127   : > { %v1400_v32 = vshrl.u32 %v1385_v25, 16  ;;  %v1403_v33 = vshll.u32 %v1385_v25, 16  ;;  %v956_v34 = vadd.f32 %v955_v29, %v14935_v1  ;;  %v957_v35 = vpop.f32.mrb[18].mxu0 }
 0x128   : > { %v958_v38 = vpop.f32.mrb[19].mxu0 }
 0x129   : > { %v1402_v40 = vrot.slane %v1400_v32, 6  ;;  %v1405_v43 = vrot.slane %v1403_v33, 7  ;;  %v959_v46 = vadd.f32 %v958_v38, %v14935_v1  ;;  %v1294_v50 = vmax.f32 %v956_v34, 0.0 }
 0x12b   : > { %v1406_v9 = vor.u32 %v1405_v43, %v1402_v40  ;;  %v1296_v16 = vmax.f32 %v959_v46, 0.0 }
 0x12d   : > { %v14948_v19 = vsel %vm14942_vm6, 0, %v1406_v9  ;;  %v14952_v23 = vsel %vm14942_vm6, %v1406_v9, 0  ;;  %v1386_v30 = vpack.c.bf16 %v1296_v16, %v1294_v50  ;;  %v962_v45 = vpop.f32.mrb[20].mxu0 }
 0x12e   : > { %v963_v31 = vpop.f32.mrb[21].mxu0  ;;  %v14956_v51 = vshll.u32 %v14948_v19, 16  ;;  %v14959_v54 = vshll.u32 %v14952_v23, 16  ;;  %v14963_v60 = vshrl.u32 %v14948_v19, 16 }
 0x12f   : > { %v1408_v55 = vshrl.u32 %v1386_v30, 16  ;;  %v1411_v56 = vshll.u32 %v1386_v30, 16  ;;  %v964_v57 = vadd.f32 %v963_v31, %v14935_v1  ;;  %v965_v58 = vpop.f32.mrb[22].mxu0 }
 0x130   : > { %v966_v59 = vpop.f32.mrb[23].mxu0  ;;  %v1563_v15 = vrot.slane %v14956_v51, 1  ;;  %v1568_v17 = vrot.slane %v14959_v54, 1 }
 0x131   : > { %v1410_v3 = vrot.slane %v1408_v55, 6  ;;  %v1413_v62 = vrot.slane %v1411_v56, 7  ;;  %v967_v63 = vadd.f32 %v966_v59, %v14935_v1  ;;  %v1298_v20 = vmax.f32 %v964_v57, 0.0 }
 0x132   : > { %v1564_v11 = vor.u32 %v1563_v15, %v14963_v60 }
 0x133   : > { %v1414_v18 = vor.u32 %v1413_v62, %v1410_v3  ;;  %v1300_v21 = vmax.f32 %v967_v63, 0.0  ;;  %v1949_v3 = vsel %vm18603_vm4, %v14929_v5, 0  ;;  %v15013_v63 = vld [vmem:[%s18776_s3 + $0x8] sm:$0x7] }
 0x134   : > { %v1569_v22 = vsel %vm18592_vm7, %v1564_v11, %v1568_v17 }
 0x135   : > { %v14978_v24 = vsel %vm14942_vm6, 0, %v1414_v18  ;;  %v14982_v8 = vsel %vm14942_vm6, %v1414_v18, 0  ;;  %v1387_v25 = vpack.c.bf16 %v1300_v21, %v1298_v20  ;;  %v970_v28 = vpop.f32.mrb[24].mxu0  ;;  %12462 = vmatprep.mubr.msk.bf16.mxu1 %vm1728_vm8, %v1569_v22 }
 0x136   : > { %v14986_v29 = vshll.u32 %v14978_v24, 16  ;;  %v14989_v32 = vshll.u32 %v14982_v8, 16  ;;  %v971_v33 = vadd.f32 %v970_v28, %v14969_v7  ;;  %v972_v34 = vpop.f32.mrb[25].mxu0  ;;  %v14995_v16 = vshrl.u32 %v14978_v24, 16 }
 0x137   : > { %v1416_v35 = vshrl.u32 %v1387_v25, 16  ;;  %v1419_v38 = vshll.u32 %v1387_v25, 16  ;;  %v973_v40 = vadd.f32 %v972_v34, %v14935_v1  ;;  %v974_v43 = vpop.f32.mrb[26].mxu0 }
 0x138   : > { %v1302_v46 = vmax.f32 %v971_v33, 0.0  ;;  %v975_v9 = vadd.f32 %v974_v43, %v14969_v7  ;;  %v976_v50 = vpop.f32.mrb[27].mxu0  ;;  %v1575_v30 = vrot.slane %v14986_v29, 1  ;;  %v1580_v57 = vrot.slane %v14989_v32, 1 }
 0x139   : > { %v1418_v45 = vrot.slane %v1416_v35, 6  ;;  %v1421_v14 = vrot.slane %v1419_v38, 7  ;;  %v977_v31 = vadd.f32 %v976_v50, %v14935_v1  ;;  %v1303_v59 = vmax.f32 %v973_v40, 0.0 }
 0x13a   : > { %1369 = vst.msk [vmem:[%s14999_s17] sm:$0xff] %vm1368_vm9, %v1302_v46  ;;  %v1305_v55 = vmax.f32 %v975_v9, 0.0  ;;  %v1576_v56 = vor.u32 %v1575_v30, %v14995_v16 }
 0x13b   : > { %v1422_v58 = vor.u32 %v1421_v14, %v1418_v45  ;;  %v1306_v15 = vmax.f32 %v977_v31, 0.0 }
 0x13c   : > { %1370 = vst.msk [vmem:[%s14999_s17 + $0x8] sm:$0xff] %vm1368_vm9, %v1305_v55  ;;  %v1581_v62 = vsel %vm18592_vm7, %v1576_v56, %v1580_v57 }
 0x13d   : > { %v15017_v11 = vsel %vm14942_vm6, 0, %v1422_v58  ;;  %v15021_v17 = vsel %vm14942_vm6, %v1422_v58, 0  ;;  %v1388_v18 = vpack.c.bf16 %v1306_v15, %v1303_v59  ;;  %v980_v20 = vpop.f32.mrb[28].mxu0  ;;  %12463 = vmatmul.mubr.msk.bf16.vlgmr.msra.gmra.mrb[28].mxu1 %vm1728_vm8, %v1581_v62 }
 0x13e   : > { %v981_v5 = vadd.f32 %v980_v20, %v14969_v7  ;;  %v982_v21 = vpop.f32.mrb[29].mxu0  ;;  %v15026_v22 = vshll.u32 %v15017_v11, 16  ;;  %v15029_v25 = vshll.u32 %v15021_v17, 16  ;;  %12491 = vmatpush3.bf16.msra.mxu1 %v1949_v3  ;;  %v15036_v46 = vshrl.u32 %v15017_v11, 16 }
 0x13f   : > { %v1424_v28 = vshrl.u32 %v1388_v18, 16  ;;  %v1427_v33 = vshll.u32 %v1388_v18, 16  ;;  %v983_v34 = vadd.f32 %v982_v21, %v14935_v1  ;;  %v984_v35 = vpop.f32.mrb[30].mxu0  ;;  %14284 = vmatprep.subr.msk.bf16.mxu1 %vm18603_vm4, %v15013_v63 }
 0x140   : > { %v1308_v38 = vmax.f32 %v981_v5, 0.0  ;;  %v985_v40 = vadd.f32 %v984_v35, %v14969_v7  ;;  %v986_v43 = vpop.f32.mrb[31].mxu0  ;;  %v1587_v9 = vrot.slane %v15026_v22, 1  ;;  %v1592_v55 = vrot.slane %v15029_v25, 1 }
 0x141   : > { %v1426_v50 = vrot.slane %v1424_v28, 6  ;;  %v1429_v30 = vrot.slane %v1427_v33, 7  ;;  %v987_v45 = vadd.f32 %v986_v43, %v14935_v1  ;;  %v1309_v57 = vmax.f32 %v983_v34, 0.0 }
 0x142   : > { %1371 = vst.msk [vmem:[%s14999_s17 + $0x10] sm:$0xff] %vm1368_vm9, %v1308_v38  ;;  %v1311_v14 = vmax.f32 %v985_v40, 0.0  ;;  %v1588_v31 = vor.u32 %v1587_v9, %v15036_v46 }
 0x143   : > { %v1430_v56 = vor.u32 %v1429_v30, %v1426_v50  ;;  %v1312_v58 = vmax.f32 %v987_v45, 0.0 }
 0x144   : > { %1372 = vst.msk [vmem:[%s14999_s17 + $0x18] sm:$0xff] %vm1368_vm9, %v1311_v14  ;;  %v1593_v59 = vsel %vm18592_vm7, %v1588_v31, %v1592_v55 }
 0x145   : > { %v15049_v15 = vsel %vm14942_vm6, 0, %v1430_v56  ;;  %v15053_v3 = vsel %vm14942_vm6, %v1430_v56, 0  ;;  %v1389_v62 = vpack.c.bf16 %v1312_v58, %v1309_v57  ;;  %v990_v18 = vpop.f32.mrb[32].mxu0  ;;  %12466 = vmatprep.mubr.msk.bf16.mxu1 %vm1728_vm8, %v1593_v59 }
 0x146   : > { %v991_v20 = vadd.f32 %v990_v18, %v14969_v7  ;;  %v992_v5 = vpop.f32.mrb[33].mxu0  ;;  %v15058_v21 = vshll.u32 %v15049_v15, 16  ;;  %v15061_v28 = vshll.u32 %v15053_v3, 16  ;;  %v15066_v50 = vshrl.u32 %v15049_v15, 16 }
 0x147   : > { %v1432_v33 = vshrl.u32 %v1389_v62, 16  ;;  %v1435_v34 = vshll.u32 %v1389_v62, 16  ;;  %v993_v35 = vadd.f32 %v992_v5, %v14935_v1  ;;  %v994_v38 = vpop.f32.mrb[34].mxu0 }
 0x148   : > { %18780 = vst [vmem:[#allocation32_spill] sm:$0xff] %v15058_v21  ;;  %18781 = vst [vmem:[#allocation33_spill] sm:$0xff] %v15061_v28  ;;  %v1314_v40 = vmax.f32 %v991_v20, 0.0  ;;  %v995_v43 = vadd.f32 %v994_v38, %v14969_v7  ;;  %v996_v9 = vpop.f32.mrb[35].mxu0  ;;  %v1599_v30 = vrot.slane %v15058_v21, 1  ;;  %v1604_v57 = vrot.slane %v15061_v28, 1 }
 0x149   : > { %18782 = vst [vmem:[#allocation34_spill] sm:$0xff] %v15066_v50  ;;  %v1434_v45 = vrot.slane %v1432_v33, 6  ;;  %v1437_v14 = vrot.slane %v1435_v34, 7  ;;  %v997_v31 = vadd.f32 %v996_v9, %v14935_v1  ;;  %v1315_v59 = vmax.f32 %v993_v35, 0.0 }
 0x14a   : > { %1373 = vst.msk [vmem:[%s14999_s17 + $0x20] sm:$0xff] %vm1368_vm9, %v1314_v40  ;;  %v1317_v55 = vmax.f32 %v995_v43, 0.0  ;;  %v1600_v56 = vor.u32 %v1599_v30, %v15066_v50 }
 0x14b   : > { %v1438_v58 = vor.u32 %v1437_v14, %v1434_v45  ;;  %v1318_v62 = vmax.f32 %v997_v31, 0.0 }
 0x14c   : > { %1374 = vst.msk [vmem:[%s14999_s17 + $0x28] sm:$0xff] %vm1368_vm9, %v1317_v55  ;;  %v1605_v18 = vsel %vm18592_vm7, %v1600_v56, %v1604_v57 }
 0x14d   : > { %v15079_v20 = vsel %vm14942_vm6, 0, %v1438_v58  ;;  %v15083_v5 = vsel %vm14942_vm6, %v1438_v58, 0  ;;  %v1390_v33 = vpack.c.bf16 %v1318_v62, %v1315_v59  ;;  %v1000_v34 = vpop.f32.mrb[36].mxu0  ;;  %12467 = vmatmul.mubr.msk.bf16.gmra.mrb[32].mxu1 %vm1728_vm8, %v1605_v18 }
 0x14e   : > { %v1001_v38 = vadd.f32 %v1000_v34, %v14969_v7  ;;  %v1002_v35 = vpop.f32.mrb[37].mxu0  ;;  %v15088_v40 = vshll.u32 %v15079_v20, 16  ;;  %v15091_v43 = vshll.u32 %v15083_v5, 16  ;;  %v15096_v57 = vshrl.u32 %v15079_v20, 16 }
 0x14f   : > { %v1440_v9 = vshrl.u32 %v1390_v33, 16  ;;  %v1443_v30 = vshll.u32 %v1390_v33, 16  ;;  %v1003_v45 = vadd.f32 %v1002_v35, %v14935_v1  ;;  %v1004_v14 = vpop.f32.mrb[38].mxu0 }
 0x150   : > { %18783 = vst [vmem:[#allocation35_spill] sm:$0xff] %v15088_v40  ;;  %18784 = vst [vmem:[#allocation36_spill] sm:$0xff] %v15091_v43  ;;  %v1320_v31 = vmax.f32 %v1001_v38, 0.0  ;;  %v1005_v55 = vadd.f32 %v1004_v14, %v14969_v7  ;;  %v1006_v56 = vpop.f32.mrb[39].mxu0  ;;  %v1611_v58 = vrot.slane %v15088_v40, 1  ;;  %v1616_v35 = vrot.slane %v15091_v43, 1 }
 0x151   : > { %18785 = vst [vmem:[#allocation37_spill] sm:$0xff] %v15096_v57  ;;  %v1442_v59 = vrot.slane %v1440_v9, 6  ;;  %v1445_v62 = vrot.slane %v1443_v30, 7  ;;  %v1007_v18 = vadd.f32 %v1006_v56, %v14935_v1  ;;  %v1321_v4 = vmax.f32 %v1003_v45, 0.0 }
 0x152   : > { %1375 = vst.msk [vmem:[%s14999_s17 + $0x30] sm:$0xff] %vm1368_vm9, %v1320_v31  ;;  %v1323_v33 = vmax.f32 %v1005_v55, 0.0  ;;  %v1612_v34 = vor.u32 %v1611_v58, %v15096_v57 }
 0x153   : > { %v1446_v38 = vor.u32 %v1445_v62, %v1442_v59  ;;  %v1324_v14 = vmax.f32 %v1007_v18, 0.0 }
 0x154   : > { %1376 = vst.msk [vmem:[%s14999_s17 + $0x38] sm:$0xff] %vm1368_vm9, %v1323_v33  ;;  %v1617_v2 = vsel %vm18592_vm7, %v1612_v34, %v1616_v35 }
 0x155   : > { %v15109_v9 = vsel %vm14942_vm6, 0, %v1446_v38  ;;  %v15113_v30 = vsel %vm14942_vm6, %v1446_v38, 0  ;;  %v1391_v31 = vpack.c.bf16 %v1324_v14, %v1321_v4  ;;  %v1010_v55 = vpop.f32.mrb[40].mxu0  ;;  %12470 = vmatprep.mubr.msk.bf16.mxu1 %vm1728_vm8, %v1617_v2 }
 0x156   : > { %v1011_v56 = vadd.f32 %v1010_v55, %v14969_v7  ;;  %v1012_v45 = vpop.f32.mrb[41].mxu0  ;;  %v15118_v58 = vshll.u32 %v15109_v9, 16  ;;  %v15121_v59 = vshll.u32 %v15113_v30, 16  ;;  %v15126_v38 = vshrl.u32 %v15109_v9, 16 }
 0x157   : > { %v1448_v62 = vshrl.u32 %v1391_v31, 16  ;;  %v1451_v18 = vshll.u32 %v1391_v31, 16  ;;  %v1013_v33 = vadd.f32 %v1012_v45, %v14935_v1  ;;  %v1014_v34 = vpop.f32.mrb[42].mxu0 }
 0x158   : > { %18786 = vst [vmem:[#allocation38_spill] sm:$0xff] %v15118_v58  ;;  %18787 = vst [vmem:[#allocation39_spill] sm:$0xff] %v15121_v59  ;;  %v1326_v4 = vmax.f32 %v1011_v56, 0.0  ;;  %v1015_v35 = vadd.f32 %v1014_v34, %v14969_v7  ;;  %v1016_v2 = vpop.f32.mrb[43].mxu0  ;;  %v1623_v14 = vrot.slane %v15118_v58, 1  ;;  %v1628_v13 = vrot.slane %v15121_v59, 1 }
 0x159   : > { %18788 = vst [vmem:[#allocation40_spill] sm:$0xff] %v15126_v38  ;;  %v1450_v55 = vrot.slane %v1448_v62, 6  ;;  %v1453_v27 = vrot.slane %v1451_v18, 7  ;;  %v1017_v26 = vadd.f32 %v1016_v2, %v14935_v1  ;;  %v1327_v12 = vmax.f32 %v1013_v33, 0.0 }
 0x15a   : > { %1377 = vst.msk [vmem:[%s14999_s17 + $0x40] sm:$0xff] %vm1368_vm9, %v1326_v4  ;;  %v1329_v31 = vmax.f32 %v1015_v35, 0.0  ;;  %v1624_v45 = vor.u32 %v1623_v14, %v15126_v38 }
 0x15b   : > { %v1454_v56 = vor.u32 %v1453_v27, %v1450_v55  ;;  %v1330_v34 = vmax.f32 %v1017_v26, 0.0 }
 0x15c   : > { %1378 = vst.msk [vmem:[%s14999_s17 + $0x48] sm:$0xff] %vm1368_vm9, %v1329_v31  ;;  %v1629_v0 = vsel %vm18592_vm7, %v1624_v45, %v1628_v13 }
 0x15d   : > { %v15139_v62 = vsel %vm14942_vm6, 0, %v1454_v56  ;;  %v15143_v18 = vsel %vm14942_vm6, %v1454_v56, 0  ;;  %v1392_v4 = vpack.c.bf16 %v1330_v34, %v1327_v12  ;;  %v1020_v35 = vpop.f32.mrb[44].mxu0  ;;  %12471 = vmatmul.mubr.msk.bf16.gmra.mrb[36].mxu1 %vm1728_vm8, %v1629_v0 }
 0x15e   : > { %v1021_v27 = vadd.f32 %v1020_v35, %v14969_v7  ;;  %v1022_v26 = vpop.f32.mrb[45].mxu0  ;;  %v15148_v33 = vshll.u32 %v15139_v62, 16  ;;  %v15151_v13 = vshll.u32 %v15143_v18, 16  ;;  %v15156_v56 = vshrl.u32 %v15139_v62, 16 }
 0x15f   : > { %v1456_v2 = vshrl.u32 %v1392_v4, 16  ;;  %v1459_v14 = vshll.u32 %v1392_v4, 16  ;;  %v1023_v55 = vadd.f32 %v1022_v26, %v14935_v1  ;;  %v1024_v31 = vpop.f32.mrb[46].mxu0 }
 0x160   : > { %18789 = vst [vmem:[#allocation41_spill] sm:$0xff] %v15148_v33  ;;  %18790 = vst [vmem:[#allocation42_spill] sm:$0xff] %v15151_v13  ;;  %v1332_v12 = vmax.f32 %v1021_v27, 0.0  ;;  %v1025_v45 = vadd.f32 %v1024_v31, %v14969_v7  ;;  %v1026_v0 = vpop.f32.mrb[47].mxu0  ;;  %v1635_v34 = vrot.slane %v15148_v33, 1  ;;  %v1640_v53 = vrot.slane %v15151_v13, 1 }
 0x161   : > { %18791 = vst [vmem:[#allocation43_spill] sm:$0xff] %v15156_v56  ;;  %v1458_v35 = vrot.slane %v1456_v2, 6  ;;  %v1461_v61 = vrot.slane %v1459_v14, 7  ;;  %v1027_v47 = vadd.f32 %v1026_v0, %v14935_v1  ;;  %v1333_v44 = vmax.f32 %v1023_v55, 0.0 }
 0x162   : > { %1379 = vst.msk [vmem:[%s14999_s17 + $0x50] sm:$0xff] %vm1368_vm9, %v1332_v12  ;;  %v1335_v4 = vmax.f32 %v1025_v45, 0.0  ;;  %v1636_v26 = vor.u32 %v1635_v34, %v15156_v56 }
 0x163   : > { %v1462_v27 = vor.u32 %v1461_v61, %v1458_v35  ;;  %v1336_v31 = vmax.f32 %v1027_v47, 0.0 }
 0x164   : > { %1380 = vst.msk [vmem:[%s14999_s17 + $0x58] sm:$0xff] %vm1368_vm9, %v1335_v4  ;;  %v1641_v41 = vsel %vm18592_vm7, %v1636_v26, %v1640_v53 }
 0x165   : > { %v15169_v2 = vsel %vm14942_vm6, 0, %v1462_v27  ;;  %v15173_v14 = vsel %vm14942_vm6, %v1462_v27, 0  ;;  %v1393_v12 = vpack.c.bf16 %v1336_v31, %v1333_v44  ;;  %v1030_v45 = vpop.f32.mrb[48].mxu0  ;;  %12474 = vmatprep.mubr.msk.bf16.mxu1 %vm1728_vm8, %v1641_v41 }
 0x166   : > { %v1031_v61 = vadd.f32 %v1030_v45, %v14969_v7  ;;  %v1032_v47 = vpop.f32.mrb[49].mxu0  ;;  %v15178_v55 = vshll.u32 %v15169_v2, 16  ;;  %v15181_v53 = vshll.u32 %v15173_v14, 16  ;;  %v15186_v27 = vshrl.u32 %v15169_v2, 16 }
 0x167   : > { %v1464_v0 = vshrl.u32 %v1393_v12, 16  ;;  %v1467_v34 = vshll.u32 %v1393_v12, 16  ;;  %v1033_v35 = vadd.f32 %v1032_v47, %v14935_v1  ;;  %v1034_v4 = vpop.f32.mrb[50].mxu0 }
 0x168   : > { %18792 = vst [vmem:[#allocation44_spill] sm:$0xff] %v15178_v55  ;;  %18793 = vst [vmem:[#allocation45_spill] sm:$0xff] %v15181_v53  ;;  %v1338_v44 = vmax.f32 %v1031_v61, 0.0  ;;  %v1035_v26 = vadd.f32 %v1034_v4, %v14969_v7  ;;  %v1036_v41 = vpop.f32.mrb[51].mxu0  ;;  %v1647_v31 = vrot.slane %v15178_v55, 1  ;;  %v1652_v52 = vrot.slane %v15181_v53, 1 }
 0x169   : > { %18794 = vst [vmem:[#allocation46_spill] sm:$0xff] %v15186_v27  ;;  %v1466_v45 = vrot.slane %v1464_v0, 6  ;;  %v1469_v6 = vrot.slane %v1467_v34, 7  ;;  %v1037_v39 = vadd.f32 %v1036_v41, %v14935_v1  ;;  %v1339_v49 = vmax.f32 %v1033_v35, 0.0 }
 0x16a   : > { %1381 = vst.msk [vmem:[%s14999_s17 + $0x60] sm:$0xff] %vm1368_vm9, %v1338_v44  ;;  %v1341_v12 = vmax.f32 %v1035_v26, 0.0  ;;  %v1648_v47 = vor.u32 %v1647_v31, %v15186_v27 }
 0x16b   : > { %v1470_v61 = vor.u32 %v1469_v6, %v1466_v45  ;;  %v1342_v4 = vmax.f32 %v1037_v39, 0.0 }
 0x16c   : > { %1382 = vst.msk [vmem:[%s14999_s17 + $0x68] sm:$0xff] %vm1368_vm9, %v1341_v12  ;;  %v1653_v42 = vsel %vm18592_vm7, %v1648_v47, %v1652_v52 }
 0x16d   : > { %v15199_v0 = vsel %vm14942_vm6, 0, %v1470_v61  ;;  %v15203_v34 = vsel %vm14942_vm6, %v1470_v61, 0  ;;  %v1394_v44 = vpack.c.bf16 %v1342_v4, %v1339_v49  ;;  %v1040_v26 = vpop.f32.mrb[52].mxu0  ;;  %12475 = vmatmul.mubr.msk.bf16.gmra.mrb[40].mxu1 %vm1728_vm8, %v1653_v42 }
 0x16e   : > { %v1041_v6 = vadd.f32 %v1040_v26, %v14969_v7  ;;  %v1042_v39 = vpop.f32.mrb[53].mxu0  ;;  %v15208_v35 = vshll.u32 %v15199_v0, 16  ;;  %v15211_v52 = vshll.u32 %v15203_v34, 16  ;;  %v15216_v61 = vshrl.u32 %v15199_v0, 16 }
 0x16f   : > { %v1472_v41 = vshrl.u32 %v1394_v44, 16  ;;  %v1475_v31 = vshll.u32 %v1394_v44, 16  ;;  %v1043_v45 = vadd.f32 %v1042_v39, %v14935_v1  ;;  %v1044_v12 = vpop.f32.mrb[54].mxu0 }
 0x170   : > { %18795 = vst [vmem:[#allocation47_spill] sm:$0xff] %v15208_v35  ;;  %18796 = vst [vmem:[#allocation48_spill] sm:$0xff] %v15211_v52  ;;  %v1344_v49 = vmax.f32 %v1041_v6, 0.0  ;;  %v1045_v47 = vadd.f32 %v1044_v12, %v14969_v7  ;;  %v1046_v42 = vpop.f32.mrb[55].mxu0  ;;  %v1659_v4 = vrot.slane %v15208_v35, 1  ;;  %v1664_v53 = vrot.slane %v15211_v52, 1 }
 0x171   : > { %18797 = vst [vmem:[#allocation49_spill] sm:$0xff] %v15216_v61  ;;  %v1474_v26 = vrot.slane %v1472_v41, 6  ;;  %v1477_v37 = vrot.slane %v1475_v31, 7  ;;  %v1047_v36 = vadd.f32 %v1046_v42, %v14935_v1  ;;  %v1345_v55 = vmax.f32 %v1043_v45, 0.0 }
 0x172   : > { %1383 = vst.msk [vmem:[%s14999_s17 + $0x70] sm:$0xff] %vm1368_vm9, %v1344_v49  ;;  %v1347_v44 = vmax.f32 %v1045_v47, 0.0  ;;  %v1660_v39 = vor.u32 %v1659_v4, %v15216_v61 }
 0x173   : > { %v1478_v6 = vor.u32 %v1477_v37, %v1474_v26  ;;  %v1348_v7 = vmax.f32 %v1047_v36, 0.0 }
 0x174   : > { %1384 = vst.msk [vmem:[%s14999_s17 + $0x78] sm:$0xff] %vm1368_vm9, %v1347_v44  ;;  %v1665_v12 = vsel %vm18592_vm7, %v1660_v39, %v1664_v53 }
 0x175   : > { %v15229_v41 = vsel %vm14942_vm6, 0, %v1478_v6  ;;  %v15233_v31 = vsel %vm14942_vm6, %v1478_v6, 0  ;;  %v1395_v49 = vpack.c.bf16 %v1348_v7, %v1345_v55  ;;  %v1050_v47 = vpop.f32.mrb[56].mxu0  ;;  %12478 = vmatprep.mubr.msk.bf16.mxu1 %vm1728_vm8, %v1665_v12 }
 0x176   : > { %v1051_v42 = vpop.f32.mrb[57].mxu0  ;;  %v15237_v37 = vshll.u32 %v15229_v41, 16  ;;  %v15240_v36 = vshll.u32 %v15233_v31, 16  ;;  %v15244_v39 = vshrl.u32 %v15229_v41, 16 }
 0x177   : > { %v1480_v53 = vshrl.u32 %v1395_v49, 16  ;;  %v1483_v45 = vshll.u32 %v1395_v49, 16  ;;  %v1052_v4 = vadd.f32 %v1051_v42, %v14935_v1  ;;  %v1053_v26 = vpop.f32.mrb[58].mxu0 }
 0x178   : > { %18798 = vst [vmem:[#allocation50_spill] sm:$0xff] %v15237_v37  ;;  %18799 = vst [vmem:[#allocation51_spill] sm:$0xff] %v15240_v36  ;;  %v1054_v44 = vpop.f32.mrb[59].mxu0  ;;  %v1671_v55 = vrot.slane %v15237_v37, 1  ;;  %v1676_v52 = vrot.slane %v15240_v36, 1 }
 0x179   : > { %18800 = vst [vmem:[#allocation52_spill] sm:$0xff] %v15244_v39  ;;  %v1482_v6 = vrot.slane %v1480_v53, 6  ;;  %v1485_v7 = vrot.slane %v1483_v45, 7  ;;  %v1055_v12 = vadd.f32 %v1054_v44, %v14935_v1  ;;  %v1350_v61 = vmax.f32 %v1052_v4, 0.0 }
 0x17a   : > { %v1672_v47 = vor.u32 %v1671_v55, %v15244_v39 }
 0x17b   : > { %v1486_v35 = vor.u32 %v1485_v7, %v1482_v6  ;;  %v1352_v49 = vmax.f32 %v1055_v12, 0.0 }
 0x17c   : > { %v1677_v42 = vsel %vm18592_vm7, %v1672_v47, %v1676_v52  ;;  %v12434_v52 = vpop.f32.mrb[0].mxu1 }
 0x17d   : > { %v15253_v26 = vsel %vm14942_vm6, 0, %v1486_v35  ;;  %v15257_v37 = vsel %vm14942_vm6, %v1486_v35, 0  ;;  %v1396_v53 = vpack.c.bf16 %v1352_v49, %v1350_v61  ;;  %v1058_v45 = vpop.f32.mrb[60].mxu0  ;;  %12479 = vmatmul.mubr.msk.bf16.gmra.mrb[44].mxu1 %vm1728_vm8, %v1677_v42 }
 0x17e   : > { %v1059_v44 = vpop.f32.mrb[61].mxu0  ;;  %v15261_v55 = vshll.u32 %v15253_v26, 16  ;;  %v15264_v4 = vshll.u32 %v15257_v37, 16  ;;  %v15268_v35 = vshrl.u32 %v15253_v26, 16 }
 0x17f   : > { %v1488_v6 = vshrl.u32 %v1396_v53, 16  ;;  %v1491_v7 = vshll.u32 %v1396_v53, 16  ;;  %v1060_v12 = vadd.f32 %v1059_v44, %v14935_v1  ;;  %v1061_v47 = vpop.f32.mrb[62].mxu0 }
 0x180   : > { %18801 = vst [vmem:[#allocation53_spill] sm:$0xff] %v15261_v55  ;;  %18802 = vst [vmem:[#allocation54_spill] sm:$0xff] %v15264_v4  ;;  %v1062_v36 = vpop.f32.mrb[63].mxu0  ;;  %v1683_v61 = vrot.slane %v15261_v55, 1  ;;  %v1688_v27 = vrot.slane %v15264_v4, 1 }
 0x181   : > { %18803 = vst [vmem:[#allocation55_spill] sm:$0xff] %v15268_v35  ;;  %v1490_v49 = vrot.slane %v1488_v6, 6  ;;  %v1493_v42 = vrot.slane %v1491_v7, 7  ;;  %v1063_v45 = vadd.f32 %v1062_v36, %v14935_v1  ;;  %v1354_v33 = vmax.f32 %v1060_v12, 0.0  ;;  %v1173_v36 = vpop.f32.mrb[1].mxu1 }
 0x182   : > { %v1684_v39 = vor.u32 %v1683_v61, %v15268_v35  ;;  %v12435_v4 = vpop.f32.mrb[2].mxu1 }
 0x183   : > { %v1494_v13 = vor.u32 %v1493_v42, %v1490_v49  ;;  %v1356_v53 = vmax.f32 %v1063_v45, 0.0  ;;  %v1185_v40 = vadd.f32 %v12435_v4, %v14719_v10 }
 0x184   : > { %v1689_v44 = vsel %vm18592_vm7, %v1684_v39, %v1688_v27  ;;  %v1182_v27 = vadd.f32 %v12434_v52, %v14719_v10 }
 0x185   : > { %v15277_v47 = vsel %vm14942_vm6, 0, %v1494_v13  ;;  %v15281_v55 = vsel %vm14942_vm6, %v1494_v13, 0  ;;  %v1397_v6 = vpack.c.bf16 %v1356_v53, %v1354_v33  ;;  %v1066_v7 = vpop.f32.mrb[64].mxu0  ;;  %12482 = vmatprep.mubr.msk.bf16.mxu1 %vm1728_vm8, %v1689_v44 }
 0x186   : > { %v1067_v61 = vpop.f32.mrb[65].mxu0  ;;  %v15285_v49 = vshll.u32 %v15277_v47, 16  ;;  %v15288_v12 = vshll.u32 %v15281_v55, 16  ;;  %v15293_v53 = vshrl.u32 %v15277_v47, 16  ;;  %v1176_v7 = vpop.f32.mrb[3].mxu1  ;;  %v1310_v38 = vmax.f32 %v1182_v27, 0.0 }
 0x187   : > { %v1496_v39 = vshrl.u32 %v1397_v6, 16  ;;  %v1499_v42 = vshll.u32 %v1397_v6, 16  ;;  %v1068_v45 = vadd.f32 %v1067_v61, %v14935_v1  ;;  %v1069_v13 = vpop.f32.mrb[66].mxu0  ;;  %v12438_v58 = vpop.f32.mrb[4].mxu1 }
 0x188   : > { %18804 = vst [vmem:[#allocation56_spill] sm:$0xff] %v15285_v49  ;;  %18805 = vst [vmem:[#allocation57_spill] sm:$0xff] %v15288_v12  ;;  %v1070_v33 = vpop.f32.mrb[67].mxu0  ;;  %v1695_v44 = vrot.slane %v15285_v49, 1  ;;  %v1700_v6 = vrot.slane %v15288_v12, 1  ;;  %v1174_v49 = vadd.f32 %v1173_v36, %v14719_v10  ;;  %v1177_v36 = vadd.f32 %v1176_v7, %v14719_v10 }
 0x189   : > { %18806 = vst [vmem:[#allocation58_spill] sm:$0xff] %v15293_v53  ;;  %v1498_v35 = vrot.slane %v1496_v39, 6  ;;  %v1501_v56 = vrot.slane %v1499_v42, 7  ;;  %v1071_v59 = vadd.f32 %v1070_v33, %v14935_v1  ;;  %v1358_v13 = vmax.f32 %v1068_v45, 0.0 }
 0x18a   : > { %v1696_v52 = vor.u32 %v1695_v44, %v15293_v53  ;;  %v1307_v21 = vmax.f32 %v1177_v36, 0.0 }
 0x18b   : > { %v1502_v61 = vor.u32 %v1501_v56, %v1498_v35  ;;  %v1360_v43 = vmax.f32 %v1071_v59, 0.0  ;;  %v1313_v56 = vmax.f32 %v1185_v40, 0.0  ;;  %v1189_v35 = vpop.f32.mrb[5].mxu1 }
 0x18c   : > { %v1701_v57 = vsel %vm18592_vm7, %v1696_v52, %v1700_v6  ;;  %v12439_v45 = vpop.f32.mrb[6].mxu1 }
 0x18d   : > { %v15304_v39 = vsel %vm14942_vm6, 0, %v1502_v61  ;;  %v15308_v1 = vsel %vm14942_vm6, %v1502_v61, 0  ;;  %v1398_v42 = vpack.c.bf16 %v1360_v43, %v1358_v13  ;;  %12483 = vmatmul.mubr.msk.bf16.gmra.mrb[48].mxu1 %vm1728_vm8, %v1701_v57  ;;  %v1074_v59 = vpop.f32.mrb[68].mxu0  ;;  %v15318_v6 = vpack.c.bf16 %v1313_v56, %v1310_v38  ;;  %v1192_v43 = vpop.f32.mrb[7].mxu1 }
 0x18e   : > { %v15312_v4 = vshll.u32 %v15304_v39, 16  ;;  %v15315_v27 = vshll.u32 %v15308_v1, 16  ;;  %v1075_v33 = vpop.f32.mrb[69].mxu0  ;;  %v15321_v57 = vshrl.u32 %v15304_v39, 16  ;;  %v1304_v61 = vmax.f32 %v1174_v49, 0.0  ;;  %v12442_v13 = vpop.f32.mrb[8].mxu1 }
 0x18f   : > { %v1504_v44 = vshrl.u32 %v1398_v42, 16  ;;  %v1507_v52 = vshll.u32 %v1398_v42, 16  ;;  %18809 = vst [vmem:[#allocation61_spill] sm:$0xff] %v15318_v6  ;;  %v1076_v59 = vpop.f32.mrb[70].mxu0  ;;  %v1198_v38 = vadd.f32 %v12438_v58, %v14719_v10  ;;  %v1201_v56 = vadd.f32 %v12439_v45, %v14719_v10  ;;  %v1205_v36 = vpop.f32.mrb[9].mxu1 }
 0x190   : > { %18807 = vst [vmem:[#allocation59_spill] sm:$0xff] %v15312_v4  ;;  %18808 = vst [vmem:[#allocation60_spill] sm:$0xff] %v15315_v27  ;;  %v1707_v40 = vrot.slane %v15312_v4, 1  ;;  %v1077_v28 = vpop.f32.mrb[71].mxu0  ;;  %v1712_v33 = vrot.slane %v15315_v27, 1  ;;  %v15329_v50 = vpack.c.bf16 %v1307_v21, %v1304_v61  ;;  %v1190_v49 = vadd.f32 %v1189_v35, %v14719_v10 }
 0x191   : > { %18810 = vst [vmem:[#allocation62_spill] sm:$0xff] %v15321_v57  ;;  %v1506_v12 = vrot.slane %v1504_v44, 6  ;;  %v1509_v53 = vrot.slane %v1507_v52, 7  ;;  %v1322_v58 = vmax.f32 %v1198_v38, 0.0  ;;  %v1325_v45 = vmax.f32 %v1201_v56, 0.0  ;;  %v12443_v52 = vpop.f32.mrb[10].mxu1 }
 0x192   : > { %v1708_v7 = vor.u32 %v1707_v40, %v15321_v57  ;;  %18811 = vst [vmem:[#allocation63_spill] sm:$0xff] %v15329_v50  ;;  %v1206_v50 = vadd.f32 %v1205_v36, %v14719_v10  ;;  %v1217_v4 = vadd.f32 %v12443_v52, %v14719_v10 }
 0x193   : > { %v1510_v42 = vor.u32 %v1509_v53, %v1506_v12 }
 0x194   : > { %v1713_v6 = vsel %vm18592_vm7, %v1708_v7, %v1712_v33  ;;  %v1316_v7 = vmax.f32 %v1190_v49, 0.0  ;;  %v1208_v33 = vpop.f32.mrb[11].mxu1 }
 0x195   : > { %v15334_v44 = vsel %vm14942_vm6, 0, %v1510_v42  ;;  %v15338_v28 = vsel %vm14942_vm6, %v1510_v42, 0  ;;  %12486 = vmatprep.mubr.msk.bf16.mxu1 %vm1728_vm8, %v1713_v6  ;;  %v1080_v12 = vpop.f32.mrb[72].mxu0  ;;  %v1193_v6 = vadd.f32 %v1192_v43, %v14719_v10  ;;  %v15352_v42 = vpack.c.bf16 %v1325_v45, %v1322_v58  ;;  %v12446_v48 = vpop.f32.mrb[12].mxu1 }
 0x196   : > { %v15342_v53 = vshll.u32 %v15334_v44, 16  ;;  %v15345_v21 = vshll.u32 %v15338_v28, 16  ;;  %v1081_v35 = vpop.f32.mrb[73].mxu0  ;;  %v15348_v61 = vshrl.u32 %v15334_v44, 16  ;;  %v1214_v12 = vadd.f32 %v12442_v13, %v14719_v10  ;;  %v1221_v45 = vpop.f32.mrb[13].mxu1 }
 0x197   : > { %v1082_v40 = vpop.f32.mrb[74].mxu0  ;;  %18812 = vst [vmem:[#allocation64_spill] sm:$0xff] %v15352_v42  ;;  %v1337_v58 = vmax.f32 %v1217_v4, 0.0  ;;  %v1230_v36 = vadd.f32 %v12446_v48, %v14719_v10  ;;  %v12447_v52 = vpop.f32.mrb[14].mxu1 }
 0x198   : > { %v1719_v59 = vrot.slane %v15342_v53, 1  ;;  %v1083_v38 = vpop.f32.mrb[75].mxu0  ;;  %v1724_v56 = vrot.slane %v15345_v21, 1  ;;  %v1319_v40 = vmax.f32 %v1193_v6, 0.0  ;;  %v1334_v27 = vmax.f32 %v1214_v12, 0.0 }
 0x199   : > { %v1209_v6 = vadd.f32 %v1208_v33, %v14719_v10  ;;  %v1222_v38 = vadd.f32 %v1221_v45, %v14719_v10  ;;  %v2212_v45 = vsel %vm18603_vm4, %v15013_v63, 0 }
 0x19a   : > { %v1720_v35 = vor.u32 %v1719_v59, %v15348_v61  ;;  %v15360_v43 = vpack.c.bf16 %v1319_v40, %v1316_v7  ;;  %v1328_v59 = vmax.f32 %v1206_v50, 0.0  ;;  %v1233_v7 = vadd.f32 %v12447_v52, %v14719_v10 }
 0x19b   : > { %v1331_v40 = vmax.f32 %v1209_v6, 0.0  ;;  %v15382_v6 = vld [vmem:[%s18776_s3 + $0xc] sm:$0x7] }
 0x19c   : > { %v1725_v49 = vsel %vm18592_vm7, %v1720_v35, %v1724_v56  ;;  %18813 = vst [vmem:[#allocation65_spill] sm:$0xff] %v15360_v43  ;;  %v15368_v35 = vpack.c.bf16 %v1337_v58, %v1334_v27  ;;  %v1224_v56 = vpop.f32.mrb[15].mxu1  ;;  %v1349_v33 = vmax.f32 %v1233_v7, 0.0 }
 0x19d   : > { %12487 = vmatmul.mubr.msk.bf16.gmra.mrb[52].mxu1 %vm1728_vm8, %v1725_v49  ;;  %v1086_v13 = vpop.f32.mrb[76].mxu0  ;;  %v1346_v49 = vmax.f32 %v1230_v36, 0.0  ;;  %v1225_v42 = vadd.f32 %v1224_v56, %v14719_v10  ;;  %v12450_v50 = vpop.f32.mrb[16].mxu1  ;;  %v15372_v57 = vpack.c.bf16 %v1331_v40, %v1328_v59 }
 0x19e   : > { %12492 = vmatprep.mubr.msk.bf16.mxu1 %vm1728_vm8, %v14948_v19  ;;  %v1087_v12 = vpop.f32.mrb[77].mxu0  ;;  %18814 = vst [vmem:[#allocation66_spill] sm:$0xff] %v15368_v35  ;;  %v1340_v13 = vmax.f32 %v1222_v38, 0.0  ;;  %v1246_v58 = vadd.f32 %v12450_v50, %v14719_v10 }
 0x19f   : > { %v1088_v4 = vpop.f32.mrb[78].mxu0  ;;  %18815 = vst [vmem:[#allocation67_spill] sm:$0xff] %v15372_v57  ;;  %v1343_v48 = vmax.f32 %v1225_v42, 0.0  ;;  %v15376_v27 = vpack.c.bf16 %v1349_v33, %v1346_v49  ;;  %v18826_v57 = vld [vmem:[#allocation32_spill] sm:$0xff] }
 0x1a0   : > { %v1089_v43 = vpop.f32.mrb[79].mxu0  ;;  %v1355_v59 = vmax.f32 %v1246_v58, 0.0 }
 0x1a1   : > { %18816 = vst [vmem:[#allocation68_spill] sm:$0xff] %v15376_v27  ;;  %v15384_v36 = vpack.c.bf16 %v1343_v48, %v1340_v13  ;;  %v1237_v43 = vpop.f32.mrb[17].mxu1 }
 0x1a2   : > { %v1238_v63 = vadd.f32 %v1237_v43, %v14719_v10  ;;  %v12451_v42 = vpop.f32.mrb[18].mxu1 }
 0x1a3   : > { %18817 = vst [vmem:[#allocation69_spill] sm:$0xff] %v15384_v36  ;;  %v1249_v38 = vadd.f32 %v12451_v42, %v14719_v10  ;;  %v1240_v52 = vpop.f32.mrb[19].mxu1 }
 0x1a4   : > { %v12454_v12 = vpop.f32.mrb[20].mxu1  ;;  %v1351_v7 = vmax.f32 %v1238_v63, 0.0  ;;  %v1241_v4 = vadd.f32 %v1240_v52, %v14719_v10 }
 0x1a5   : > { %12493 = vmatmul.mubr.msk.bf16.vlgmr.msra.gmra.mrb[28].mxu1 %vm1728_vm8, %v14978_v24  ;;  %v1357_v56 = vmax.f32 %v1249_v38, 0.0  ;;  %v1262_v13 = vadd.f32 %v12454_v12, %v14719_v10  ;;  %v1253_v33 = vpop.f32.mrb[21].mxu1 }
 0x1a6   : > { %12521 = vmatpush3.bf16.msra.mxu1 %v2212_v45  ;;  %12496 = vmatprep.mubr.msk.bf16.mxu1 %vm1728_vm8, %v15017_v11  ;;  %v1353_v49 = vmax.f32 %v1241_v4, 0.0  ;;  %v1254_v48 = vadd.f32 %v1253_v33, %v14719_v10  ;;  %v12455_v45 = vpop.f32.mrb[22].mxu1 }
 0x1a7   : > { %14285 = vmatprep.subr.msk.bf16.mxu1 %vm18603_vm4, %v15382_v6  ;;  %v15395_v40 = vpack.c.bf16 %v1357_v56, %v1355_v59  ;;  %v1362_v58 = vmax.f32 %v1262_v13, 0.0  ;;  %v1265_v43 = vadd.f32 %v12455_v45, %v14719_v10  ;;  %v1256_v63 = vpop.f32.mrb[23].mxu1 }
 0x1a8   : > { %v15400_v50 = vpack.c.bf16 %v1353_v49, %v1351_v7  ;;  %v1359_v42 = vmax.f32 %v1254_v48, 0.0  ;;  %v1257_v59 = vadd.f32 %v1256_v63, %v14719_v10  ;;  %v12458_v38 = vpop.f32.mrb[24].mxu1  ;;  %v2505_v7 = vrot.slane %v15348_v61, 1 }
 0x1a9   : > { %18818 = vst [vmem:[#allocation70_spill] sm:$0xff] %v15395_v40  ;;  %v1363_v52 = vmax.f32 %v1265_v43, 0.0  ;;  %v1278_v4 = vadd.f32 %v12458_v38, %v14719_v10  ;;  %v2506_v49 = vrot.slane %v15342_v53, 2  ;;  %v1269_v13 = vpop.f32.mrb[25].mxu1  ;;  %v2407_v40 = vrot.slane %v15026_v22, 2 }
 0x1aa   : > { %18819 = vst [vmem:[#allocation71_spill] sm:$0xff] %v15400_v50  ;;  %v1361_v12 = vmax.f32 %v1257_v59, 0.0  ;;  %v1270_v45 = vadd.f32 %v1269_v13, %v14719_v10  ;;  %v12459_v43 = vpop.f32.mrb[26].mxu1  ;;  %v18568_v13 = vshrl.u32 %v15338_v28, 16 }
 0x1ab   : > { %v15408_v56 = vpack.c.bf16 %v1363_v52, %v1362_v58  ;;  %v15416_v48 = vor.u32 %v2506_v49, %v2505_v7  ;;  %v1366_v58 = vmax.f32 %v1278_v4, 0.0  ;;  %v1281_v63 = vadd.f32 %v12459_v43, %v14719_v10  ;;  %v1272_v59 = vpop.f32.mrb[27].mxu1 }
 0x1ac   : > { %v15412_v33 = vpack.c.bf16 %v1361_v12, %v1359_v42  ;;  %v1364_v38 = vmax.f32 %v1270_v45, 0.0  ;;  %v1273_v42 = vadd.f32 %v1272_v59, %v14719_v10  ;;  %v2125_v7 = vrot.slane %v14948_v19, 1 }
 0x1ad   : > { %12497 = vmatmul.mubr.msk.bf16.gmra.mrb[32].mxu1 %vm1728_vm8, %v15049_v15  ;;  %18820 = vst [vmem:[#allocation72_spill] sm:$0xff] %v15408_v56  ;;  %v1367_v52 = vmax.f32 %v1281_v63, 0.0  ;;  %v2126_v4 = vrot.slane %v14952_v23, 1  ;;  %v2128_v45 = vrot.slane %v14978_v24, 1  ;;  %v2129_v43 = vrot.slane %v14982_v8, 1 }
 0x1ae   : > { %12500 = vmatprep.mubr.msk.bf16.mxu1 %vm1728_vm8, %v15079_v20  ;;  %18821 = vst [vmem:[#allocation73_spill] sm:$0xff] %v15412_v33  ;;  %v1365_v12 = vmax.f32 %v1273_v42, 0.0  ;;  %v3090_v63 = vrot.slane %v15342_v53, 3  ;;  %v2131_v59 = vrot.slane %v15017_v11, 1  ;;  %v3092_v42 = vrot.slane %v18568_v13, 2 }
 0x1af   : > { %v15423_v56 = vpack.c.bf16 %v1367_v52, %v1366_v58  ;;  %v2127_v49 = vsel %vm18591_vm3, %v2125_v7, %v2126_v4  ;;  %v3089_v58 = vrot.slane %v15348_v61, 2  ;;  %v3093_v52 = vrot.slane %v15345_v21, 3  ;;  %v15461_v53 = vld [vmem:[%s18776_s3 + $0x10] sm:$0x7] }
 0x1b0   : > { %v15425_v33 = vpack.c.bf16 %v1365_v12, %v1364_v38  ;;  %v2132_v38 = vrot.slane %v15021_v17, 1  ;;  %v2559_v7 = vsel %vm18603_vm4, %v15382_v6, 0  ;;  %v2134_v6 = vrot.slane %v15049_v15, 1 }
 0x1b1   : > { %18822 = vst [vmem:[#allocation74_spill] sm:$0xff] %v15423_v56  ;;  %v3091_v12 = vor.u32 %v3090_v63, %v3089_v58  ;;  %v3094_v4 = vor.u32 %v3093_v52, %v3092_v42  ;;  %v2138_v58 = vrot.slane %v15083_v5, 1  ;;  %v2141_v42 = vrot.slane %v15113_v30, 1 }
 0x1b2   : > { %18823 = vst [vmem:[#allocation75_spill] sm:$0xff] %v15425_v33  ;;  %v2133_v61 = vsel %vm18591_vm3, %v2131_v59, %v2132_v38  ;;  %v2140_v38 = vrot.slane %v15109_v9, 1  ;;  %v2143_v52 = vrot.slane %v15139_v62, 1  ;;  %v2406_v56 = vrot.slane %v15036_v46, 1 }
 0x1b3   : > { %v15466_v13 = vsel %vm18588_vm10, %v3091_v12, %v3094_v4  ;;  %v2144_v12 = vrot.slane %v15143_v18, 1 }
 0x1b4   : > { %18824 = vst [vmem:[#allocation76_spill] sm:$0xff] %v15466_v13  ;;  %v2408_v27 = vor.u32 %v2407_v40, %v2406_v56  ;;  %v15549_v40 = vld [vmem:[%s18776_s3 + $0x14] sm:$0x7] }
 0x1b5   : > { %12501 = vmatmul.mubr.msk.bf16.gmra.mrb[36].mxu1 %vm1728_vm8, %v15109_v9  ;;  %v2145_v4 = vsel %vm18591_vm3, %v2143_v52, %v2144_v12  ;;  %v18828_v56 = vld [vmem:[#allocation37_spill] sm:$0xff] }
 0x1b6   : > { %12504 = vmatprep.mubr.msk.bf16.mxu1 %vm1728_vm8, %v15139_v62 }
 0x1bd   : > { %12505 = vmatmul.mubr.msk.bf16.gmra.mrb[40].mxu1 %vm1728_vm8, %v15169_v2 }
 0x1be   : > { %12508 = vmatprep.mubr.msk.bf16.mxu1 %vm1728_vm8, %v15199_v0 }
 0x1c5   : > { %12509 = vmatmul.mubr.msk.bf16.gmra.mrb[44].mxu1 %vm1728_vm8, %v15229_v41 }
 0x1c6   : > { %12512 = vmatprep.mubr.msk.bf16.mxu1 %vm1728_vm8, %v15253_v26 }
 0x1cd   : > { %12513 = vmatmul.mubr.msk.bf16.gmra.mrb[48].mxu1 %vm1728_vm8, %v15277_v47 }
 0x1ce   : > { %12516 = vmatprep.mubr.msk.bf16.mxu1 %vm1728_vm8, %v15304_v39 }
 0x1d5   : > { %12517 = vmatmul.mubr.msk.bf16.gmra.mrb[52].mxu1 %vm1728_vm8, %v15334_v44 }
 0x1d6   : > { %12522 = vmatprep.mubr.msk.bf16.mxu1 %vm1728_vm8, %v2127_v49  ;;  %v2130_v49 = vsel %vm18591_vm3, %v2128_v45, %v2129_v43  ;;  %v2135_v45 = vrot.slane %v15053_v3, 1  ;;  %v2137_v43 = vrot.slane %v15079_v20, 1 }
 0x1d8   : > { %v2136_v63 = vsel %vm18591_vm3, %v2134_v6, %v2135_v45  ;;  %v2139_v59 = vsel %vm18591_vm3, %v2137_v43, %v2138_v58  ;;  %v2149_v6 = vrot.slane %v15199_v0, 1  ;;  %v2150_v45 = vrot.slane %v15203_v34, 1 }
 0x1da   : > { %v2151_v58 = vsel %vm18591_vm3, %v2149_v6, %v2150_v45  ;;  %v18569_v6 = vshrl.u32 %v14952_v23, 16 }
 0x1dd   : > { %12523 = vmatmul.mubr.msk.bf16.vlgmr.msra.gmra.mrb[28].mxu1 %vm1728_vm8, %v2130_v49  ;;  %v2146_v49 = vrot.slane %v15169_v2, 1 }
 0x1de   : > { %12551 = vmatpush3.bf16.msra.mxu1 %v2559_v7  ;;  %12526 = vmatprep.mubr.msk.bf16.mxu1 %vm1728_vm8, %v2133_v61  ;;  %v2142_v7 = vsel %vm18591_vm3, %v2140_v38, %v2141_v42  ;;  %v2147_v61 = vrot.slane %v15173_v14, 1  ;;  %v2155_v38 = vrot.slane %v15253_v26, 1  ;;  %v2156_v42 = vrot.slane %v15257_v37, 1 }
 0x1df   : > { %14286 = vmatprep.subr.msk.bf16.mxu1 %vm18603_vm4, %v15461_v53 }
 0x1e0   : > { %v2148_v43 = vsel %vm18591_vm3, %v2146_v49, %v2147_v61  ;;  %v2157_v12 = vsel %vm18591_vm3, %v2155_v38, %v2156_v42  ;;  %v2161_v49 = vrot.slane %v15304_v39, 1  ;;  %v2162_v61 = vrot.slane %v15308_v1, 1 }
 0x1e1   : > { %v2394_v38 = vrot.slane %v14959_v54, 2  ;;  %v18570_v42 = vshrl.u32 %v14982_v8, 16 }
 0x1e5   : > { %12527 = vmatmul.mubr.msk.bf16.gmra.mrb[32].mxu1 %vm1728_vm8, %v2136_v63  ;;  %v2152_v63 = vrot.slane %v15229_v41, 1 }
 0x1e6   : > { %12530 = vmatprep.mubr.msk.bf16.mxu1 %vm1728_vm8, %v2139_v59  ;;  %v2153_v59 = vrot.slane %v15233_v31, 1 }
 0x1e8   : > { %v2154_v52 = vsel %vm18591_vm3, %v2152_v63, %v2153_v59  ;;  %v2389_v63 = vrot.slane %v14956_v51, 2  ;;  %v2393_v59 = vrot.slane %v18569_v6, 1  ;;  %v2402_v6 = vrot.slane %v18570_v42, 1 }
 0x1ed   : > { %12531 = vmatmul.mubr.msk.bf16.gmra.mrb[36].mxu1 %vm1728_vm8, %v2142_v7  ;;  %v2158_v7 = vrot.slane %v15277_v47, 1 }
 0x1ee   : > { %12534 = vmatprep.mubr.msk.bf16.mxu1 %vm1728_vm8, %v2145_v4  ;;  %v2159_v4 = vrot.slane %v15281_v55, 1 }
 0x1f0   : > { %v2160_v45 = vsel %vm18591_vm3, %v2158_v7, %v2159_v4  ;;  %v18571_v7 = vshrl.u32 %v15021_v17, 16 }
 0x1f5   : > { %12535 = vmatmul.mubr.msk.bf16.gmra.mrb[40].mxu1 %vm1728_vm8, %v2148_v43  ;;  %v2388_v43 = vrot.slane %v14963_v60, 1 }
 0x1f6   : > { %12538 = vmatprep.mubr.msk.bf16.mxu1 %vm1728_vm8, %v2151_v58  ;;  %v2163_v58 = vsel %vm18591_vm3, %v2161_v49, %v2162_v61  ;;  %v2397_v49 = vrot.slane %v14995_v16, 1  ;;  %v2398_v61 = vrot.slane %v14986_v29, 2 }
 0x1f7   : > { %v2390_v4 = vor.u32 %v2389_v63, %v2388_v43  ;;  %v2411_v43 = vrot.slane %v18571_v7, 1  ;;  %v2412_v63 = vrot.slane %v15029_v25, 2  ;;  %v2416_v7 = vrot.slane %v18826_v57, 2 }
 0x1f8   : > { %v2399_v42 = vor.u32 %v2398_v61, %v2397_v49  ;;  %v2424_v49 = vrot.slane %v18828_v56, 1  ;;  %v18829_v61 = vld [vmem:[#allocation35_spill] sm:$0xff]  ;;  %v18832_v56 = vld [vmem:[#allocation38_spill] sm:$0xff] }
 0x1f9   : > { %v2413_v36 = vor.u32 %v2412_v63, %v2411_v43  ;;  %v18830_v63 = vld [vmem:[#allocation36_spill] sm:$0xff] }
 0x1fd   : > { %12539 = vmatmul.mubr.msk.bf16.gmra.mrb[44].mxu1 %vm1728_vm8, %v2154_v52  ;;  %v2164_v52 = vrot.slane %v15334_v44, 1 }
 0x1fe   : > { %12542 = vmatprep.mubr.msk.bf16.mxu1 %vm1728_vm8, %v2157_v12  ;;  %v2165_v12 = vrot.slane %v15338_v28, 1 }
 0x200   : > { %v2166_v33 = vsel %vm18591_vm3, %v2164_v52, %v2165_v12  ;;  %v18575_v52 = vshrl.u32 %v15083_v5, 16  ;;  %v18825_v12 = vld [vmem:[#allocation34_spill] sm:$0xff] }
 0x201   : > { %v2415_v35 = vrot.slane %v18825_v12, 1 }
 0x202   : > { %v2429_v43 = vrot.slane %v18575_v52, 1 }
 0x205   : > { %12543 = vmatmul.mubr.msk.bf16.gmra.mrb[48].mxu1 %vm1728_vm8, %v2160_v45  ;;  %v2395_v45 = vor.u32 %v2394_v38, %v2393_v59  ;;  %v18574_v38 = vshrl.u32 %v15053_v3, 16 }
 0x206   : > { %12546 = vmatprep.mubr.msk.bf16.mxu1 %vm1728_vm8, %v2163_v58  ;;  %v2403_v58 = vrot.slane %v14989_v32, 2 }
 0x207   : > { %v2396_v59 = vsel %vm18590_vm11, %v2390_v4, %v2395_v45  ;;  %v2420_v10 = vrot.slane %v18574_v38, 1  ;;  %v2822_v4 = vsel %vm18603_vm4, %v15461_v53, 0  ;;  %v2430_v53 = vrot.slane %v18830_v63, 2 }
 0x208   : > { %v2404_v50 = vor.u32 %v2403_v58, %v2402_v6  ;;  %v2414_v6 = vsel %vm18590_vm11, %v2408_v27, %v2413_v36  ;;  %v2425_v58 = vrot.slane %v18829_v61, 2  ;;  %v2417_v27 = vor.u32 %v2416_v7, %v2415_v35  ;;  %v18831_v61 = vld [vmem:[#allocation40_spill] sm:$0xff]  ;;  %v18833_v35 = vld [vmem:[#allocation39_spill] sm:$0xff] }
 0x209   : > { %v2433_v52 = vrot.slane %v18831_v61, 1  ;;  %v2434_v63 = vrot.slane %v18832_v56, 2  ;;  %v18837_v56 = vld [vmem:[#allocation46_spill] sm:$0xff]  ;;  %v18838_v61 = vld [vmem:[#allocation44_spill] sm:$0xff] }
 0x20a   : > { %v2405_v45 = vsel %vm18590_vm11, %v2399_v42, %v2404_v50  ;;  %v18576_v50 = vshrl.u32 %v15113_v30, 16  ;;  %v18577_v42 = vshrl.u32 %v15143_v18, 16 }
 0x20c   : > { %v2447_v57 = vrot.slane %v18577_v42, 1  ;;  %v2451_v42 = vrot.slane %v18837_v56, 1 }
 0x20d   : > { %12547 = vmatmul.mubr.msk.bf16.gmra.mrb[52].mxu1 %vm1728_vm8, %v2166_v33  ;;  %v18827_v33 = vld [vmem:[#allocation33_spill] sm:$0xff] }
 0x20e   : > { %12552 = vmatprep.mubr.msk.bf16.mxu1 %vm1728_vm8, %v2396_v59  ;;  %v2421_v13 = vrot.slane %v18827_v33, 2  ;;  %v2426_v59 = vor.u32 %v2425_v58, %v2424_v49  ;;  %v18836_v49 = vld [vmem:[#allocation42_spill] sm:$0xff] }
 0x20f   : > { %v2448_v58 = vrot.slane %v18836_v49, 2 }
 0x210   : > { %v2422_v36 = vor.u32 %v2421_v13, %v2420_v10  ;;  %v2439_v10 = vrot.slane %v18833_v35, 2  ;;  %v18834_v13 = vld [vmem:[#allocation43_spill] sm:$0xff]  ;;  %v18578_v35 = vshrl.u32 %v15173_v14, 16 }
 0x211   : > { %v2442_v7 = vrot.slane %v18834_v13, 1  ;;  %v18579_v13 = vshrl.u32 %v15203_v34, 16 }
 0x212   : > { %v2423_v38 = vsel %vm18590_vm11, %v2417_v27, %v2422_v36 }
 0x215   : > { %12553 = vmatmul.mubr.msk.bf16.vlgmr.msra.gmra.mrb[28].mxu1 %vm1728_vm8, %v2405_v45  ;;  %v2431_v45 = vor.u32 %v2430_v53, %v2429_v43  ;;  %v2435_v53 = vor.u32 %v2434_v63, %v2433_v52  ;;  %v18841_v63 = vld [vmem:[#allocation47_spill] sm:$0xff] }
 0x216   : > { %12581 = vmatpush3.bf16.msra.mxu1 %v2822_v4  ;;  %12556 = vmatprep.mubr.msk.bf16.mxu1 %vm1728_vm8, %v2414_v6  ;;  %v2438_v4 = vrot.slane %v18576_v50, 1  ;;  %v18835_v6 = vld [vmem:[#allocation41_spill] sm:$0xff]  ;;  %v2449_v50 = vor.u32 %v2448_v58, %v2447_v57 }
 0x217   : > { %14287 = vmatprep.subr.msk.bf16.mxu1 %vm18603_vm4, %v15549_v40  ;;  %v2443_v33 = vrot.slane %v18835_v6, 2  ;;  %v2432_v43 = vsel %vm18590_vm11, %v2426_v59, %v2431_v45  ;;  %v2456_v59 = vrot.slane %v18578_v35, 1  ;;  %v18839_v45 = vld [vmem:[#allocation45_spill] sm:$0xff]  ;;  %v18581_v35 = vshrl.u32 %v15257_v37, 16 }
 0x218   : > { %v2440_v27 = vor.u32 %v2439_v10, %v2438_v4  ;;  %v2457_v52 = vrot.slane %v18839_v45, 2  ;;  %v18840_v57 = vld [vmem:[#allocation49_spill] sm:$0xff]  ;;  %v2461_v4 = vrot.slane %v18841_v63, 2  ;;  %v2465_v10 = vrot.slane %v18579_v13, 1  ;;  %v18845_v13 = vld [vmem:[#allocation51_spill] sm:$0xff] }
 0x219   : > { %v2444_v36 = vor.u32 %v2443_v33, %v2442_v7  ;;  %v2460_v33 = vrot.slane %v18840_v57, 1  ;;  %v18842_v7 = vld [vmem:[#allocation48_spill] sm:$0xff]  ;;  %v18844_v57 = vld [vmem:[#allocation50_spill] sm:$0xff]  ;;  %v2475_v56 = vrot.slane %v18845_v13, 2 }
 0x21a   : > { %v2441_v6 = vsel %vm18590_vm11, %v2435_v53, %v2440_v27  ;;  %v2466_v58 = vrot.slane %v18842_v7, 2  ;;  %v2458_v53 = vor.u32 %v2457_v52, %v2456_v59  ;;  %v2483_v52 = vrot.slane %v18581_v35, 1 }
 0x21b   : > { %v2450_v49 = vsel %vm18590_vm11, %v2444_v36, %v2449_v50  ;;  %v18580_v50 = vshrl.u32 %v15233_v31, 16  ;;  %v2462_v27 = vor.u32 %v2461_v4, %v2460_v33  ;;  %v18848_v33 = vld [vmem:[#allocation54_spill] sm:$0xff] }
 0x21c   : > { %v2467_v36 = vor.u32 %v2466_v58, %v2465_v10  ;;  %v2484_v4 = vrot.slane %v18848_v33, 2  ;;  %v18851_v33 = vld [vmem:[#allocation57_spill] sm:$0xff] }
 0x21d   : > { %12557 = vmatmul.mubr.msk.bf16.gmra.mrb[32].mxu1 %vm1728_vm8, %v2423_v38  ;;  %v2452_v38 = vrot.slane %v18838_v61, 2  ;;  %v2470_v61 = vrot.slane %v18844_v57, 2  ;;  %v2474_v63 = vrot.slane %v18580_v50, 1  ;;  %v18582_v50 = vshrl.u32 %v15281_v55, 16 }
 0x21e   : > { %12560 = vmatprep.mubr.msk.bf16.mxu1 %vm1728_vm8, %v2432_v43  ;;  %v2493_v57 = vrot.slane %v18851_v33, 2 }
 0x21f   : > { %v2453_v43 = vor.u32 %v2452_v38, %v2451_v42  ;;  %v2468_v42 = vsel %vm18590_vm11, %v2462_v27, %v2467_v36  ;;  %v18847_v38 = vld [vmem:[#allocation53_spill] sm:$0xff]  ;;  %v2476_v58 = vor.u32 %v2475_v56, %v2474_v63  ;;  %v18849_v27 = vld [vmem:[#allocation58_spill] sm:$0xff]  ;;  %v2492_v35 = vrot.slane %v18582_v50, 1  ;;  %v18853_v56 = vld [vmem:[#allocation59_spill] sm:$0xff] }
 0x220   : > { %v2479_v59 = vrot.slane %v18847_v38, 2  ;;  %v2487_v36 = vrot.slane %v18849_v27, 1  ;;  %v18850_v38 = vld [vmem:[#allocation56_spill] sm:$0xff] }
 0x221   : > { %v2459_v7 = vsel %vm18590_vm11, %v2453_v43, %v2458_v53  ;;  %v2485_v53 = vor.u32 %v2484_v4, %v2483_v52  ;;  %v2488_v13 = vrot.slane %v18850_v38, 2 }
 0x223   : > { %v2489_v4 = vor.u32 %v2488_v13, %v2487_v36  ;;  %v2742_v36 = vrot.slane %v15021_v17, 2 }
 0x225   : > { %12561 = vmatmul.mubr.msk.bf16.gmra.mrb[36].mxu1 %vm1728_vm8, %v2441_v6  ;;  %v18843_v6 = vld [vmem:[#allocation52_spill] sm:$0xff] }
 0x226   : > { %12564 = vmatprep.mubr.msk.bf16.mxu1 %vm1728_vm8, %v2450_v49  ;;  %v2469_v45 = vrot.slane %v18843_v6, 1  ;;  %v18846_v49 = vld [vmem:[#allocation55_spill] sm:$0xff] }
 0x227   : > { %v2478_v12 = vrot.slane %v18846_v49, 1  ;;  %v18583_v49 = vshrl.u32 %v15308_v1, 16 }
 0x228   : > { %v2471_v10 = vor.u32 %v2470_v61, %v2469_v45  ;;  %v2497_v45 = vrot.slane %v18853_v56, 2 }
 0x229   : > { %v2480_v43 = vor.u32 %v2479_v59, %v2478_v12  ;;  %v2501_v63 = vrot.slane %v18583_v49, 1  ;;  %v18854_v59 = vld [vmem:[#allocation60_spill] sm:$0xff] }
 0x22a   : > { %v2502_v52 = vrot.slane %v18854_v59, 2 }
 0x22b   : > { %v2486_v12 = vsel %vm18590_vm11, %v2480_v43, %v2485_v53  ;;  %v2511_v43 = vrot.slane %v15345_v21, 2  ;;  %v2738_v21 = vrot.slane %v14978_v24, 2 }
 0x22c   : > { %v2503_v50 = vor.u32 %v2502_v52, %v2501_v63  ;;  %v2747_v63 = vrot.slane %v15079_v20, 2  ;;  %v2748_v52 = vrot.slane %v15083_v5, 2 }
 0x22d   : > { %12565 = vmatmul.mubr.msk.bf16.gmra.mrb[40].mxu1 %vm1728_vm8, %v2459_v7  ;;  %v2477_v7 = vsel %vm18590_vm11, %v2471_v10, %v2476_v58  ;;  %v2494_v10 = vor.u32 %v2493_v57, %v2492_v35  ;;  %v2736_v35 = vrot.slane %v14952_v23, 2 }
 0x22e   : > { %12568 = vmatprep.mubr.msk.bf16.mxu1 %vm1728_vm8, %v2468_v42  ;;  %v18852_v42 = vld [vmem:[#allocation62_spill] sm:$0xff] }
 0x22f   : > { %v2496_v61 = vrot.slane %v18852_v42, 1  ;;  %v2495_v33 = vsel %vm18590_vm11, %v2489_v4, %v2494_v10  ;;  %v18855_v42 = vshrl.u32 %v15338_v28, 16  ;;  %v2749_v10 = vsel %vm18589_vm12, %v2747_v63, %v2748_v52  ;;  %v11466_v52 = vld [vmem:[%s18467_s5 + $0x4] sm:$0x7] }
 0x230   : > { %14289 = vmatprep.subr.msk.bf16.mxu0 %vm18603_vm4, %v11466_v52 }
 0x231   : > { %v2498_v58 = vor.u32 %v2497_v45, %v2496_v61  ;;  %v2744_v45 = vrot.slane %v15049_v15, 2 }
 0x233   : > { %v2504_v53 = vsel %vm18590_vm11, %v2498_v58, %v2503_v50  ;;  %v2739_v50 = vrot.slane %v14982_v8, 2  ;;  %v2750_v58 = vrot.slane %v15109_v9, 2 }
 0x235   : > { %12569 = vmatmul.mubr.msk.bf16.gmra.mrb[44].mxu1 %vm1728_vm8, %v2477_v7  ;;  %v2510_v7 = vrot.slane %v18855_v42, 1  ;;  %v3141_v42 = vsel %vm18603_vm4, %v15549_v40, 0  ;;  %v2740_v61 = vsel %vm18589_vm12, %v2738_v21, %v2739_v50  ;;  %v2745_v40 = vrot.slane %v15053_v3, 2 }
 0x236   : > { %12572 = vmatprep.mubr.msk.bf16.mxu1 %vm1728_vm8, %v2486_v12  ;;  %v2735_v12 = vrot.slane %v14948_v19, 2  ;;  %v2759_v21 = vrot.slane %v15199_v0, 2  ;;  %v2760_v50 = vrot.slane %v15203_v34, 2 }
 0x237   : > { %v2512_v49 = vor.u32 %v2511_v43, %v2510_v7  ;;  %v2746_v4 = vsel %vm18589_vm12, %v2744_v45, %v2745_v40  ;;  %v2751_v7 = vrot.slane %v15113_v30, 2  ;;  %v2753_v43 = vrot.slane %v15139_v62, 2 }
 0x238   : > { %v2737_v57 = vsel %vm18589_vm12, %v2735_v12, %v2736_v35  ;;  %v2766_v45 = vrot.slane %v15257_v37, 2 }
 0x239   : > { %v2513_v13 = vsel %vm18590_vm11, %v15416_v48, %v2512_v49  ;;  %v15648_v48 = vld [vmem:[%s18776_s3 + $0x18] sm:$0x7]  ;;  %v2752_v12 = vsel %vm18589_vm12, %v2750_v58, %v2751_v7  ;;  %v2769_v58 = vrot.slane %v15281_v55, 2  ;;  %v2771_v7 = vrot.slane %v15304_v39, 2 }
 0x23d   : > { %12573 = vmatmul.mubr.msk.bf16.gmra.mrb[48].mxu1 %vm1728_vm8, %v2495_v33  ;;  %v2741_v33 = vrot.slane %v15017_v11, 2 }
 0x23e   : > { %12576 = vmatprep.mubr.msk.bf16.mxu1 %vm1728_vm8, %v2504_v53  ;;  %v2754_v53 = vrot.slane %v15143_v18, 2 }
 0x23f   : > { %v2743_v49 = vsel %vm18589_vm12, %v2741_v33, %v2742_v36  ;;  %v2761_v36 = vsel %vm18589_vm12, %v2759_v21, %v2760_v50  ;;  %v3002_v50 = vrot.slane %v14959_v54, 3  ;;  %v3012_v54 = vrot.slane %v15036_v46, 2  ;;  %v18859_v46 = vld [vmem:[#allocation34_spill] sm:$0xff] }
 0x240   : > { %v2755_v35 = vsel %vm18589_vm12, %v2753_v43, %v2754_v53  ;;  %v2772_v43 = vrot.slane %v15308_v1, 2 }
 0x245   : > { %12577 = vmatmul.mubr.msk.bf16.gmra.mrb[52].mxu1 %vm1728_vm8, %v2513_v13  ;;  %v2756_v13 = vrot.slane %v15169_v2, 2 }
 0x246   : > { %12582 = vmatprep.mubr.msk.bf16.mxu1 %vm1728_vm8, %v2737_v57  ;;  %v2757_v57 = vrot.slane %v15173_v14, 2 }
 0x248   : > { %v2758_v33 = vsel %vm18589_vm12, %v2756_v13, %v2757_v57  ;;  %v2999_v13 = vrot.slane %v14956_v51, 3  ;;  %v18856_v57 = vshrl.u32 %v14952_v23, 16  ;;  %v18857_v51 = vshrl.u32 %v14982_v8, 16 }
 0x24a   : > { %v3001_v21 = vrot.slane %v18856_v57, 2  ;;  %v18861_v57 = vshrl.u32 %v15053_v3, 16 }
 0x24d   : > { %12583 = vmatmul.mubr.msk.bf16.vlgmr.msra.gmra.mrb[28].mxu1 %vm1728_vm8, %v2740_v61  ;;  %v2763_v61 = vrot.slane %v15233_v31, 2 }
 0x24e   : > { %12611 = vmatpush3.bf16.msra.mxu1 %v3141_v42  ;;  %12586 = vmatprep.mubr.msk.bf16.mxu1 %vm1728_vm8, %v2743_v49  ;;  %v2762_v42 = vrot.slane %v15229_v41, 2  ;;  %v2765_v49 = vrot.slane %v15253_v26, 2 }
 0x24f   : > { %14288 = vmatprep.subr.msk.bf16.mxu1 %vm18603_vm4, %v15648_v48 }
 0x250   : > { %v2764_v40 = vsel %vm18589_vm12, %v2762_v42, %v2763_v61  ;;  %v2767_v63 = vsel %vm18589_vm12, %v2765_v49, %v2766_v45  ;;  %v3003_v61 = vor.u32 %v3002_v50, %v3001_v21  ;;  %v3005_v49 = vrot.slane %v14995_v16, 2  ;;  %v18862_v50 = vld [vmem:[#allocation33_spill] sm:$0xff] }
 0x251   : > { %v3006_v45 = vrot.slane %v14986_v29, 3  ;;  %v3016_v16 = vrot.slane %v15029_v25, 3  ;;  %v3022_v21 = vrot.slane %v18861_v57, 2  ;;  %v3023_v25 = vrot.slane %v18862_v50, 3  ;;  %v18874_v50 = vld [vmem:[#allocation42_spill] sm:$0xff] }
 0x252   : > { %v18873_v57 = vshrl.u32 %v15143_v18, 16 }
 0x253   : > { %v3007_v29 = vor.u32 %v3006_v45, %v3005_v49  ;;  %v18866_v45 = vld [vmem:[#allocation36_spill] sm:$0xff] }
 0x255   : > { %12587 = vmatmul.mubr.msk.bf16.gmra.mrb[32].mxu1 %vm1728_vm8, %v2746_v4  ;;  %v3726_v4 = vsel %vm18603_vm4, %v11466_v52, 0 }
 0x256   : > { %12590 = vmatprep.mubr.msk.bf16.mxu1 %vm1728_vm8, %v2749_v10  ;;  %12671 = vmatpush3.bf16.msra.mxu0 %v3726_v4  ;;  %v2768_v10 = vrot.slane %v15277_v47, 2  ;;  %v3013_v4 = vrot.slane %v15026_v22, 3 }
 0x258   : > { %v2770_v53 = vsel %vm18589_vm12, %v2768_v10, %v2769_v58  ;;  %v18858_v10 = vshrl.u32 %v15021_v17, 16 }
 0x25a   : > { %v3015_v58 = vrot.slane %v18858_v10, 2 }
 0x25d   : > { %12591 = vmatmul.mubr.msk.bf16.gmra.mrb[36].mxu1 %vm1728_vm8, %v2752_v12  ;;  %v2998_v12 = vrot.slane %v14963_v60, 2 }
 0x25e   : > { %12594 = vmatprep.mubr.msk.bf16.mxu1 %vm1728_vm8, %v2755_v35  ;;  %v2773_v35 = vsel %vm18589_vm12, %v2771_v7, %v2772_v43  ;;  %v3014_v43 = vor.u32 %v3013_v4, %v3012_v54  ;;  %v18867_v4 = vld [vmem:[#allocation40_spill] sm:$0xff] }
 0x25f   : > { %v3000_v42 = vor.u32 %v2999_v13, %v2998_v12  ;;  %v3019_v12 = vrot.slane %v18859_v46, 2  ;;  %v3033_v10 = vrot.slane %v18867_v4, 2  ;;  %v18879_v4 = vld [vmem:[#allocation49_spill] sm:$0xff] }
 0x261   : > { %v3004_v52 = vsel %vm18588_vm10, %v3000_v42, %v3003_v61  ;;  %v18864_v61 = vld [vmem:[#allocation35_spill] sm:$0xff] }
 0x265   : > { %12595 = vmatmul.mubr.msk.bf16.gmra.mrb[40].mxu1 %vm1728_vm8, %v2758_v33  ;;  %v2774_v33 = vrot.slane %v15334_v44, 2 }
 0x266   : > { %12598 = vmatprep.mubr.msk.bf16.mxu1 %vm1728_vm8, %v2761_v36  ;;  %v2775_v36 = vrot.slane %v15338_v28, 2 }
 0x268   : > { %v2776_v60 = vsel %vm18589_vm12, %v2774_v33, %v2775_v36  ;;  %v18863_v33 = vld [vmem:[#allocation37_spill] sm:$0xff] }
 0x269   : > { %v3026_v36 = vrot.slane %v18863_v33, 2 }
 0x26d   : > { %12599 = vmatmul.mubr.msk.bf16.gmra.mrb[44].mxu1 %vm1728_vm8, %v2764_v40  ;;  %v3008_v40 = vrot.slane %v18857_v51, 2  ;;  %v3030_v51 = vrot.slane %v18866_v45, 3 }
 0x26e   : > { %12602 = vmatprep.mubr.msk.bf16.mxu1 %vm1728_vm8, %v2767_v63  ;;  %v3009_v63 = vrot.slane %v14989_v32, 3  ;;  %v3404_v32 = vsel %vm18603_vm4, %v15648_v48, 0  ;;  %v18865_v48 = vshrl.u32 %v15083_v5, 16 }
 0x270   : > { %v3010_v7 = vor.u32 %v3009_v63, %v3008_v40  ;;  %v3029_v49 = vrot.slane %v18865_v48, 2  ;;  %v3024_v63 = vor.u32 %v3023_v25, %v3022_v21  ;;  %v3043_v21 = vrot.slane %v18873_v57, 2  ;;  %v18883_v57 = vld [vmem:[#allocation50_spill] sm:$0xff] }
 0x271   : > { %v3044_v25 = vrot.slane %v18874_v50, 3 }
 0x272   : > { %v3011_v22 = vsel %vm18588_vm10, %v3007_v29, %v3010_v7  ;;  %v18869_v7 = vshrl.u32 %v15113_v30, 16 }
 0x275   : > { %12603 = vmatmul.mubr.msk.bf16.gmra.mrb[48].mxu1 %vm1728_vm8, %v2770_v53  ;;  %v3017_v53 = vor.u32 %v3016_v16, %v3015_v58  ;;  %v18868_v58 = vld [vmem:[#allocation38_spill] sm:$0xff] }
 0x276   : > { %12606 = vmatprep.mubr.msk.bf16.mxu1 %vm1728_vm8, %v2773_v35  ;;  %v18860_v35 = vld [vmem:[#allocation32_spill] sm:$0xff]  ;;  %v3034_v16 = vrot.slane %v18868_v58, 3  ;;  %v3054_v58 = vrot.slane %v18879_v4, 2 }
 0x277   : > { %v3020_v13 = vrot.slane %v18860_v35, 3  ;;  %v3018_v42 = vsel %vm18588_vm10, %v3014_v43, %v3017_v53  ;;  %v3036_v43 = vrot.slane %v18869_v7, 2  ;;  %v18870_v53 = vld [vmem:[#allocation39_spill] sm:$0xff]  ;;  %v18881_v7 = vshrl.u32 %v15203_v34, 16 }
 0x278   : > { %v3037_v46 = vrot.slane %v18870_v53, 3  ;;  %v18871_v35 = vld [vmem:[#allocation43_spill] sm:$0xff]  ;;  %v3035_v33 = vor.u32 %v3034_v16, %v3033_v10  ;;  %v18882_v53 = vld [vmem:[#allocation48_spill] sm:$0xff] }
 0x279   : > { %v3021_v40 = vor.u32 %v3020_v13, %v3019_v12  ;;  %v18872_v12 = vld [vmem:[#allocation41_spill] sm:$0xff]  ;;  %v18880_v16 = vld [vmem:[#allocation47_spill] sm:$0xff] }
 0x27a   : > { %v3041_v13 = vrot.slane %v18872_v12, 3 }
 0x27b   : > { %v3025_v29 = vsel %vm18588_vm10, %v3021_v40, %v3024_v63  ;;  %v18877_v40 = vshrl.u32 %v15173_v14, 16 }
 0x27d   : > { %12607 = vmatmul.mubr.msk.bf16.gmra.mrb[52].mxu1 %vm1728_vm8, %v2776_v60  ;;  %v3027_v60 = vrot.slane %v18864_v61, 3  ;;  %v3045_v61 = vor.u32 %v3044_v25, %v3043_v21  ;;  %v3050_v63 = vrot.slane %v18877_v40, 2  ;;  %v3062_v21 = vrot.slane %v18883_v57, 3  ;;  %v18889_v40 = vld [vmem:[#allocation54_spill] sm:$0xff] }
 0x27e   : > { %12612 = vmatprep.mubr.msk.bf16.mxu1 %vm1728_vm8, %v3004_v52  ;;  %v3031_v52 = vor.u32 %v3030_v51, %v3029_v49  ;;  %v18876_v49 = vld [vmem:[#allocation44_spill] sm:$0xff]  ;;  %v18884_v25 = vshrl.u32 %v15233_v31, 16 }
 0x27f   : > { %v3028_v54 = vor.u32 %v3027_v60, %v3026_v36  ;;  %v3038_v36 = vor.u32 %v3037_v46, %v3036_v43  ;;  %v18875_v60 = vld [vmem:[#allocation46_spill] sm:$0xff]  ;;  %v3048_v45 = vrot.slane %v18876_v49, 3  ;;  %v3057_v43 = vrot.slane %v18881_v7, 2  ;;  %v18887_v49 = vld [vmem:[#allocation53_spill] sm:$0xff] }
 0x280   : > { %v3047_v48 = vrot.slane %v18875_v60, 2  ;;  %v3058_v46 = vrot.slane %v18882_v53, 3  ;;  %v18890_v7 = vshrl.u32 %v15281_v55, 16  ;;  %v18891_v53 = vld [vmem:[#allocation57_spill] sm:$0xff] }
 0x281   : > { %v3039_v51 = vsel %vm18588_vm10, %v3035_v33, %v3038_v36  ;;  %v3064_v33 = vrot.slane %v18884_v25, 2  ;;  %v18885_v36 = vld [vmem:[#allocation51_spill] sm:$0xff] }
 0x282   : > { %v3059_v12 = vor.u32 %v3058_v46, %v3057_v43  ;;  %v3078_v43 = vrot.slane %v18890_v7, 2  ;;  %v3079_v46 = vrot.slane %v18891_v53, 3  ;;  %v3357_v7 = vrot.slane %v15338_v28, 3 }
 0x285   : > { %12613 = vmatmul.mubr.msk.bf16.vlgmr.msra.gmra.mrb[28].mxu1 %vm1728_vm8, %v3011_v22  ;;  %v3040_v22 = vrot.slane %v18871_v35, 2  ;;  %v3049_v35 = vor.u32 %v3048_v45, %v3047_v48  ;;  %v3069_v45 = vrot.slane %v18887_v49, 3  ;;  %v3323_v49 = vrot.slane %v15017_v11, 3 }
 0x286   : > { %12641 = vmatpush3.bf16.msra.mxu1 %v3404_v32  ;;  %12616 = vmatprep.mubr.msk.bf16.mxu1 %vm1728_vm8, %v3018_v42  ;;  %v3032_v32 = vsel %vm18588_vm10, %v3028_v54, %v3031_v52  ;;  %v18878_v54 = vld [vmem:[#allocation45_spill] sm:$0xff] }
 0x287   : > { %v3042_v42 = vor.u32 %v3041_v13, %v3040_v22  ;;  %v3051_v52 = vrot.slane %v18878_v54, 3  ;;  %v3061_v13 = vrot.slane %v18843_v6, 2 }
 0x289   : > { %v3046_v10 = vsel %vm18588_vm10, %v3042_v42, %v3045_v61  ;;  %v3052_v22 = vor.u32 %v3051_v52, %v3050_v63  ;;  %v3065_v42 = vrot.slane %v18885_v36, 3  ;;  %v18886_v61 = vld [vmem:[#allocation55_spill] sm:$0xff]  ;;  %v3072_v63 = vrot.slane %v18889_v40, 3 }
 0x28a   : > { %v3068_v60 = vrot.slane %v18886_v61, 2  ;;  %v3063_v54 = vor.u32 %v3062_v21, %v3061_v13  ;;  %v18893_v13 = vshrl.u32 %v15308_v1, 16  ;;  %v3080_v21 = vor.u32 %v3079_v46, %v3078_v43 }
 0x28b   : > { %v3053_v50 = vsel %vm18588_vm10, %v3049_v35, %v3052_v22  ;;  %v3066_v52 = vor.u32 %v3065_v42, %v3064_v33  ;;  %v18892_v35 = vld [vmem:[#allocation62_spill] sm:$0xff]  ;;  %v3318_v42 = vrot.slane %v14952_v23, 3  ;;  %v3332_v40 = vrot.slane %v15109_v9, 3 }
 0x28c   : > { %v3070_v4 = vor.u32 %v3069_v45, %v3068_v60  ;;  %v3082_v22 = vrot.slane %v18892_v35, 2  ;;  %v3320_v60 = vrot.slane %v14978_v24, 3  ;;  %v3324_v45 = vrot.slane %v15021_v17, 3 }
 0x28d   : > { %12617 = vmatmul.mubr.msk.bf16.gmra.mrb[32].mxu1 %vm1728_vm8, %v3025_v29  ;;  %v3055_v29 = vrot.slane %v18880_v16, 3  ;;  %v3076_v16 = vrot.slane %v18850_v38, 3  ;;  %v3086_v38 = vrot.slane %v18854_v59, 3  ;;  %v18894_v59 = vld [vmem:[#allocation76_spill] sm:$0xff]  ;;  %v3329_v24 = vrot.slane %v15079_v20, 3 }
 0x28e   : > { %12620 = vmatprep.mubr.msk.bf16.mxu1 %vm1728_vm8, %v3032_v32  ;;  %v3325_v23 = vsel %vm18587_vm13, %v3323_v49, %v3324_v45  ;;  %v3341_v9 = vrot.slane %v15199_v0, 3 }
 0x28f   : > { %v3056_v32 = vor.u32 %v3055_v29, %v3054_v58  ;;  %v3067_v29 = vsel %vm18588_vm10, %v3063_v54, %v3066_v52  ;;  %v3338_v54 = vrot.slane %v15169_v2, 3  ;;  %v3339_v52 = vrot.slane %v15173_v14, 3 }
 0x290   : > { %v3347_v2 = vrot.slane %v15253_v26, 3  ;;  %v3348_v14 = vrot.slane %v15257_v37, 3 }
 0x291   : > { %v3060_v48 = vsel %vm18588_vm10, %v3056_v32, %v3059_v12  ;;  %v3083_v12 = vrot.slane %v18853_v56, 3  ;;  %v3317_v56 = vrot.slane %v14948_v19, 3 }
 0x293   : > { %v3319_v61 = vsel %vm18587_vm13, %v3317_v56, %v3318_v42 }
 0x295   : > { %12621 = vmatmul.mubr.msk.bf16.gmra.mrb[36].mxu1 %vm1728_vm8, %v3039_v51  ;;  %v18888_v51 = vshrl.u32 %v15257_v37, 16 }
 0x296   : > { %12624 = vmatprep.mubr.msk.bf16.mxu1 %vm1728_vm8, %v3046_v10  ;;  %v3075_v10 = vrot.slane %v18849_v27, 2  ;;  %v3085_v27 = vrot.slane %v18893_v13, 2 }
 0x297   : > { %v3071_v6 = vrot.slane %v18888_v51, 2  ;;  %v3326_v51 = vrot.slane %v15049_v15, 3  ;;  %v3335_v15 = vrot.slane %v15139_v62, 3  ;;  %v3340_v62 = vsel %vm18587_vm13, %v3338_v54, %v3339_v52 }
 0x298   : > { %v3077_v57 = vor.u32 %v3076_v16, %v3075_v10  ;;  %v3087_v25 = vor.u32 %v3086_v38, %v3085_v27  ;;  %v3350_v10 = vrot.slane %v15277_v47, 3  ;;  %v3351_v16 = vrot.slane %v15281_v55, 3  ;;  %v3698_v55 = vld [vmem:[%s18467_s5] sm:$0x7] }
 0x299   : > { %v3073_v58 = vor.u32 %v3072_v63, %v3071_v6  ;;  %v3327_v6 = vrot.slane %v15053_v3, 3  ;;  %v3333_v63 = vrot.slane %v15113_v30, 3  ;;  %v3336_v3 = vrot.slane %v15143_v18, 3  ;;  %14290 = vmatprep.subr.msk.bf16.mxu0 %vm18603_vm4, %v3698_v55 }
 0x29a   : > { %v3081_v33 = vsel %vm18588_vm10, %v3077_v57, %v3080_v21  ;;  %v3342_v30 = vrot.slane %v15203_v34, 3  ;;  %v3349_v34 = vsel %vm18587_vm13, %v3347_v2, %v3348_v14  ;;  %v3352_v26 = vsel %vm18587_vm13, %v3350_v10, %v3351_v16 }
 0x29b   : > { %v3074_v32 = vsel %vm18588_vm10, %v3070_v4, %v3073_v58  ;;  %v3328_v11 = vsel %vm18587_vm13, %v3326_v51, %v3327_v6  ;;  %v3334_v20 = vsel %vm18587_vm13, %v3332_v40, %v3333_v63  ;;  %v3344_v4 = vrot.slane %v15229_v41, 3 }
 0x29c   : > { %v3343_v18 = vsel %vm18587_vm13, %v3341_v9, %v3342_v30  ;;  %v3345_v58 = vrot.slane %v15233_v31, 3  ;;  %v3353_v41 = vrot.slane %v15304_v39, 3  ;;  %v3354_v31 = vrot.slane %v15308_v1, 3  ;;  %v15865_v1 = vld [vmem:[%s18466_s4] ss:$0 sm:$0xff] }
 0x29d   : > { %12625 = vmatmul.mubr.msk.bf16.gmra.mrb[40].mxu1 %vm1728_vm8, %v3053_v50  ;;  %v3084_v50 = vor.u32 %v3083_v12, %v3082_v22  ;;  %v15860_v39 = vstv %s11299_s19  ;;  %v18895_v21 = vmov 0  ;;  %v15909_v30 = vld [vmem:[%s18467_s5 + $0x8] sm:$0x7]  ;;  %s11877_s19 = sshll.u32 %s14516_s28, 5 }
 0x29e   : > { %12628 = vmatprep.mubr.msk.bf16.mxu1 %vm1728_vm8, %v3060_v48  ;;  %v3321_v48 = vrot.slane %v14982_v8, 3  ;;  %v3330_v8 = vrot.slane %v15083_v5, 3  ;;  %v3337_v5 = vsel %vm18587_vm13, %v3335_v15, %v3336_v3  ;;  %v3346_v0 = vsel %vm18587_vm13, %v3344_v4, %v3345_v58 }
 0x29f   : > { %v3088_v36 = vsel %vm18588_vm10, %v3084_v50, %v3087_v25  ;;  %v3355_v37 = vsel %vm18587_vm13, %v3353_v41, %v3354_v31  ;;  %v3829_v3 = vsel %vm18603_vm4, %v3698_v55, 0 }
 0x2a0   : > { %v3322_v19 = vsel %vm18587_vm13, %v3320_v60, %v3321_v48  ;;  %v3331_v17 = vsel %vm18587_vm13, %v3329_v24, %v3330_v8  ;;  %v614_v48 = vadd.s32 6, %v15860_v39 }
 0x2a2   : > { %vm654_vm1 = vcmp.lt.s32.totalorder %v614_v48, 16 }
 0x2a5   : > { %12629 = vmatmul.mubr.msk.bf16.gmra.mrb[44].mxu1 %vm1728_vm8, %v3067_v29  ;;  %v3356_v29 = vrot.slane %v15334_v44, 3  ;;  %v612_v44 = vadd.s32 4, %v15860_v39 }
 0x2a6   : > { %12632 = vmatprep.mubr.msk.bf16.mxu1 %vm1728_vm8, %v3074_v32 }
 0x2a7   : > { %v3358_v47 = vsel %vm18587_vm13, %v3356_v29, %v3357_v7  ;;  %vm632_vm14 = vcmp.ge.s32.totalorder %v612_v44, 0  ;;  %vm652_vm15 = vcmp.lt.s32.totalorder %v612_v44, 16  ;;  %v617_v7 = vadd.s32 9, %v15860_v39 }
 0x2a8   : > { %vm15872_vm5 = vmand %vm632_vm14, %vm652_vm15  ;;  %vm634_vm15 = vcmp.ge.s32.totalorder %v614_v48, 0 }
 0x2a9   : > { %v18896_v21 = vsel %vm15872_vm5, 4294967295, %v18895_v21  ;;  %vm15897_vm0 = vmand %vm634_vm15, %vm654_vm1 }
 0x2aa   : > { %18897 = vst [vmem:[#allocation52_spill] sm:$0xff] %v18896_v21 }
 0x2ad   : > { %12633 = vmatmul.mubr.msk.bf16.gmra.mrb[48].mxu1 %vm1728_vm8, %v3081_v33 }
 0x2ae   : > { %12636 = vmatprep.mubr.msk.bf16.mxu1 %vm1728_vm8, %v3088_v36  ;;  %v613_v36 = vadd.s32 5, %v15860_v39 }
 0x2b0   : > { %vm633_vm9 = vcmp.ge.s32.totalorder %v613_v36, 0  ;;  %vm653_vm14 = vcmp.lt.s32.totalorder %v613_v36, 16 }
 0x2b1   : > { %vm15890_vm2 = vmand %vm633_vm9, %vm653_vm14 }
 0x2b5   : > { %12637 = vmatmul.mubr.msk.bf16.gmra.mrb[52].mxu1 %vm1728_vm8, %v18894_v59 }
 0x2b6   : > { %12642 = vmatprep.mubr.msk.bf16.mxu1 %vm1728_vm8, %v3319_v61 }
 0x2bd   : > { %12643 = vmatmul.mubr.msk.bf16.vlgmr.msra.gmra.mrb[28].mxu1 %vm1728_vm8, %v3322_v19 }
 0x2be   : > { %12646 = vmatprep.mubr.msk.bf16.mxu1 %vm1728_vm8, %v3325_v23 }
 0x2c5   : > { %12647 = vmatmul.mubr.msk.bf16.gmra.mrb[32].mxu1 %vm1728_vm8, %v3328_v11  ;;  %v18898_v11 = vmov 0 }
 0x2c6   : > { %12650 = vmatprep.mubr.msk.bf16.mxu1 %vm1728_vm8, %v3331_v17  ;;  %v18899_v11 = vsel %vm15890_vm2, 4294967295, %v18898_v11 }
 0x2c7   : > { %18900 = vst [vmem:[#allocation58_spill] sm:$0xff] %v18899_v11 }
 0x2cd   : > { %12651 = vmatmul.mubr.msk.bf16.gmra.mrb[36].mxu1 %vm1728_vm8, %v3334_v20  ;;  %v615_v20 = vadd.s32 7, %v15860_v39 }
 0x2ce   : > { %12654 = vmatprep.mubr.msk.bf16.mxu1 %vm1728_vm8, %v3337_v5  ;;  %v18901_v5 = vmov 0 }
 0x2cf   : > { %v18902_v5 = vsel %vm15897_vm0, 4294967295, %v18901_v5  ;;  %vm635_vm1 = vcmp.ge.s32.totalorder %v615_v20, 0  ;;  %vm655_vm9 = vcmp.lt.s32.totalorder %v615_v20, 16  ;;  %v18916_v20 = vmov 0 }
 0x2d0   : > { %18903 = vst [vmem:[#allocation56_spill] sm:$0xff] %v18902_v5  ;;  %vm15924_vm13 = vmand %vm635_vm1, %vm655_vm9  ;;  %vm637_vm1 = vcmp.ge.s32.totalorder %v617_v7, 0  ;;  %vm657_vm9 = vcmp.lt.s32.totalorder %v617_v7, 16 }
 0x2d1   : > { %vm15950_vm12 = vmand %vm637_vm1, %vm657_vm9 }
 0x2d5   : > { %12655 = vmatmul.mubr.msk.bf16.gmra.mrb[40].mxu1 %vm1728_vm8, %v3340_v62  ;;  %v616_v62 = vadd.s32 8, %v15860_v39 }
 0x2d6   : > { %12658 = vmatprep.mubr.msk.bf16.mxu1 %vm1728_vm8, %v3343_v18 }
 0x2d7   : > { %vm636_vm14 = vcmp.ge.s32.totalorder %v616_v62, 0  ;;  %vm656_vm15 = vcmp.lt.s32.totalorder %v616_v62, 16 }
 0x2d8   : > { %vm15930_vm10 = vmand %vm636_vm14, %vm656_vm15 }
 0x2dd   : > { %12659 = vmatmul.mubr.msk.bf16.gmra.mrb[44].mxu1 %vm1728_vm8, %v3346_v0 }
 0x2de   : > { %12662 = vmatprep.mubr.msk.bf16.mxu1 %vm1728_vm8, %v3349_v34 }
 0x2e5   : > { %12663 = vmatmul.mubr.msk.bf16.gmra.mrb[48].mxu1 %vm1728_vm8, %v3352_v26  ;;  %v18904_v26 = vmov 0 }
 0x2e6   : > { %12666 = vmatprep.mubr.msk.bf16.mxu1 %vm1728_vm8, %v3355_v37  ;;  %v18905_v26 = vsel %vm15924_vm13, 4294967295, %v18904_v26 }
 0x2e7   : > { %18906 = vst [vmem:[#allocation59_spill] sm:$0xff] %v18905_v26 }
 0x2ed   : > { %12667 = vmatmul.mubr.msk.bf16.gmra.mrb[52].mxu1 %vm1728_vm8, %v3358_v47  ;;  %v18907_v47 = vmov 0 }
 0x2ee   : > { %v18908_v47 = vsel %vm15930_vm10, 4294967295, %v18907_v47 }
 0x2ef   : > { %18909 = vst [vmem:[#allocation60_spill] sm:$0xff] %v18908_v47 }
 0x390   : > { %v12644_v28 = vpop.f32.mrb[28].mxu1 }
 0x391   : > { %v3588_v43 = vadd.f32 %v12644_v28, %v15865_v1  ;;  %v3440_v53 = vpop.f32.mrb[29].mxu1 }
 0x392   : > { %v3586_v46 = vadd.f32 %v15865_v1, %v3440_v53  ;;  %v12645_v35 = vpop.f32.mrb[30].mxu1 }
 0x393   : > { %v3589_v22 = vadd.f32 %v12645_v35, %v15865_v1  ;;  %v3443_v32 = vpop.f32.mrb[31].mxu1  ;;  %v3616_v13 = vmax.f32 %v3588_v43, 0.0  ;;  %v618_v43 = vadd.s32 10, %v15860_v39 }
 0x394   : > { %v3587_v12 = vadd.f32 %v15865_v1, %v3443_v32  ;;  %v3614_v38 = vmax.f32 %v3586_v46, 0.0 }
 0x395   : > { %v3617_v27 = vmax.f32 %v3589_v22, 0.0  ;;  %vm638_vm14 = vcmp.ge.s32.totalorder %v618_v43, 0  ;;  %vm658_vm15 = vcmp.lt.s32.totalorder %v618_v43, 16 }
 0x396   : > { %v3615_v57 = vmax.f32 %v3587_v12, 0.0  ;;  %vm15957_vm11 = vmand %vm638_vm14, %vm658_vm15 }
 0x397   : > { %v3643_v50 = vpack.c.bf16 %v3617_v27, %v3616_v13 }
 0x398   : > { %v15876_v25 = vpack.c.bf16 %v3615_v57, %v3614_v38  ;;  %v12648_v33 = vpop.f32.mrb[32].mxu1 }
 0x399   : > { %v3592_v56 = vadd.f32 %v12648_v33, %v15865_v1  ;;  %v3456_v42 = vpop.f32.mrb[33].mxu1  ;;  %v15882_v59 = vsel %vm15872_vm5, %v3643_v50, 0  ;;  %v18910_v33 = vmov 0 }
 0x39a   : > { %v3590_v61 = vadd.f32 %v15865_v1, %v3456_v42  ;;  %v12649_v60 = vpop.f32.mrb[34].mxu1  ;;  %12672 = vmatprep.mubr.msk.bf16.mxu0 %vm1728_vm8, %v15882_v59  ;;  %v18911_v33 = vsel %vm15950_vm12, 4294967295, %v18910_v33  ;;  %v611_v42 = vadd.s32 3, %v15860_v39 }
 0x39b   : > { %v3593_v49 = vadd.f32 %v12649_v60, %v15865_v1  ;;  %v3459_v45 = vpop.f32.mrb[35].mxu1  ;;  %v3620_v23 = vmax.f32 %v3592_v56, 0.0  ;;  %18912 = vst [vmem:[#allocation34_spill] sm:$0xff] %v18911_v33  ;;  %v18913_v60 = vmov 0 }
 0x39c   : > { %v3591_v19 = vadd.f32 %v15865_v1, %v3459_v45  ;;  %v3618_v6 = vmax.f32 %v3590_v61, 0.0  ;;  %v619_v61 = vadd.s32 11, %v15860_v39  ;;  %v18914_v60 = vsel %vm15957_vm11, 4294967295, %v18913_v60 }
 0x39d   : > { %v3621_v51 = vmax.f32 %v3593_v49, 0.0  ;;  %18915 = vst [vmem:[#allocation32_spill] sm:$0xff] %v18914_v60  ;;  %vm631_vm1 = vcmp.ge.s32.totalorder %v611_v42, 0  ;;  %vm651_vm9 = vcmp.lt.s32.totalorder %v611_v42, 16 }
 0x39e   : > { %v3619_v24 = vmax.f32 %v3591_v19, 0.0  ;;  %vm639_vm14 = vcmp.ge.s32.totalorder %v619_v61, 0  ;;  %vm659_vm15 = vcmp.lt.s32.totalorder %v619_v61, 16  ;;  %vm15978_vm3 = vmand %vm631_vm1, %vm651_vm9 }
 0x39f   : > { %v3645_v8 = vpack.c.bf16 %v3621_v51, %v3620_v23  ;;  %v18917_v20 = vsel %vm15978_vm3, 4294967295, %v18916_v20  ;;  %vm15982_vm7 = vmand %vm639_vm14, %vm659_vm15 }
 0x3a0   : > { %v3644_v17 = vpack.c.bf16 %v3619_v24, %v3618_v6  ;;  %v12652_v40 = vpop.f32.mrb[36].mxu1  ;;  %18918 = vst [vmem:[#allocation33_spill] sm:$0xff] %v18917_v20 }
 0x3a1   : > { %v3596_v63 = vadd.f32 %v12652_v40, %v15865_v1  ;;  %v3472_v15 = vpop.f32.mrb[37].mxu1  ;;  %v15917_v58 = vsel %vm15897_vm0, %v3645_v8, 0 }
 0x3a2   : > { %v15903_v54 = vsel %vm15890_vm2, %v3644_v17, 0  ;;  %v3594_v52 = vadd.f32 %v15865_v1, %v3472_v15  ;;  %v12653_v9 = vpop.f32.mrb[38].mxu1 }
 0x3a3   : > { %v3597_v18 = vadd.f32 %v12653_v9, %v15865_v1  ;;  %v3475_v4 = vpop.f32.mrb[39].mxu1  ;;  %12673 = vmatmul.mubr.msk.bf16.vlgmr.msra.gmra.mrb[92].mxu0 %vm1728_vm8, %v15903_v54  ;;  %v3624_v14 = vmax.f32 %v3596_v63, 0.0 }
 0x3a4   : > { %v3595_v2 = vadd.f32 %v15865_v1, %v3475_v4  ;;  %12689 = vmatpush3.bf16.msra.mxu0 %v3829_v3  ;;  %12676 = vmatprep.mubr.msk.bf16.mxu0 %vm1728_vm8, %v15917_v58  ;;  %v3622_v34 = vmax.f32 %v3594_v52, 0.0  ;;  %v18919_v52 = vmov 0 }
 0x3a5   : > { %v3625_v0 = vmax.f32 %v3597_v18, 0.0  ;;  %14291 = vmatprep.subr.msk.bf16.mxu0 %vm18603_vm4, %v15909_v30  ;;  %v18920_v52 = vsel %vm15982_vm7, 4294967295, %v18919_v52 }
 0x3a6   : > { %v3623_v10 = vmax.f32 %v3595_v2, 0.0  ;;  %18921 = vst [vmem:[#allocation37_spill] sm:$0xff] %v18920_v52 }
 0x3a7   : > { %v3647_v16 = vpack.c.bf16 %v3625_v0, %v3624_v14 }
 0x3a8   : > { %v3646_v41 = vpack.c.bf16 %v3623_v10, %v3622_v34  ;;  %v12656_v31 = vpop.f32.mrb[40].mxu1  ;;  %v3684_v34 = vsel %vm15978_vm3, %v15876_v25, 0 }
 0x3a9   : > { %v3600_v37 = vadd.f32 %v12656_v31, %v15865_v1  ;;  %v3488_v29 = vpop.f32.mrb[41].mxu1  ;;  %v15942_v53 = vsel %vm15930_vm10, %v3647_v16, 0  ;;  %vm18938_vm10 = vcmask 1042432  }
 0x3aa   : > { %v15936_v55 = vsel %vm15924_vm13, %v3646_v41, 0  ;;  %v3598_v44 = vadd.f32 %v15865_v1, %v3488_v29  ;;  %v12657_v28 = vpop.f32.mrb[42].mxu1 }
 0x3ab   : > { %v3601_v46 = vadd.f32 %v12657_v28, %v15865_v1  ;;  %v3491_v35 = vpop.f32.mrb[43].mxu1  ;;  %12677 = vmatmul.mubr.msk.bf16.gmra.mrb[96].mxu0 %vm1728_vm8, %v15936_v55  ;;  %v3628_v32 = vmax.f32 %v3600_v37, 0.0 }
 0x3ac   : > { %v3599_v22 = vadd.f32 %v15865_v1, %v3491_v35  ;;  %12680 = vmatprep.mubr.msk.bf16.mxu0 %vm1728_vm8, %v15942_v53  ;;  %v3626_v13 = vmax.f32 %v3598_v44, 0.0 }
 0x3ad   : > { %v3629_v12 = vmax.f32 %v3601_v46, 0.0  ;;  %v3934_v46 = vsel %vm18603_vm4, %v15909_v30, 0 }
 0x3ae   : > { %v3627_v27 = vmax.f32 %v3599_v22, 0.0  ;;  %v11492_v22 = vld [vmem:[%s18467_s5 + $0xc] sm:$0x7] }
 0x3af   : > { %v3649_v38 = vpack.c.bf16 %v3629_v12, %v3628_v32 }
 0x3b0   : > { %v3648_v57 = vpack.c.bf16 %v3627_v27, %v3626_v13  ;;  %v12660_v50 = vpop.f32.mrb[44].mxu1 }
 0x3b1   : > { %v3604_v36 = vadd.f32 %v12660_v50, %v15865_v1  ;;  %v3504_v56 = vpop.f32.mrb[45].mxu1  ;;  %v15968_v19 = vsel %vm15957_vm11, %v3649_v38, 0 }
 0x3b2   : > { %v15963_v48 = vsel %vm15950_vm12, %v3648_v57, 0  ;;  %v3602_v49 = vadd.f32 %v15865_v1, %v3504_v56  ;;  %v12661_v45 = vpop.f32.mrb[46].mxu1 }
 0x3b3   : > { %v3605_v23 = vadd.f32 %v12661_v45, %v15865_v1  ;;  %v3507_v51 = vpop.f32.mrb[47].mxu1  ;;  %12681 = vmatmul.mubr.msk.bf16.gmra.mrb[100].mxu0 %vm1728_vm8, %v15963_v48  ;;  %v3632_v24 = vmax.f32 %v3604_v36, 0.0 }
 0x3b4   : > { %v3603_v6 = vadd.f32 %v15865_v1, %v3507_v51  ;;  %12684 = vmatprep.mubr.msk.bf16.mxu0 %vm1728_vm8, %v15968_v19  ;;  %v3630_v17 = vmax.f32 %v3602_v49, 0.0 }
 0x3b5   : > { %v3633_v8 = vmax.f32 %v3605_v23, 0.0 }
 0x3b6   : > { %v3631_v40 = vmax.f32 %v3603_v6, 0.0 }
 0x3b7   : > { %v15976_v63 = vpack.c.bf16 %v3633_v8, %v3632_v24 }
 0x3b8   : > { %v3650_v15 = vpack.c.bf16 %v3631_v40, %v3630_v17  ;;  %v12664_v3 = vpop.f32.mrb[48].mxu1 }
 0x3b9   : > { %v3608_v9 = vadd.f32 %v12664_v3, %v15865_v1  ;;  %v3520_v62 = vpop.f32.mrb[49].mxu1 }
 0x3ba   : > { %v15989_v18 = vsel %vm15982_vm7, %v3650_v15, 0  ;;  %v3606_v4 = vadd.f32 %v15865_v1, %v3520_v62  ;;  %v12665_v2 = vpop.f32.mrb[50].mxu1  ;;  %v4055_v15 = vsel %vm18603_vm4, %v11492_v22, 0 }
 0x3bb   : > { %v3609_v14 = vadd.f32 %v12665_v2, %v15865_v1  ;;  %v3523_v0 = vpop.f32.mrb[51].mxu1  ;;  %12685 = vmatmul.mubr.msk.bf16.gmra.mrb[104].mxu0 %vm1728_vm8, %v15989_v18  ;;  %v3636_v16 = vmax.f32 %v3608_v9, 0.0 }
 0x3bc   : > { %v3607_v10 = vadd.f32 %v15865_v1, %v3523_v0  ;;  %12690 = vmatprep.mubr.msk.bf16.mxu0 %vm1728_vm8, %v3684_v34  ;;  %v3634_v31 = vmax.f32 %v3606_v4, 0.0 }
 0x3bd   : > { %v3637_v41 = vmax.f32 %v3609_v14, 0.0 }
 0x3be   : > { %v3635_v37 = vmax.f32 %v3607_v10, 0.0 }
 0x3bf   : > { %v16000_v29 = vpack.c.bf16 %v3637_v41, %v3636_v16 }
 0x3c0   : > { %v16002_v7 = vpack.c.bf16 %v3635_v37, %v3634_v31  ;;  %v12668_v44 = vpop.f32.mrb[52].mxu1 }
 0x3c1   : > { %v3612_v28 = vadd.f32 %v12668_v44, %v15865_v1  ;;  %v3536_v43 = vpop.f32.mrb[53].mxu1 }
 0x3c2   : > { %v3610_v25 = vadd.f32 %v15865_v1, %v3536_v43  ;;  %v12669_v35 = vpop.f32.mrb[54].mxu1 }
 0x3c3   : > { %v3613_v32 = vadd.f32 %v12669_v35, %v15865_v1  ;;  %v3539_v12 = vpop.f32.mrb[55].mxu1  ;;  %12691 = vmatmul.mubr.msk.bf16.vlgmr.msra.gmra.mrb[92].mxu0 %vm1728_vm8, %v15882_v59  ;;  %v3640_v30 = vmax.f32 %v3612_v28, 0.0  ;;  %v18922_v59 = vld [vmem:[#allocation11_spill] sm:$0xff] }
 0x3c4   : > { %v3611_v13 = vadd.f32 %v15865_v1, %v3539_v12  ;;  %12707 = vmatpush3.bf16.msra.mxu0 %v3934_v46  ;;  %12694 = vmatprep.mubr.msk.bf16.mxu0 %vm1728_vm8, %v15903_v54  ;;  %v3638_v38 = vmax.f32 %v3610_v25, 0.0  ;;  %v12422_v1 = vpop.f32.mrb[80].mxu0 }
 0x3c5   : > { %v3641_v27 = vmax.f32 %v3613_v32, 0.0  ;;  %14292 = vmatprep.subr.msk.bf16.mxu0 %vm18603_vm4, %v11492_v22  ;;  %v1134_v56 = vadd.f32 %v12422_v1, %v18922_v59  ;;  %v1125_v42 = vpop.f32.mrb[81].mxu0 }
 0x3c6   : > { %v3639_v57 = vmax.f32 %v3611_v13, 0.0  ;;  %v1126_v61 = vadd.f32 %v1125_v42, %v18922_v59  ;;  %v12423_v49 = vpop.f32.mrb[82].mxu0 }
 0x3c7   : > { %v16018_v50 = vpack.c.bf16 %v3641_v27, %v3640_v30  ;;  %v1286_v45 = vmax.f32 %v1134_v56, 0.0  ;;  %v1137_v23 = vadd.f32 %v12423_v49, %v18922_v59  ;;  %v1128_v51 = vpop.f32.mrb[83].mxu0  ;;  %v620_v56 = vadd.s32 12, %v15860_v39 }
 0x3c8   : > { %v16020_v36 = vpack.c.bf16 %v3639_v57, %v3638_v38  ;;  %v1284_v6 = vmax.f32 %v1126_v61, 0.0  ;;  %v1129_v24 = vadd.f32 %v1128_v51, %v18922_v59  ;;  %v12426_v8 = vpop.f32.mrb[84].mxu0  ;;  %v18923_v61 = vmov 0 }
 0x3c9   : > { %v1287_v17 = vmax.f32 %v1137_v23, 0.0  ;;  %v1150_v62 = vadd.f32 %v12426_v8, %v18922_v59  ;;  %v1141_v4 = vpop.f32.mrb[85].mxu0  ;;  %vm640_vm1 = vcmp.ge.s32.totalorder %v620_v56, 0  ;;  %vm660_vm9 = vcmp.lt.s32.totalorder %v620_v56, 16  ;;  %v11573_v56 = vld [vmem:[%s18469_s7 + $0xc] sm:$0x7] }
 0x3ca   : > { %v1285_v40 = vmax.f32 %v1129_v24, 0.0  ;;  %v1142_v2 = vadd.f32 %v1141_v4, %v18922_v59  ;;  %v12427_v14 = vpop.f32.mrb[86].mxu0  ;;  %vm16076_vm14 = vmand %vm640_vm1, %vm660_vm9 }
 0x3cb   : > { %12695 = vmatmul.mubr.msk.bf16.gmra.mrb[96].mxu0 %vm1728_vm8, %v15917_v58  ;;  %v16039_v3 = vpack.c.bf16 %v1287_v17, %v1286_v45  ;;  %v1291_v0 = vmax.f32 %v1150_v62, 0.0  ;;  %v1153_v34 = vadd.f32 %v12427_v14, %v18922_v59  ;;  %v1144_v10 = vpop.f32.mrb[87].mxu0  ;;  %v18924_v61 = vsel %vm16076_vm14, 4294967295, %v18923_v61  ;;  %v11510_v45 = vld [vmem:[%s18467_s5 + $0x14] sm:$0x7] }
 0x3cc   : > { %12698 = vmatprep.mubr.msk.bf16.mxu0 %vm1728_vm8, %v15936_v55  ;;  %v16044_v9 = vpack.c.bf16 %v1285_v40, %v1284_v6  ;;  %v1288_v16 = vmax.f32 %v1142_v2, 0.0  ;;  %v1145_v41 = vadd.f32 %v1144_v10, %v18922_v59  ;;  %v12430_v31 = vpop.f32.mrb[88].mxu0  ;;  %18925 = vst [vmem:[#allocation35_spill] sm:$0xff] %v18924_v61  ;;  %v4297_v51 = vsel %vm18603_vm4, %v11510_v45, 0  ;;  %v11519_v6 = vld [vmem:[%s18467_s5 + $0x18] sm:$0x7] }
 0x3cd   : > { %v1293_v37 = vmax.f32 %v1153_v34, 0.0  ;;  %v1166_v28 = vadd.f32 %v12430_v31, %v18922_v59  ;;  %v1157_v25 = vpop.f32.mrb[89].mxu0  ;;  %v4418_v8 = vsel %vm18603_vm4, %v11519_v6, 0  ;;  %v11529_v17 = vld [vmem:[%s18469_s7 + $0x4] sm:$0x7] }
 0x3ce   : > { %v1289_v44 = vmax.f32 %v1145_v41, 0.0  ;;  %v1158_v35 = vadd.f32 %v1157_v25, %v18922_v59  ;;  %v12431_v22 = vpop.f32.mrb[90].mxu0  ;;  %v18940_v10 = vld [vmem:[#allocation63_spill] sm:$0xff]  ;;  %v18941_v41 = vld [vmem:[#allocation61_spill] sm:$0xff] }
 0x3cf   : > { %v16056_v43 = vpack.c.bf16 %v1293_v37, %v1291_v0  ;;  %v1299_v32 = vmax.f32 %v1166_v28, 0.0  ;;  %v1169_v12 = vadd.f32 %v12431_v22, %v18922_v59  ;;  %v1160_v13 = vpop.f32.mrb[91].mxu0  ;;  %v11558_v0 = vld [vmem:[%s18469_s7 + $0x8] sm:$0x7]  ;;  %v16226_v31 = vsel %vm15924_vm13, %v18941_v41, 0  ;;  %v18942_v37 = vld [vmem:[#allocation65_spill] sm:$0xff] }
 0x3d0   : > { %v16060_v46 = vpack.c.bf16 %v1289_v44, %v1288_v16  ;;  %v1295_v30 = vmax.f32 %v1158_v35, 0.0  ;;  %v1161_v27 = vadd.f32 %v1160_v13, %v18922_v59  ;;  %v3693_v59 = vsel %vm16076_vm14, %v15976_v63, 0  ;;  %v18944_v28 = vld [vmem:[#allocation64_spill] sm:$0xff]  ;;  %v18948_v35 = vld [vmem:[#allocation66_spill] sm:$0xff] }
 0x3d1   : > { %v1301_v38 = vmax.f32 %v1169_v12, 0.0  ;;  %v18926_v63 = vmov 0  ;;  %v16221_v16 = vsel %vm15897_vm0, %v18940_v10, 0  ;;  %v18952_v13 = vld [vmem:[#allocation68_spill] sm:$0xff] }
 0x3d2   : > { %v1297_v57 = vmax.f32 %v1161_v27, 0.0  ;;  %v18954_v27 = vld [vmem:[#allocation71_spill] sm:$0xff] }
 0x3d3   : > { %12699 = vmatmul.mubr.msk.bf16.gmra.mrb[100].mxu0 %vm1728_vm8, %v15942_v53  ;;  %v16067_v1 = vpack.c.bf16 %v1301_v38, %v1299_v32  ;;  %v18950_v32 = vld [vmem:[#allocation69_spill] sm:$0xff] }
 0x3d4   : > { %12702 = vmatprep.mubr.msk.bf16.mxu0 %vm1728_vm8, %v15963_v48  ;;  %v16070_v42 = vpack.c.bf16 %v1297_v57, %v1295_v30 }
 0x3d5   : > { %v16212_v34 = vsel %vm15890_vm2, %v16067_v1, 0 }
 0x3db   : > { %12703 = vmatmul.mubr.msk.bf16.gmra.mrb[104].mxu0 %vm1728_vm8, %v15968_v19 }
 0x3dc   : > { %12708 = vmatprep.mubr.msk.bf16.mxu0 %vm1728_vm8, %v15903_v54  ;;  %v11501_v54 = vld [vmem:[%s18467_s5 + $0x10] sm:$0x7] }
 0x3dd   : > { %v4176_v49 = vsel %vm18603_vm4, %v11501_v54, 0 }
 0x3e3   : > { %12709 = vmatmul.mubr.msk.bf16.vlgmr.msra.gmra.mrb[92].mxu0 %vm1728_vm8, %v15917_v58 }
 0x3e4   : > { %12725 = vmatpush3.bf16.msra.mxu0 %v4055_v15  ;;  %12712 = vmatprep.mubr.msk.bf16.mxu0 %vm1728_vm8, %v15936_v55  ;;  %v4751_v15 = vsel %vm18603_vm4, %v11529_v17, 0 }
 0x3e5   : > { %14293 = vmatprep.subr.msk.bf16.mxu0 %vm18603_vm4, %v11501_v54  ;;  %v4705_v54 = vld [vmem:[%s18469_s7] sm:$0x7] }
 0x3e6   : > { %v4902_v2 = vsel %vm18938_vm10, %v4705_v54, 0 }
 0x3eb   : > { %12713 = vmatmul.mubr.msk.bf16.gmra.mrb[96].mxu0 %vm1728_vm8, %v15942_v53 }
 0x3ec   : > { %12716 = vmatprep.mubr.msk.bf16.mxu0 %vm1728_vm8, %v15963_v48 }
 0x3f3   : > { %12717 = vmatmul.mubr.msk.bf16.gmra.mrb[100].mxu0 %vm1728_vm8, %v15968_v19 }
 0x3f4   : > { %12720 = vmatprep.mubr.msk.bf16.mxu0 %vm1728_vm8, %v15989_v18 }
 0x3fb   : > { %12721 = vmatmul.mubr.msk.bf16.gmra.mrb[104].mxu0 %vm1728_vm8, %v3693_v59 }
 0x3fc   : > { %12726 = vmatprep.mubr.msk.bf16.mxu0 %vm1728_vm8, %v15917_v58  ;;  %v621_v58 = vadd.s32 13, %v15860_v39 }
 0x3fe   : > { %vm641_vm15 = vcmp.ge.s32.totalorder %v621_v58, 0  ;;  %vm661_vm1 = vcmp.lt.s32.totalorder %v621_v58, 16  ;;  %v16357_v58 = vld [vmem:[%s18469_s7 + $0x14] sm:$0x7] }
 0x3ff   : > { %vm16103_vm9 = vmand %vm641_vm15, %vm661_vm1 }
 0x400   : > { %v18927_v63 = vsel %vm16103_vm9, 4294967295, %v18926_v63  ;;  %v3694_v23 = vsel %vm16103_vm9, %v16002_v7, 0  ;;  %v18929_v7 = vmov 0 }
 0x401   : > { %18928 = vst [vmem:[#allocation36_spill] sm:$0xff] %v18927_v63 }
 0x403   : > { %12727 = vmatmul.mubr.msk.bf16.vlgmr.msra.gmra.mrb[92].mxu0 %vm1728_vm8, %v15936_v55 }
 0x404   : > { %12743 = vmatpush3.bf16.msra.mxu0 %v4176_v49  ;;  %12730 = vmatprep.mubr.msk.bf16.mxu0 %vm1728_vm8, %v15942_v53 }
 0x405   : > { %14294 = vmatprep.subr.msk.bf16.mxu0 %vm18603_vm4, %v11510_v45 }
 0x40b   : > { %12731 = vmatmul.mubr.msk.bf16.gmra.mrb[96].mxu0 %vm1728_vm8, %v15963_v48 }
 0x40c   : > { %12734 = vmatprep.mubr.msk.bf16.mxu0 %vm1728_vm8, %v15968_v19 }
 0x413   : > { %12735 = vmatmul.mubr.msk.bf16.gmra.mrb[100].mxu0 %vm1728_vm8, %v15989_v18 }
 0x414   : > { %12738 = vmatprep.mubr.msk.bf16.mxu0 %vm1728_vm8, %v3693_v59 }
 0x41b   : > { %12739 = vmatmul.mubr.msk.bf16.gmra.mrb[104].mxu0 %vm1728_vm8, %v3694_v23 }
 0x41c   : > { %12744 = vmatprep.mubr.msk.bf16.mxu0 %vm1728_vm8, %v15936_v55  ;;  %v622_v55 = vadd.s32 14, %v15860_v39 }
 0x41e   : > { %vm642_vm15 = vcmp.ge.s32.totalorder %v622_v55, 0  ;;  %vm662_vm1 = vcmp.lt.s32.totalorder %v622_v55, 16 }
 0x41f   : > { %vm16129_vm6 = vmand %vm642_vm15, %vm662_vm1 }
 0x420   : > { %v18930_v7 = vsel %vm16129_vm6, 4294967295, %v18929_v7  ;;  %v3695_v24 = vsel %vm16129_vm6, %v16000_v29, 0  ;;  %v18932_v29 = vmov 0 }
 0x421   : > { %18931 = vst [vmem:[#allocation40_spill] sm:$0xff] %v18930_v7 }
 0x423   : > { %12745 = vmatmul.mubr.msk.bf16.vlgmr.msra.gmra.mrb[92].mxu0 %vm1728_vm8, %v15942_v53 }
 0x424   : > { %12761 = vmatpush3.bf16.msra.mxu0 %v4297_v51  ;;  %12748 = vmatprep.mubr.msk.bf16.mxu0 %vm1728_vm8, %v15963_v48 }
 0x425   : > { %14295 = vmatprep.subr.msk.bf16.mxu0 %vm18603_vm4, %v11519_v6 }
 0x42b   : > { %12749 = vmatmul.mubr.msk.bf16.gmra.mrb[96].mxu0 %vm1728_vm8, %v15968_v19 }
 0x42c   : > { %12752 = vmatprep.mubr.msk.bf16.mxu0 %vm1728_vm8, %v15989_v18 }
 0x433   : > { %12753 = vmatmul.mubr.msk.bf16.gmra.mrb[100].mxu0 %vm1728_vm8, %v3693_v59 }
 0x434   : > { %12756 = vmatprep.mubr.msk.bf16.mxu0 %vm1728_vm8, %v3694_v23 }
 0x43b   : > { %12757 = vmatmul.mubr.msk.bf16.gmra.mrb[104].mxu0 %vm1728_vm8, %v3695_v24 }
 0x43c   : > { %12762 = vmatprep.mubr.msk.bf16.mxu0 %vm1728_vm8, %v15942_v53  ;;  %v623_v53 = vadd.s32 15, %v15860_v39 }
 0x43e   : > { %vm643_vm15 = vcmp.ge.s32.totalorder %v623_v53, 0  ;;  %vm663_vm1 = vcmp.lt.s32.totalorder %v623_v53, 16 }
 0x43f   : > { %vm16154_vm6 = vmand %vm643_vm15, %vm663_vm1 }
 0x440   : > { %v18933_v29 = vsel %vm16154_vm6, 4294967295, %v18932_v29  ;;  %v3696_v40 = vsel %vm16154_vm6, %v16020_v36, 0  ;;  %v624_v36 = vadd.s32 16, %v15860_v39 }
 0x441   : > { %18934 = vst [vmem:[#allocation38_spill] sm:$0xff] %v18933_v29 }
 0x442   : > { %vm644_vm6 = vcmp.ge.s32.totalorder %v624_v36, 0  ;;  %vm664_vm9 = vcmp.lt.s32.totalorder %v624_v36, 16 }
 0x443   : > { %12763 = vmatmul.mubr.msk.bf16.vlgmr.msra.gmra.mrb[92].mxu0 %vm1728_vm8, %v15963_v48 }
 0x444   : > { %12779 = vmatpush3.bf16.msra.mxu0 %v4418_v8  ;;  %12766 = vmatprep.mubr.msk.bf16.mxu0 %vm1728_vm8, %v15968_v19 }
 0x445   : > { %14296 = vmatprep.subr.msk.bf16.mxu0 %vm18603_vm4, %v11529_v17 }
 0x44b   : > { %12767 = vmatmul.mubr.msk.bf16.gmra.mrb[96].mxu0 %vm1728_vm8, %v15989_v18 }
 0x44c   : > { %12770 = vmatprep.mubr.msk.bf16.mxu0 %vm1728_vm8, %v3693_v59 }
 0x453   : > { %12771 = vmatmul.mubr.msk.bf16.gmra.mrb[100].mxu0 %vm1728_vm8, %v3694_v23 }
 0x454   : > { %12774 = vmatprep.mubr.msk.bf16.mxu0 %vm1728_vm8, %v3695_v24 }
 0x45b   : > { %12775 = vmatmul.mubr.msk.bf16.gmra.mrb[104].mxu0 %vm1728_vm8, %v3696_v40 }
 0x45c   : > { %12780 = vmatprep.mubr.msk.bf16.mxu0 %vm1728_vm8, %v15963_v48  ;;  %v609_v48 = vadd.s32 1, %v15860_v39 }
 0x45e   : > { %vm629_vm15 = vcmp.ge.s32.totalorder %v609_v48, 0  ;;  %vm649_vm1 = vcmp.lt.s32.totalorder %v609_v48, 16 }
 0x45f   : > { %vm669_vm14 = vmand %vm629_vm15, %vm649_vm1  ;;  %vm628_vm15 = vcmp.ge.s32.totalorder %v15860_v39, 0  ;;  %vm648_vm1 = vcmp.lt.s32.totalorder %v15860_v39, 16 }
 0x460   : > { %v4686_v4 = vsel %vm669_vm14, %v16039_v3, 0  ;;  %v16207_v3 = vsel %vm15872_vm5, %v16070_v42, 0  ;;  %vm18951_vm14 = vnez %v18924_v61  ;;  %v11588_v42 = vld [vmem:[%s18469_s7 + $0x10] sm:$0x7] }
 0x461   : > { %v16263_v12 = vsel %vm18951_vm14, %v18950_v32, 0  ;;  %vm18955_vm14 = vnez %v18930_v7 }
 0x462   : > { %v16279_v38 = vsel %vm18955_vm14, %v18954_v27, 0 }
 0x463   : > { %12781 = vmatmul.mubr.msk.bf16.vlgmr.msra.gmra.mrb[92].mxu0 %vm1728_vm8, %v15968_v19  ;;  %v610_v19 = vadd.s32 2, %v15860_v39 }
 0x464   : > { %12797 = vmatpush3.bf16.msra.mxu0 %v4751_v15  ;;  %12784 = vmatprep.mubr.msk.bf16.mxu0 %vm1728_vm8, %v15989_v18  ;;  %v18935_v18 = vmov 0 }
 0x465   : > { %14297 = vmatprep.subr.msk.bf16.mxu0 %vm18603_vm4, %v4705_v54  ;;  %vm16180_vm4 = vmand %vm644_vm6, %vm664_vm9  ;;  %vm630_vm7 = vcmp.ge.s32.totalorder %v610_v19, 0  ;;  %vm650_vm11 = vcmp.lt.s32.totalorder %v610_v19, 16  ;;  %vm18953_vm9 = vnez %v18927_v63 }
 0x466   : > { %v18936_v18 = vsel %vm16180_vm4, 4294967295, %v18935_v18  ;;  %v3697_v62 = vsel %vm16180_vm4, %v16018_v50, 0  ;;  %vm670_vm12 = vmand %vm630_vm7, %vm650_vm11  ;;  %v16199_v50 = vsel %vm15978_vm3, %v16056_v43, 0  ;;  %vm18943_vm7 = vnez %v18908_v47 }
 0x467   : > { %18937 = vst [vmem:[#allocation39_spill] sm:$0xff] %v18936_v18  ;;  %v4687_v14 = vsel %vm670_vm12, %v16060_v46, 0  ;;  %vm18939_vm6 = vmmov %vm18938_vm10  ;;  %v16235_v44 = vsel %vm18943_vm7, %v18942_v37, 0  ;;  %vm18945_vm10 = vnez %v18911_v33  ;;  %v18946_v46 = vld [vmem:[#allocation67_spill] sm:$0xff]  ;;  %vm18947_vm11 = vnez %v18914_v60 }
 0x468   : > { %v16240_v43 = vsel %vm18945_vm10, %v18944_v28, 0  ;;  %v16249_v25 = vsel %vm18947_vm11, %v18946_v46, 0  ;;  %vm18949_vm12 = vnez %v18920_v52  ;;  %v16268_v30 = vsel %vm18953_vm9, %v18952_v13, 0 }
 0x469   : > { %v16254_v22 = vsel %vm18949_vm12, %v18948_v35, 0  ;;  %vm18956_vm9 = vcmask 1042432  }
 0x46a   : > { %v5055_v1 = vsel %vm18956_vm9, %v11558_v0, 0 }
 0x46b   : > { %12785 = vmatmul.mubr.msk.bf16.gmra.mrb[96].mxu0 %vm1728_vm8, %v3693_v59  ;;  %v18959_v59 = vld [vmem:[#allocation70_spill] sm:$0xff] }
 0x46c   : > { %12788 = vmatprep.mubr.msk.bf16.mxu0 %vm1728_vm8, %v3694_v23  ;;  %v16372_v23 = vld [vmem:[%s18468_s6] ss:$0 sm:$0xff] }
 0x473   : > { %12789 = vmatmul.mubr.msk.bf16.gmra.mrb[100].mxu0 %vm1728_vm8, %v3695_v24 }
 0x474   : > { %12792 = vmatprep.mubr.msk.bf16.mxu0 %vm1728_vm8, %v3696_v40 }
 0x47b   : > { %12793 = vmatmul.mubr.msk.bf16.gmra.mrb[104].mxu0 %vm1728_vm8, %v3697_v62 }
 0x47c   : > { %12798 = vmatprep.mubr.msk.bf16.mxu0 %vm1728_vm8, %v4686_v4 }
 0x483   : > { %12799 = vmatmul.mubr.msk.bf16.vlgmr.msra.gmra.mrb[108].mxu0 %vm1728_vm8, %v4687_v14 }
 0x484   : > { %12827 = vmatpush3.bf16.msra.mxu0 %v4902_v2  ;;  %12802 = vmatprep.mubr.msk.bf16.mxu0 %vm1728_vm8, %v16199_v50 }
 0x485   : > { %14298 = vmatprep.subr.msk.bf16.mxu0 %vm18939_vm6, %v11558_v0  ;;  %vm668_vm6 = vmand %vm628_vm15, %vm648_vm1 }
 0x486   : > { %v4685_v57 = vsel %vm668_vm6, %v16044_v9, 0  ;;  %vm18957_vm15 = vmmov %vm18956_vm9  ;;  %v5236_v9 = vsel %vm18956_vm9, %v11573_v56, 0  ;;  %vm18960_vm6 = vnez %v18933_v29 }
 0x487   : > { %vm18958_vm1 = vmmov %vm18956_vm9  ;;  %v16347_v49 = vsel %vm18960_vm6, %v18959_v59, 0 }
 0x488   : > { %vm18962_vm9 = vmmov %vm18958_vm1 }
 0x48b   : > { %12803 = vmatmul.mubr.msk.bf16.gmra.mrb[112].mxu0 %vm1728_vm8, %v16207_v3 }
 0x48c   : > { %12806 = vmatprep.mubr.msk.bf16.mxu0 %vm1728_vm8, %v16212_v34 }
 0x493   : > { %12807 = vmatmul.mubr.msk.bf16.gmra.mrb[116].mxu0 %vm1728_vm8, %v16221_v16 }
 0x494   : > { %12810 = vmatprep.mubr.msk.bf16.mxu0 %vm1728_vm8, %v16226_v31 }
 0x49b   : > { %12811 = vmatmul.mubr.msk.bf16.gmra.mrb[120].mxu0 %vm1728_vm8, %v16235_v44 }
 0x49c   : > { %12814 = vmatprep.mubr.msk.bf16.mxu0 %vm1728_vm8, %v16240_v43 }
 0x4a3   : > { %12815 = vmatmul.mubr.msk.bf16.gmra.mrb[124].mxu0 %vm1728_vm8, %v16249_v25 }
 0x4a4   : > { %12818 = vmatprep.mubr.msk.bf16.mxu0 %vm1728_vm8, %v16254_v22 }
 0x4ab   : > { %12819 = vmatmul.mubr.msk.bf16.gmra.mrb[128].mxu0 %vm1728_vm8, %v16263_v12 }
 0x4ac   : > { %12822 = vmatprep.mubr.msk.bf16.mxu0 %vm1728_vm8, %v16268_v30 }
 0x4b3   : > { %12823 = vmatmul.mubr.msk.bf16.gmra.mrb[132].mxu0 %vm1728_vm8, %v16279_v38 }
 0x4b4   : > { %12828 = vmatprep.mubr.msk.bf16.mxu0 %vm1728_vm8, %v4685_v57 }
 0x4bb   : > { %12829 = vmatmul.mubr.msk.bf16.vlgmr.msra.gmra.mrb[108].mxu0 %vm1728_vm8, %v4686_v4 }
 0x4bc   : > { %12857 = vmatpush3.bf16.msra.mxu0 %v5055_v1  ;;  %12832 = vmatprep.mubr.msk.bf16.mxu0 %vm1728_vm8, %v4687_v14 }
 0x4bd   : > { %14299 = vmatprep.subr.msk.bf16.mxu0 %vm18957_vm15, %v11573_v56  ;;  %vm18961_vm15 = vmmov %vm18958_vm1 }
 0x4be   : > { %v5417_v45 = vsel %vm18961_vm15, %v11588_v42, 0  ;;  %vm18964_vm15 = vmmov %vm18958_vm1 }
 0x4c3   : > { %12833 = vmatmul.mubr.msk.bf16.gmra.mrb[112].mxu0 %vm1728_vm8, %v16199_v50 }
 0x4c4   : > { %12836 = vmatprep.mubr.msk.bf16.mxu0 %vm1728_vm8, %v16207_v3 }
 0x4cb   : > { %12837 = vmatmul.mubr.msk.bf16.gmra.mrb[116].mxu0 %vm1728_vm8, %v16212_v34 }
 0x4cc   : > { %12840 = vmatprep.mubr.msk.bf16.mxu0 %vm1728_vm8, %v16221_v16 }
 0x4d3   : > { %12841 = vmatmul.mubr.msk.bf16.gmra.mrb[120].mxu0 %vm1728_vm8, %v16226_v31 }
 0x4d4   : > { %12844 = vmatprep.mubr.msk.bf16.mxu0 %vm1728_vm8, %v16235_v44 }
 0x4db   : > { %12845 = vmatmul.mubr.msk.bf16.gmra.mrb[124].mxu0 %vm1728_vm8, %v16240_v43 }
 0x4dc   : > { %12848 = vmatprep.mubr.msk.bf16.mxu0 %vm1728_vm8, %v16249_v25 }
 0x4e3   : > { %12849 = vmatmul.mubr.msk.bf16.gmra.mrb[128].mxu0 %vm1728_vm8, %v16254_v22 }
 0x4e4   : > { %12852 = vmatprep.mubr.msk.bf16.mxu0 %vm1728_vm8, %v16263_v12 }
 0x4eb   : > { %12853 = vmatmul.mubr.msk.bf16.gmra.mrb[132].mxu0 %vm1728_vm8, %v16268_v30 }
 0x4ec   : > { %12858 = vmatprep.mubr.msk.bf16.mxu0 %vm1728_vm8, %v4687_v14 }
 0x4f3   : > { %12859 = vmatmul.mubr.msk.bf16.vlgmr.msra.gmra.mrb[108].mxu0 %vm1728_vm8, %v16199_v50 }
 0x4f4   : > { %12887 = vmatpush3.bf16.msra.mxu0 %v5236_v9  ;;  %12862 = vmatprep.mubr.msk.bf16.mxu0 %vm1728_vm8, %v16207_v3 }
 0x4f5   : > { %14300 = vmatprep.subr.msk.bf16.mxu0 %vm18958_vm1, %v11588_v42 }
 0x4fb   : > { %12863 = vmatmul.mubr.msk.bf16.gmra.mrb[112].mxu0 %vm1728_vm8, %v16212_v34 }
 0x4fc   : > { %12866 = vmatprep.mubr.msk.bf16.mxu0 %vm1728_vm8, %v16221_v16 }
 0x503   : > { %12867 = vmatmul.mubr.msk.bf16.gmra.mrb[116].mxu0 %vm1728_vm8, %v16226_v31 }
 0x504   : > { %12870 = vmatprep.mubr.msk.bf16.mxu0 %vm1728_vm8, %v16235_v44 }
 0x50b   : > { %12871 = vmatmul.mubr.msk.bf16.gmra.mrb[120].mxu0 %vm1728_vm8, %v16240_v43 }
 0x50c   : > { %12874 = vmatprep.mubr.msk.bf16.mxu0 %vm1728_vm8, %v16249_v25 }
 0x513   : > { %12875 = vmatmul.mubr.msk.bf16.gmra.mrb[124].mxu0 %vm1728_vm8, %v16254_v22 }
 0x514   : > { %12878 = vmatprep.mubr.msk.bf16.mxu0 %vm1728_vm8, %v16263_v12 }
 0x51b   : > { %12879 = vmatmul.mubr.msk.bf16.gmra.mrb[128].mxu0 %vm1728_vm8, %v16268_v30 }
 0x51c   : > { %12882 = vmatprep.mubr.msk.bf16.mxu0 %vm1728_vm8, %v16279_v38 }
 0x523   : > { %12883 = vmatmul.mubr.msk.bf16.gmra.mrb[132].mxu0 %vm1728_vm8, %v16347_v49 }
 0x524   : > { %12888 = vmatprep.mubr.msk.bf16.mxu0 %vm1728_vm8, %v16199_v50 }
 0x52b   : > { %12889 = vmatmul.mubr.msk.bf16.vlgmr.msra.gmra.mrb[108].mxu0 %vm1728_vm8, %v16207_v3 }
 0x52c   : > { %12917 = vmatpush3.bf16.msra.mxu0 %v5417_v45  ;;  %12892 = vmatprep.mubr.msk.bf16.mxu0 %vm1728_vm8, %v16212_v34 }
 0x52d   : > { %14301 = vmatprep.subr.msk.bf16.mxu0 %vm18962_vm9, %v16357_v58  ;;  %vm18965_vm9 = vmmov %vm18958_vm1 }
 0x533   : > { %12893 = vmatmul.mubr.msk.bf16.gmra.mrb[112].mxu0 %vm1728_vm8, %v16221_v16 }
 0x534   : > { %12896 = vmatprep.mubr.msk.bf16.mxu0 %vm1728_vm8, %v16226_v31 }
 0x536   : > { %v12782_v51 = vpop.f32.mrb[92].mxu0 }
 0x537   : > { %v4542_v6 = vadd.f32 %v12782_v51, %v16372_v23  ;;  %v4454_v55 = vpop.f32.mrb[93].mxu0 }
 0x538   : > { %v4540_v24 = vadd.f32 %v16372_v23, %v4454_v55  ;;  %v12783_v8 = vpop.f32.mrb[94].mxu0 }
 0x539   : > { %v4558_v17 = vmax.f32 %v4542_v6, 0.0  ;;  %v4543_v53 = vadd.f32 %v12783_v8, %v16372_v23  ;;  %v4457_v40 = vpop.f32.mrb[95].mxu0 }
 0x53a   : > { %v4556_v15 = vmax.f32 %v4540_v24, 0.0  ;;  %v4541_v54 = vadd.f32 %v16372_v23, %v4457_v40 }
 0x53b   : > { %12897 = vmatmul.mubr.msk.bf16.gmra.mrb[116].mxu0 %vm1728_vm8, %v16235_v44  ;;  %4592 = vrot.lane.b32.xlu1 %v4558_v17, %s18738_s14  ;;  %v4559_v48 = vmax.f32 %v4543_v53, 0.0 }
 0x53c   : > { %12900 = vmatprep.mubr.msk.bf16.mxu0 %vm1728_vm8, %v16240_v43  ;;  %4588 = vrot.lane.b32.xlu0 %v4556_v15, %s18738_s14  ;;  %v4557_v36 = vmax.f32 %v4541_v54, 0.0 }
 0x53e   : > { %v12786_v19 = vpop.f32.mrb[96].mxu0 }
 0x53f   : > { %v4546_v62 = vadd.f32 %v12786_v19, %v16372_v23  ;;  %4594 = vrot.lane.b32.xlu1 %v4559_v48, %s18738_s14  ;;  %v4470_v4 = vpop.f32.mrb[97].mxu0 }
 0x540   : > { %4590 = vrot.lane.b32.xlu0 %v4557_v36, %s18738_s14  ;;  %v12787_v2 = vpop.f32.mrb[98].mxu0  ;;  %v4544_v10 = vadd.f32 %v16372_v23, %v4470_v4  ;;  %v5598_v4 = vsel %vm18958_vm1, %v16357_v58, 0 }
 0x541   : > { %v4562_v14 = vmax.f32 %v4546_v62, 0.0  ;;  %v4547_v0 = vadd.f32 %v12787_v2, %v16372_v23  ;;  %v4473_v50 = vpop.f32.mrb[99].mxu0  ;;  %v18963_v62 = vld [vmem:[#allocation73_spill] sm:$0xff]  ;;  %v11618_v2 = vld [vmem:[%s18469_s7 + $0x18] sm:$0x7] }
 0x542   : > { %v4545_v37 = vadd.f32 %v16372_v23, %v4473_v50  ;;  %v4560_v28 = vmax.f32 %v4544_v10, 0.0 }
 0x543   : > { %v4563_v41 = vmax.f32 %v4547_v0, 0.0  ;;  %12901 = vmatmul.mubr.msk.bf16.gmra.mrb[120].mxu0 %vm1728_vm8, %v16249_v25  ;;  %v18966_v0 = vld [vmem:[#allocation72_spill] sm:$0xff] }
 0x544   : > { %12904 = vmatprep.mubr.msk.bf16.mxu0 %vm1728_vm8, %v16254_v22  ;;  %4600 = vrot.lane.b32.xlu0 %v4562_v14, %s18738_s14  ;;  %v4561_v35 = vmax.f32 %v4545_v37, 0.0  ;;  %v625_v14 = vadd.s32 17, %v15860_v39 }
 0x545   : > { %4602 = vrot.lane.b32.xlu1 %v4563_v41, %s18738_s14 }
 0x546   : > { %v12790_v46 = vpop.f32.mrb[100].mxu0 }
 0x547   : > { %v4550_v32 = vadd.f32 %v12790_v46, %v16372_v23  ;;  %v4486_v13 = vpop.f32.mrb[101].mxu0 }
 0x548   : > { %4596 = vrot.lane.b32.xlu0 %v4560_v28, %s18738_s14  ;;  %v12791_v27 = vpop.f32.mrb[102].mxu0  ;;  %v4548_v9 = vadd.f32 %v16372_v23, %v4486_v13 }
 0x549   : > { %v4566_v57 = vmax.f32 %v4550_v32, 0.0  ;;  %v4551_v1 = vadd.f32 %v12791_v27, %v16372_v23  ;;  %4598 = vrot.lane.b32.xlu1 %v4561_v35, %s18738_s14  ;;  %v4489_v56 = vpop.f32.mrb[103].mxu0 }
 0x54a   : > { %v4549_v59 = vadd.f32 %v16372_v23, %v4489_v56  ;;  %v4564_v45 = vmax.f32 %v4548_v9, 0.0 }
 0x54b   : > { %v4567_v42 = vmax.f32 %v4551_v1, 0.0  ;;  %12905 = vmatmul.mubr.msk.bf16.gmra.mrb[124].mxu0 %vm1728_vm8, %v16263_v12  ;;  %v626_v1 = vadd.s32 18, %v15860_v39 }
 0x54c   : > { %12908 = vmatprep.mubr.msk.bf16.mxu0 %vm1728_vm8, %v16268_v30  ;;  %4608 = vrot.lane.b32.xlu0 %v4566_v57, %s18738_s14  ;;  %v4565_v6 = vmax.f32 %v4549_v59, 0.0 }
 0x54d   : > { %4610 = vrot.lane.b32.xlu1 %v4567_v42, %s18738_s14 }
 0x54e   : > { %v12794_v51 = vpop.f32.mrb[104].mxu0 }
 0x54f   : > { %v4554_v55 = vadd.f32 %v12794_v51, %v16372_v23  ;;  %v4502_v24 = vpop.f32.mrb[105].mxu0  ;;  %v18968_v51 = vld [vmem:[#allocation75_spill] sm:$0xff] }
 0x550   : > { %4604 = vrot.lane.b32.xlu0 %v4564_v45, %s18738_s14  ;;  %v12795_v8 = vpop.f32.mrb[106].mxu0  ;;  %v4552_v15 = vadd.f32 %v16372_v23, %v4502_v24 }
 0x551   : > { %v4570_v17 = vmax.f32 %v4554_v55, 0.0  ;;  %v4555_v53 = vadd.f32 %v12795_v8, %v16372_v23  ;;  %4606 = vrot.lane.b32.xlu1 %v4565_v6, %s18738_s14  ;;  %v4505_v40 = vpop.f32.mrb[107].mxu0 }
 0x552   : > { %v4553_v48 = vadd.f32 %v16372_v23, %v4505_v40  ;;  %v4568_v36 = vmax.f32 %v4552_v15, 0.0  ;;  %v16425_v23 = vsel %vm16180_vm4, %v18963_v62, 0  ;;  %vm665_vm4 = vcmp.lt.s32.totalorder %v625_v14, 16 }
 0x553   : > { %v4571_v54 = vmax.f32 %v4555_v53, 0.0  ;;  %12909 = vmatmul.mubr.msk.bf16.gmra.mrb[128].mxu0 %vm1728_vm8, %v16279_v38 }
 0x554   : > { %12912 = vmatprep.mubr.msk.bf16.mxu0 %vm1728_vm8, %v16347_v49  ;;  %4616 = vrot.lane.b32.xlu0 %v4570_v17, %s18738_s14  ;;  %v4569_v19 = vmax.f32 %v4553_v48, 0.0 }
 0x555   : > { %4618 = vrot.lane.b32.xlu1 %v4571_v54, %s18738_s14 }
 0x558   : > { %4612 = vrot.lane.b32.xlu0 %v4568_v36, %s18738_s14 }
 0x559   : > { %4614 = vrot.lane.b32.xlu1 %v4569_v19, %s18738_s14  ;;  %s14535_s14 = smov [#allocation2]  }
 0x55a   : > { %s14438_s2 = sshll.u32 %s14535_s14, 4  ;;  %s14439_s2 = int_to_ptr.vmem [resolvable:$false] %s14438_s2 }
 0x55b   : > { %12913 = vmatmul.mubr.msk.bf16.gmra.mrb[132].mxu0 %vm1728_vm8, %v16425_v23  ;;  %s14440_s3 = scalar_lea.vmem %s14439_s2, 4096  ;;  %p14441_p2 = scmp.lt.s32.totalorder %s18396_s18, %s14439_s2 }
 0x55c   : > { %12918 = vmatprep.mubr.msk.bf16.mxu0 %vm1728_vm8, %v16207_v3  ;;  %v11634_v3 = vld [vmem:[%s18471_s9 + $0x4] sm:$0x7] }
 0x55d   : > { %14303 = vmatprep.subr.msk.bf16.mxu1 %vm18965_vm9, %v11634_v3  ;;  %v6399_v58 = vsel %vm18958_vm1, %v11634_v3, 0  ;;  %vm18967_vm9 = vmmov %vm18958_vm1  ;;  %vm666_vm1 = vcmp.lt.s32.totalorder %v626_v1, 16 }
 0x55e   : > { %13007 = vmatpush3.bf16.msra.mxu1 %v6399_v58  ;;  %v5779_v10 = vsel %vm18967_vm9, %v11618_v2, 0 }
 0x563   : > { %12919 = vmatmul.mubr.msk.bf16.vlgmr.msra.gmra.mrb[108].mxu0 %vm1728_vm8, %v16212_v34 }
 0x564   : > { %12947 = vmatpush3.bf16.msra.mxu0 %v5598_v4  ;;  %12922 = vmatprep.mubr.msk.bf16.mxu0 %vm1728_vm8, %v16221_v16 }
 0x565   : > { %14302 = vmatprep.subr.msk.bf16.mxu0 %vm18964_vm15, %v11618_v2  ;;  %vm645_vm15 = vcmp.ge.s32.totalorder %v625_v14, 0 }
 0x566   : > { %vm685_vm6 = vmand %vm645_vm15, %vm665_vm4  ;;  %vm4636_vm4 = vcmask 130112  }
 0x567   : > { %v16468_v50 = vsel %vm685_vm6, %v18966_v0, 0  ;;  %vm646_vm6 = vcmp.ge.s32.totalorder %v626_v1, 0 }
 0x568   : > { %vm686_vm15 = vmand %vm646_vm6, %vm666_vm1  ;;  %vm18970_vm1 = vcmask 1042432  }
 0x569   : > { %v4703_v6 = vsel %vm686_vm15, %v18968_v51, 0 }
 0x56b   : > { %12923 = vmatmul.mubr.msk.bf16.gmra.mrb[112].mxu0 %vm1728_vm8, %v16226_v31 }
 0x56c   : > { %12926 = vmatprep.mubr.msk.bf16.mxu0 %vm1728_vm8, %v16235_v44 }
 0x573   : > { %12927 = vmatmul.mubr.msk.bf16.gmra.mrb[116].mxu0 %vm1728_vm8, %v16240_v43 }
 0x574   : > { %12930 = vmatprep.mubr.msk.bf16.mxu0 %vm1728_vm8, %v16249_v25 }
 0x57b   : > { %12931 = vmatmul.mubr.msk.bf16.gmra.mrb[120].mxu0 %vm1728_vm8, %v16254_v22 }
 0x57c   : > { %12934 = vmatprep.mubr.msk.bf16.mxu0 %vm1728_vm8, %v16263_v12 }
 0x583   : > { %12935 = vmatmul.mubr.msk.bf16.gmra.mrb[124].mxu0 %vm1728_vm8, %v16268_v30 }
 0x584   : > { %12938 = vmatprep.mubr.msk.bf16.mxu0 %vm1728_vm8, %v16279_v38 }
 0x58b   : > { %12939 = vmatmul.mubr.msk.bf16.gmra.mrb[128].mxu0 %vm1728_vm8, %v16347_v49 }
 0x58c   : > { %12942 = vmatprep.mubr.msk.bf16.mxu0 %vm1728_vm8, %v16425_v23 }
 0x593   : > { %12943 = vmatmul.mubr.msk.bf16.gmra.mrb[132].mxu0 %vm1728_vm8, %v16468_v50 }
 0x594   : > { %12948 = vmatprep.mubr.msk.bf16.mxu0 %vm1728_vm8, %v16212_v34 }
 0x59b   : > { %12949 = vmatmul.mubr.msk.bf16.vlgmr.msra.gmra.mrb[108].mxu0 %vm1728_vm8, %v16221_v16 }
 0x59c   : > { %12977 = vmatpush3.bf16.msra.mxu0 %v5779_v10  ;;  %12952 = vmatprep.mubr.msk.bf16.mxu0 %vm1728_vm8, %v16226_v31 }
 0x5a3   : > { %12953 = vmatmul.mubr.msk.bf16.gmra.mrb[112].mxu0 %vm1728_vm8, %v16235_v44 }
 0x5a4   : > { %12956 = vmatprep.mubr.msk.bf16.mxu0 %vm1728_vm8, %v16240_v43 }
 0x5ab   : > { %12957 = vmatmul.mubr.msk.bf16.gmra.mrb[116].mxu0 %vm1728_vm8, %v16249_v25 }
 0x5ac   : > { %12960 = vmatprep.mubr.msk.bf16.mxu0 %vm1728_vm8, %v16254_v22 }
 0x5ad   : > { %v4593_v34 = vpop.permute.xlu1 %4592 }
 0x5ae   : > { %4639 = vst.msk [vmem:[%s14999_s17 + $0x10] sm:$0xff] %vm4636_vm4, %v4593_v34  ;;  %v4589_v41 = vpop.permute.xlu0 %4588 }
 0x5af   : > { %4637 = vst.msk [vmem:[%s14999_s17] sm:$0xff] %vm4636_vm4, %v4589_v41 }
 0x5b1   : > { %v4595_v37 = vpop.permute.xlu1 %4594 }
 0x5b2   : > { %4640 = vst.msk [vmem:[%s14999_s17 + $0x18] sm:$0xff] %vm4636_vm4, %v4595_v37  ;;  %v4591_v28 = vpop.permute.xlu0 %4590 }
 0x5b3   : > { %4638 = vst.msk [vmem:[%s14999_s17 + $0x8] sm:$0xff] %vm4636_vm4, %v4591_v28  ;;  %12961 = vmatmul.mubr.msk.bf16.gmra.mrb[120].mxu0 %vm1728_vm8, %v16263_v12 }
 0x5b4   : > { %12964 = vmatprep.mubr.msk.bf16.mxu0 %vm1728_vm8, %v16268_v30 }
 0x5b6   : > { %v4601_v46 = vpop.permute.xlu0 %4600 }
 0x5b7   : > { %4643 = vst.msk [vmem:[%s14999_s17 + $0x30] sm:$0xff] %vm4636_vm4, %v4601_v46  ;;  %v4603_v35 = vpop.permute.xlu1 %4602 }
 0x5b8   : > { %4644 = vst.msk [vmem:[%s14999_s17 + $0x38] sm:$0xff] %vm4636_vm4, %v4603_v35 }
 0x5ba   : > { %v4597_v32 = vpop.permute.xlu0 %4596 }
 0x5bb   : > { %4641 = vst.msk [vmem:[%s14999_s17 + $0x20] sm:$0xff] %vm4636_vm4, %v4597_v32  ;;  %12965 = vmatmul.mubr.msk.bf16.gmra.mrb[124].mxu0 %vm1728_vm8, %v16279_v38  ;;  %v4599_v13 = vpop.permute.xlu1 %4598 }
 0x5bc   : > { %4642 = vst.msk [vmem:[%s14999_s17 + $0x28] sm:$0xff] %vm4636_vm4, %v4599_v13  ;;  %12968 = vmatprep.mubr.msk.bf16.mxu0 %vm1728_vm8, %v16347_v49 }
 0x5be   : > { %v4609_v27 = vpop.permute.xlu0 %4608 }
 0x5bf   : > { %4647 = vst.msk [vmem:[%s14999_s17 + $0x50] sm:$0xff] %vm4636_vm4, %v4609_v27  ;;  %v4611_v57 = vpop.permute.xlu1 %4610 }
 0x5c0   : > { %4648 = vst.msk [vmem:[%s14999_s17 + $0x58] sm:$0xff] %vm4636_vm4, %v4611_v57  ;;  %v18971_v57 = vld [vmem:[#allocation31_spill] sm:$0xff] }
 0x5c1   : > { %vm18972_vm15 = vnez %v18971_v57 }
 0x5c2   : > { %v4605_v56 = vpop.permute.xlu0 %4604 }
 0x5c3   : > { %4645 = vst.msk [vmem:[%s14999_s17 + $0x40] sm:$0xff] %vm4636_vm4, %v4605_v56  ;;  %12969 = vmatmul.mubr.msk.bf16.gmra.mrb[128].mxu0 %vm1728_vm8, %v16425_v23  ;;  %v4607_v9 = vpop.permute.xlu1 %4606 }
 0x5c4   : > { %4646 = vst.msk [vmem:[%s14999_s17 + $0x48] sm:$0xff] %vm4636_vm4, %v4607_v9  ;;  %12972 = vmatprep.mubr.msk.bf16.mxu0 %vm1728_vm8, %v16468_v50 }
 0x5c6   : > { %v4617_v42 = vpop.permute.xlu0 %4616 }
 0x5c7   : > { %4651 = vst.msk [vmem:[%s14999_s17 + $0x70] sm:$0xff] %vm4636_vm4, %v4617_v42  ;;  %v4619_v59 = vpop.permute.xlu1 %4618 }
 0x5c8   : > { %4652 = vst.msk [vmem:[%s14999_s17 + $0x78] sm:$0xff] %vm4636_vm4, %v4619_v59 }
 0x5ca   : > { %v4613_v45 = vpop.permute.xlu0 %4612 }
 0x5cb   : > { %4649 = vst.msk [vmem:[%s14999_s17 + $0x60] sm:$0xff] %vm4636_vm4, %v4613_v45  ;;  %12973 = vmatmul.mubr.msk.bf16.gmra.mrb[132].mxu0 %vm1728_vm8, %v4703_v6  ;;  %v4615_v55 = vpop.permute.xlu1 %4614 }
 0x5cc   : > { %4650 = vst.msk [vmem:[%s14999_s17 + $0x68] sm:$0xff] %vm4636_vm4, %v4615_v55  ;;  %12978 = vmatprep.mubr.msk.bf16.mxu0 %vm1728_vm8, %v16221_v16  ;;  %v627_v16 = vadd.s32 19, %v15860_v39  ;;  %v16569_v39 = vld [vmem:[%s18470_s8] ss:$0 sm:$0xff] }
 0x5ce   : > { %vm647_vm9 = vcmp.ge.s32.totalorder %v627_v16, 0  ;;  %vm667_vm4 = vcmp.lt.s32.totalorder %v627_v16, 16 }
 0x5cf   : > { %vm687_vm6 = vmand %vm647_vm9, %vm667_vm4  ;;  %vm18979_vm4 = vsmask.f32 7424 }
 0x5d0   : > { %vm18975_vm9 = vmmov %vm18970_vm1 }
 0x5d3   : > { %12979 = vmatmul.mubr.msk.bf16.vlgmr.msra.gmra.mrb[108].mxu0 %vm1728_vm8, %v16226_v31  ;;  %v18969_v31 = vld [vmem:[#allocation74_spill] sm:$0xff] }
 0x5d4   : > { %12982 = vmatprep.mubr.msk.bf16.mxu0 %vm1728_vm8, %v16235_v44  ;;  %v4704_v44 = vsel %vm687_vm6, %v18969_v31, 0  ;;  %vm18980_vm6 = vmmov %vm18979_vm4 }
 0x5db   : > { %12983 = vmatmul.mubr.msk.bf16.gmra.mrb[112].mxu0 %vm1728_vm8, %v16240_v43  ;;  %v6185_v43 = vld [vmem:[%s18471_s9] sm:$0x7] }
 0x5dc   : > { %12986 = vmatprep.mubr.msk.bf16.mxu0 %vm1728_vm8, %v16249_v25  ;;  %14304 = vmatprep.subr.msk.bf16.mxu1 %vm18970_vm1, %v6185_v43 }
 0x5e3   : > { %12987 = vmatmul.mubr.msk.bf16.gmra.mrb[116].mxu0 %vm1728_vm8, %v16254_v22 }
 0x5e4   : > { %12990 = vmatprep.mubr.msk.bf16.mxu0 %vm1728_vm8, %v16263_v12 }
 0x5eb   : > { %12991 = vmatmul.mubr.msk.bf16.gmra.mrb[120].mxu0 %vm1728_vm8, %v16268_v30 }
 0x5ec   : > { %12994 = vmatprep.mubr.msk.bf16.mxu0 %vm1728_vm8, %v16279_v38 }
 0x5f3   : > { %12995 = vmatmul.mubr.msk.bf16.gmra.mrb[124].mxu0 %vm1728_vm8, %v16347_v49 }
 0x5f4   : > { %12998 = vmatprep.mubr.msk.bf16.mxu0 %vm1728_vm8, %v16425_v23 }
 0x5fb   : > { %12999 = vmatmul.mubr.msk.bf16.gmra.mrb[128].mxu0 %vm1728_vm8, %v16468_v50 }
 0x5fc   : > { %13002 = vmatprep.mubr.msk.bf16.mxu0 %vm1728_vm8, %v4703_v6  ;;  %v16595_v6 = vsel %vm18975_vm9, %v6185_v43, 0  ;;  %vm18983_vm9 = vmmov %vm18979_vm4 }
 0x603   : > { %13003 = vmatmul.mubr.msk.bf16.gmra.mrb[132].mxu0 %vm1728_vm8, %v4704_v44 }
 0x6a6   : > { %v12980_v25 = vpop.f32.mrb[108].mxu0 }
 0x6a7   : > { %v5963_v22 = vadd.f32 %v12980_v25, %v16569_v39  ;;  %v5815_v12 = vpop.f32.mrb[109].mxu0 }
 0x6a8   : > { %v5961_v30 = vadd.f32 %v16569_v39, %v5815_v12  ;;  %v12981_v38 = vpop.f32.mrb[110].mxu0 }
 0x6a9   : > { %v5964_v49 = vadd.f32 %v12981_v38, %v16569_v39  ;;  %v5818_v24 = vpop.f32.mrb[111].mxu0  ;;  %v5991_v17 = vmax.f32 %v5963_v22, 0.0 }
 0x6aa   : > { %v5962_v8 = vadd.f32 %v16569_v39, %v5818_v24  ;;  %v5989_v40 = vmax.f32 %v5961_v30, 0.0 }
 0x6ab   : > { %v5992_v53 = vmax.f32 %v5964_v49, 0.0 }
 0x6ac   : > { %v5990_v15 = vmax.f32 %v5962_v8, 0.0 }
 0x6ad   : > { %v6018_v54 = vpack.c.bf16 %v5992_v53, %v5991_v17 }
 0x6ae   : > { %v6017_v48 = vpack.c.bf16 %v5990_v15, %v5989_v40  ;;  %v12984_v36 = vpop.f32.mrb[112].mxu0 }
 0x6af   : > { %v6040_v19 = vshrl.u32 %v6018_v54, 16  ;;  %v6043_v62 = vshll.u32 %v6018_v54, 16  ;;  %v5967_v23 = vadd.f32 %v12984_v36, %v16569_v39  ;;  %v5831_v4 = vpop.f32.mrb[113].mxu0 }
 0x6b0   : > { %v6032_v2 = vshrl.u32 %v6017_v48, 16  ;;  %v6035_v3 = vshll.u32 %v6017_v48, 16  ;;  %v12985_v58 = vpop.f32.mrb[114].mxu0  ;;  %v5965_v50 = vadd.f32 %v16569_v39, %v5831_v4 }
 0x6b1   : > { %v6042_v14 = vrot.slane %v6040_v19, 6  ;;  %v6045_v0 = vrot.slane %v6043_v62, 7  ;;  %v5968_v10 = vadd.f32 %v12985_v58, %v16569_v39  ;;  %v5834_v34 = vpop.f32.mrb[115].mxu0  ;;  %v5995_v35 = vmax.f32 %v5967_v23, 0.0 }
 0x6b2   : > { %v6034_v41 = vrot.slane %v6032_v2, 6  ;;  %v6037_v37 = vrot.slane %v6035_v3, 7  ;;  %v5966_v28 = vadd.f32 %v16569_v39, %v5834_v34  ;;  %v5993_v9 = vmax.f32 %v5965_v50, 0.0 }
 0x6b3   : > { %v6046_v46 = vor.u32 %v6045_v0, %v6042_v14  ;;  %v5996_v32 = vmax.f32 %v5968_v10, 0.0 }
 0x6b4   : > { %v6038_v13 = vor.u32 %v6037_v37, %v6034_v41  ;;  %v5994_v27 = vmax.f32 %v5966_v28, 0.0 }
 0x6b5   : > { %v16581_v1 = vsel %vm18972_vm15, 0, %v6046_v46  ;;  %v16585_v56 = vsel %vm18972_vm15, %v6046_v46, 0  ;;  %v6020_v42 = vpack.c.bf16 %v5996_v32, %v5995_v35 }
 0x6b6   : > { %v16588_v59 = vshll.u32 %v16581_v1, 16  ;;  %v16592_v45 = vsel %vm18972_vm15, 0, %v6038_v13  ;;  %v12988_v51 = vpop.f32.mrb[116].mxu0  ;;  %v16598_v55 = vshll.u32 %v16585_v56, 16  ;;  %v6019_v44 = vpack.c.bf16 %v5994_v27, %v5993_v9 }
 0x6b7   : > { %18974 = vst [vmem:[#allocation41_spill] sm:$0xff] %v16592_v45  ;;  %v6056_v16 = vshrl.u32 %v6020_v42, 16  ;;  %v6059_v31 = vshll.u32 %v6020_v42, 16  ;;  %v5847_v25 = vpop.f32.mrb[117].mxu0  ;;  %v16602_v22 = vsel %vm18972_vm15, %v6038_v13, 0  ;;  %v5971_v12 = vadd.f32 %v12988_v51, %v16569_v39 }
 0x6b8   : > { %18973 = vst [vmem:[#allocation43_spill] sm:$0xff] %v16588_v59  ;;  %18976 = vst [vmem:[#allocation42_spill] sm:$0xff] %v16598_v55  ;;  %v5969_v30 = vadd.f32 %v16569_v39, %v5847_v25  ;;  %v12989_v38 = vpop.f32.mrb[118].mxu0  ;;  %v16607_v49 = vshll.u32 %v16592_v45, 16  ;;  %v6048_v8 = vshrl.u32 %v6019_v44, 16  ;;  %v6051_v17 = vshll.u32 %v6019_v44, 16 }
 0x6b9   : > { %v6058_v43 = vrot.slane %v6056_v16, 6  ;;  %v6061_v24 = vrot.slane %v6059_v31, 7  ;;  %v5850_v53 = vpop.f32.mrb[119].mxu0  ;;  %v5999_v40 = vmax.f32 %v5971_v12, 0.0  ;;  %v5972_v15 = vadd.f32 %v12989_v38, %v16569_v39 }
 0x6ba   : > { %v5970_v54 = vadd.f32 %v16569_v39, %v5850_v53  ;;  %v16612_v48 = vshrl.u32 %v16592_v45, 16  ;;  %v6050_v19 = vrot.slane %v6048_v8, 6  ;;  %v6053_v62 = vrot.slane %v6051_v17, 7 }
 0x6bb   : > { %v6062_v36 = vor.u32 %v6061_v24, %v6058_v43  ;;  %v6191_v23 = vrot.slane %v16607_v49, 1  ;;  %v5997_v4 = vmax.f32 %v5969_v30, 0.0  ;;  %v6000_v2 = vmax.f32 %v5972_v15, 0.0 }
 0x6bc   : > { %18977 = vst [vmem:[#allocation46_spill] sm:$0xff] %v16612_v48  ;;  %v5998_v3 = vmax.f32 %v5970_v54, 0.0  ;;  %v16616_v58 = vshll.u32 %v16602_v22, 16  ;;  %v6054_v0 = vor.u32 %v6053_v62, %v6050_v19  ;;  %v16624_v10 = vshrl.u32 %v16581_v1, 16  ;;  %v16652_v19 = vld [vmem:[%s18471_s9 + $0x8] sm:$0x7] }
 0x6bd   : > { %v16620_v14 = vsel %vm18972_vm15, 0, %v6062_v36  ;;  %v6192_v50 = vor.u32 %v6191_v23, %v16612_v48  ;;  %v16628_v34 = vsel %vm18972_vm15, %v6062_v36, 0  ;;  %v6022_v41 = vpack.c.bf16 %v6000_v2, %v5999_v40 }
 0x6be   : > { %18978 = vst [vmem:[#allocation44_spill] sm:$0xff] %v16616_v58  ;;  %v6021_v37 = vpack.c.bf16 %v5998_v3, %v5997_v4  ;;  %v12992_v28 = vpop.f32.mrb[120].mxu0  ;;  %v6203_v46 = vrot.slane %v16588_v59, 1  ;;  %v16633_v35 = vsel %vm18972_vm15, 0, %v6054_v0  ;;  %v16637_v32 = vsel %vm18972_vm15, %v6054_v0, 0 }
 0x6bf   : > { %v5975_v13 = vadd.f32 %v12992_v28, %v16569_v39  ;;  %v6196_v27 = vrot.slane %v16616_v58, 1  ;;  %v5863_v9 = vpop.f32.mrb[121].mxu0  ;;  %v6072_v42 = vshrl.u32 %v6022_v41, 16  ;;  %v6075_v51 = vshll.u32 %v6022_v41, 16 }
 0x6c0   : > { %v6064_v16 = vshrl.u32 %v6021_v37, 16  ;;  %v6067_v31 = vshll.u32 %v6021_v37, 16  ;;  %v12993_v44 = vpop.f32.mrb[122].mxu0  ;;  %v5973_v12 = vadd.f32 %v16569_v39, %v5863_v9  ;;  %v6204_v30 = vor.u32 %v6203_v46, %v16624_v10 }
 0x6c1   : > { %v6197_v25 = vsel %vm18979_vm4, %v6192_v50, %v6196_v27  ;;  %v6208_v38 = vrot.slane %v16598_v55, 1  ;;  %v5866_v43 = vpop.f32.mrb[123].mxu0  ;;  %v6074_v24 = vrot.slane %v6072_v42, 6  ;;  %v6077_v8 = vrot.slane %v6075_v51, 7 }
 0x6c2   : > { %v6066_v17 = vrot.slane %v6064_v16, 6  ;;  %v6069_v53 = vrot.slane %v6067_v31, 7  ;;  %13008 = vmatprep.mubr.msk.bf16.mxu1 %vm1728_vm8, %v6197_v25  ;;  %v6003_v40 = vmax.f32 %v5975_v13, 0.0  ;;  %v5976_v54 = vadd.f32 %v12993_v44, %v16569_v39 }
 0x6c3   : > { %v6209_v15 = vsel %vm18980_vm6, %v6204_v30, %v6208_v38  ;;  %v5974_v36 = vadd.f32 %v16569_v39, %v5866_v43  ;;  %v6078_v62 = vor.u32 %v6077_v8, %v6074_v24  ;;  %v6001_v4 = vmax.f32 %v5973_v12, 0.0  ;;  %vm18989_vm6 = vmmov %vm18979_vm4 }
 0x6c4   : > { %v6070_v23 = vor.u32 %v6069_v53, %v6066_v17  ;;  %13009 = vmatmul.mubr.msk.bf16.vlgmr.msra.gmra.mrb[56].mxu1 %vm1728_vm8, %v6209_v15  ;;  %v16656_v2 = vshll.u32 %v16633_v35, 16  ;;  %v6004_v3 = vmax.f32 %v5976_v54, 0.0  ;;  %v16660_v50 = vshrl.u32 %v16633_v35, 16 }
 0x6c5   : > { %13037 = vmatpush3.bf16.msra.mxu1 %v16595_v6  ;;  %v6002_v0 = vmax.f32 %v5974_v36, 0.0  ;;  %v16663_v41 = vshll.u32 %v16637_v32, 16  ;;  %v16667_v37 = vsel %vm18972_vm15, 0, %v6078_v62  ;;  %v16671_v28 = vsel %vm18972_vm15, %v6078_v62, 0 }
 0x6c6   : > { %18981 = vst [vmem:[#allocation45_spill] sm:$0xff] %v16660_v50  ;;  %v16675_v46 = vsel %vm18972_vm15, 0, %v6070_v23  ;;  %v12996_v6 = vpop.f32.mrb[124].mxu0  ;;  %v16678_v13 = vshrl.u32 %v16620_v14, 16  ;;  %14305 = vmatprep.subr.msk.bf16.mxu1 %vm18970_vm1, %v16652_v19  ;;  %v6024_v27 = vpack.c.bf16 %v6004_v3, %v6003_v40  ;;  %v6215_v51 = vrot.slane %v16656_v2, 1  ;;  %vm18990_vm1 = vmmov %vm18979_vm4 }
 0x6c7   : > { %18982 = vst [vmem:[#allocation49_spill] sm:$0xff] %v16675_v46  ;;  %v6023_v9 = vpack.c.bf16 %v6002_v0, %v6001_v4  ;;  %v5979_v42 = vadd.f32 %v12996_v6, %v16569_v39  ;;  %v5879_v16 = vpop.f32.mrb[125].mxu0  ;;  %v16686_v31 = vsel %vm18972_vm15, %v6070_v23, 0  ;;  %v16690_v25 = vshll.u32 %v16620_v14, 16 }
 0x6c8   : > { %v5977_v44 = vadd.f32 %v16569_v39, %v5879_v16  ;;  %v16693_v12 = vshll.u32 %v16628_v34, 16  ;;  %v12997_v30 = vpop.f32.mrb[126].mxu0  ;;  %v6088_v38 = vshrl.u32 %v6024_v27, 16  ;;  %v6091_v43 = vshll.u32 %v6024_v27, 16 }
 0x6c9   : > { %v6080_v24 = vshrl.u32 %v6023_v9, 16  ;;  %v6083_v8 = vshll.u32 %v6023_v9, 16  ;;  %v5882_v17 = vpop.f32.mrb[127].mxu0  ;;  %v6007_v53 = vmax.f32 %v5979_v42, 0.0  ;;  %v6216_v40 = vor.u32 %v6215_v51, %v16660_v50 }
 0x6ca   : > { %v6220_v15 = vrot.slane %v16663_v41, 1  ;;  %v6227_v54 = vrot.slane %v16690_v25, 1  ;;  %v6090_v36 = vrot.slane %v6088_v38, 6  ;;  %v6093_v62 = vrot.slane %v6091_v43, 7 }
 0x6cb   : > { %v6082_v23 = vrot.slane %v6080_v24, 6  ;;  %v6085_v4 = vrot.slane %v6083_v8, 7  ;;  %v6232_v6 = vrot.slane %v16693_v12, 1  ;;  %v5980_v27 = vadd.f32 %v12997_v30, %v16569_v39 }
 0x6cc   : > { %v6221_v3 = vsel %vm18983_vm9, %v6216_v40, %v6220_v15  ;;  %v6228_v0 = vor.u32 %v6227_v54, %v16678_v13  ;;  %v6094_v9 = vor.u32 %v6093_v62, %v6090_v36  ;;  %v6005_v51 = vmax.f32 %v5977_v44, 0.0  ;;  %vm18997_vm9 = vmmov %vm18990_vm1 }
 0x6cd   : > { %v6086_v42 = vor.u32 %v6085_v4, %v6082_v23  ;;  %13012 = vmatprep.mubr.msk.bf16.mxu1 %vm1728_vm8, %v6221_v3  ;;  %v5978_v16 = vadd.f32 %v16569_v39, %v5882_v17  ;;  %v6008_v43 = vmax.f32 %v5980_v27, 0.0  ;;  %v16706_v8 = vshll.u32 %v16675_v46, 16 }
 0x6ce   : > { %v6233_v38 = vsel %vm18979_vm4, %v6228_v0, %v6232_v6  ;;  %v13000_v24 = vpop.f32.mrb[128].mxu0  ;;  %v16709_v40 = vshll.u32 %v16686_v31, 16  ;;  %v16713_v30 = vsel %vm18972_vm15, 0, %v6094_v9  ;;  %v16717_v15 = vsel %vm18972_vm15, %v6094_v9, 0  ;;  %vm19002_vm4 = vmmov %vm18990_vm1 }
 0x6cf   : > { %18984 = vst [vmem:[#allocation47_spill] sm:$0xff] %v16706_v8  ;;  %v16721_v44 = vsel %vm18972_vm15, 0, %v6086_v42  ;;  %13013 = vmatmul.mubr.msk.bf16.gmra.mrb[60].mxu1 %vm1728_vm8, %v6233_v38  ;;  %v16725_v17 = vshrl.u32 %v16675_v46, 16  ;;  %v5895_v54 = vpop.f32.mrb[129].mxu0  ;;  %v6026_v36 = vpack.c.bf16 %v6008_v43, %v6007_v53  ;;  %v6006_v62 = vmax.f32 %v5978_v16, 0.0 }
 0x6d0   : > { %18985 = vst [vmem:[#allocation48_spill] sm:$0xff] %v16709_v40  ;;  %v5983_v23 = vadd.f32 %v13000_v24, %v16569_v39  ;;  %v6239_v4 = vrot.slane %v16706_v8, 1  ;;  %v13001_v3 = vpop.f32.mrb[130].mxu0  ;;  %v16731_v0 = vsel %vm18972_vm15, %v6086_v42, 0  ;;  %v6244_v6 = vrot.slane %v16709_v40, 1 }
 0x6d1   : > { %v5981_v27 = vadd.f32 %v16569_v39, %v5895_v54  ;;  %v16736_v9 = vshll.u32 %v16667_v37, 16  ;;  %v5898_v38 = vpop.f32.mrb[131].mxu0  ;;  %v6104_v18 = vshrl.u32 %v6026_v36, 16  ;;  %v6107_v53 = vshll.u32 %v6026_v36, 16 }
 0x6d2   : > { %v6025_v16 = vpack.c.bf16 %v6006_v62, %v6005_v51  ;;  %v16739_v43 = vshrl.u32 %v16667_v37, 16  ;;  %v6011_v24 = vmax.f32 %v5983_v23, 0.0  ;;  %v6240_v29 = vor.u32 %v6239_v4, %v16725_v17 }
 0x6d3   : > { %18986 = vst [vmem:[#allocation50_spill] sm:$0xff] %v16736_v9  ;;  %v6251_v42 = vrot.slane %v16736_v9, 1  ;;  %v16744_v7 = vshll.u32 %v16671_v28, 16  ;;  %v6106_v63 = vrot.slane %v6104_v18, 6  ;;  %v6109_v54 = vrot.slane %v6107_v53, 7 }
 0x6d4   : > { %18987 = vst [vmem:[#allocation51_spill] sm:$0xff] %v16739_v43  ;;  %v6096_v61 = vshrl.u32 %v6025_v16, 16  ;;  %v6099_v20 = vshll.u32 %v6025_v16, 16  ;;  %v6245_v52 = vsel %vm18989_vm6, %v6240_v29, %v6244_v6  ;;  %v5984_v62 = vadd.f32 %v13001_v3, %v16569_v39  ;;  %vm19006_vm6 = vmmov %vm18990_vm1 }
 0x6d5   : > { %18988 = vst [vmem:[#allocation55_spill] sm:$0xff] %v16744_v7  ;;  %v6252_v36 = vor.u32 %v6251_v42, %v16739_v43  ;;  %v6256_v51 = vrot.slane %v16744_v7, 1  ;;  %v6110_v23 = vor.u32 %v6109_v54, %v6106_v63  ;;  %13016 = vmatprep.mubr.msk.bf16.mxu1 %vm1728_vm8, %v6245_v52  ;;  %v5982_v33 = vadd.f32 %v16569_v39, %v5898_v38 }
 0x6d6   : > { %v6098_v60 = vrot.slane %v6096_v61, 6  ;;  %v6101_v4 = vrot.slane %v6099_v20, 7  ;;  %v13004_v47 = vpop.f32.mrb[132].mxu0  ;;  %v6009_v18 = vmax.f32 %v5981_v27, 0.0  ;;  %v6012_v16 = vmax.f32 %v5984_v62, 0.0 }
 0x6d7   : > { %v6257_v53 = vsel %vm18990_vm1, %v6252_v36, %v6256_v51  ;;  %v5987_v29 = vadd.f32 %v13004_v47, %v16569_v39  ;;  %v5911_v6 = vpop.f32.mrb[133].mxu0  ;;  %v16756_v42 = vsel %vm18972_vm15, 0, %v6110_v23  ;;  %v6010_v20 = vmax.f32 %v5982_v33, 0.0 }
 0x6d8   : > { %v6102_v3 = vor.u32 %v6101_v4, %v6098_v60  ;;  %13017 = vmatmul.mubr.msk.bf16.gmra.mrb[64].mxu1 %vm1728_vm8, %v6257_v53  ;;  %v16760_v52 = vshrl.u32 %v16721_v44, 16  ;;  %v13005_v61 = vpop.f32.mrb[134].mxu0  ;;  %v16764_v63 = vsel %vm18972_vm15, %v6110_v23, 0  ;;  %v6028_v27 = vpack.c.bf16 %v6012_v16, %v6011_v24 }
 0x6d9   : > { %v16767_v47 = vshll.u32 %v16721_v44, 16  ;;  %v16770_v38 = vshll.u32 %v16731_v0, 16  ;;  %v5914_v54 = vpop.f32.mrb[135].mxu0  ;;  %v6027_v36 = vpack.c.bf16 %v6010_v20, %v6009_v18  ;;  %v6015_v51 = vmax.f32 %v5987_v29, 0.0 }
 0x6da   : > { %18991 = vst [vmem:[#allocation53_spill] sm:$0xff] %v16760_v52  ;;  %v16774_v60 = vsel %vm18972_vm15, 0, %v6102_v3  ;;  %v16778_v33 = vsel %vm18972_vm15, %v6102_v3, 0  ;;  %v6120_v62 = vshrl.u32 %v6028_v27, 16  ;;  %v6123_v23 = vshll.u32 %v6028_v27, 16 }
 0x6db   : > { %18992 = vst [vmem:[#allocation54_spill] sm:$0xff] %v16767_v47  ;;  %18993 = vst [vmem:[#allocation57_spill] sm:$0xff] %v16770_v38  ;;  %v6263_v24 = vrot.slane %v16767_v47, 1  ;;  %v5985_v4 = vadd.f32 %v16569_v39, %v5911_v6  ;;  %v6112_v53 = vshrl.u32 %v6027_v36, 16  ;;  %v6115_v16 = vshll.u32 %v6027_v36, 16 }
 0x6dc   : > { %v6268_v26 = vrot.slane %v16770_v38, 1  ;;  %v16784_v5 = vshrl.u32 %v16713_v30, 16  ;;  %v6122_v11 = vrot.slane %v6120_v62, 6  ;;  %v6125_v21 = vrot.slane %v6123_v23, 7 }
 0x6dd   : > { %v6264_v3 = vor.u32 %v6263_v24, %v16760_v52  ;;  %v16788_v18 = vshll.u32 %v16713_v30, 16  ;;  %v6114_v29 = vrot.slane %v6112_v53, 6  ;;  %v6117_v20 = vrot.slane %v6115_v16, 7 }
 0x6de   : > { %18994 = vst [vmem:[#allocation62_spill] sm:$0xff] %v16784_v5  ;;  %v16791_v27 = vshll.u32 %v16717_v15, 16  ;;  %v5988_v6 = vadd.f32 %v13005_v61, %v16569_v39  ;;  %v6126_v36 = vor.u32 %v6125_v21, %v6122_v11  ;;  %v5986_v62 = vadd.f32 %v16569_v39, %v5914_v54 }
 0x6df   : > { %18995 = vst [vmem:[#allocation76_spill] sm:$0xff] %v16788_v18  ;;  %v6269_v38 = vsel %vm18997_vm9, %v6264_v3, %v6268_v26  ;;  %v6275_v47 = vrot.slane %v16788_v18, 1  ;;  %v6118_v23 = vor.u32 %v6117_v20, %v6114_v29  ;;  %v6013_v24 = vmax.f32 %v5985_v4, 0.0  ;;  %vm19014_vm9 = vmmov %vm18990_vm1 }
 0x6e0   : > { %18996 = vst [vmem:[#allocation11_spill] sm:$0xff] %v16791_v27  ;;  %13020 = vmatprep.mubr.msk.bf16.mxu1 %vm1728_vm8, %v6269_v38  ;;  %v6280_v52 = vrot.slane %v16791_v27, 1  ;;  %v6016_v53 = vmax.f32 %v5988_v6, 0.0  ;;  %v16801_v16 = vsel %vm18972_vm15, 0, %v6126_v36  ;;  %v6014_v21 = vmax.f32 %v5986_v62, 0.0 }
 0x6e1   : > { %18998 = vst [vmem:[#allocation63_spill] sm:$0xff] %v16801_v16  ;;  %v6276_v61 = vor.u32 %v6275_v47, %v16784_v5  ;;  %v16805_v11 = vshrl.u32 %v16774_v60, 16  ;;  %v16809_v26 = vsel %vm18972_vm15, 0, %v6118_v23  ;;  %v16813_v39 = vsel %vm18972_vm15, %v6118_v23, 0 }
 0x6e2   : > { %19000 = vst [vmem:[#allocation65_spill] sm:$0xff] %v16809_v26  ;;  %v6030_v38 = vpack.c.bf16 %v6016_v53, %v6015_v51  ;;  %v16816_v54 = vshll.u32 %v16774_v60, 16  ;;  %v6029_v3 = vpack.c.bf16 %v6014_v21, %v6013_v24  ;;  %v16820_v47 = vshll.u32 %v16778_v33, 16 }
 0x6e3   : > { %18999 = vst [vmem:[#allocation61_spill] sm:$0xff] %v16805_v11  ;;  %v6281_v4 = vsel %vm19002_vm4, %v6276_v61, %v6280_v52  ;;  %v16823_v29 = vshrl.u32 %v16756_v42, 16  ;;  %v16828_v51 = vshll.u32 %v16756_v42, 16  ;;  %v16832_v24 = vshll.u32 %v16764_v63, 16  ;;  %vm19015_vm4 = vmmov %vm18990_vm1 }
 0x6e4   : > { %19001 = vst [vmem:[#allocation64_spill] sm:$0xff] %v16816_v54  ;;  %19003 = vst [vmem:[#allocation67_spill] sm:$0xff] %v16820_v47  ;;  %13021 = vmatmul.mubr.msk.bf16.gmra.mrb[68].mxu1 %vm1728_vm8, %v6281_v4  ;;  %v6136_v20 = vshrl.u32 %v6030_v38, 16  ;;  %v6139_v6 = vshll.u32 %v6030_v38, 16  ;;  %v6287_v62 = vrot.slane %v16816_v54, 1  ;;  %v6128_v23 = vshrl.u32 %v6029_v3, 16 }
 0x6e5   : > { %19004 = vst [vmem:[#allocation66_spill] sm:$0xff] %v16828_v51  ;;  %v6131_v53 = vshll.u32 %v6029_v3, 16  ;;  %v6292_v52 = vrot.slane %v16820_v47, 1  ;;  %19005 = vst [vmem:[#allocation69_spill] sm:$0xff] %v16832_v24  ;;  %v6299_v4 = vrot.slane %v16828_v51, 1  ;;  %v16839_v3 = vshll.u32 %v16809_v26, 16 }
 0x6e6   : > { %v6138_v61 = vrot.slane %v6136_v20, 6  ;;  %v6141_v21 = vrot.slane %v6139_v6, 7  ;;  %v6288_v27 = vor.u32 %v6287_v62, %v16805_v11  ;;  %v6130_v18 = vrot.slane %v6128_v23, 6 }
 0x6e7   : > { %v6133_v38 = vrot.slane %v6131_v53, 7  ;;  %v6300_v7 = vor.u32 %v6299_v4, %v16823_v29  ;;  %19007 = vst [vmem:[#allocation68_spill] sm:$0xff] %v16839_v3  ;;  %v6304_v20 = vrot.slane %v16832_v24, 1  ;;  %v16844_v6 = vshll.u32 %v16813_v39, 16 }
 0x6e8   : > { %v6142_v5 = vor.u32 %v6141_v21, %v6138_v61  ;;  %v6293_v54 = vsel %vm19006_vm6, %v6288_v27, %v6292_v52  ;;  %v16847_v62 = vshll.u32 %v16801_v16, 16  ;;  %v16851_v23 = vsel %vm18972_vm15, %v6126_v36, 0  ;;  %vm19016_vm6 = vmmov %vm18990_vm1 }
 0x6e9   : > { %v6134_v47 = vor.u32 %v6133_v38, %v6130_v18  ;;  %13024 = vmatprep.mubr.msk.bf16.mxu1 %vm1728_vm8, %v6293_v54  ;;  %19008 = vst [vmem:[#allocation71_spill] sm:$0xff] %v16844_v6  ;;  %v16854_v27 = vshrl.u32 %v16809_v26, 16  ;;  %v6311_v53 = vrot.slane %v16839_v3, 1  ;;  %v6305_v52 = vsel %vm18990_vm1, %v6300_v7, %v6304_v20 }
 0x6ea   : > { %19009 = vst [vmem:[#allocation70_spill] sm:$0xff] %v16847_v62  ;;  %v6323_v61 = vrot.slane %v16847_v62, 1  ;;  %v16869_v36 = vsel %vm18972_vm15, 0, %v6142_v5  ;;  %v6316_v4 = vrot.slane %v16844_v6, 1  ;;  %v16881_v7 = vshll.u32 %v16851_v23, 16 }
 0x6eb   : > { %19010 = vst [vmem:[#allocation73_spill] sm:$0xff] %v16854_v27  ;;  %v16859_v18 = vsel %vm18972_vm15, 0, %v6134_v47  ;;  %v16863_v54 = vsel %vm18972_vm15, %v6134_v47, 0  ;;  %19012 = vst [vmem:[#allocation75_spill] sm:$0xff] %v16869_v36  ;;  %v6312_v21 = vor.u32 %v6311_v53, %v16854_v27  ;;  %v16878_v47 = vshrl.u32 %v16801_v16, 16 }
 0x6ec   : > { %19011 = vst [vmem:[#allocation72_spill] sm:$0xff] %v16859_v18  ;;  %13025 = vmatmul.mubr.msk.bf16.gmra.mrb[72].mxu1 %vm1728_vm8, %v6305_v52  ;;  %v16875_v38 = vshll.u32 %v16859_v18, 16  ;;  %v16884_v20 = vshll.u32 %v16863_v54, 16  ;;  %v16888_v52 = vshrl.u32 %v16859_v18, 16  ;;  %v16894_v3 = vshll.u32 %v16869_v36, 16 }
 0x6ed   : > { %v6317_v62 = vsel %vm19014_vm9, %v6312_v21, %v6316_v4  ;;  %v6324_v6 = vor.u32 %v6323_v61, %v16878_v47  ;;  %v6328_v51 = vrot.slane %v16881_v7, 1  ;;  %v16901_v21 = vsel %vm18972_vm15, %v6142_v5, 0 }
 0x6ee   : > { %19013 = vst [vmem:[#allocation74_spill] sm:$0xff] %v16875_v38  ;;  %v6335_v53 = vrot.slane %v16875_v38, 1  ;;  %13028 = vmatprep.mubr.msk.bf16.mxu1 %vm1728_vm8, %v6317_v62  ;;  %v6340_v24 = vrot.slane %v16884_v20, 1  ;;  %v6347_v62 = vrot.slane %v16894_v3, 1  ;;  %v16909_v61 = vshrl.u32 %v16869_v36, 16 }
 0x6ef   : > { %v6329_v38 = vsel %vm19016_vm6, %v6324_v6, %v6328_v51  ;;  %vm19017_vm9 = vcmask 1042432   ;;  %v11678_v6 = vld [vmem:[%s18471_s9 + $0xc] sm:$0x7]  ;;  %vm19019_vm6 = vcmask 1046528  }
 0x6f0   : > { %v6336_v27 = vor.u32 %v6335_v53, %v16888_v52  ;;  %v16912_v53 = vshll.u32 %v16901_v21, 16  ;;  %v6348_v57 = vor.u32 %v6347_v62, %v16909_v61  ;;  %v6837_v51 = vsel %vm19017_vm9, %v16652_v19, 0 }
 0x6f1   : > { %v6751_v19 = vrot.slane %v16602_v22, 1  ;;  %v6756_v62 = vrot.slane %v16633_v35, 1 }
 0x6f2   : > { %v6341_v4 = vsel %vm19015_vm4, %v6336_v27, %v6340_v24  ;;  %v6352_v5 = vrot.slane %v16912_v53, 1  ;;  %vm19018_vm4 = vmmov %vm19017_vm9 }
 0x6f3   : > { %vm19021_vm9 = vmmov %vm19019_vm6 }
 0x6f4   : > { %13029 = vmatmul.mubr.msk.bf16.gmra.mrb[76].mxu1 %vm1728_vm8, %v6329_v38  ;;  %v6353_v24 = vsel %vm18990_vm1, %v6348_v57, %v6352_v5  ;;  %v6750_v57 = vrot.slane %v16592_v45, 1  ;;  %v6753_v38 = vrot.slane %v16581_v1, 1  ;;  %v6757_v5 = vrot.slane %v16637_v32, 1  ;;  %vm19020_vm1 = vmmov %vm19018_vm4 }
 0x6f5   : > { %13032 = vmatprep.mubr.msk.bf16.mxu1 %vm1728_vm8, %v6341_v4  ;;  %v6754_v4 = vrot.slane %v16585_v56, 1 }
 0x6f6   : > { %v6752_v27 = vsel %vm19019_vm6, %v6750_v57, %v6751_v19  ;;  %v6759_v19 = vrot.slane %v16620_v14, 1 }
 0x6fc   : > { %13033 = vmatmul.mubr.msk.bf16.gmra.mrb[80].mxu1 %vm1728_vm8, %v6353_v24  ;;  %v7183_v24 = vsel %vm19020_vm1, %v11678_v6, 0 }
 0x6fd   : > { %13038 = vmatprep.mubr.msk.bf16.mxu1 %vm1728_vm8, %v16592_v45  ;;  %v16965_v45 = vld [vmem:[%s18471_s9 + $0x10] sm:$0x7] }
 0x704   : > { %13039 = vmatmul.mubr.msk.bf16.vlgmr.msra.gmra.mrb[56].mxu1 %vm1728_vm8, %v16581_v1 }
 0x705   : > { %13067 = vmatpush3.bf16.msra.mxu1 %v6837_v51  ;;  %13042 = vmatprep.mubr.msk.bf16.mxu1 %vm1728_vm8, %v16633_v35  ;;  %v6755_v51 = vsel %vm19021_vm9, %v6753_v38, %v6754_v4  ;;  %v6763_v38 = vrot.slane %v16686_v31, 1 }
 0x706   : > { %14306 = vmatprep.subr.msk.bf16.mxu1 %vm19018_vm4, %v11678_v6  ;;  %vm19022_vm4 = vmmov %vm19019_vm6  ;;  %v6760_v6 = vrot.slane %v16628_v34, 1 }
 0x707   : > { %v6758_v57 = vsel %vm19022_vm4, %v6756_v62, %v6757_v5  ;;  %vm19023_vm6 = vmmov %vm19020_vm1  ;;  %v6765_v5 = vrot.slane %v16667_v37, 1 }
 0x708   : > { %vm19024_vm1 = vmmov %vm19022_vm4 }
 0x709   : > { %v6761_v4 = vsel %vm19024_vm1, %v6759_v19, %v6760_v6  ;;  %vm19025_vm9 = vmmov %vm19024_vm1  ;;  %v6771_v6 = vrot.slane %v16713_v30, 1 }
 0x70a   : > { %vm19026_vm4 = vmmov %vm19024_vm1 }
 0x70c   : > { %13043 = vmatmul.mubr.msk.bf16.gmra.mrb[60].mxu1 %vm1728_vm8, %v16620_v14 }
 0x70d   : > { %13046 = vmatprep.mubr.msk.bf16.mxu1 %vm1728_vm8, %v16675_v46 }
 0x714   : > { %13047 = vmatmul.mubr.msk.bf16.gmra.mrb[64].mxu1 %vm1728_vm8, %v16667_v37 }
 0x715   : > { %13050 = vmatprep.mubr.msk.bf16.mxu1 %vm1728_vm8, %v16721_v44 }
 0x71c   : > { %13051 = vmatmul.mubr.msk.bf16.gmra.mrb[68].mxu1 %vm1728_vm8, %v16713_v30 }
 0x71d   : > { %13054 = vmatprep.mubr.msk.bf16.mxu1 %vm1728_vm8, %v16774_v60 }
 0x724   : > { %13055 = vmatmul.mubr.msk.bf16.gmra.mrb[72].mxu1 %vm1728_vm8, %v16756_v42 }
 0x725   : > { %13058 = vmatprep.mubr.msk.bf16.mxu1 %vm1728_vm8, %v16809_v26 }
 0x72c   : > { %13059 = vmatmul.mubr.msk.bf16.gmra.mrb[76].mxu1 %vm1728_vm8, %v16801_v16 }
 0x72d   : > { %13062 = vmatprep.mubr.msk.bf16.mxu1 %vm1728_vm8, %v16859_v18 }
 0x734   : > { %13063 = vmatmul.mubr.msk.bf16.gmra.mrb[80].mxu1 %vm1728_vm8, %v16869_v36 }
 0x735   : > { %13068 = vmatprep.mubr.msk.bf16.mxu1 %vm1728_vm8, %v6752_v27  ;;  %v6762_v27 = vrot.slane %v16675_v46, 1 }
 0x737   : > { %v6764_v62 = vsel %vm19025_vm9, %v6762_v27, %v6763_v38  ;;  %v6772_v27 = vrot.slane %v16717_v15, 1  ;;  %v6774_v38 = vrot.slane %v16774_v60, 1  ;;  %vm19028_vm9 = vmmov %vm19024_vm1 }
 0x73c   : > { %13069 = vmatmul.mubr.msk.bf16.vlgmr.msra.gmra.mrb[56].mxu1 %vm1728_vm8, %v6755_v51  ;;  %v6768_v51 = vrot.slane %v16721_v44, 1 }
 0x73d   : > { %13097 = vmatpush3.bf16.msra.mxu1 %v7183_v24  ;;  %13072 = vmatprep.mubr.msk.bf16.mxu1 %vm1728_vm8, %v6758_v57  ;;  %v6766_v24 = vrot.slane %v16671_v28, 1  ;;  %v6769_v57 = vrot.slane %v16731_v0, 1 }
 0x73e   : > { %14307 = vmatprep.subr.msk.bf16.mxu1 %vm19023_vm6, %v16965_v45  ;;  %vm19027_vm6 = vmmov %vm19024_vm1 }
 0x73f   : > { %v6767_v46 = vsel %vm19026_vm4, %v6765_v5, %v6766_v24  ;;  %v6770_v19 = vsel %vm19027_vm6, %v6768_v51, %v6769_v57  ;;  %v6778_v24 = vrot.slane %v16764_v63, 1  ;;  %v6780_v51 = vrot.slane %v16809_v26, 1  ;;  %vm19029_vm4 = vmmov %vm19024_vm1 }
 0x740   : > { %v6781_v57 = vrot.slane %v16813_v39, 1  ;;  %vm19030_vm6 = vmmov %vm19024_vm1 }
 0x744   : > { %13073 = vmatmul.mubr.msk.bf16.gmra.mrb[60].mxu1 %vm1728_vm8, %v6761_v4  ;;  %v6775_v4 = vrot.slane %v16778_v33, 1 }
 0x745   : > { %13076 = vmatprep.mubr.msk.bf16.mxu1 %vm1728_vm8, %v6764_v62  ;;  %v6773_v62 = vsel %vm19024_vm1, %v6771_v6, %v6772_v27  ;;  %v6782_v6 = vsel %vm19030_vm6, %v6780_v51, %v6781_v57  ;;  %v6783_v27 = vrot.slane %v16801_v16, 1  ;;  %v7013_v51 = vrot.slane %v16607_v49, 2 }
 0x746   : > { %v6776_v5 = vsel %vm19028_vm9, %v6774_v38, %v6775_v4  ;;  %v6784_v38 = vrot.slane %v16851_v23, 1  ;;  %v6786_v4 = vrot.slane %v16859_v18, 1  ;;  %vm19031_vm9 = vmmov %vm19024_vm1  ;;  %v6790_v18 = vrot.slane %v16901_v21, 1 }
 0x747   : > { %vm19033_vm6 = vsmask.f32 6400 }
 0x748   : > { %v6785_v26 = vsel %vm19024_vm1, %v6783_v27, %v6784_v38  ;;  %v18673_v27 = vshrl.u32 %v16585_v56, 16 }
 0x74c   : > { %13077 = vmatmul.mubr.msk.bf16.gmra.mrb[64].mxu1 %vm1728_vm8, %v6767_v46  ;;  %v6777_v46 = vrot.slane %v16756_v42, 1 }
 0x74d   : > { %13080 = vmatprep.mubr.msk.bf16.mxu1 %vm1728_vm8, %v6770_v19 }
 0x74e   : > { %v6779_v19 = vsel %vm19029_vm4, %v6777_v46, %v6778_v24  ;;  %v7012_v46 = vrot.slane %v16612_v48, 1  ;;  %vm19032_vm4 = vmmov %vm19024_vm1  ;;  %vm19034_vm1 = vcmask 1042432  }
 0x750   : > { %v7014_v38 = vor.u32 %v7013_v51, %v7012_v46  ;;  %v7031_v51 = vrot.slane %v16656_v2, 2 }
 0x754   : > { %13081 = vmatmul.mubr.msk.bf16.gmra.mrb[68].mxu1 %vm1728_vm8, %v6773_v62  ;;  %v6787_v62 = vrot.slane %v16863_v54, 1 }
 0x755   : > { %13084 = vmatprep.mubr.msk.bf16.mxu1 %vm1728_vm8, %v6776_v5  ;;  %v18669_v5 = vshrl.u32 %v16602_v22, 16 }
 0x756   : > { %v6788_v24 = vsel %vm19031_vm9, %v6786_v4, %v6787_v62  ;;  %v7021_v62 = vrot.slane %v16624_v10, 1  ;;  %vm19035_vm9 = vmmov %vm19033_vm6 }
 0x757   : > { %v7017_v57 = vrot.slane %v18669_v5, 1  ;;  %v7022_v5 = vrot.slane %v16588_v59, 2 }
 0x75c   : > { %13085 = vmatmul.mubr.msk.bf16.gmra.mrb[72].mxu1 %vm1728_vm8, %v6779_v19  ;;  %v7018_v19 = vrot.slane %v16616_v58, 2  ;;  %v7026_v58 = vrot.slane %v18673_v27, 1  ;;  %v18679_v27 = vshrl.u32 %v16628_v34, 16 }
 0x75d   : > { %13088 = vmatprep.mubr.msk.bf16.mxu1 %vm1728_vm8, %v6782_v6  ;;  %v6789_v6 = vrot.slane %v16869_v36, 1  ;;  %v7030_v36 = vrot.slane %v16660_v50, 1  ;;  %v18678_v50 = vshrl.u32 %v16686_v31, 16 }
 0x75e   : > { %v7019_v48 = vor.u32 %v7018_v19, %v7017_v57  ;;  %v7036_v57 = vrot.slane %v16663_v41, 2  ;;  %v7023_v19 = vor.u32 %v7022_v5, %v7021_v62  ;;  %v7048_v5 = vrot.slane %v16725_v17, 1 }
 0x75f   : > { %v6791_v4 = vsel %vm19032_vm4, %v6789_v6, %v6790_v18  ;;  %vm19036_vm4 = vmmov %vm19033_vm6  ;;  %v7049_v62 = vrot.slane %v16706_v8, 2  ;;  %v19040_v8 = vld [vmem:[#allocation53_spill] sm:$0xff] }
 0x760   : > { %v7020_v46 = vsel %vm19033_vm6, %v7014_v38, %v7019_v48  ;;  %v7445_v48 = vsel %vm19034_vm1, %v16965_v45, 0  ;;  %v7039_v38 = vrot.slane %v16678_v13, 1  ;;  %vm19037_vm6 = vmmov %vm19034_vm1 }
 0x761   : > { %vm19038_vm1 = vmmov %vm19036_vm4 }
 0x764   : > { %13089 = vmatmul.mubr.msk.bf16.gmra.mrb[76].mxu1 %vm1728_vm8, %v6785_v26  ;;  %v18677_v26 = vshrl.u32 %v16637_v32, 16 }
 0x765   : > { %13092 = vmatprep.mubr.msk.bf16.mxu1 %vm1728_vm8, %v6788_v24  ;;  %v7027_v24 = vrot.slane %v16598_v55, 2  ;;  %v7032_v55 = vor.u32 %v7031_v51, %v7030_v36  ;;  %v17050_v36 = vld [vmem:[%s18471_s9 + $0x14] sm:$0x7]  ;;  %v7054_v51 = vrot.slane %v16709_v40, 2 }
 0x766   : > { %v7035_v18 = vrot.slane %v18677_v26, 1 }
 0x767   : > { %v7028_v6 = vor.u32 %v7027_v24, %v7026_v58  ;;  %v7045_v58 = vrot.slane %v16693_v12, 2  ;;  %v7053_v24 = vrot.slane %v18678_v50, 1  ;;  %v7058_v50 = vrot.slane %v16736_v9, 2 }
 0x768   : > { %v7037_v59 = vor.u32 %v7036_v57, %v7035_v18 }
 0x769   : > { %v7029_v26 = vsel %vm19035_vm9, %v7023_v19, %v7028_v6  ;;  %v18682_v19 = vshrl.u32 %v16671_v28, 16  ;;  %v7055_v6 = vor.u32 %v7054_v51, %v7053_v24  ;;  %vm19041_vm9 = vmmov %vm19038_vm1 }
 0x76a   : > { %v7038_v45 = vsel %vm19036_vm4, %v7032_v55, %v7037_v59  ;;  %v18684_v59 = vshrl.u32 %v16731_v0, 16  ;;  %v7057_v55 = vrot.slane %v16739_v43, 1  ;;  %vm19046_vm4 = vmmov %vm19038_vm1 }
 0x76c   : > { %13093 = vmatmul.mubr.msk.bf16.gmra.mrb[80].mxu1 %vm1728_vm8, %v6791_v4  ;;  %v7040_v4 = vrot.slane %v16690_v25, 2  ;;  %v7059_v51 = vor.u32 %v7058_v50, %v7057_v55  ;;  %v7084_v50 = vrot.slane %v16805_v11, 1  ;;  %v19049_v55 = vld [vmem:[#allocation64_spill] sm:$0xff] }
 0x76d   : > { %13098 = vmatprep.mubr.msk.bf16.mxu1 %vm1728_vm8, %v7020_v46  ;;  %v7044_v46 = vrot.slane %v18679_v27, 1 }
 0x76e   : > { %v7041_v18 = vor.u32 %v7040_v4, %v7039_v38  ;;  %v7066_v38 = vrot.slane %v19040_v8, 1  ;;  %v18688_v8 = vshrl.u32 %v16778_v33, 16 }
 0x76f   : > { %v7046_v57 = vor.u32 %v7045_v58, %v7044_v46  ;;  %v19042_v46 = vld [vmem:[#allocation54_spill] sm:$0xff] }
 0x770   : > { %v7067_v58 = vrot.slane %v19042_v46, 2 }
 0x771   : > { %v7047_v27 = vsel %vm19038_vm1, %v7041_v18, %v7046_v57  ;;  %v18686_v57 = vshrl.u32 %v16717_v15, 16 }
 0x774   : > { %13099 = vmatmul.mubr.msk.bf16.vlgmr.msra.gmra.mrb[56].mxu1 %vm1728_vm8, %v7029_v26  ;;  %v7050_v26 = vor.u32 %v7049_v62, %v7048_v5  ;;  %v7071_v5 = vrot.slane %v18684_v59, 1  ;;  %v19043_v62 = vld [vmem:[#allocation57_spill] sm:$0xff]  ;;  %v7080_v59 = vrot.slane %v18686_v57, 1 }
 0x775   : > { %13127 = vmatpush3.bf16.msra.mxu1 %v7445_v48  ;;  %13102 = vmatprep.mubr.msk.bf16.mxu1 %vm1728_vm8, %v7038_v45  ;;  %v7062_v48 = vrot.slane %v18682_v19, 1  ;;  %v19039_v45 = vld [vmem:[#allocation55_spill] sm:$0xff]  ;;  %v7072_v24 = vrot.slane %v19043_v62, 2  ;;  %v7068_v19 = vor.u32 %v7067_v58, %v7066_v38  ;;  %v7089_v38 = vrot.slane %v18688_v8, 1  ;;  %v19052_v8 = vld [vmem:[#allocation69_spill] sm:$0xff] }
 0x776   : > { %14308 = vmatprep.subr.msk.bf16.mxu1 %vm19037_vm6, %v17050_v36  ;;  %v7063_v40 = vrot.slane %v19039_v45, 2  ;;  %v7056_v4 = vsel %vm19041_vm9, %v7050_v26, %v7055_v6  ;;  %v19045_v26 = vld [vmem:[#allocation76_spill] sm:$0xff]  ;;  %v19047_v62 = vld [vmem:[#allocation11_spill] sm:$0xff]  ;;  %vm19048_vm6 = vmmov %vm19038_vm1 }
 0x777   : > { %v7073_v45 = vor.u32 %v7072_v24, %v7071_v5  ;;  %v7076_v6 = vrot.slane %v19045_v26, 2  ;;  %v7081_v43 = vrot.slane %v19047_v62, 2  ;;  %v18689_v5 = vshrl.u32 %v16764_v63, 16  ;;  %vm19056_vm9 = vmmov %vm19038_vm1 }
 0x778   : > { %v7064_v18 = vor.u32 %v7063_v40, %v7062_v48  ;;  %v7085_v48 = vrot.slane %v19049_v55, 2  ;;  %v7099_v62 = vrot.slane %v19052_v8, 2 }
 0x779   : > { %v7074_v40 = vsel %vm19048_vm6, %v7068_v19, %v7073_v45  ;;  %v19051_v19 = vld [vmem:[#allocation66_spill] sm:$0xff]  ;;  %v7098_v55 = vrot.slane %v18689_v5, 1  ;;  %vm19059_vm6 = vmmov %vm19038_vm1 }
 0x77a   : > { %v7065_v46 = vsel %vm19046_vm4, %v7059_v51, %v7064_v18  ;;  %v7082_v51 = vor.u32 %v7081_v43, %v7080_v59  ;;  %v18690_v18 = vshrl.u32 %v16813_v39, 16  ;;  %v7086_v57 = vor.u32 %v7085_v48, %v7084_v50  ;;  %v19055_v59 = vld [vmem:[#allocation71_spill] sm:$0xff]  ;;  %vm19058_vm4 = vmmov %vm19038_vm1 }
 0x77b   : > { %v7094_v45 = vrot.slane %v19051_v19, 2 }
 0x77c   : > { %13103 = vmatmul.mubr.msk.bf16.gmra.mrb[60].mxu1 %vm1728_vm8, %v7047_v27  ;;  %v19044_v27 = vld [vmem:[#allocation62_spill] sm:$0xff]  ;;  %v7107_v43 = vrot.slane %v18690_v18, 1 }
 0x77d   : > { %13106 = vmatprep.mubr.msk.bf16.mxu1 %vm1728_vm8, %v7056_v4  ;;  %v7075_v9 = vrot.slane %v19044_v27, 1  ;;  %v19050_v4 = vld [vmem:[#allocation67_spill] sm:$0xff]  ;;  %v19054_v27 = vld [vmem:[#allocation68_spill] sm:$0xff] }
 0x77e   : > { %v7090_v58 = vrot.slane %v19050_v4, 2  ;;  %v19053_v4 = vld [vmem:[#allocation73_spill] sm:$0xff] }
 0x77f   : > { %v7077_v24 = vor.u32 %v7076_v6, %v7075_v9  ;;  %v7102_v26 = vrot.slane %v19053_v4, 1  ;;  %v7103_v9 = vrot.slane %v19054_v27, 2  ;;  %v7108_v6 = vrot.slane %v19055_v59, 2  ;;  %v19057_v27 = vld [vmem:[#allocation70_spill] sm:$0xff] }
 0x780   : > { %v7091_v11 = vor.u32 %v7090_v58, %v7089_v38  ;;  %v7100_v38 = vor.u32 %v7099_v62, %v7098_v55  ;;  %v18693_v4 = vshrl.u32 %v16851_v23, 16  ;;  %v7112_v18 = vrot.slane %v19057_v27, 2 }
 0x781   : > { %v7104_v58 = vor.u32 %v7103_v9, %v7102_v26  ;;  %v7109_v5 = vor.u32 %v7108_v6, %v7107_v43  ;;  %v7120_v62 = vrot.slane %v16888_v52, 1  ;;  %v19060_v26 = vld [vmem:[#allocation74_spill] sm:$0xff]  ;;  %v18692_v43 = vshrl.u32 %v16901_v21, 16 }
 0x782   : > { %v7092_v50 = vsel %vm19056_vm9, %v7086_v57, %v7091_v11  ;;  %v7116_v11 = vrot.slane %v18693_v4, 1  ;;  %v7117_v57 = vrot.slane %v16881_v7, 2  ;;  %v7121_v55 = vrot.slane %v19060_v26, 2  ;;  %vm19061_vm9 = vmmov %vm19038_vm1 }
 0x783   : > { %v7398_v4 = vrot.slane %v16901_v21, 2 }
 0x784   : > { %13107 = vmatmul.mubr.msk.bf16.gmra.mrb[64].mxu1 %vm1728_vm8, %v7065_v46  ;;  %v7093_v46 = vrot.slane %v16823_v29, 1  ;;  %v7122_v6 = vor.u32 %v7121_v55, %v7120_v62  ;;  %v7359_v62 = vrot.slane %v16602_v22, 2 }
 0x785   : > { %13110 = vmatprep.mubr.msk.bf16.mxu1 %vm1728_vm8, %v7074_v40  ;;  %v7083_v40 = vsel %vm19038_vm1, %v7077_v24, %v7082_v51  ;;  %v18691_v24 = vshrl.u32 %v16863_v54, 16  ;;  %v7111_v51 = vrot.slane %v16878_v47, 1 }
 0x786   : > { %v7095_v48 = vor.u32 %v7094_v45, %v7093_v46  ;;  %v7126_v45 = vrot.slane %v16884_v20, 2 }
 0x787   : > { %v7125_v46 = vrot.slane %v18691_v24, 1  ;;  %v7113_v9 = vor.u32 %v7112_v18, %v7111_v51  ;;  %v7135_v24 = vrot.slane %v16912_v53, 2 }
 0x788   : > { %v7101_v59 = vsel %vm19058_vm4, %v7095_v48, %v7100_v38  ;;  %v7129_v48 = vrot.slane %v16909_v61, 1  ;;  %v7130_v38 = vrot.slane %v16894_v3, 2  ;;  %vm19063_vm4 = vmmov %vm19038_vm1 }
 0x78a   : > { %v7131_v51 = vor.u32 %v7130_v38, %v7129_v48  ;;  %v17151_v48 = vld [vmem:[%s18471_s9 + $0x18] sm:$0x7]  ;;  %v7367_v38 = vrot.slane %v16620_v14, 2 }
 0x78c   : > { %13111 = vmatmul.mubr.msk.bf16.gmra.mrb[68].mxu1 %vm1728_vm8, %v7083_v40  ;;  %v7110_v40 = vsel %vm19059_vm6, %v7104_v58, %v7109_v5  ;;  %v7118_v5 = vor.u32 %v7117_v57, %v7116_v11  ;;  %v7134_v58 = vrot.slane %v18692_v43, 1  ;;  %v19062_v11 = vld [vmem:[#allocation41_spill] sm:$0xff]  ;;  %vm19064_vm6 = vcmask 1045504  }
 0x78d   : > { %13114 = vmatprep.mubr.msk.bf16.mxu1 %vm1728_vm8, %v7092_v50  ;;  %v7127_v50 = vor.u32 %v7126_v45, %v7125_v46  ;;  %v7358_v57 = vrot.slane %v19062_v11, 2  ;;  %v7361_v45 = vrot.slane %v16581_v1, 2 }
 0x78f   : > { %v7128_v18 = vsel %vm19061_vm9, %v7122_v6, %v7127_v50  ;;  %v7360_v46 = vsel %vm19064_vm6, %v7358_v57, %v7359_v62  ;;  %vm19066_vm9 = vmmov %vm19064_vm6  ;;  %v7373_v62 = vrot.slane %v16667_v37, 2 }
 0x794   : > { %13115 = vmatmul.mubr.msk.bf16.gmra.mrb[72].mxu1 %vm1728_vm8, %v7101_v59  ;;  %v7119_v59 = vsel %vm19038_vm1, %v7113_v9, %v7118_v5  ;;  %v7362_v9 = vrot.slane %v16585_v56, 2  ;;  %v7364_v5 = vrot.slane %v16633_v35, 2  ;;  %vm19065_vm1 = vcmask 1042432  }
 0x795   : > { %13118 = vmatprep.mubr.msk.bf16.mxu1 %vm1728_vm8, %v7110_v40  ;;  %v7136_v40 = vor.u32 %v7135_v24, %v7134_v58  ;;  %v7365_v24 = vrot.slane %v16637_v32, 2  ;;  %v7763_v6 = vsel %vm19065_vm1, %v17050_v36, 0  ;;  %v7368_v36 = vrot.slane %v16628_v34, 2  ;;  %v19069_v58 = vld [vmem:[#allocation49_spill] sm:$0xff] }
 0x796   : > { %v7363_v50 = vsel %vm19066_vm9, %v7361_v45, %v7362_v9  ;;  %v7377_v45 = vrot.slane %v16731_v0, 2 }
 0x797   : > { %v7137_v55 = vsel %vm19063_vm4, %v7131_v51, %v7136_v40  ;;  %vm19067_vm4 = vmmov %vm19064_vm6  ;;  %v7371_v51 = vrot.slane %v16686_v31, 2 }
 0x798   : > { %vm19068_vm6 = vmmov %vm19065_vm1 }
 0x799   : > { %vm19070_vm1 = vmmov %vm19067_vm4 }
 0x79a   : > { %v7369_v40 = vsel %vm19070_vm1, %v7367_v38, %v7368_v36  ;;  %vm19071_vm9 = vmmov %vm19070_vm1 }
 0x79c   : > { %13119 = vmatmul.mubr.msk.bf16.gmra.mrb[76].mxu1 %vm1728_vm8, %v7119_v59  ;;  %v7366_v59 = vsel %vm19067_vm4, %v7364_v5, %v7365_v24  ;;  %vm19072_vm4 = vmmov %vm19070_vm1  ;;  %v7379_v24 = vrot.slane %v16713_v30, 2 }
 0x79d   : > { %13122 = vmatprep.mubr.msk.bf16.mxu1 %vm1728_vm8, %v7128_v18  ;;  %v7370_v18 = vrot.slane %v19069_v58, 2 }
 0x79f   : > { %v7372_v57 = vsel %vm19071_vm9, %v7370_v18, %v7371_v51  ;;  %vm19074_vm9 = vmmov %vm19070_vm1  ;;  %v7385_v18 = vrot.slane %v16756_v42, 2  ;;  %v7386_v51 = vrot.slane %v16764_v63, 2 }
 0x7a4   : > { %13123 = vmatmul.mubr.msk.bf16.gmra.mrb[80].mxu1 %vm1728_vm8, %v7137_v55  ;;  %v7374_v55 = vrot.slane %v16671_v28, 2 }
 0x7a5   : > { %13128 = vmatprep.mubr.msk.bf16.mxu1 %vm1728_vm8, %v7360_v46  ;;  %v7376_v46 = vrot.slane %v16721_v44, 2 }
 0x7a6   : > { %v7375_v9 = vsel %vm19072_vm4, %v7373_v62, %v7374_v55  ;;  %v7389_v62 = vrot.slane %v16813_v39, 2  ;;  %vm19076_vm4 = vmmov %vm19070_vm1 }
 0x7a7   : > { %v7387_v55 = vsel %vm19076_vm4, %v7385_v18, %v7386_v51 }
 0x7ac   : > { %13129 = vmatmul.mubr.msk.bf16.vlgmr.msra.gmra.mrb[56].mxu1 %vm1728_vm8, %v7363_v50  ;;  %v7382_v50 = vrot.slane %v16774_v60, 2 }
 0x7ad   : > { %13157 = vmatpush3.bf16.msra.mxu1 %v7763_v6  ;;  %13132 = vmatprep.mubr.msk.bf16.mxu1 %vm1728_vm8, %v7366_v59  ;;  %v7380_v6 = vrot.slane %v16717_v15, 2  ;;  %v7383_v59 = vrot.slane %v16778_v33, 2 }
 0x7ae   : > { %14309 = vmatprep.subr.msk.bf16.mxu1 %vm19068_vm6, %v17151_v48  ;;  %vm19073_vm6 = vmmov %vm19070_vm1 }
 0x7af   : > { %v7378_v5 = vsel %vm19073_vm6, %v7376_v46, %v7377_v45  ;;  %v7381_v38 = vsel %vm19070_vm1, %v7379_v24, %v7380_v6  ;;  %v7384_v36 = vsel %vm19074_vm9, %v7382_v50, %v7383_v59  ;;  %vm19077_vm6 = vmmov %vm19070_vm1  ;;  %v11739_v45 = vld [vmem:[%s18473_s11 + $0x4] sm:$0x7]  ;;  %vm19078_vm1 = vcmask 1042432   ;;  %v19080_v6 = vld [vmem:[#allocation72_spill] sm:$0xff] }
 0x7b0   : > { %14310 = vmatprep.subr.msk.bf16.mxu0 %vm19078_vm1, %v11739_v45  ;;  %vm19079_vm9 = vmmov %vm19078_vm1  ;;  %v7392_v24 = vrot.slane %v16851_v23, 2  ;;  %v7394_v50 = vrot.slane %v19080_v6, 2  ;;  %v7395_v59 = vrot.slane %v16863_v54, 2 }
 0x7b1   : > { %vm19086_vm1 = vmmov %vm19076_vm4 }
 0x7b4   : > { %13133 = vmatmul.mubr.msk.bf16.gmra.mrb[60].mxu1 %vm1728_vm8, %v7369_v40  ;;  %v19075_v40 = vld [vmem:[#allocation65_spill] sm:$0xff] }
 0x7b5   : > { %13136 = vmatprep.mubr.msk.bf16.mxu1 %vm1728_vm8, %v7372_v57  ;;  %v7388_v57 = vrot.slane %v19075_v40, 2 }
 0x7b7   : > { %v7390_v46 = vsel %vm19077_vm6, %v7388_v57, %v7389_v62  ;;  %vm19082_vm6 = vmmov %vm19076_vm4  ;;  %v7621_v57 = vrot.slane %v16607_v49, 3  ;;  %v19083_v62 = vshrl.u32 %v16602_v22, 16  ;;  %v19088_v49 = vshrl.u32 %v16585_v56, 16 }
 0x7b8   : > { %v7396_v51 = vsel %vm19082_vm6, %v7394_v50, %v7395_v59  ;;  %v19087_v50 = vld [vmem:[#allocation43_spill] sm:$0xff] }
 0x7b9   : > { %v7628_v59 = vrot.slane %v19087_v50, 3  ;;  %v7630_v6 = vrot.slane %v19088_v49, 2 }
 0x7bc   : > { %13137 = vmatmul.mubr.msk.bf16.gmra.mrb[64].mxu1 %vm1728_vm8, %v7375_v9  ;;  %v8319_v9 = vsel %vm19079_vm9, %v11739_v45, 0  ;;  %vm19091_vm9 = vsmask.f32 5376 }
 0x7bd   : > { %13140 = vmatprep.mubr.msk.bf16.mxu1 %vm1728_vm8, %v7378_v5  ;;  %13217 = vmatpush3.bf16.msra.mxu0 %v8319_v9  ;;  %v7391_v5 = vrot.slane %v16801_v16, 2  ;;  %v19085_v9 = vld [vmem:[#allocation75_spill] sm:$0xff]  ;;  %vm19094_vm6 = vmmov %vm19091_vm9 }
 0x7be   : > { %v7397_v43 = vrot.slane %v19085_v9, 2 }
 0x7c4   : > { %13141 = vmatmul.mubr.msk.bf16.gmra.mrb[68].mxu1 %vm1728_vm8, %v7381_v38  ;;  %v7393_v38 = vsel %vm19076_vm4, %v7391_v5, %v7392_v24  ;;  %vm19093_vm4 = vcmask 1042432  }
 0x7c5   : > { %13144 = vmatprep.mubr.msk.bf16.mxu1 %vm1728_vm8, %v7384_v36  ;;  %v19081_v36 = vld [vmem:[#allocation46_spill] sm:$0xff]  ;;  %v8025_v49 = vsel %vm19093_vm4, %v17151_v48, 0  ;;  %v19098_v48 = vshrl.u32 %v16686_v31, 16 }
 0x7c6   : > { %v7620_v18 = vrot.slane %v19081_v36, 2  ;;  %v7399_v36 = vsel %vm19086_vm1, %v7397_v43, %v7398_v4  ;;  %vm19096_vm1 = vmmov %vm19094_vm6 }
 0x7c7   : > { %vm19106_vm4 = vmmov %vm19096_vm1 }
 0x7c8   : > { %v7622_v5 = vor.u32 %v7621_v57, %v7620_v18  ;;  %v7635_v18 = vrot.slane %v16656_v2, 3  ;;  %v19092_v57 = vshrl.u32 %v16637_v32, 16 }
 0x7ca   : > { %v7637_v4 = vrot.slane %v19092_v57, 2  ;;  %v19100_v57 = vld [vmem:[#allocation51_spill] sm:$0xff] }
 0x7cc   : > { %13145 = vmatmul.mubr.msk.bf16.gmra.mrb[72].mxu1 %vm1728_vm8, %v7387_v55  ;;  %v7623_v55 = vrot.slane %v19083_v62, 2  ;;  %v19089_v62 = vld [vmem:[#allocation42_spill] sm:$0xff] }
 0x7cd   : > { %13148 = vmatprep.mubr.msk.bf16.mxu1 %vm1728_vm8, %v7390_v46  ;;  %v19084_v46 = vld [vmem:[#allocation44_spill] sm:$0xff]  ;;  %v7631_v16 = vrot.slane %v19089_v62, 3 }
 0x7ce   : > { %v7624_v45 = vrot.slane %v19084_v46, 3  ;;  %v19090_v46 = vld [vmem:[#allocation45_spill] sm:$0xff] }
 0x7cf   : > { %v7634_v40 = vrot.slane %v19090_v46, 2  ;;  %v7648_v46 = vrot.slane %v16725_v17, 2  ;;  %v7655_v17 = vrot.slane %v19100_v57, 2 }
 0x7d0   : > { %v7625_v24 = vor.u32 %v7624_v45, %v7623_v55  ;;  %v7632_v55 = vor.u32 %v7631_v16, %v7630_v6 }
 0x7d1   : > { %v7636_v45 = vor.u32 %v7635_v18, %v7634_v40  ;;  %v19097_v40 = vld [vmem:[#allocation47_spill] sm:$0xff] }
 0x7d2   : > { %v7649_v6 = vrot.slane %v19097_v40, 3 }
 0x7d4   : > { %13149 = vmatmul.mubr.msk.bf16.gmra.mrb[76].mxu1 %vm1728_vm8, %v7393_v38  ;;  %v7627_v38 = vrot.slane %v16624_v10, 2  ;;  %v7638_v10 = vrot.slane %v16663_v41, 3  ;;  %v7645_v41 = vrot.slane %v16693_v12, 3  ;;  %v7650_v18 = vor.u32 %v7649_v6, %v7648_v46  ;;  %v19109_v46 = vld [vmem:[#allocation57_spill] sm:$0xff] }
 0x7d5   : > { %13152 = vmatprep.mubr.msk.bf16.mxu1 %vm1728_vm8, %v7396_v51  ;;  %v7626_v51 = vsel %vm19091_vm9, %v7622_v5, %v7625_v24  ;;  %v7642_v5 = vrot.slane %v16690_v25, 3  ;;  %v19095_v24 = vshrl.u32 %v16628_v34, 16  ;;  %vm19102_vm9 = vmmov %vm19096_vm1 }
 0x7d6   : > { %v7629_v43 = vor.u32 %v7628_v59, %v7627_v38  ;;  %v7639_v50 = vor.u32 %v7638_v10, %v7637_v4  ;;  %v19099_v38 = vld [vmem:[#allocation48_spill] sm:$0xff]  ;;  %v19101_v4 = vld [vmem:[#allocation50_spill] sm:$0xff] }
 0x7d7   : > { %v7644_v62 = vrot.slane %v19095_v24, 2  ;;  %v7652_v25 = vrot.slane %v19099_v38, 3  ;;  %v7656_v10 = vrot.slane %v19101_v4, 3  ;;  %v19105_v24 = vld [vmem:[#allocation53_spill] sm:$0xff] }
 0x7d8   : > { %v7633_v2 = vsel %vm19094_vm6, %v7629_v43, %v7632_v55  ;;  %v7640_v16 = vsel %vm19096_vm1, %v7636_v45, %v7639_v50  ;;  %v19103_v55 = vshrl.u32 %v16671_v28, 16  ;;  %v19104_v50 = vld [vmem:[#allocation55_spill] sm:$0xff]  ;;  %v7662_v40 = vrot.slane %v19105_v24, 2  ;;  %vm19112_vm6 = vmmov %vm19096_vm1 }
 0x7d9   : > { %v7657_v6 = vor.u32 %v7656_v10, %v7655_v17  ;;  %v19116_v10 = vld [vmem:[#allocation64_spill] sm:$0xff] }
 0x7da   : > { %v7658_v45 = vrot.slane %v19103_v55, 2 }
 0x7dc   : > { %13153 = vmatmul.mubr.msk.bf16.gmra.mrb[80].mxu1 %vm1728_vm8, %v7399_v36  ;;  %v7641_v36 = vrot.slane %v16678_v13, 2  ;;  %v7651_v13 = vrot.slane %v19098_v48, 2 }
 0x7dd   : > { %13158 = vmatprep.mubr.msk.bf16.mxu1 %vm1728_vm8, %v7626_v51  ;;  %v7646_v51 = vor.u32 %v7645_v41, %v7644_v62  ;;  %v19108_v62 = vshrl.u32 %v16731_v0, 16 }
 0x7de   : > { %v7643_v59 = vor.u32 %v7642_v5, %v7641_v36  ;;  %v7653_v12 = vor.u32 %v7652_v25, %v7651_v13  ;;  %v19107_v36 = vld [vmem:[#allocation54_spill] sm:$0xff] }
 0x7df   : > { %v7663_v5 = vrot.slane %v19107_v36, 3  ;;  %v7665_v41 = vrot.slane %v19108_v62, 2  ;;  %v19110_v25 = vld [vmem:[#allocation62_spill] sm:$0xff] }
 0x7e0   : > { %v7647_v43 = vsel %vm19102_vm9, %v7643_v59, %v7646_v51  ;;  %v7669_v59 = vrot.slane %v19110_v25, 2  ;;  %v19111_v51 = vld [vmem:[#allocation76_spill] sm:$0xff]  ;;  %vm19119_vm9 = vmmov %vm19096_vm1  ;;  %v7687_v25 = vrot.slane %v19052_v8, 3  ;;  %v7697_v8 = vrot.slane %v16878_v47, 2 }
 0x7e1   : > { %v7664_v13 = vor.u32 %v7663_v5, %v7662_v40  ;;  %v7670_v57 = vrot.slane %v19111_v51, 3  ;;  %v19121_v51 = vld [vmem:[#allocation73_spill] sm:$0xff] }
 0x7e3   : > { %v7671_v5 = vor.u32 %v7670_v57, %v7669_v59  ;;  %v19123_v57 = vld [vmem:[#allocation68_spill] sm:$0xff] }
 0x7e4   : > { %13159 = vmatmul.mubr.msk.bf16.vlgmr.msra.gmra.mrb[56].mxu1 %vm1728_vm8, %v7633_v2  ;;  %v7659_v2 = vrot.slane %v19104_v50, 3  ;;  %v19115_v50 = vld [vmem:[#allocation61_spill] sm:$0xff] }
 0x7e5   : > { %13187 = vmatpush3.bf16.msra.mxu1 %v8025_v49  ;;  %13162 = vmatprep.mubr.msk.bf16.mxu1 %vm1728_vm8, %v7640_v16  ;;  %v7654_v49 = vsel %vm19106_vm4, %v7650_v18, %v7653_v12  ;;  %v7666_v16 = vrot.slane %v19109_v46, 3  ;;  %v19113_v18 = vshrl.u32 %v16717_v15, 16  ;;  %v7676_v24 = vrot.slane %v19115_v50, 2  ;;  %vm19122_vm4 = vmmov %vm19096_vm1 }
 0x7e6   : > { %v7660_v48 = vor.u32 %v7659_v2, %v7658_v45  ;;  %v7677_v45 = vrot.slane %v19116_v10, 3  ;;  %v19117_v2 = vshrl.u32 %v16778_v33, 16  ;;  %v7698_v10 = vrot.slane %v19057_v27, 3 }
 0x7e7   : > { %v7667_v38 = vor.u32 %v7666_v16, %v7665_v41  ;;  %v7672_v12 = vrot.slane %v19113_v18, 2  ;;  %v7683_v16 = vrot.slane %v16823_v29, 2  ;;  %v7691_v18 = vrot.slane %v19123_v57, 3 }
 0x7e8   : > { %v7661_v4 = vsel %vm19112_vm6, %v7657_v6, %v7660_v48  ;;  %v7679_v40 = vrot.slane %v19117_v2, 2  ;;  %v7678_v41 = vor.u32 %v7677_v45, %v7676_v24  ;;  %v7684_v6 = vrot.slane %v19051_v19, 3  ;;  %vm19126_vm6 = vmmov %vm19096_vm1 }
 0x7e9   : > { %v7668_v17 = vsel %vm19096_vm1, %v7664_v13, %v7667_v38  ;;  %v19120_v13 = vshrl.u32 %v16764_v63, 16  ;;  %v19127_v2 = vshrl.u32 %v16851_v23, 16  ;;  %v7708_v27 = vrot.slane %v16884_v20, 3 }
 0x7eb   : > { %v7686_v38 = vrot.slane %v19120_v13, 2  ;;  %v7712_v13 = vrot.slane %v16894_v3, 3 }
 0x7ec   : > { %13163 = vmatmul.mubr.msk.bf16.gmra.mrb[60].mxu1 %vm1728_vm8, %v7647_v43  ;;  %v19114_v43 = vld [vmem:[#allocation11_spill] sm:$0xff] }
 0x7ed   : > { %13166 = vmatprep.mubr.msk.bf16.mxu1 %vm1728_vm8, %v7654_v49  ;;  %v7673_v55 = vrot.slane %v19114_v43, 3  ;;  %v19118_v49 = vld [vmem:[#allocation67_spill] sm:$0xff]  ;;  %v7688_v50 = vor.u32 %v7687_v25, %v7686_v38  ;;  %v19130_v38 = vshrl.u32 %v16901_v21, 16  ;;  %v7715_v25 = vrot.slane %v16912_v53, 3 }
 0x7ee   : > { %v7680_v36 = vrot.slane %v19118_v49, 3  ;;  %v19125_v43 = vld [vmem:[#allocation71_spill] sm:$0xff]  ;;  %v7701_v49 = vrot.slane %v16881_v7, 3  ;;  %v7711_v7 = vrot.slane %v16909_v61, 2  ;;  %v7939_v61 = vrot.slane %v16602_v22, 3 }
 0x7ef   : > { %v7674_v62 = vor.u32 %v7673_v55, %v7672_v12  ;;  %v19124_v12 = vshrl.u32 %v16813_v39, 16  ;;  %v7694_v19 = vrot.slane %v19125_v43, 3  ;;  %v7685_v55 = vor.u32 %v7684_v6, %v7683_v16 }
 0x7f0   : > { %v7681_v46 = vor.u32 %v7680_v36, %v7679_v40  ;;  %v7700_v40 = vrot.slane %v19127_v2, 2  ;;  %v7704_v36 = vrot.slane %v16888_v52, 2  ;;  %v7941_v53 = vrot.slane %v16581_v1, 3  ;;  %v19143_v2 = vld [vmem:[#allocation63_spill] sm:$0xff] }
 0x7f1   : > { %v7675_v48 = vsel %vm19119_vm9, %v7671_v5, %v7674_v62  ;;  %v7693_v29 = vrot.slane %v19124_v12, 2  ;;  %v7689_v45 = vsel %vm19126_vm6, %v7685_v55, %v7688_v50  ;;  %v7705_v62 = vrot.slane %v19060_v26, 3  ;;  %vm19129_vm9 = vmmov %vm19096_vm1 }
 0x7f2   : > { %v7682_v59 = vsel %vm19122_vm4, %v7678_v41, %v7681_v46  ;;  %v19128_v41 = vshrl.u32 %v16863_v54, 16  ;;  %v7699_v46 = vor.u32 %v7698_v10, %v7697_v8  ;;  %v7702_v16 = vor.u32 %v7701_v49, %v7700_v40  ;;  %vm19131_vm4 = vmmov %vm19096_vm1 }
 0x7f3   : > { %v7706_v6 = vor.u32 %v7705_v62, %v7704_v36  ;;  %v7714_v26 = vrot.slane %v19130_v38, 2  ;;  %vm19132_vm6 = vmmov %vm19096_vm1  ;;  %v7944_v12 = vrot.slane %v16633_v35, 3  ;;  %v7947_v43 = vrot.slane %v16620_v14, 3  ;;  %v19144_v36 = vld [vmem:[#allocation72_spill] sm:$0xff] }
 0x7f4   : > { %13167 = vmatmul.mubr.msk.bf16.gmra.mrb[64].mxu1 %vm1728_vm8, %v7661_v4  ;;  %v7690_v4 = vrot.slane %v19121_v51, 2  ;;  %v7707_v47 = vrot.slane %v19128_v41, 2  ;;  %v7703_v52 = vsel %vm19129_vm9, %v7699_v46, %v7702_v16  ;;  %v7713_v51 = vor.u32 %v7712_v13, %v7711_v7 }
 0x7f5   : > { %13170 = vmatprep.mubr.msk.bf16.mxu1 %vm1728_vm8, %v7668_v17  ;;  %v7695_v17 = vor.u32 %v7694_v19, %v7693_v29  ;;  %v7945_v29 = vrot.slane %v16637_v32, 3  ;;  %v7948_v19 = vrot.slane %v16628_v34, 3  ;;  %v7950_v1 = vrot.slane %v19069_v58, 3 }
 0x7f6   : > { %v7692_v24 = vor.u32 %v7691_v18, %v7690_v4  ;;  %v7716_v4 = vor.u32 %v7715_v25, %v7714_v26  ;;  %v7942_v18 = vrot.slane %v16585_v56, 3  ;;  %v7951_v56 = vrot.slane %v16686_v31, 3 }
 0x7f7   : > { %v7953_v55 = vrot.slane %v16667_v37, 3  ;;  %v7954_v50 = vrot.slane %v16671_v28, 3  ;;  %v7956_v14 = vrot.slane %v16721_v44, 3  ;;  %v7957_v34 = vrot.slane %v16731_v0, 3 }
 0x7f8   : > { %v7696_v5 = vsel %vm19096_vm1, %v7692_v24, %v7695_v17  ;;  %v7717_v57 = vsel %vm19132_vm6, %v7713_v51, %v7716_v4  ;;  %vm19133_vm1 = vcmask 1044480   ;;  %v7959_v24 = vrot.slane %v16713_v30, 3 }
 0x7f9   : > { %vm19134_vm9 = vmmov %vm19133_vm1  ;;  %v7952_v32 = vsel %vm19133_vm1, %v7950_v1, %v7951_v56  ;;  %v7960_v17 = vrot.slane %v16717_v15, 3  ;;  %v7962_v37 = vrot.slane %v16774_v60, 3  ;;  %v7963_v28 = vrot.slane %v16778_v33, 3 }
 0x7fa   : > { %vm19136_vm6 = vmmov %vm19133_vm1  ;;  %v7965_v8 = vrot.slane %v16756_v42, 3  ;;  %v7966_v10 = vrot.slane %v16764_v63, 3  ;;  %v7969_v15 = vrot.slane %v16813_v39, 3  ;;  %v7971_v40 = vrot.slane %v19143_v2, 3 }
 0x7fb   : > { %v7949_v35 = vsel %vm19136_vm6, %v7947_v43, %v7948_v19  ;;  %vm19139_vm6 = vmmov %vm19133_vm1  ;;  %v7964_v0 = vsel %vm19133_vm1, %v7962_v37, %v7963_v28  ;;  %v7972_v49 = vrot.slane %v16851_v23, 3  ;;  %v7974_v42 = vrot.slane %v19144_v36, 3  ;;  %v8291_v23 = vld [vmem:[%s18473_s11] sm:$0x7] }
 0x7fc   : > { %13171 = vmatmul.mubr.msk.bf16.gmra.mrb[68].mxu1 %vm1728_vm8, %v7675_v48  ;;  %v7709_v48 = vor.u32 %v7708_v27, %v7707_v47  ;;  %v7961_v44 = vsel %vm19139_vm6, %v7959_v24, %v7960_v17  ;;  %v7975_v63 = vrot.slane %v16863_v54, 3  ;;  %vm19145_vm6 = vmmov %vm19133_vm1  ;;  %v7977_v62 = vrot.slane %v19085_v9, 3  ;;  %v17370_v54 = vld [vmem:[%s18472_s10] ss:$0 sm:$0xff]  ;;  %v17398_v24 = vld [vmem:[%s18473_s11 + $0x8] sm:$0x7] }
 0x7fd   : > { %13174 = vmatprep.mubr.msk.bf16.mxu1 %vm1728_vm8, %v7682_v59  ;;  %v7938_v59 = vrot.slane %v19062_v11, 3  ;;  %v7943_v11 = vsel %vm19134_vm9, %v7941_v53, %v7942_v18  ;;  %vm19137_vm9 = vmmov %vm19133_vm1  ;;  %v7978_v41 = vrot.slane %v16901_v21, 3 }
 0x7fe   : > { %v7710_v20 = vsel %vm19131_vm4, %v7706_v6, %v7709_v48  ;;  %vm19135_vm4 = vmmov %vm19133_vm1  ;;  %v7955_v58 = vsel %vm19137_vm9, %v7953_v55, %v7954_v50  ;;  %v7976_v39 = vsel %vm19133_vm1, %v7974_v42, %v7975_v63 }
 0x7ff   : > { %v7940_v3 = vsel %vm19133_vm1, %v7938_v59, %v7939_v61  ;;  %v7946_v22 = vsel %vm19135_vm4, %v7944_v12, %v7945_v29  ;;  %vm19138_vm4 = vmmov %vm19133_vm1 }
 0x800   : > { %v7958_v31 = vsel %vm19138_vm4, %v7956_v14, %v7957_v34  ;;  %vm19141_vm9 = vmmov %vm19133_vm1 }
 0x801   : > { %v7967_v60 = vsel %vm19141_vm9, %v7965_v8, %v7966_v10  ;;  %vm19142_vm4 = vmmov %vm19133_vm1 }
 0x802   : > { %vm19146_vm9 = vmmov %vm19133_vm1 }
 0x803   : > { %v7979_v47 = vsel %vm19146_vm9, %v7977_v62, %v7978_v41 }
 0x804   : > { %13175 = vmatmul.mubr.msk.bf16.gmra.mrb[72].mxu1 %vm1728_vm8, %v7689_v45  ;;  %v19140_v45 = vld [vmem:[#allocation65_spill] sm:$0xff] }
 0x805   : > { %13178 = vmatprep.mubr.msk.bf16.mxu1 %vm1728_vm8, %v7696_v5  ;;  %v7968_v30 = vrot.slane %v19140_v45, 3  ;;  %v7973_v5 = vsel %vm19145_vm6, %v7971_v40, %v7972_v49 }
 0x807   : > { %v7970_v33 = vsel %vm19142_vm4, %v7968_v30, %v7969_v15  ;;  %vm19147_vm4 = vcmask 1042432  }
 0x808   : > { %14311 = vmatprep.subr.msk.bf16.mxu0 %vm19147_vm4, %v8291_v23 }
 0x80c   : > { %13179 = vmatmul.mubr.msk.bf16.gmra.mrb[76].mxu1 %vm1728_vm8, %v7703_v52 }
 0x80d   : > { %13182 = vmatprep.mubr.msk.bf16.mxu1 %vm1728_vm8, %v7710_v20 }
 0x814   : > { %13183 = vmatmul.mubr.msk.bf16.gmra.mrb[80].mxu1 %vm1728_vm8, %v7717_v57 }
 0x815   : > { %13188 = vmatprep.mubr.msk.bf16.mxu1 %vm1728_vm8, %v7940_v3 }
 0x81c   : > { %13189 = vmatmul.mubr.msk.bf16.vlgmr.msra.gmra.mrb[56].mxu1 %vm1728_vm8, %v7943_v11 }
 0x81d   : > { %13192 = vmatprep.mubr.msk.bf16.mxu1 %vm1728_vm8, %v7946_v22 }
 0x824   : > { %13193 = vmatmul.mubr.msk.bf16.gmra.mrb[60].mxu1 %vm1728_vm8, %v7949_v35 }
 0x825   : > { %13196 = vmatprep.mubr.msk.bf16.mxu1 %vm1728_vm8, %v7952_v32 }
 0x82c   : > { %13197 = vmatmul.mubr.msk.bf16.gmra.mrb[64].mxu1 %vm1728_vm8, %v7955_v58 }
 0x82d   : > { %13200 = vmatprep.mubr.msk.bf16.mxu1 %vm1728_vm8, %v7958_v31 }
 0x834   : > { %13201 = vmatmul.mubr.msk.bf16.gmra.mrb[68].mxu1 %vm1728_vm8, %v7961_v44 }
 0x835   : > { %13204 = vmatprep.mubr.msk.bf16.mxu1 %vm1728_vm8, %v7964_v0 }
 0x83c   : > { %13205 = vmatmul.mubr.msk.bf16.gmra.mrb[72].mxu1 %vm1728_vm8, %v7967_v60 }
 0x83d   : > { %13208 = vmatprep.mubr.msk.bf16.mxu1 %vm1728_vm8, %v7970_v33 }
 0x844   : > { %13209 = vmatmul.mubr.msk.bf16.gmra.mrb[76].mxu1 %vm1728_vm8, %v7973_v5 }
 0x845   : > { %13212 = vmatprep.mubr.msk.bf16.mxu1 %vm1728_vm8, %v7976_v39 }
 0x84c   : > { %13213 = vmatmul.mubr.msk.bf16.gmra.mrb[80].mxu1 %vm1728_vm8, %v7979_v47 }
 0x8ef   : > { %v13190_v27 = vpop.f32.mrb[56].mxu1 }
 0x8f0   : > { %v8209_v9 = vadd.f32 %v13190_v27, %v17370_v54  ;;  %v8061_v46 = vpop.f32.mrb[57].mxu1 }
 0x8f1   : > { %v8207_v21 = vadd.f32 %v17370_v54, %v8061_v46  ;;  %v13191_v16 = vpop.f32.mrb[58].mxu1 }
 0x8f2   : > { %v8210_v6 = vadd.f32 %v13191_v16, %v17370_v54  ;;  %v8064_v48 = vpop.f32.mrb[59].mxu1  ;;  %v8237_v52 = vmax.f32 %v8209_v9, 0.0 }
 0x8f3   : > { %v8208_v7 = vadd.f32 %v17370_v54, %v8064_v48  ;;  %v8235_v38 = vmax.f32 %v8207_v21, 0.0 }
 0x8f4   : > { %v8238_v13 = vmax.f32 %v8210_v6, 0.0 }
 0x8f5   : > { %v8236_v26 = vmax.f32 %v8208_v7, 0.0 }
 0x8f6   : > { %v8264_v25 = vpack.c.bf16 %v8238_v13, %v8237_v52 }
 0x8f7   : > { %v17376_v20 = vpack.c.bf16 %v8236_v26, %v8235_v38  ;;  %v13194_v51 = vpop.f32.mrb[60].mxu1 }
 0x8f8   : > { %v8213_v4 = vadd.f32 %v13194_v51, %v17370_v54  ;;  %v8077_v59 = vpop.f32.mrb[61].mxu1  ;;  %v17381_v57 = vsel %vm15872_vm5, %v8264_v25, 0  ;;  %vm19149_vm5 = vmmov %vm19147_vm4 }
 0x8f9   : > { %v8211_v3 = vadd.f32 %v17370_v54, %v8077_v59  ;;  %v13195_v53 = vpop.f32.mrb[62].mxu1  ;;  %13218 = vmatprep.mubr.msk.bf16.mxu0 %vm1728_vm8, %v17381_v57  ;;  %v8422_v50 = vsel %vm19149_vm5, %v8291_v23, 0 }
 0x8fa   : > { %v8214_v18 = vadd.f32 %v13195_v53, %v17370_v54  ;;  %v8080_v12 = vpop.f32.mrb[63].mxu1  ;;  %v8241_v11 = vmax.f32 %v8213_v4, 0.0 }
 0x8fb   : > { %v8212_v29 = vadd.f32 %v17370_v54, %v8080_v12  ;;  %v8239_v43 = vmax.f32 %v8211_v3, 0.0 }
 0x8fc   : > { %v8242_v22 = vmax.f32 %v8214_v18, 0.0 }
 0x8fd   : > { %v8240_v19 = vmax.f32 %v8212_v29, 0.0 }
 0x8fe   : > { %v8266_v1 = vpack.c.bf16 %v8242_v22, %v8241_v11 }
 0x8ff   : > { %v8265_v56 = vpack.c.bf16 %v8240_v19, %v8239_v43  ;;  %v13198_v35 = vpop.f32.mrb[64].mxu1 }
 0x900   : > { %v8217_v32 = vadd.f32 %v13198_v35, %v17370_v54  ;;  %v8093_v55 = vpop.f32.mrb[65].mxu1  ;;  %v17405_v44 = vsel %vm15897_vm0, %v8266_v1, 0 }
 0x901   : > { %v17392_v34 = vsel %vm15890_vm2, %v8265_v56, 0  ;;  %v8215_v58 = vadd.f32 %v17370_v54, %v8093_v55  ;;  %v13199_v31 = vpop.f32.mrb[66].mxu1  ;;  %vm19152_vm2 = vmmov %vm19147_vm4 }
 0x902   : > { %v8218_v17 = vadd.f32 %v13199_v31, %v17370_v54  ;;  %v8096_v37 = vpop.f32.mrb[67].mxu1  ;;  %13219 = vmatmul.mubr.msk.bf16.vlgmr.msra.gmra.mrb[136].mxu0 %vm1728_vm8, %v17392_v34  ;;  %v8245_v8 = vmax.f32 %v8217_v32, 0.0  ;;  %vm19159_vm0 = vmmov %vm19152_vm2 }
 0x903   : > { %v8216_v0 = vadd.f32 %v17370_v54, %v8096_v37  ;;  %13235 = vmatpush3.bf16.msra.mxu0 %v8422_v50  ;;  %13222 = vmatprep.mubr.msk.bf16.mxu0 %vm1728_vm8, %v17405_v44  ;;  %v8243_v45 = vmax.f32 %v8215_v58, 0.0  ;;  %v8277_v58 = vsel %vm15978_vm3, %v17376_v20, 0  ;;  %vm19160_vm3 = vmmov %vm19159_vm0 }
 0x904   : > { %v8246_v10 = vmax.f32 %v8218_v17, 0.0  ;;  %14312 = vmatprep.subr.msk.bf16.mxu0 %vm19152_vm2, %v17398_v24  ;;  %vm19167_vm6 = vmmov %vm19159_vm0 }
 0x905   : > { %v8244_v30 = vmax.f32 %v8216_v0, 0.0  ;;  %vm19168_vm1 = vmmov %vm19159_vm0 }
 0x906   : > { %v8268_v15 = vpack.c.bf16 %v8246_v10, %v8245_v8  ;;  %vm19171_vm4 = vmmov %vm19159_vm0 }
 0x907   : > { %v8267_v60 = vpack.c.bf16 %v8244_v30, %v8243_v45  ;;  %v13202_v33 = vpop.f32.mrb[68].mxu1  ;;  %vm19172_vm5 = vmmov %vm19159_vm0 }
 0x908   : > { %v8221_v2 = vadd.f32 %v13202_v33, %v17370_v54  ;;  %v8109_v40 = vpop.f32.mrb[69].mxu1  ;;  %v17420_v39 = vsel %vm18943_vm7, %v8268_v15, 0  ;;  %vm19162_vm7 = vmmov %vm19159_vm0 }
 0x909   : > { %v17415_v36 = vsel %vm15924_vm13, %v8267_v60, 0  ;;  %v8219_v42 = vadd.f32 %v17370_v54, %v8109_v40  ;;  %v13203_v63 = vpop.f32.mrb[70].mxu1  ;;  %v8527_v60 = vsel %vm19159_vm0, %v17398_v24, 0  ;;  %vm19161_vm13 = vmmov %vm19159_vm0 }
 0x90a   : > { %v8222_v62 = vadd.f32 %v13203_v63, %v17370_v54  ;;  %v8112_v41 = vpop.f32.mrb[71].mxu1  ;;  %13223 = vmatmul.mubr.msk.bf16.gmra.mrb[140].mxu0 %vm1728_vm8, %v17415_v36  ;;  %v8249_v23 = vmax.f32 %v8221_v2, 0.0  ;;  %v11765_v2 = vld [vmem:[%s18473_s11 + $0xc] sm:$0x7]  ;;  %vm19174_vm2 = vmmov %vm19159_vm0 }
 0x90b   : > { %v8220_v47 = vadd.f32 %v17370_v54, %v8112_v41  ;;  %13226 = vmatprep.mubr.msk.bf16.mxu0 %vm1728_vm8, %v17420_v39  ;;  %v8247_v9 = vmax.f32 %v8219_v42, 0.0 }
 0x90c   : > { %v8250_v27 = vmax.f32 %v8222_v62, 0.0 }
 0x90d   : > { %v8248_v46 = vmax.f32 %v8220_v47, 0.0 }
 0x90e   : > { %v8270_v21 = vpack.c.bf16 %v8250_v27, %v8249_v23  ;;  %v11802_v27 = vld [vmem:[%s18475_s13 + $0x4] sm:$0x7] }
 0x90f   : > { %v8269_v16 = vpack.c.bf16 %v8248_v46, %v8247_v9  ;;  %v13206_v6 = vpop.f32.mrb[72].mxu1 }
 0x910   : > { %v8225_v48 = vadd.f32 %v13206_v6, %v17370_v54  ;;  %v8125_v7 = vpop.f32.mrb[73].mxu1  ;;  %v17436_v51 = vsel %vm18947_vm11, %v8270_v21, 0  ;;  %vm19165_vm11 = vmmov %vm19159_vm0  ;;  %v11783_v21 = vld [vmem:[%s18473_s11 + $0x14] sm:$0x7] }
 0x911   : > { %v17431_v13 = vsel %vm18945_vm10, %v8269_v16, 0  ;;  %v8223_v38 = vadd.f32 %v17370_v54, %v8125_v7  ;;  %v13207_v26 = vpop.f32.mrb[74].mxu1  ;;  %14317 = vmatprep.subr.msk.bf16.mxu1 %vm19165_vm11, %v11802_v27  ;;  %v8890_v6 = vsel %vm19171_vm4, %v11783_v21, 0  ;;  %vm19190_vm11 = vmmov %vm19168_vm1 }
 0x912   : > { %v8226_v4 = vadd.f32 %v13207_v26, %v17370_v54  ;;  %v8128_v59 = vpop.f32.mrb[75].mxu1  ;;  %13227 = vmatmul.mubr.msk.bf16.gmra.mrb[144].mxu0 %vm1728_vm8, %v17431_v13  ;;  %v8253_v3 = vmax.f32 %v8225_v48, 0.0  ;;  %v11792_v48 = vld [vmem:[%s18473_s11 + $0x18] sm:$0x7]  ;;  %v19177_v26 = vld [vmem:[#allocation39_spill] sm:$0xff] }
 0x913   : > { %v8224_v61 = vadd.f32 %v17370_v54, %v8128_v59  ;;  %13230 = vmatprep.mubr.msk.bf16.mxu0 %vm1728_vm8, %v17436_v51  ;;  %v8251_v18 = vmax.f32 %v8223_v38, 0.0  ;;  %v9011_v52 = vsel %vm19174_vm2, %v11792_v48, 0  ;;  %v19175_v38 = vld [vmem:[#allocation38_spill] sm:$0xff]  ;;  %vm19209_vm2 = vsmask.f32 6400 }
 0x914   : > { %v8254_v53 = vmax.f32 %v8226_v4, 0.0 }
 0x915   : > { %v8252_v12 = vmax.f32 %v8224_v61, 0.0 }
 0x916   : > { %v8272_v29 = vpack.c.bf16 %v8254_v53, %v8253_v3 }
 0x917   : > { %v8271_v11 = vpack.c.bf16 %v8252_v12, %v8251_v18  ;;  %v13210_v22 = vpop.f32.mrb[76].mxu1 }
 0x918   : > { %v8229_v43 = vadd.f32 %v13210_v22, %v17370_v54  ;;  %v8141_v19 = vpop.f32.mrb[77].mxu1 }
 0x919   : > { %v17447_v56 = vsel %vm18949_vm12, %v8271_v11, 0  ;;  %v8227_v35 = vadd.f32 %v17370_v54, %v8141_v19  ;;  %v13211_v32 = vpop.f32.mrb[78].mxu1  ;;  %vm19166_vm12 = vmmov %vm19159_vm0  ;;  %vm19178_vm0 = vnez %v19177_v26 }
 0x91a   : > { %v8230_v55 = vadd.f32 %v13211_v32, %v17370_v54  ;;  %v8144_v50 = vpop.f32.mrb[79].mxu1  ;;  %13231 = vmatmul.mubr.msk.bf16.gmra.mrb[148].mxu0 %vm1728_vm8, %v17447_v56  ;;  %v8257_v17 = vmax.f32 %v8229_v43, 0.0  ;;  %v9385_v9 = vsel %vm19166_vm12, %v11802_v27, 0  ;;  %vm19191_vm12 = vcmask 1041408  }
 0x91b   : > { %v8228_v31 = vadd.f32 %v17370_v54, %v8144_v50  ;;  %13236 = vmatprep.mubr.msk.bf16.mxu0 %vm1728_vm8, %v8277_v58  ;;  %v8255_v28 = vmax.f32 %v8227_v35, 0.0  ;;  %13343 = vmatpush3.bf16.msra.mxu1 %v9385_v9 }
 0x91c   : > { %v8258_v37 = vmax.f32 %v8230_v55, 0.0 }
 0x91d   : > { %v8256_v0 = vmax.f32 %v8228_v31, 0.0 }
 0x91e   : > { %v17458_v8 = vpack.c.bf16 %v8258_v37, %v8257_v17 }
 0x91f   : > { %v8273_v10 = vpack.c.bf16 %v8256_v0, %v8255_v28  ;;  %v13214_v45 = vpop.f32.mrb[80].mxu1 }
 0x920   : > { %v8233_v30 = vadd.f32 %v13214_v45, %v17370_v54  ;;  %v8157_v15 = vpop.f32.mrb[81].mxu1  ;;  %v8288_v7 = vsel %vm18955_vm14, %v17458_v8, 0  ;;  %vm19176_vm14 = vnez %v19175_v38 }
 0x921   : > { %v8231_v20 = vadd.f32 %v17370_v54, %v8157_v15  ;;  %v13215_v33 = vpop.f32.mrb[82].mxu1 }
 0x922   : > { %v8234_v40 = vadd.f32 %v13215_v33, %v17370_v54  ;;  %v8160_v49 = vpop.f32.mrb[83].mxu1  ;;  %13237 = vmatmul.mubr.msk.bf16.vlgmr.msra.gmra.mrb[136].mxu0 %vm1728_vm8, %v17381_v57  ;;  %v8261_v24 = vmax.f32 %v8233_v30, 0.0  ;;  %v11774_v57 = vld [vmem:[%s18473_s11 + $0x10] sm:$0x7] }
 0x923   : > { %v8232_v42 = vadd.f32 %v17370_v54, %v8160_v49  ;;  %13253 = vmatpush3.bf16.msra.mxu0 %v8527_v60  ;;  %13240 = vmatprep.mubr.msk.bf16.mxu0 %vm1728_vm8, %v17392_v34  ;;  %v8259_v5 = vmax.f32 %v8231_v20, 0.0  ;;  %v8648_v54 = vsel %vm19161_vm13, %v11765_v2, 0  ;;  %v8769_v46 = vsel %vm19167_vm6, %v11774_v57, 0  ;;  %vm19183_vm13 = vmmov %vm19168_vm1 }
 0x924   : > { %v8262_v63 = vmax.f32 %v8234_v40, 0.0  ;;  %14313 = vmatprep.subr.msk.bf16.mxu0 %vm19160_vm3, %v11765_v2  ;;  %vm19179_vm3 = vmmov %vm19168_vm1 }
 0x925   : > { %v8260_v62 = vmax.f32 %v8232_v42, 0.0 }
 0x926   : > { %v17474_v41 = vpack.c.bf16 %v8262_v63, %v8261_v24 }
 0x927   : > { %v8275_v47 = vpack.c.bf16 %v8260_v62, %v8259_v5 }
 0x928   : > { %v8290_v25 = vsel %vm19178_vm0, %v17474_v41, 0  ;;  %vm19216_vm0 = vmmov %vm19209_vm2 }
 0x92a   : > { %13241 = vmatmul.mubr.msk.bf16.gmra.mrb[140].mxu0 %vm1728_vm8, %v17405_v44 }
 0x92b   : > { %13244 = vmatprep.mubr.msk.bf16.mxu0 %vm1728_vm8, %v17415_v36 }
 0x932   : > { %13245 = vmatmul.mubr.msk.bf16.gmra.mrb[144].mxu0 %vm1728_vm8, %v17420_v39 }
 0x933   : > { %13248 = vmatprep.mubr.msk.bf16.mxu0 %vm1728_vm8, %v17431_v13 }
 0x93a   : > { %13249 = vmatmul.mubr.msk.bf16.gmra.mrb[148].mxu0 %vm1728_vm8, %v17436_v51 }
 0x93b   : > { %13254 = vmatprep.mubr.msk.bf16.mxu0 %vm1728_vm8, %v17392_v34  ;;  %v19163_v34 = vld [vmem:[#allocation35_spill] sm:$0xff] }
 0x93c   : > { %vm19164_vm10 = vnez %v19163_v34 }
 0x93d   : > { %v8286_v23 = vsel %vm19164_vm10, %v8272_v29, 0 }
 0x942   : > { %13255 = vmatmul.mubr.msk.bf16.vlgmr.msra.gmra.mrb[136].mxu0 %vm1728_vm8, %v17405_v44 }
 0x943   : > { %13271 = vmatpush3.bf16.msra.mxu0 %v8648_v54  ;;  %13258 = vmatprep.mubr.msk.bf16.mxu0 %vm1728_vm8, %v17415_v36 }
 0x944   : > { %14314 = vmatprep.subr.msk.bf16.mxu0 %vm19162_vm7, %v11774_v57  ;;  %vm19187_vm7 = vsmask.f32 7424 }
 0x945   : > { %vm19188_vm10 = vmmov %vm19187_vm7 }
 0x946   : > { %vm19192_vm6 = vmmov %vm19187_vm7 }
 0x94a   : > { %13259 = vmatmul.mubr.msk.bf16.gmra.mrb[140].mxu0 %vm1728_vm8, %v17420_v39 }
 0x94b   : > { %13262 = vmatprep.mubr.msk.bf16.mxu0 %vm1728_vm8, %v17431_v13 }
 0x952   : > { %13263 = vmatmul.mubr.msk.bf16.gmra.mrb[144].mxu0 %vm1728_vm8, %v17436_v51 }
 0x953   : > { %13266 = vmatprep.mubr.msk.bf16.mxu0 %vm1728_vm8, %v17447_v56 }
 0x95a   : > { %13267 = vmatmul.mubr.msk.bf16.gmra.mrb[148].mxu0 %vm1728_vm8, %v8286_v23 }
 0x95b   : > { %13272 = vmatprep.mubr.msk.bf16.mxu0 %vm1728_vm8, %v17405_v44  ;;  %v19169_v44 = vld [vmem:[#allocation36_spill] sm:$0xff] }
 0x95c   : > { %vm19170_vm9 = vnez %v19169_v44 }
 0x95d   : > { %v8287_v16 = vsel %vm19170_vm9, %v8273_v10, 0 }
 0x962   : > { %13273 = vmatmul.mubr.msk.bf16.vlgmr.msra.gmra.mrb[136].mxu0 %vm1728_vm8, %v17415_v36 }
 0x963   : > { %13289 = vmatpush3.bf16.msra.mxu0 %v8769_v46  ;;  %13276 = vmatprep.mubr.msk.bf16.mxu0 %vm1728_vm8, %v17420_v39 }
 0x964   : > { %14315 = vmatprep.subr.msk.bf16.mxu0 %vm19168_vm1, %v11783_v21  ;;  %vm19194_vm1 = vmmov %vm19192_vm6 }
 0x965   : > { %vm19195_vm9 = vmmov %vm19194_vm1 }
 0x966   : > { %vm19206_vm4 = vmmov %vm19194_vm1 }
 0x96a   : > { %13277 = vmatmul.mubr.msk.bf16.gmra.mrb[140].mxu0 %vm1728_vm8, %v17431_v13 }
 0x96b   : > { %13280 = vmatprep.mubr.msk.bf16.mxu0 %vm1728_vm8, %v17436_v51 }
 0x972   : > { %13281 = vmatmul.mubr.msk.bf16.gmra.mrb[144].mxu0 %vm1728_vm8, %v17447_v56 }
 0x973   : > { %13284 = vmatprep.mubr.msk.bf16.mxu0 %vm1728_vm8, %v8286_v23 }
 0x97a   : > { %13285 = vmatmul.mubr.msk.bf16.gmra.mrb[148].mxu0 %vm1728_vm8, %v8287_v16 }
 0x97b   : > { %13290 = vmatprep.mubr.msk.bf16.mxu0 %vm1728_vm8, %v17415_v36 }
 0x982   : > { %13291 = vmatmul.mubr.msk.bf16.vlgmr.msra.gmra.mrb[136].mxu0 %vm1728_vm8, %v17420_v39 }
 0x983   : > { %13307 = vmatpush3.bf16.msra.mxu0 %v8890_v6  ;;  %13294 = vmatprep.mubr.msk.bf16.mxu0 %vm1728_vm8, %v17431_v13 }
 0x984   : > { %14316 = vmatprep.subr.msk.bf16.mxu0 %vm19172_vm5, %v11792_v48  ;;  %vm19208_vm5 = vmmov %vm19194_vm1 }
 0x98a   : > { %13295 = vmatmul.mubr.msk.bf16.gmra.mrb[140].mxu0 %vm1728_vm8, %v17436_v51 }
 0x98b   : > { %13298 = vmatprep.mubr.msk.bf16.mxu0 %vm1728_vm8, %v17447_v56 }
 0x992   : > { %13299 = vmatmul.mubr.msk.bf16.gmra.mrb[144].mxu0 %vm1728_vm8, %v8286_v23 }
 0x993   : > { %13302 = vmatprep.mubr.msk.bf16.mxu0 %vm1728_vm8, %v8287_v16 }
 0x99a   : > { %13303 = vmatmul.mubr.msk.bf16.gmra.mrb[148].mxu0 %vm1728_vm8, %v8288_v7 }
 0x99b   : > { %13308 = vmatprep.mubr.msk.bf16.mxu0 %vm1728_vm8, %v17420_v39  ;;  %v8289_v39 = vsel %vm19176_vm14, %v8275_v47, 0  ;;  %vm19211_vm14 = vmmov %vm19209_vm2 }
 0x9a2   : > { %13309 = vmatmul.mubr.msk.bf16.vlgmr.msra.gmra.mrb[136].mxu0 %vm1728_vm8, %v17431_v13 }
 0x9a3   : > { %13325 = vmatpush3.bf16.msra.mxu0 %v9011_v52  ;;  %13312 = vmatprep.mubr.msk.bf16.mxu0 %vm1728_vm8, %v17436_v51 }
 0x9aa   : > { %13313 = vmatmul.mubr.msk.bf16.gmra.mrb[140].mxu0 %vm1728_vm8, %v17447_v56 }
 0x9ab   : > { %13316 = vmatprep.mubr.msk.bf16.mxu0 %vm1728_vm8, %v8286_v23 }
 0x9b2   : > { %13317 = vmatmul.mubr.msk.bf16.gmra.mrb[144].mxu0 %vm1728_vm8, %v8287_v16 }
 0x9b3   : > { %13320 = vmatprep.mubr.msk.bf16.mxu0 %vm1728_vm8, %v8288_v7 }
 0x9ba   : > { %13321 = vmatmul.mubr.msk.bf16.gmra.mrb[148].mxu0 %vm1728_vm8, %v8289_v39 }
 0x9bb   : > { %13326 = vmatprep.mubr.msk.bf16.mxu0 %vm1728_vm8, %v17431_v13  ;;  %v9261_v13 = vld [vmem:[%s18475_s13] sm:$0x7] }
 0x9bc   : > { %14318 = vmatprep.subr.msk.bf16.mxu1 %vm19179_vm3, %v9261_v13  ;;  %v17617_v54 = vsel %vm19183_vm13, %v9261_v13, 0  ;;  %vm19223_vm13 = vmmov %vm19216_vm0 }
 0x9c2   : > { %13327 = vmatmul.mubr.msk.bf16.vlgmr.msra.gmra.mrb[136].mxu0 %vm1728_vm8, %v17436_v51  ;;  %v17591_v51 = vld [vmem:[%s18474_s12] ss:$0 sm:$0xff] }
 0x9c3   : > { %13330 = vmatprep.mubr.msk.bf16.mxu0 %vm1728_vm8, %v17447_v56 }
 0x9ca   : > { %13331 = vmatmul.mubr.msk.bf16.gmra.mrb[140].mxu0 %vm1728_vm8, %v8286_v23 }
 0x9cb   : > { %13334 = vmatprep.mubr.msk.bf16.mxu0 %vm1728_vm8, %v8287_v16 }
 0x9d2   : > { %13335 = vmatmul.mubr.msk.bf16.gmra.mrb[144].mxu0 %vm1728_vm8, %v8288_v7 }
 0x9d3   : > { %13338 = vmatprep.mubr.msk.bf16.mxu0 %vm1728_vm8, %v8289_v39 }
 0x9da   : > { %13339 = vmatmul.mubr.msk.bf16.gmra.mrb[148].mxu0 %vm1728_vm8, %v8290_v25 }
 0xa95   : > { %v13328_v4 = vpop.f32.mrb[136].mxu0 }
 0xa96   : > { %v9135_v59 = vadd.f32 %v13328_v4, %v17591_v51  ;;  %v9047_v61 = vpop.f32.mrb[137].mxu0 }
 0xa97   : > { %v9133_v3 = vadd.f32 %v17591_v51, %v9047_v61  ;;  %v13329_v53 = vpop.f32.mrb[138].mxu0 }
 0xa98   : > { %v9136_v18 = vadd.f32 %v13329_v53, %v17591_v51  ;;  %v9050_v12 = vpop.f32.mrb[139].mxu0  ;;  %v9151_v11 = vmax.f32 %v9135_v59, 0.0 }
 0xa99   : > { %v9134_v29 = vadd.f32 %v17591_v51, %v9050_v12  ;;  %v9149_v43 = vmax.f32 %v9133_v3, 0.0 }
 0xa9a   : > { %v9152_v22 = vmax.f32 %v9136_v18, 0.0 }
 0xa9b   : > { %v9150_v19 = vmax.f32 %v9134_v29, 0.0 }
 0xa9c   : > { %v9166_v1 = vpack.c.bf16 %v9152_v22, %v9151_v11 }
 0xa9d   : > { %v9165_v56 = vpack.c.bf16 %v9150_v19, %v9149_v43  ;;  %v13332_v35 = vpop.f32.mrb[140].mxu0 }
 0xa9e   : > { %v9182_v32 = vshrl.u32 %v9166_v1, 16  ;;  %v9185_v55 = vshll.u32 %v9166_v1, 16  ;;  %v9139_v50 = vadd.f32 %v13332_v35, %v17591_v51  ;;  %v9063_v14 = vpop.f32.mrb[141].mxu0 }
 0xa9f   : > { %v9174_v58 = vshrl.u32 %v9165_v56, 16  ;;  %v9177_v31 = vshll.u32 %v9165_v56, 16  ;;  %v13333_v17 = vpop.f32.mrb[142].mxu0  ;;  %v9137_v0 = vadd.f32 %v17591_v51, %v9063_v14 }
 0xaa0   : > { %v9184_v37 = vrot.slane %v9182_v32, 6  ;;  %v9187_v28 = vrot.slane %v9185_v55, 7  ;;  %v9140_v8 = vadd.f32 %v13333_v17, %v17591_v51  ;;  %v9066_v10 = vpop.f32.mrb[143].mxu0  ;;  %v9155_v20 = vmax.f32 %v9139_v50, 0.0 }
 0xaa1   : > { %v9176_v45 = vrot.slane %v9174_v58, 6  ;;  %v9179_v30 = vrot.slane %v9177_v31, 7  ;;  %v9138_v15 = vadd.f32 %v17591_v51, %v9066_v10  ;;  %v9153_v63 = vmax.f32 %v9137_v0, 0.0 }
 0xaa2   : > { %v9188_v60 = vor.u32 %v9187_v28, %v9184_v37  ;;  %v9156_v33 = vmax.f32 %v9140_v8, 0.0 }
 0xaa3   : > { %v9180_v2 = vor.u32 %v9179_v30, %v9176_v45  ;;  %v9154_v40 = vmax.f32 %v9138_v15, 0.0 }
 0xaa4   : > { %v17603_v42 = vsel %vm18972_vm15, 0, %v9188_v60  ;;  %v17607_v24 = vsel %vm18972_vm15, %v9188_v60, 0  ;;  %v9168_v5 = vpack.c.bf16 %v9156_v33, %v9155_v20 }
 0xaa5   : > { %19181 = vst [vmem:[#allocation66_spill] sm:$0xff] %v17603_v42  ;;  %v17610_v62 = vshll.u32 %v17603_v42, 16  ;;  %v17614_v41 = vsel %vm18972_vm15, 0, %v9180_v2  ;;  %v13336_v47 = vpop.f32.mrb[144].mxu0  ;;  %v17620_v57 = vshll.u32 %v17607_v24, 16  ;;  %v9167_v27 = vpack.c.bf16 %v9154_v40, %v9153_v63 }
 0xaa6   : > { %19182 = vst [vmem:[#allocation69_spill] sm:$0xff] %v17614_v41  ;;  %v9198_v34 = vshrl.u32 %v9168_v5, 16  ;;  %v9201_v23 = vshll.u32 %v9168_v5, 16  ;;  %v9079_v9 = vpop.f32.mrb[145].mxu0  ;;  %v17624_v46 = vsel %vm18972_vm15, %v9180_v2, 0  ;;  %v9143_v21 = vadd.f32 %v13336_v47, %v17591_v51 }
 0xaa7   : > { %19184 = vst [vmem:[#allocation70_spill] sm:$0xff] %v17624_v46  ;;  %v9141_v44 = vadd.f32 %v17591_v51, %v9079_v9  ;;  %v13337_v16 = vpop.f32.mrb[146].mxu0  ;;  %v17629_v6 = vshll.u32 %v17614_v41, 16  ;;  %v9190_v7 = vshrl.u32 %v9167_v27, 16  ;;  %v9193_v52 = vshll.u32 %v9167_v27, 16 }
 0xaa8   : > { %v9200_v48 = vrot.slane %v9198_v34, 6  ;;  %v9203_v36 = vrot.slane %v9201_v23, 7  ;;  %v9082_v38 = vpop.f32.mrb[147].mxu0  ;;  %v9159_v39 = vmax.f32 %v9143_v21, 0.0  ;;  %v9144_v26 = vadd.f32 %v13337_v16, %v17591_v51  ;;  %v17674_v27 = vld [vmem:[%s18475_s13 + $0x8] sm:$0x7] }
 0xaa9   : > { %v9142_v25 = vadd.f32 %v17591_v51, %v9082_v38  ;;  %v17634_v13 = vshrl.u32 %v17614_v41, 16  ;;  %v9192_v59 = vrot.slane %v9190_v7, 6  ;;  %v9195_v61 = vrot.slane %v9193_v52, 7 }
 0xaaa   : > { %v9204_v4 = vor.u32 %v9203_v36, %v9200_v48  ;;  %v9267_v3 = vrot.slane %v17629_v6, 1  ;;  %v9157_v53 = vmax.f32 %v9141_v44, 0.0  ;;  %v9160_v18 = vmax.f32 %v9144_v26, 0.0 }
 0xaab   : > { %v9158_v12 = vmax.f32 %v9142_v25, 0.0  ;;  %v17638_v29 = vshll.u32 %v17624_v46, 16  ;;  %v9196_v22 = vor.u32 %v9195_v61, %v9192_v59  ;;  %v17646_v19 = vshrl.u32 %v17603_v42, 16 }
 0xaac   : > { %v17642_v11 = vsel %vm18972_vm15, 0, %v9204_v4  ;;  %v9268_v43 = vor.u32 %v9267_v3, %v17634_v13  ;;  %v17650_v1 = vsel %vm18972_vm15, %v9204_v4, 0  ;;  %v9170_v56 = vpack.c.bf16 %v9160_v18, %v9159_v39 }
 0xaad   : > { %19185 = vst [vmem:[#allocation74_spill] sm:$0xff] %v17642_v11  ;;  %v9169_v35 = vpack.c.bf16 %v9158_v12, %v9157_v53  ;;  %v13340_v32 = vpop.f32.mrb[148].mxu0  ;;  %v9279_v55 = vrot.slane %v17610_v62, 1  ;;  %v17655_v50 = vsel %vm18972_vm15, 0, %v9196_v22  ;;  %v17659_v14 = vsel %vm18972_vm15, %v9196_v22, 0 }
 0xaae   : > { %19186 = vst [vmem:[#allocation41_spill] sm:$0xff] %v17655_v50  ;;  %v9147_v58 = vadd.f32 %v13340_v32, %v17591_v51  ;;  %v9272_v31 = vrot.slane %v17638_v29, 1  ;;  %v9095_v17 = vpop.f32.mrb[149].mxu0  ;;  %v9214_v37 = vshrl.u32 %v9170_v56, 16  ;;  %v9217_v28 = vshll.u32 %v9170_v56, 16 }
 0xaaf   : > { %v9206_v0 = vshrl.u32 %v9169_v35, 16  ;;  %v9209_v8 = vshll.u32 %v9169_v35, 16  ;;  %v13341_v10 = vpop.f32.mrb[150].mxu0  ;;  %v9145_v30 = vadd.f32 %v17591_v51, %v9095_v17  ;;  %v9280_v15 = vor.u32 %v9279_v55, %v17646_v19  ;;  %v17721_v12 = vld [vmem:[%s18477_s15] sm:$0x3] }
 0xab0   : > { %v9273_v45 = vsel %vm19187_vm7, %v9268_v43, %v9272_v31  ;;  %v9284_v60 = vrot.slane %v17620_v57, 1  ;;  %v9098_v20 = vpop.f32.mrb[151].mxu0  ;;  %v9216_v33 = vrot.slane %v9214_v37, 6  ;;  %v9219_v2 = vrot.slane %v9217_v28, 7  ;;  %14324 = vmatprep.subr.msk.bf16.mxu0 %vm19191_vm12, %v17721_v12 }
 0xab1   : > { %v9208_v40 = vrot.slane %v9206_v0, 6  ;;  %v9211_v63 = vrot.slane %v9209_v8, 7  ;;  %13344 = vmatprep.mubr.msk.bf16.mxu1 %vm1728_vm8, %v9273_v45  ;;  %v9163_v5 = vmax.f32 %v9147_v58, 0.0  ;;  %v9148_v34 = vadd.f32 %v13341_v10, %v17591_v51 }
 0xab2   : > { %v9285_v47 = vsel %vm19188_vm10, %v9280_v15, %v9284_v60  ;;  %v9146_v23 = vadd.f32 %v17591_v51, %v9098_v20  ;;  %v9220_v9 = vor.u32 %v9219_v2, %v9216_v33  ;;  %v9161_v44 = vmax.f32 %v9145_v30, 0.0 }
 0xab3   : > { %v9212_v21 = vor.u32 %v9211_v63, %v9208_v40  ;;  %13345 = vmatmul.mubr.msk.bf16.vlgmr.msra.gmra.mrb[84].mxu1 %vm1728_vm8, %v9285_v47  ;;  %v17678_v16 = vshll.u32 %v17655_v50, 16  ;;  %v9164_v48 = vmax.f32 %v9148_v34, 0.0  ;;  %v17682_v7 = vshrl.u32 %v17655_v50, 16 }
 0xab4   : > { %13361 = vmatpush3.bf16.msra.mxu1 %v17617_v54  ;;  %v9162_v36 = vmax.f32 %v9146_v23, 0.0  ;;  %v17685_v51 = vshll.u32 %v17659_v14, 16  ;;  %v17689_v52 = vsel %vm18972_vm15, 0, %v9220_v9  ;;  %v17700_v54 = vshrl.u32 %v17642_v11, 16 }
 0xab5   : > { %v17693_v38 = vsel %vm18972_vm15, 0, %v9212_v21  ;;  %v17697_v39 = vsel %vm18972_vm15, %v9212_v21, 0  ;;  %14319 = vmatprep.subr.msk.bf16.mxu1 %vm19190_vm11, %v17674_v27  ;;  %v9172_v26 = vpack.c.bf16 %v9164_v48, %v9163_v5  ;;  %v9291_v4 = vrot.slane %v17678_v16, 1  ;;  %vm19238_vm11 = vmmov %vm19216_vm0 }
 0xab6   : > { %19189 = vst [vmem:[#allocation49_spill] sm:$0xff] %v17693_v38  ;;  %v9171_v25 = vpack.c.bf16 %v9162_v36, %v9161_v44  ;;  %v9296_v59 = vrot.slane %v17685_v51, 1  ;;  %v17707_v61 = vshll.u32 %v17642_v11, 16  ;;  %v17710_v3 = vshll.u32 %v17650_v1, 16 }
 0xab7   : > { %v17713_v53 = vshrl.u32 %v17693_v38, 16  ;;  %v17716_v18 = vshll.u32 %v17693_v38, 16  ;;  %v9230_v22 = vshrl.u32 %v9172_v26, 16  ;;  %v9233_v43 = vshll.u32 %v9172_v26, 16 }
 0xab8   : > { %v9222_v56 = vshrl.u32 %v9171_v25, 16  ;;  %v9225_v35 = vshll.u32 %v9171_v25, 16  ;;  %v9292_v32 = vor.u32 %v9291_v4, %v17682_v7  ;;  %v9303_v55 = vrot.slane %v17707_v61, 1 }
 0xab9   : > { %v9308_v58 = vrot.slane %v17710_v3, 1  ;;  %v9315_v31 = vrot.slane %v17716_v18, 1  ;;  %v9232_v17 = vrot.slane %v9230_v22, 6  ;;  %v9235_v37 = vrot.slane %v9233_v43, 7 }
 0xaba   : > { %v9224_v28 = vrot.slane %v9222_v56, 6  ;;  %v9227_v0 = vrot.slane %v9225_v35, 7  ;;  %v9297_v8 = vsel %vm19192_vm6, %v9292_v32, %v9296_v59  ;;  %v9304_v10 = vor.u32 %v9303_v55, %v17700_v54 }
 0xabb   : > { %v9316_v45 = vor.u32 %v9315_v31, %v17713_v53  ;;  %v17733_v30 = vshll.u32 %v17697_v39, 16  ;;  %v17737_v15 = vsel %vm18972_vm15, %v9220_v9, 0  ;;  %v9236_v60 = vor.u32 %v9235_v37, %v9232_v17  ;;  %13348 = vmatprep.mubr.msk.bf16.mxu1 %vm1728_vm8, %v9297_v8 }
 0xabc   : > { %v9228_v20 = vor.u32 %v9227_v0, %v9224_v28  ;;  %v17741_v33 = vshll.u32 %v17689_v52, 16  ;;  %v9309_v2 = vsel %vm19194_vm1, %v9304_v10, %v9308_v58  ;;  %v17760_v23 = vshrl.u32 %v17689_v52, 16 }
 0xabd   : > { %v9320_v40 = vrot.slane %v17733_v30, 1  ;;  %v17747_v63 = vsel %vm18972_vm15, 0, %v9236_v60  ;;  %13349 = vmatmul.mubr.msk.bf16.gmra.mrb[88].mxu1 %vm1728_vm8, %v9309_v2  ;;  %v17764_v21 = vshll.u32 %v17737_v15, 16  ;;  %v17778_v26 = vsel %vm18972_vm15, %v9236_v60, 0  ;;  %v19221_v60 = vld [vmem:[#allocation29_spill] sm:$0xff] }
 0xabe   : > { %19193 = vst [vmem:[#allocation46_spill] sm:$0xff] %v17741_v33  ;;  %v17751_v5 = vsel %vm18972_vm15, 0, %v9228_v20  ;;  %v17755_v47 = vsel %vm18972_vm15, %v9228_v20, 0  ;;  %19196 = vst [vmem:[#allocation44_spill] sm:$0xff] %v17760_v23  ;;  %v9327_v9 = vrot.slane %v17741_v33, 1  ;;  %v17774_v36 = vshll.u32 %v17747_v63, 16 }
 0xabf   : > { %v9321_v34 = vsel %vm19195_vm9, %v9316_v45, %v9320_v40  ;;  %19197 = vst [vmem:[#allocation75_spill] sm:$0xff] %v17764_v21  ;;  %v17768_v44 = vshll.u32 %v17751_v5, 16  ;;  %v17771_v48 = vshll.u32 %v17755_v47, 16  ;;  %19201 = vst [vmem:[#allocation47_spill] sm:$0xff] %v17778_v26  ;;  %v17782_v4 = vshrl.u32 %v17751_v5, 16  ;;  %v19207_v45 = vld [vmem:[#allocation12_spill] sm:$0xff] }
 0xac0   : > { %13352 = vmatprep.mubr.msk.bf16.mxu1 %vm1728_vm8, %v9321_v34  ;;  %19200 = vst [vmem:[#allocation45_spill] sm:$0xff] %v17774_v36  ;;  %v9328_v25 = vor.u32 %v9327_v9, %v17760_v23  ;;  %v9351_v22 = vrot.slane %v17774_v36, 1  ;;  %v9332_v43 = vrot.slane %v17764_v21, 1  ;;  %v17790_v32 = vshrl.u32 %v17747_v63, 16  ;;  %vm19205_vm15 = vmmov %vm19194_vm1 }
 0xac1   : > { %19198 = vst [vmem:[#allocation43_spill] sm:$0xff] %v17768_v44  ;;  %19199 = vst [vmem:[#allocation42_spill] sm:$0xff] %v17771_v48  ;;  %v9339_v59 = vrot.slane %v17768_v44, 1  ;;  %v9344_v35 = vrot.slane %v17771_v48, 1  ;;  %v17793_v49 = vshll.u32 %v17778_v26, 16  ;;  %v18696_v17 = vshrl.u32 %v17607_v24, 16 }
 0xac2   : > { %19202 = vst [vmem:[#allocation48_spill] sm:$0xff] %v17782_v4  ;;  %19203 = vst [vmem:[#allocation51_spill] sm:$0xff] %v17790_v32  ;;  %v9333_v55 = vsel %vm19205_vm15, %v9328_v25, %v9332_v43  ;;  %v9352_v31 = vor.u32 %v9351_v22, %v17790_v32  ;;  %v9782_v28 = vrot.slane %v17634_v13, 1  ;;  %v9783_v0 = vrot.slane %v17629_v6, 2  ;;  %v19222_v48 = vld [vmem:[#allocation30_spill] sm:$0xff]  ;;  %v19228_v26 = vld [vmem:[#allocation20_spill] sm:$0xff] }
 0xac3   : > { %v9340_v56 = vor.u32 %v9339_v59, %v17782_v4  ;;  %19204 = vst [vmem:[#allocation50_spill] sm:$0xff] %v17793_v49  ;;  %v9356_v37 = vrot.slane %v17793_v49, 1  ;;  %v18697_v8 = vshrl.u32 %v17624_v46, 16  ;;  %v9788_v10 = vrot.slane %v17638_v29, 2  ;;  %v19229_v44 = vld [vmem:[#allocation23_spill] sm:$0xff]  ;;  %v19230_v4 = vld [vmem:[#allocation24_spill] sm:$0xff]  ;;  %vm19244_vm1 = vmmov %vm19179_vm3 }
 0xac4   : > { %v9791_v2 = vrot.slane %v17646_v19, 1  ;;  %v9792_v40 = vrot.slane %v17610_v62, 2  ;;  %v9784_v34 = vor.u32 %v9783_v0, %v9782_v28  ;;  %v9796_v25 = vrot.slane %v18696_v17, 1  ;;  %v19213_v17 = vld [vmem:[#allocation13_spill] sm:$0xff] }
 0xac5   : > { %13353 = vmatmul.mubr.msk.bf16.gmra.mrb[92].mxu1 %vm1728_vm8, %v9333_v55  ;;  %v9345_v58 = vsel %vm19206_vm4, %v9340_v56, %v9344_v35  ;;  %v9357_v20 = vsel %vm19208_vm5, %v9352_v31, %v9356_v37  ;;  %v9787_v9 = vrot.slane %v18697_v8, 1  ;;  %v9797_v59 = vrot.slane %v17620_v57, 2  ;;  %v19214_v8 = vld [vmem:[#allocation14_spill] sm:$0xff]  ;;  %vm19247_vm4 = vmmov %vm19244_vm1 }
 0xac6   : > { %13356 = vmatprep.mubr.msk.bf16.mxu1 %vm1728_vm8, %v9345_v58  ;;  %v9793_v22 = vor.u32 %v9792_v40, %v9791_v2  ;;  %v9800_v43 = vrot.slane %v17682_v7, 1  ;;  %v9801_v56 = vrot.slane %v17678_v16, 2  ;;  %v18695_v35 = vshrl.u32 %v17659_v14, 16 }
 0xac7   : > { %v9789_v55 = vor.u32 %v9788_v10, %v9787_v9  ;;  %v9798_v58 = vor.u32 %v9797_v59, %v9796_v25  ;;  %v9806_v31 = vrot.slane %v17685_v51, 2  ;;  %v9809_v37 = vrot.slane %v17700_v54, 1 }
 0xac8   : > { %v9802_v28 = vor.u32 %v9801_v56, %v9800_v43  ;;  %v9805_v0 = vrot.slane %v18695_v35, 1  ;;  %v9810_v2 = vrot.slane %v17707_v61, 2  ;;  %v18702_v40 = vshrl.u32 %v17650_v1, 16 }
 0xac9   : > { %v17828_v10 = vsel %vm19209_vm2, %v9784_v34, %v9789_v55  ;;  %v17831_v9 = vsel %vm19211_vm14, %v9793_v22, %v9798_v58  ;;  %v9815_v25 = vrot.slane %v17710_v3, 2  ;;  %v9819_v35 = vrot.slane %v17716_v18, 2  ;;  %v19215_v55 = vld [vmem:[#allocation16_spill] sm:$0xff] }
 0xaca   : > { %19210 = vst [vmem:[#allocation55_spill] sm:$0xff] %v17828_v10  ;;  %19212 = vst [vmem:[#allocation53_spill] sm:$0xff] %v17831_v9  ;;  %v9807_v59 = vor.u32 %v9806_v31, %v9805_v0  ;;  %v9811_v43 = vor.u32 %v9810_v2, %v9809_v37  ;;  %v9814_v56 = vrot.slane %v18702_v40, 1  ;;  %v18711_v34 = vshrl.u32 %v17697_v39, 16  ;;  %v19218_v0 = vld [vmem:[#allocation17_spill] sm:$0xff]  ;;  %v19219_v40 = vld [vmem:[#allocation27_spill] sm:$0xff] }
 0xacb   : > { %v9824_v22 = vrot.slane %v17733_v30, 2  ;;  %v19220_v9 = vld [vmem:[#allocation28_spill] sm:$0xff]  ;;  %v9667_v58 = vsel %vm19179_vm3, %v17674_v27, 0  ;;  %v19233_v2 = vrot.slane %v19219_v40, 7  ;;  %vm19234_vm7 = vcmask 1040384  }
 0xacc   : > { %v17844_v36 = vsel %vm19216_vm0, %v9802_v28, %v9807_v59  ;;  %v9816_v31 = vor.u32 %v9815_v25, %v9814_v56  ;;  %v9823_v49 = vrot.slane %v18711_v34, 1  ;;  %v19227_v56 = vld [vmem:[#allocation19_spill] sm:$0xff]  ;;  %v11828_v34 = vld [vmem:[%s18475_s13 + $0xc] sm:$0x7]  ;;  %vm19237_vm10 = vmmov %vm19234_vm7  ;;  %v9619_v32 = vrot.slane %v17603_v42, 1 }
 0xacd   : > { %13357 = vmatmul.mubr.msk.bf16.gmra.mrb[96].mxu1 %vm1728_vm8, %v9357_v20  ;;  %v9818_v20 = vrot.slane %v17713_v53, 1  ;;  %19217 = vst [vmem:[#allocation54_spill] sm:$0xff] %v17844_v36  ;;  %v17874_v25 = vsel %vm19234_vm7, 0.0, %v19233_v2  ;;  %v19240_v36 = vrot.slane %v19221_v60, 7  ;;  %vm19241_vm12 = vmmov %vm19234_vm7  ;;  %v19242_v2 = vrot.slane %v19222_v48, 7 }
 0xace   : > { %13362 = vmatprep.mubr.msk.bf16.mxu1 %vm1728_vm8, %v17614_v41  ;;  %v17856_v28 = vsel %vm19223_vm13, %v9811_v43, %v9816_v31  ;;  %v9825_v10 = vor.u32 %v9824_v22, %v9823_v49  ;;  %19235 = vst [vmem:[#allocation62_spill] sm:$0xff] %v17874_v25  ;;  %v19236_v49 = vrot.slane %v19220_v9, 7  ;;  %vm19243_vm6 = vmmov %vm19234_vm7  ;;  %v9631_v48 = vrot.slane %v17689_v52, 1 }
 0xacf   : > { %v9820_v37 = vor.u32 %v9819_v35, %v9818_v20  ;;  %19224 = vst [vmem:[#allocation57_spill] sm:$0xff] %v17856_v28  ;;  %v19225_v35 = vld [vmem:[#allocation18_spill] sm:$0xff]  ;;  %v19226_v20 = vld [vmem:[#allocation15_spill] sm:$0xff]  ;;  %v17889_v59 = vsel %vm19241_vm12, 0.0, %v19240_v36  ;;  %v17894_v27 = vsel %vm19243_vm6, %v19242_v2, 0.0  ;;  %v9623_v36 = vrot.slane %v17659_v14, 1  ;;  %vm19257_vm7 = vmmov %vm19243_vm6 }
 0xad0   : > { %v17879_v22 = vsel %vm19237_vm10, %v19236_v49, 0.0  ;;  %v9616_v49 = vrot.slane %v17614_v41, 1  ;;  %v9626_v28 = vrot.slane %v17650_v1, 1  ;;  %v9628_v2 = vrot.slane %v17693_v38, 1  ;;  %vm19259_vm10 = vmmov %vm19243_vm6 }
 0xad1   : > { %v17884_v43 = vsel %vm19238_vm11, %v9820_v37, %v9825_v10  ;;  %v9620_v10 = vrot.slane %v17607_v24, 1  ;;  %v9622_v37 = vrot.slane %v17655_v50, 1  ;;  %v9629_v41 = vrot.slane %v17697_v39, 1  ;;  %vm19261_vm11 = vmmov %vm19243_vm6 }
 0xad2   : > { %19239 = vst [vmem:[#allocation76_spill] sm:$0xff] %v17884_v43  ;;  %v9625_v43 = vrot.slane %v17642_v11, 1  ;;  %vm19245_vm9 = vcmask 1041408   ;;  %v9634_v33 = vrot.slane %v17751_v5, 1  ;;  %v9635_v23 = vrot.slane %v17755_v47, 1 }
 0xad3   : > { %v10998_v40 = vsel %vm19245_vm9, %v17721_v12, 0  ;;  %vm19246_vm15 = vcmask 1046528   ;;  %v17922_v31 = vsel %vm19247_vm4, %v11828_v34, 0  ;;  %vm19264_vm12 = vcmask 1045504  }
 0xad4   : > { %13469 = vmatpush3.bf16.msra.mxu0 %v10998_v40  ;;  %vm19248_vm5 = vmmov %vm19246_vm15 }
 0xad5   : > { %13363 = vmatmul.mubr.msk.bf16.vlgmr.msra.gmra.mrb[84].mxu1 %vm1728_vm8, %v17603_v42  ;;  %v9632_v42 = vrot.slane %v17737_v15, 1  ;;  %v17927_v12 = vsel %vm19248_vm5, %v9619_v32, %v9620_v10  ;;  %vm19249_vm2 = vmmov %vm19248_vm5  ;;  %v10163_v32 = vrot.slane %v17629_v6, 3 }
 0xad6   : > { %13379 = vmatpush3.bf16.msra.mxu1 %v9667_v58  ;;  %13366 = vmatprep.mubr.msk.bf16.mxu1 %vm1728_vm8, %v17655_v50  ;;  %v9617_v58 = vrot.slane %v17624_v46, 1  ;;  %v17930_v9 = vsel %vm19249_vm2, %v9622_v37, %v9623_v36  ;;  %vm19250_vm14 = vmmov %vm19249_vm2  ;;  %v19256_v36 = vrot.slane %v19207_v45, 7  ;;  %v19265_v45 = vrot.slane %v19225_v35, 2 }
 0xad7   : > { %14320 = vmatprep.subr.msk.bf16.mxu1 %vm19244_vm1, %v11828_v34  ;;  %v17933_v40 = vsel %vm19250_vm14, %v9625_v43, %v9626_v28  ;;  %vm19251_vm0 = vmmov %vm19249_vm2  ;;  %v19255_v43 = vrot.slane %v19213_v17, 7  ;;  %vm19268_vm1 = vsmask.f32 5376 }
 0xad8   : > { %v17919_v25 = vsel %vm19246_vm15, %v9616_v49, %v9617_v58  ;;  %v17936_v60 = vsel %vm19251_vm0, %v9628_v2, %v9629_v41  ;;  %vm19252_vm3 = vmmov %vm19251_vm0  ;;  %v10162_v49 = vrot.slane %v17634_v13, 2  ;;  %v19253_v58 = vshrl.u32 %v17624_v46, 16 }
 0xad9   : > { %v17941_v34 = vsel %vm19252_vm3, %v9631_v48, %v9632_v42  ;;  %vm19254_vm13 = vmmov %vm19251_vm0  ;;  %v10166_v41 = vrot.slane %v17638_v29, 3  ;;  %v10717_v42 = vsel %vm19257_vm7, %v19256_v36, %v19255_v43  ;;  %v19258_v13 = vmov %v19256_v36 }
 0xada   : > { %v10165_v10 = vrot.slane %v19253_v58, 2  ;;  %v17948_v37 = vsel %vm19254_vm13, %v9634_v33, %v9635_v23  ;;  %v10164_v48 = vor.u32 %v10163_v32, %v10162_v49  ;;  %v10763_v6 = vsel %vm19259_vm10, 0.0, %v19258_v13  ;;  %vm19267_vm6 = vmmov %vm19264_vm12  ;;  %v19271_v13 = vld [vmem:[#allocation21_spill] sm:$0xff] }
 0xadb   : > { %v19260_v2 = vmov %v19255_v43  ;;  %v10797_v23 = vrot.slane %v10717_v42, 1  ;;  %v10796_v21 = vrot.slane %v10763_v6, 1  ;;  %v10869_v29 = vrot.slane %v10763_v6, 2  ;;  %vm19269_vm9 = vmmov %vm19251_vm0 }
 0xadc   : > { %v10771_v33 = vsel %vm19261_vm11, %v19260_v2, 0.0  ;;  %v10167_v58 = vor.u32 %v10166_v41, %v10165_v10  ;;  %v10870_v28 = vrot.slane %v10717_v42, 2  ;;  %v19263_v43 = vrot.slane %v19215_v55, 2  ;;  %vm19270_vm15 = vmmov %vm19251_vm0 }
 0xadd   : > { %13367 = vmatmul.mubr.msk.bf16.gmra.mrb[88].mxu1 %vm1728_vm8, %v17642_v11  ;;  %v10799_v50 = vrot.slane %v10771_v33, 1  ;;  %v19262_v11 = vrot.slane %v19218_v0, 2  ;;  %v10798_v10 = vsel %vm19269_vm9, %v10796_v21, %v10797_v23  ;;  %vm19272_vm4 = vmmov %vm19267_vm6  ;;  %v19274_v0 = vld [vmem:[#allocation22_spill] sm:$0xff]  ;;  %v10170_v21 = vrot.slane %v17610_v62, 3 }
 0xade   : > { %13370 = vmatprep.mubr.msk.bf16.mxu1 %vm1728_vm8, %v17693_v38  ;;  %v10872_v38 = vrot.slane %v10771_v33, 2  ;;  %v17974_v36 = vsel %vm19268_vm1, %v10164_v48, %v10167_v58  ;;  %v10852_v33 = vadd.f32 %v10798_v10, %v10763_v6  ;;  %v10871_v55 = vsel %vm19272_vm4, %v10869_v29, %v10870_v28  ;;  %vm19273_vm5 = vmmov %vm19272_vm4 }
 0xadf   : > { %v10876_v49 = vsel %vm19264_vm12, %v19263_v43, %v19262_v11  ;;  %v19266_v32 = vmov %v19262_v11  ;;  %v10800_v41 = vsel %vm19270_vm15, %v10797_v23, %v10799_v50  ;;  %v10169_v48 = vrot.slane %v17646_v19, 2  ;;  %vm19279_vm2 = vmmov %vm19257_vm7 }
 0xae0   : > { %v10878_v17 = vsel %vm19267_vm6, %v19266_v32, %v19265_v45  ;;  %v10927_v2 = vadd.f32 %v10876_v49, %v19271_v13  ;;  %v10853_v46 = vadd.f32 %v10800_v41, %v10717_v42  ;;  %v10873_v11 = vsel %vm19273_vm5, %v10870_v28, %v10872_v38  ;;  %vm19280_vm14 = vmmov %vm19268_vm1 }
 0xae1   : > { %v10928_v35 = vadd.f32 %v10878_v17, %v19274_v0  ;;  %v10925_v50 = vadd.f32 %v10871_v55, %v10852_v33  ;;  %v19275_v42 = vshrl.u32 %v17607_v24, 16  ;;  %v10173_v38 = vrot.slane %v17620_v57, 3  ;;  %vm19282_vm0 = vmmov %vm19279_vm2 }
 0xae2   : > { %v10943_v43 = vmul.f32 0.11111111, %v10927_v2  ;;  %v10926_v6 = vadd.f32 %v10873_v11, %v10853_v46  ;;  %v9839_v28 = vshrl.u32 %v17755_v47, 16  ;;  %v10171_v29 = vor.u32 %v10170_v21, %v10169_v48  ;;  %vm19284_vm3 = vmmov %vm19282_vm0 }
 0xae3   : > { %v10172_v23 = vrot.slane %v19275_v42, 2  ;;  %v10944_v58 = vmul.f32 0.11111111, %v10928_v35  ;;  %v10176_v49 = vrot.slane %v17682_v7, 2  ;;  %v10941_v45 = vmul.f32 0.11111111, %v10925_v50  ;;  %vm19287_vm10 = vmmov %vm19268_vm1 }
 0xae4   : > { %v10942_v19 = vmul.f32 0.11111111, %v10926_v6  ;;  %v10177_v62 = vrot.slane %v17678_v16, 3  ;;  %v19276_v10 = vshrl.u32 %v17659_v14, 16  ;;  %v10180_v41 = vrot.slane %v17685_v51, 3  ;;  %vm19288_vm11 = vmmov %vm19269_vm9 }
 0xae5   : > { %13371 = vmatmul.mubr.msk.bf16.gmra.mrb[92].mxu1 %vm1728_vm8, %v17689_v52  ;;  %v10174_v32 = vor.u32 %v10173_v38, %v10172_v23  ;;  %v10958_v17 = vpack.c.bf16 %v10944_v58, %v10943_v43  ;;  %v19277_v13 = vrot.slane %v19226_v20, 7  ;;  %v19278_v57 = vrot.slane %v19214_v8, 7  ;;  %vm19291_vm12 = vmmov %vm19282_vm0 }
 0xae6   : > { %13374 = vmatprep.mubr.msk.bf16.mxu1 %vm1728_vm8, %v17751_v5  ;;  %v10179_v46 = vrot.slane %v19276_v10, 2  ;;  %v10957_v33 = vpack.c.bf16 %v10942_v19, %v10941_v45  ;;  %v10178_v55 = vor.u32 %v10177_v62, %v10176_v49  ;;  %vm19285_vm13 = vcmask 31744   ;;  %vm19293_vm6 = vmmov %vm19282_vm0 }
 0xae7   : > { %v10723_v2 = vsel %vm19279_vm2, %v19278_v57, %v19277_v13  ;;  %v18003_v7 = vsel %vm19280_vm14, %v10171_v29, %v10174_v32  ;;  %v19281_v11 = vmov %v19278_v57  ;;  %v19283_v35 = vmov %v19277_v13  ;;  %vm19286_vm7 = vmmov %vm19285_vm13 }
 0xae8   : > { %v10765_v16 = vsel %vm19282_vm0, 0.0, %v19281_v11  ;;  %v10181_v0 = vor.u32 %v10180_v41, %v10179_v46  ;;  %v10773_v51 = vsel %vm19284_vm3, %v19283_v35, 0.0  ;;  %v10807_v48 = vrot.slane %v10723_v2, 1  ;;  %13470 = vmatprep.mubr.msk.bf16.mxu0 %vm19285_vm13, %v10957_v33  ;;  %vm19294_vm1 = vmmov %vm19269_vm9 }
 0xae9   : > { %v10806_v43 = vrot.slane %v10765_v16, 1  ;;  %v10809_v21 = vrot.slane %v10773_v51, 1  ;;  %v10879_v50 = vrot.slane %v10765_v16, 2  ;;  %v10880_v6 = vrot.slane %v10723_v2, 2  ;;  %13471 = vmatmul.mubr.msk.bf16.vlgmr.msra.gmra.mrb[152].mxu0 %vm19286_vm7, %v10958_v17  ;;  %vm19295_vm9 = vmmov %vm19272_vm4 }
 0xaea   : > { %v10882_v42 = vrot.slane %v10773_v51, 2  ;;  %v18016_v8 = vsel %vm19287_vm10, %v10178_v55, %v10181_v0  ;;  %v19289_v23 = vrot.slane %v19228_v26, 7  ;;  %v19290_v38 = vrot.slane %v19227_v56, 7  ;;  %vm19296_vm15 = vmmov %vm19272_vm4 }
 0xaeb   : > { %v10808_v20 = vsel %vm19288_vm11, %v10806_v43, %v10807_v48  ;;  %v10810_v45 = vsel %vm19294_vm1, %v10807_v48, %v10809_v21  ;;  %v10881_v32 = vsel %vm19295_vm9, %v10879_v50, %v10880_v6  ;;  %vm19298_vm4 = vmmov %vm19282_vm0  ;;  %v10184_v50 = vrot.slane %v17707_v61, 3 }
 0xaec   : > { %v10726_v58 = vsel %vm19291_vm12, %v19290_v38, %v19289_v23  ;;  %v19292_v29 = vmov %v19290_v38  ;;  %v10856_v19 = vadd.f32 %v10808_v20, %v10765_v16  ;;  %v10883_v62 = vsel %vm19296_vm15, %v10880_v6, %v10882_v42  ;;  %vm19299_vm5 = vmmov %vm19294_vm1  ;;  %v18044_v6 = vld [vmem:[%s18475_s13 + $0x10] sm:$0x7] }
 0xaed   : > { %13375 = vmatmul.mubr.msk.bf16.gmra.mrb[96].mxu1 %vm1728_vm8, %v17747_v63  ;;  %v10766_v49 = vsel %vm19293_vm6, 0.0, %v19292_v29  ;;  %v10857_v17 = vadd.f32 %v10810_v45, %v10723_v2  ;;  %v19297_v10 = vmov %v19289_v23  ;;  %v10812_v13 = vrot.slane %v10726_v58, 1  ;;  %vm19300_vm2 = vmmov %vm19294_vm1 }
 0xaee   : > { %13380 = vmatprep.mubr.msk.bf16.mxu1 %vm1728_vm8, %v17919_v25  ;;  %v10774_v46 = vsel %vm19298_vm4, %v19297_v10, 0.0  ;;  %v10811_v41 = vrot.slane %v10766_v49, 1  ;;  %v10929_v56 = vadd.f32 %v10881_v32, %v10856_v19  ;;  %v10884_v33 = vrot.slane %v10766_v49, 2  ;;  %vm19301_vm14 = vmmov %vm19295_vm9 }
 0xaef   : > { %v10814_v57 = vrot.slane %v10774_v46, 1  ;;  %v10885_v55 = vrot.slane %v10726_v58, 2  ;;  %v10930_v11 = vadd.f32 %v10883_v62, %v10857_v17  ;;  %v10887_v0 = vrot.slane %v10774_v46, 2  ;;  %vm19302_vm0 = vmmov %vm19295_vm9 }
 0xaf0   : > { %v10813_v25 = vsel %vm19299_vm5, %v10811_v41, %v10812_v13  ;;  %v10183_v16 = vrot.slane %v17700_v54, 2  ;;  %v10945_v35 = vmul.f32 0.11111111, %v10929_v56  ;;  %v19303_v54 = vshrl.u32 %v17650_v1, 16  ;;  %vm19306_vm13 = vmmov %vm19286_vm7 }
 0xaf1   : > { %v10815_v51 = vsel %vm19300_vm2, %v10812_v13, %v10814_v57  ;;  %v10858_v2 = vadd.f32 %v10813_v25, %v10766_v49  ;;  %v10886_v26 = vsel %vm19301_vm14, %v10884_v33, %v10885_v55  ;;  %v10946_v43 = vmul.f32 0.11111111, %v10930_v11  ;;  %vm19309_vm7 = vmmov %vm19298_vm4 }
 0xaf2   : > { %v10859_v48 = vadd.f32 %v10815_v51, %v10726_v58  ;;  %v10888_v21 = vsel %vm19302_vm0, %v10885_v55, %v10887_v0  ;;  %v10186_v20 = vrot.slane %v19303_v54, 2  ;;  %v10187_v23 = vrot.slane %v17710_v3, 3  ;;  %vm19311_vm10 = vmmov %vm19298_vm4  ;;  %v19318_v51 = vld [vmem:[#allocation25_spill] sm:$0xff] }
 0xaf3   : > { %v10931_v42 = vadd.f32 %v10886_v26, %v10858_v2  ;;  %v10190_v38 = vrot.slane %v17713_v53, 2  ;;  %v10959_v58 = vpack.c.bf16 %v10946_v43, %v10945_v35  ;;  %v10185_v49 = vor.u32 %v10184_v50, %v10183_v16  ;;  %vm19314_vm12 = vmmov %vm19298_vm4  ;;  %v19316_v16 = vld [vmem:[#allocation26_spill] sm:$0xff] }
 0xaf4   : > { %v10932_v29 = vadd.f32 %v10888_v21, %v10859_v48  ;;  %v10191_v61 = vrot.slane %v17716_v18, 3  ;;  %v10188_v19 = vor.u32 %v10187_v23, %v10186_v20  ;;  %v19304_v32 = vshrl.u32 %v17697_v39, 16  ;;  %vm19320_vm1 = vmmov %vm19298_vm4 }
 0xaf5   : > { %13381 = vmatmul.mubr.msk.bf16.vlgmr.msra.gmra.mrb[84].mxu1 %vm1728_vm8, %v17927_v12  ;;  %v10947_v45 = vmul.f32 0.11111111, %v10931_v42  ;;  %v10194_v53 = vrot.slane %v17733_v30, 3  ;;  %vm19305_vm3 = vcmask 1042432   ;;  %13474 = vmatprep.mubr.msk.bf16.mxu0 %vm19306_vm13, %v10959_v58  ;;  %v19307_v18 = vrot.slane %v19230_v4, 7  ;;  %vm19321_vm9 = vmmov %vm19306_vm13 }
 0xaf6   : > { %13397 = vmatpush3.bf16.msra.mxu1 %v17922_v31  ;;  %13384 = vmatprep.mubr.msk.bf16.mxu1 %vm1728_vm8, %v17930_v9  ;;  %v10193_v3 = vrot.slane %v19304_v32, 2  ;;  %v10948_v12 = vmul.f32 0.11111111, %v10932_v29  ;;  %v10192_v62 = vor.u32 %v10191_v61, %v10190_v38  ;;  %v19308_v31 = vrot.slane %v19229_v44, 7  ;;  %vm19322_vm15 = vmmov %vm19300_vm2 }
 0xaf7   : > { %14321 = vmatprep.subr.msk.bf16.mxu1 %vm19305_vm3, %v18044_v6  ;;  %vm19312_vm11 = vsmask.f32 5376  ;;  %v19313_v41 = vmov %v19307_v18  ;;  %v19317_v35 = vrot.slane %v19316_v16, 7  ;;  %v19319_v2 = vrot.slane %v19318_v51, 7  ;;  %vm19323_vm4 = vmmov %vm19300_vm2  ;;  %v19337_v16 = vld [vmem:[#allocation48_spill] sm:$0xff]  ;;  %v19338_v51 = vld [vmem:[#allocation43_spill] sm:$0xff] }
 0xaf8   : > { %v10729_v9 = vsel %vm19309_vm7, %v19308_v31, %v19307_v18  ;;  %v19310_v17 = vmov %v19308_v31  ;;  %v18071_v46 = vsel %vm19312_vm11, %v10185_v49, %v10188_v19  ;;  %v10195_v30 = vor.u32 %v10194_v53, %v10193_v3  ;;  %vm19315_vm6 = vmmov %vm19312_vm11  ;;  %v19332_v31 = vld [vmem:[#allocation46_spill] sm:$0xff] }
 0xaf9   : > { %v10767_v10 = vsel %vm19311_vm10, 0.0, %v19310_v17  ;;  %v10775_v13 = vsel %vm19314_vm12, %v19313_v41, 0.0  ;;  %v10960_v57 = vpack.c.bf16 %v10948_v12, %v10947_v45  ;;  %v10817_v33 = vrot.slane %v10729_v9, 1  ;;  %vm19325_vm5 = vmmov %vm19320_vm1 }
 0xafa   : > { %v10816_v56 = vrot.slane %v10767_v10, 1  ;;  %v10819_v55 = vrot.slane %v10775_v13, 1  ;;  %v10889_v11 = vrot.slane %v10767_v10, 2  ;;  %v18077_v25 = vsel %vm19315_vm6, %v10192_v62, %v10195_v30  ;;  %vm19327_vm2 = vmmov %vm19320_vm1  ;;  %v19331_v62 = vld [vmem:[#allocation44_spill] sm:$0xff] }
 0xafb   : > { %v10890_v0 = vrot.slane %v10729_v9, 2  ;;  %v10892_v44 = vrot.slane %v10775_v13, 2  ;;  %v10732_v26 = vsel %vm19320_vm1, %v19319_v2, %v19317_v35  ;;  %13475 = vmatmul.mubr.msk.bf16.gmra.mrb[156].mxu0 %vm19321_vm9, %v10960_v57  ;;  %v19324_v48 = vmov %v19319_v2  ;;  %vm19328_vm14 = vmmov %vm19302_vm0 }
 0xafc   : > { %v10818_v4 = vsel %vm19322_vm15, %v10816_v56, %v10817_v33  ;;  %v10820_v43 = vsel %vm19323_vm4, %v10817_v33, %v10819_v55  ;;  %v10768_v21 = vsel %vm19325_vm5, 0.0, %v19324_v48  ;;  %v19326_v50 = vmov %v19317_v35  ;;  %vm19329_vm3 = vmmov %vm19323_vm4 }
 0xafd   : > { %v10776_v42 = vsel %vm19327_vm2, %v19326_v50, 0.0  ;;  %v10860_v54 = vadd.f32 %v10818_v4, %v10767_v10  ;;  %v10861_v20 = vadd.f32 %v10820_v43, %v10729_v9  ;;  %v10891_v23 = vsel %vm19328_vm14, %v10889_v11, %v10890_v0  ;;  %13385 = vmatmul.mubr.msk.bf16.gmra.mrb[88].mxu1 %vm1728_vm8, %v17933_v40  ;;  %vm19330_vm13 = vmmov %vm19329_vm3  ;;  %v19339_v4 = vld [vmem:[#allocation42_spill] sm:$0xff] }
 0xafe   : > { %v10893_v38 = vsel %vm19302_vm0, %v10890_v0, %v10892_v44  ;;  %v10821_v58 = vrot.slane %v10768_v21, 1  ;;  %v10822_v29 = vrot.slane %v10732_v26, 1  ;;  %v10824_v49 = vrot.slane %v10776_v42, 1  ;;  %13388 = vmatprep.mubr.msk.bf16.mxu1 %vm1728_vm8, %v17936_v60  ;;  %vm19333_vm7 = vmmov %vm19302_vm0  ;;  %v19336_v0 = vld [vmem:[#allocation75_spill] sm:$0xff] }
 0xaff   : > { %v10894_v61 = vrot.slane %v10768_v21, 2  ;;  %v10933_v45 = vadd.f32 %v10891_v23, %v10860_v54  ;;  %v10934_v19 = vadd.f32 %v10893_v38, %v10861_v20  ;;  %v10895_v32 = vrot.slane %v10732_v26, 2  ;;  %vm19334_vm10 = vmmov %vm19302_vm0  ;;  %v19343_v20 = vld [vmem:[#allocation27_spill] sm:$0xff] }
 0xb00   : > { %v10897_v3 = vrot.slane %v10776_v42, 2  ;;  %v10823_v53 = vsel %vm19329_vm3, %v10821_v58, %v10822_v29  ;;  %v10825_v12 = vsel %vm19330_vm13, %v10822_v29, %v10824_v49  ;;  %v10197_v18 = vrot.slane %v19331_v62, 2  ;;  %vm19340_vm11 = vmmov %vm19321_vm9  ;;  %v19341_v42 = vld [vmem:[#allocation28_spill] sm:$0xff] }
 0xb01   : > { %v10198_v9 = vrot.slane %v19332_v31, 3  ;;  %v10949_v40 = vmul.f32 0.11111111, %v10933_v45  ;;  %v10950_v17 = vmul.f32 0.11111111, %v10934_v19  ;;  %v10862_v10 = vadd.f32 %v10823_v53, %v10768_v21  ;;  %vm19345_vm12 = vmmov %vm19320_vm1 }
 0xb02   : > { %v10863_v30 = vadd.f32 %v10825_v12, %v10732_v26  ;;  %v10896_v41 = vsel %vm19333_vm7, %v10894_v61, %v10895_v32  ;;  %v10898_v60 = vsel %vm19334_vm10, %v10895_v32, %v10897_v3  ;;  %v19335_v56 = vshrl.u32 %v17737_v15, 16  ;;  %v19346_v61 = vld [vmem:[#allocation62_spill] sm:$0xff]  ;;  %v19347_v12 = vld [vmem:[#allocation47_spill] sm:$0xff]  ;;  %vm19348_vm1 = vmmov %vm19315_vm6 }
 0xb03   : > { %v10199_v13 = vor.u32 %v10198_v9, %v10197_v18  ;;  %v10961_v33 = vpack.c.bf16 %v10950_v17, %v10949_v40  ;;  %v10935_v55 = vadd.f32 %v10896_v41, %v10862_v10  ;;  %v10201_v44 = vrot.slane %v19336_v0, 3  ;;  %vm19350_vm9 = vmmov %vm19329_vm3 }
 0xb04   : > { %v10200_v57 = vrot.slane %v19335_v56, 2  ;;  %v10936_v11 = vadd.f32 %v10898_v60, %v10863_v30  ;;  %v10204_v35 = vrot.slane %v19337_v16, 2  ;;  %v10205_v2 = vrot.slane %v19338_v51, 3  ;;  %vm19352_vm15 = vmmov %vm19329_vm3 }
 0xb05   : > { %v10207_v26 = vrot.slane %v9839_v28, 2  ;;  %v10208_v43 = vrot.slane %v19339_v4, 3  ;;  %13478 = vmatprep.mubr.msk.bf16.mxu0 %vm19340_vm11, %v10961_v33  ;;  %v10951_v48 = vmul.f32 0.11111111, %v10935_v55  ;;  %v19342_v54 = vrot.slane %v19341_v42, 7  ;;  %13389 = vmatmul.mubr.msk.bf16.gmra.mrb[92].mxu1 %vm1728_vm8, %v17941_v34  ;;  %vm19353_vm4 = vmmov %vm19340_vm11  ;;  %v19359_v55 = vld [vmem:[#allocation29_spill] sm:$0xff] }
 0xb06   : > { %v10952_v21 = vmul.f32 0.11111111, %v10936_v11  ;;  %v10202_v50 = vor.u32 %v10201_v44, %v10200_v57  ;;  %v19344_v23 = vrot.slane %v19343_v20, 7  ;;  %v10206_v58 = vor.u32 %v10205_v2, %v10204_v35  ;;  %13392 = vmatprep.mubr.msk.bf16.mxu1 %vm1728_vm8, %v17948_v37  ;;  %vm19354_vm5 = vmmov %vm19302_vm0  ;;  %v19357_v57 = vld [vmem:[#allocation30_spill] sm:$0xff] }
 0xb07   : > { %v10209_v29 = vor.u32 %v10208_v43, %v10207_v26  ;;  %v10899_v45 = vrot.slane %v19346_v61, 2  ;;  %v9637_v19 = vrot.slane %v17747_v63, 1  ;;  %v9638_v18 = vrot.slane %v19347_v12, 1  ;;  %vm19356_vm2 = vmmov %vm19302_vm0 }
 0xb08   : > { %v10735_v38 = vsel %vm19345_vm12, %v19344_v23, %v19342_v54  ;;  %v10962_v32 = vpack.c.bf16 %v10952_v21, %v10951_v48  ;;  %v18126_v3 = vsel %vm19315_vm6, %v10199_v13, %v10202_v50  ;;  %v19349_v34 = vrot.slane %v19346_v61, 1  ;;  %vm19361_vm14 = vmmov %vm19345_vm12 }
 0xb09   : > { %v10827_v49 = vrot.slane %v10735_v38, 1  ;;  %v10900_v53 = vrot.slane %v10735_v38, 2  ;;  %v18130_v9 = vsel %vm19348_vm1, %v10206_v58, %v10209_v29  ;;  %v19351_v17 = vrot.slane %v17879_v22, 1  ;;  %vm19362_vm0 = vmmov %vm19329_vm3 }
 0xb0a   : > { %13479 = vmatmul.mubr.msk.bf16.gmra.mrb[160].mxu0 %vm19353_vm4, %v10962_v32  ;;  %v19355_v60 = vrot.slane %v17879_v22, 2  ;;  %v10907_v56 = vrot.slane %v17894_v27, 2  ;;  %v19358_v33 = vrot.slane %v19357_v57, 7  ;;  %v19360_v11 = vrot.slane %v19359_v55, 7  ;;  %vm19364_vm3 = vmmov %vm19362_vm0 }
 0xb0b   : > { %v10828_v40 = vsel %vm19350_vm9, %v19349_v34, %v10827_v49  ;;  %v10830_v37 = vsel %vm19352_vm15, %v10827_v49, %v19351_v17  ;;  %v10901_v41 = vsel %vm19354_vm5, %v10899_v45, %v10900_v53  ;;  %v10904_v43 = vrot.slane %v17889_v59, 2  ;;  %vm19366_vm13 = vmmov %vm19362_vm0  ;;  %v19368_v49 = vld [vmem:[#allocation55_spill] sm:$0xff]  ;;  %v19374_v17 = vld [vmem:[#allocation54_spill] sm:$0xff] }
 0xb0c   : > { %v10864_v10 = vadd.f32 %v10828_v40, %v19346_v61  ;;  %v10865_v30 = vadd.f32 %v10830_v37, %v10735_v38  ;;  %v10903_v13 = vsel %vm19356_vm2, %v10900_v53, %v19355_v60  ;;  %v10738_v44 = vsel %vm19361_vm14, %v19360_v11, %v19358_v33  ;;  %vm19367_vm7 = vmmov %vm19356_vm2  ;;  %v19372_v40 = vld [vmem:[#allocation53_spill] sm:$0xff] }
 0xb0d   : > { %v10832_v26 = vrot.slane %v10738_v44, 1  ;;  %v9639_v48 = vsel %vm19362_vm0, %v9637_v19, %v9638_v18  ;;  %v10905_v21 = vrot.slane %v10738_v44, 2  ;;  %v19363_v42 = vrot.slane %v17889_v59, 1  ;;  %vm19369_vm10 = vmmov %vm19356_vm2  ;;  %v19377_v60 = vld [vmem:[#allocation57_spill] sm:$0xff] }
 0xb0e   : > { %v10937_v35 = vadd.f32 %v10901_v41, %v10864_v10  ;;  %v10938_v2 = vadd.f32 %v10903_v13, %v10865_v30  ;;  %v19365_v20 = vrot.slane %v17894_v27, 1  ;;  %13393 = vmatmul.mubr.msk.bf16.gmra.mrb[96].mxu1 %vm1728_vm8, %v9639_v48  ;;  %vm19370_vm11 = vmmov %vm19353_vm4  ;;  %vm19371_vm12 = vcmask 1042432   ;;  %v19382_v48 = vld [vmem:[#allocation50_spill] sm:$0xff] }
 0xb0f   : > { %v10833_v54 = vsel %vm19364_vm3, %v19363_v42, %v10832_v26  ;;  %v10906_v29 = vsel %vm19367_vm7, %v10904_v43, %v10905_v21  ;;  %13398 = vmatprep.mubr.msk.bf16.mxu1 %vm1728_vm8, %v19368_v49  ;;  %v10908_v45 = vsel %vm19369_vm10, %v10905_v21, %v10907_v56  ;;  %v10047_v18 = vsel %vm19371_vm12, %v18044_v6, 0  ;;  %vm19373_vm6 = vmmov %vm19353_vm4 }
 0xb10   : > { %v10953_v50 = vmul.f32 0.11111111, %v10937_v35  ;;  %v10954_v22 = vmul.f32 0.11111111, %v10938_v2  ;;  %v10835_v23 = vsel %vm19366_vm13, %v10832_v26, %v19365_v20  ;;  %v10866_v38 = vadd.f32 %v10833_v54, %v17889_v59  ;;  %v11846_v59 = vld [vmem:[%s18475_s13 + $0x14] sm:$0x7]  ;;  %vm19375_vm1 = vmmov %vm19371_vm12 }
 0xb11   : > { %v10867_v58 = vadd.f32 %v10835_v23, %v10738_v44  ;;  %v9827_v37 = vrot.slane %v19331_v62, 1  ;;  %v9828_v6 = vrot.slane %v19332_v31, 2  ;;  %v19376_v10 = vshrl.u32 %v17737_v15, 16  ;;  %v19378_v62 = vld [vmem:[#allocation76_spill] sm:$0xff]  ;;  %v19379_v35 = vld [vmem:[#allocation51_spill] sm:$0xff]  ;;  %v19381_v26 = vld [vmem:[#allocation45_spill] sm:$0xff] }
 0xb12   : > { %v10963_v61 = vpack.c.bf16 %v10954_v22, %v10953_v50  ;;  %v10939_v19 = vadd.f32 %v10906_v29, %v10866_v38  ;;  %v9833_v41 = vrot.slane %v19336_v0, 2  ;;  %v9836_v13 = vrot.slane %v19337_v16, 1  ;;  %v19384_v22 = vld [vmem:[#allocation69_spill] sm:$0xff]  ;;  %v19385_v54 = vld [vmem:[#allocation70_spill] sm:$0xff]  ;;  %vm19387_vm5 = vmmov %vm19356_vm2 }
 0xb13   : > { %v10940_v32 = vadd.f32 %v10908_v45, %v10867_v58  ;;  %v9832_v30 = vrot.slane %v19376_v10, 1  ;;  %v9837_v56 = vrot.slane %v19338_v51, 2  ;;  %v9841_v57 = vrot.slane %v9839_v28, 1  ;;  %v19388_v58 = vld [vmem:[#allocation66_spill] sm:$0xff]  ;;  %vm19390_vm2 = vmmov %vm19375_vm1 }
 0xb14   : > { %13482 = vmatprep.mubr.msk.bf16.mxu0 %vm19370_vm11, %v10963_v61  ;;  %v10955_v27 = vmul.f32 0.11111111, %v10939_v19  ;;  %v9842_v33 = vrot.slane %v19339_v4, 2  ;;  %v9829_v31 = vor.u32 %v9828_v6, %v9827_v37  ;;  %v9848_v11 = vshrl.u32 %v19347_v12, 16  ;;  %v19389_v61 = vld [vmem:[#allocation41_spill] sm:$0xff]  ;;  %vm19391_vm14 = vmmov %vm19387_vm5 }
 0xb15   : > { %v10956_v53 = vmul.f32 0.11111111, %v10940_v32  ;;  %v9834_v55 = vor.u32 %v9833_v41, %v9832_v30  ;;  %v9838_v0 = vor.u32 %v9837_v56, %v9836_v13  ;;  %v9845_v2 = vrot.slane %v19379_v35, 1  ;;  %vm19392_vm0 = vmmov %vm19387_vm5 }
 0xb16   : > { %13399 = vmatmul.mubr.msk.bf16.vlgmr.msra.gmra.mrb[84].mxu1 %vm1728_vm8, %v19372_v40  ;;  %v9843_v44 = vor.u32 %v9842_v33, %v9841_v57  ;;  %vm19380_vm9 = vsmask.f32 6400  ;;  %v9846_v51 = vrot.slane %v19381_v26, 2  ;;  %v9850_v43 = vrot.slane %v9848_v11, 1  ;;  %vm19393_vm3 = vmmov %vm19375_vm1 }
 0xb17   : > { %v10964_v34 = vpack.c.bf16 %v10956_v53, %v10955_v27  ;;  %13415 = vmatpush3.bf16.msra.mxu1 %v10047_v18  ;;  %13402 = vmatprep.mubr.msk.bf16.mxu1 %vm1728_vm8, %v19374_v17  ;;  %v9835_v16 = vsel %vm19380_vm9, %v9829_v31, %v9834_v55  ;;  %v9851_v28 = vrot.slane %v19382_v48, 2  ;;  %vm19383_vm15 = vmmov %vm19380_vm9  ;;  %v9996_v42 = vrot.slane %v19384_v22, 2  ;;  %v11855_v53 = vld [vmem:[%s18475_s13 + $0x18] sm:$0x7] }
 0xb18   : > { %14322 = vmatprep.subr.msk.bf16.mxu1 %vm19375_vm1, %v11846_v59  ;;  %v9844_v4 = vsel %vm19383_vm15, %v9838_v0, %v9843_v44  ;;  %v9847_v21 = vor.u32 %v9846_v51, %v9845_v2  ;;  %v9997_v20 = vrot.slane %v19385_v54, 2  ;;  %vm19386_vm4 = vmmov %vm19380_vm9  ;;  %v9999_v29 = vrot.slane %v19388_v58, 2 }
 0xb19   : > { %13483 = vmatmul.mubr.msk.bf16.gmra.mrb[164].mxu0 %vm19373_vm6, %v10964_v34  ;;  %v9852_v50 = vor.u32 %v9851_v28, %v9850_v43  ;;  %v10000_v49 = vrot.slane %v17607_v24, 2  ;;  %v10002_v45 = vrot.slane %v19389_v61, 2  ;;  %v10003_v19 = vrot.slane %v17659_v14, 2  ;;  %v19394_v34 = vld [vmem:[#allocation74_spill] sm:$0xff]  ;;  %vm19396_vm13 = vmmov %vm19392_vm0 }
 0xb1a   : > { %v9998_v38 = vsel %vm19387_vm5, %v9996_v42, %v9997_v20  ;;  %v10245_v32 = vsel %vm19390_vm2, %v11846_v59, 0  ;;  %v10005_v40 = vrot.slane %v19394_v34, 2  ;;  %v10006_v17 = vrot.slane %v17650_v1, 2  ;;  %v19395_v59 = vld [vmem:[#allocation49_spill] sm:$0xff]  ;;  %vm19397_vm7 = vmmov %vm19392_vm0 }
 0xb1b   : > { %v9853_v23 = vsel %vm19386_vm4, %v9847_v21, %v9852_v50  ;;  %v10001_v27 = vsel %vm19391_vm14, %v9999_v29, %v10000_v49  ;;  %v10004_v18 = vsel %vm19392_vm0, %v10002_v45, %v10003_v19  ;;  %v10008_v37 = vrot.slane %v19395_v59, 2  ;;  %vm19398_vm10 = vmmov %vm19392_vm0 }
 0xb1c   : > { %v10009_v6 = vrot.slane %v17697_v39, 2  ;;  %v10007_v10 = vsel %vm19396_vm13, %v10005_v40, %v10006_v17  ;;  %v10011_v41 = vrot.slane %v17689_v52, 2  ;;  %v10014_v13 = vrot.slane %v17751_v5, 2  ;;  %vm19399_vm11 = vmmov %vm19392_vm0 }
 0xb1d   : > { %v10015_v56 = vrot.slane %v17755_v47, 2  ;;  %v10018_v31 = vrot.slane %v19347_v12, 2  ;;  %vm19400_vm12 = vmmov %vm19392_vm0  ;;  %v10211_v44 = vrot.slane %v19379_v35, 2  ;;  %v10212_v2 = vrot.slane %v19381_v26, 3 }
 0xb1e   : > { %13403 = vmatmul.mubr.msk.bf16.gmra.mrb[88].mxu1 %vm1728_vm8, %v19377_v60  ;;  %v10010_v30 = vsel %vm19397_vm7, %v10008_v37, %v10009_v6  ;;  %v10012_v60 = vrot.slane %v17737_v15, 2  ;;  %vm19401_vm6 = vmmov %vm19375_vm1  ;;  %v10361_v51 = vrot.slane %v19385_v54, 3  ;;  %vm19402_vm1 = vsmask.f32 5376 }
 0xb1f   : > { %13406 = vmatprep.mubr.msk.bf16.mxu1 %vm1728_vm8, %v19378_v62  ;;  %v10016_v33 = vsel %vm19399_vm11, %v10014_v13, %v10015_v56  ;;  %v10017_v62 = vrot.slane %v17747_v63, 2  ;;  %v10411_v0 = vsel %vm19401_vm6, %v11855_v53, 0  ;;  %vm19403_vm9 = vcmask 1044480  }
 0xb20   : > { %v10013_v57 = vsel %vm19398_vm10, %v10011_v41, %v10012_v60  ;;  %v10363_v35 = vrot.slane %v19388_v58, 3  ;;  %v10367_v26 = vrot.slane %v17659_v14, 3  ;;  %vm19404_vm15 = vmmov %vm19403_vm9  ;;  %v10369_v28 = vrot.slane %v19394_v34, 3 }
 0xb21   : > { %v10019_v55 = vsel %vm19400_vm12, %v10017_v62, %v10018_v31  ;;  %vm19405_vm4 = vmmov %vm19403_vm9  ;;  %v10372_v21 = vrot.slane %v19395_v59, 3  ;;  %v10376_v42 = vrot.slane %v17737_v15, 3  ;;  %v10378_v54 = vrot.slane %v17751_v5, 3  ;;  %v11865_v15 = vld [vmem:[%s18478_s16] ss:$0 sm:$0xff] }
 0xb22   : > { %vm19406_vm5 = vmmov %vm19405_vm4  ;;  %vm11177_vm13 = vcmask 261312  }
 0xb23   : > { %vm19407_vm2 = vmmov %vm19405_vm4 }
 0xb24   : > { %vm19408_vm14 = vmmov %vm19407_vm2 }
 0xb25   : > { %vm19409_vm0 = vmmov %vm19407_vm2 }
 0xb26   : > { %13407 = vmatmul.mubr.msk.bf16.gmra.mrb[92].mxu1 %vm1728_vm8, %v9835_v16  ;;  %v10215_v16 = vrot.slane %v19382_v48, 3 }
 0xb27   : > { %13410 = vmatprep.mubr.msk.bf16.mxu1 %vm1728_vm8, %v9844_v4  ;;  %v10370_v4 = vrot.slane %v17650_v1, 3  ;;  %v10379_v1 = vrot.slane %v17755_v47, 3 }
 0xb29   : > { %v10371_v50 = vsel %vm19406_vm5, %v10369_v28, %v10370_v4 }
 0xb2e   : > { %13411 = vmatmul.mubr.msk.bf16.gmra.mrb[96].mxu1 %vm1728_vm8, %v9853_v23  ;;  %v10381_v23 = vrot.slane %v17747_v63, 3 }
 0xb2f   : > { %13416 = vmatprep.mubr.msk.bf16.mxu1 %vm1728_vm8, %v9998_v38  ;;  %v10382_v38 = vrot.slane %v19347_v12, 3 }
 0xb36   : > { %13417 = vmatmul.mubr.msk.bf16.vlgmr.msra.gmra.mrb[84].mxu1 %vm1728_vm8, %v10001_v27 }
 0xb37   : > { %13433 = vmatpush3.bf16.msra.mxu1 %v10245_v32  ;;  %13420 = vmatprep.mubr.msk.bf16.mxu1 %vm1728_vm8, %v10004_v18 }
 0xb38   : > { %14323 = vmatprep.subr.msk.bf16.mxu1 %vm19393_vm3, %v11855_v53  ;;  %vm19410_vm3 = vmmov %vm19409_vm0 }
 0xb3e   : > { %13421 = vmatmul.mubr.msk.bf16.gmra.mrb[88].mxu1 %vm1728_vm8, %v10007_v10 }
 0xb3f   : > { %13424 = vmatprep.mubr.msk.bf16.mxu1 %vm1728_vm8, %v10010_v30 }
 0xb46   : > { %13425 = vmatmul.mubr.msk.bf16.gmra.mrb[92].mxu1 %vm1728_vm8, %v10013_v57 }
 0xb47   : > { %13428 = vmatprep.mubr.msk.bf16.mxu1 %vm1728_vm8, %v10016_v33 }
 0xb4e   : > { %13429 = vmatmul.mubr.msk.bf16.gmra.mrb[96].mxu1 %vm1728_vm8, %v10019_v55 }
 0xb4f   : > { %13434 = vmatprep.mubr.msk.bf16.mxu1 %vm1728_vm8, %v17974_v36  ;;  %v10214_v36 = vrot.slane %v9848_v11, 2 }
 0xb56   : > { %13435 = vmatmul.mubr.msk.bf16.vlgmr.msra.gmra.mrb[84].mxu1 %vm1728_vm8, %v18003_v7  ;;  %v10213_v7 = vor.u32 %v10212_v2, %v10211_v44 }
 0xb57   : > { %13451 = vmatpush3.bf16.msra.mxu1 %v10411_v0  ;;  %13438 = vmatprep.mubr.msk.bf16.mxu1 %vm1728_vm8, %v18016_v8  ;;  %v10216_v8 = vor.u32 %v10215_v16, %v10214_v36 }
 0xb5e   : > { %13439 = vmatmul.mubr.msk.bf16.gmra.mrb[88].mxu1 %vm1728_vm8, %v18071_v46  ;;  %v10360_v46 = vrot.slane %v19384_v22, 3  ;;  %v10375_v22 = vrot.slane %v17689_v52, 3  ;;  %v10383_v52 = vsel %vm19410_vm3, %v10381_v23, %v10382_v38 }
 0xb5f   : > { %13442 = vmatprep.mubr.msk.bf16.mxu1 %vm1728_vm8, %v18077_v25  ;;  %v10217_v25 = vsel %vm19402_vm1, %v10213_v7, %v10216_v8 }
 0xb60   : > { %v10362_v11 = vsel %vm19403_vm9, %v10360_v46, %v10361_v51  ;;  %v10377_v20 = vsel %vm19408_vm14, %v10375_v22, %v10376_v42 }
 0xb66   : > { %13443 = vmatmul.mubr.msk.bf16.gmra.mrb[92].mxu1 %vm1728_vm8, %v18126_v3  ;;  %v10364_v3 = vrot.slane %v17607_v24, 3  ;;  %v10373_v24 = vrot.slane %v17697_v39, 3  ;;  %v10380_v39 = vsel %vm19409_vm0, %v10378_v54, %v10379_v1 }
 0xb67   : > { %13446 = vmatprep.mubr.msk.bf16.mxu1 %vm1728_vm8, %v18130_v9  ;;  %v10366_v9 = vrot.slane %v19389_v61, 3 }
 0xb68   : > { %v10365_v43 = vsel %vm19404_vm15, %v10363_v35, %v10364_v3  ;;  %v10374_v14 = vsel %vm19407_vm2, %v10372_v21, %v10373_v24 }
 0xb69   : > { %v10368_v48 = vsel %vm19405_vm4, %v10366_v9, %v10367_v26 }
 0xb6e   : > { %13447 = vmatmul.mubr.msk.bf16.gmra.mrb[96].mxu1 %vm1728_vm8, %v10217_v25 }
 0xb6f   : > { %13452 = vmatprep.mubr.msk.bf16.mxu1 %vm1728_vm8, %v10362_v11 }
 0xb76   : > { %13453 = vmatmul.mubr.msk.bf16.vlgmr.msra.gmra.mrb[84].mxu1 %vm1728_vm8, %v10365_v43  ;;  %v11864_v43 = vld [vmem:[%s19411_s0] ss:$0 sm:$0xff]  ;;  %s19412_s0 = sld [smem:[#allocation82_spill]] }
 0xb77   : > { %13456 = vmatprep.mubr.msk.bf16.mxu1 %vm1728_vm8, %v10368_v48 }
 0xb7e   : > { %13457 = vmatmul.mubr.msk.bf16.gmra.mrb[88].mxu1 %vm1728_vm8, %v10371_v50 }
 0xb7f   : > { %13460 = vmatprep.mubr.msk.bf16.mxu1 %vm1728_vm8, %v10374_v14 }
 0xb86   : > { %13461 = vmatmul.mubr.msk.bf16.gmra.mrb[92].mxu1 %vm1728_vm8, %v10377_v20 }
 0xb87   : > { %13464 = vmatprep.mubr.msk.bf16.mxu1 %vm1728_vm8, %v10380_v39 }
 0xb8e   : > { %13465 = vmatmul.mubr.msk.bf16.gmra.mrb[96].mxu1 %vm1728_vm8, %v10383_v52  ;;  %vm10629_vm8 = vcmask 195712  }
 0xbbc   : > { %v13472_v5 = vpop.f32.mrb[152].mxu0 }
 0xbbd   : > { %v11043_v47 = vadd.f32 %v13472_v5, %v11865_v15  ;;  %v11034_v58 = vpop.f32.mrb[153].mxu0 }
 0xbbe   : > { %v11035_v29 = vadd.f32 %v11865_v15, %v11034_v58  ;;  %v13473_v49 = vpop.f32.mrb[154].mxu0 }
 0xbbf   : > { %v11099_v61 = vmax.f32 %v11043_v47, 0.0  ;;  %v11046_v45 = vadd.f32 %v13473_v49, %v11865_v15  ;;  %v11037_v19 = vpop.f32.mrb[155].mxu0 }
 0xbc0   : > { %v11038_v32 = vadd.f32 %v11865_v15, %v11037_v19  ;;  %v11097_v63 = vmax.f32 %v11035_v29, 0.0 }
 0xbc1   : > { %v11100_v27 = vmax.f32 %v11046_v45, 0.0  ;;  %11133 = vrot.lane.b32.xlu0 %v11099_v61, %s14533_s21 }
 0xbc2   : > { %v11098_v12 = vmax.f32 %v11038_v32, 0.0 }
 0xbc3   : > { %11135 = vrot.lane.b32.xlu1 %v11100_v27, %s14533_s21 }
 0xbc5   : > { %11129 = vrot.lane.b32.xlu0 %v11097_v63, %s14533_s21 }
 0xbc7   : > { %11131 = vrot.lane.b32.xlu1 %v11098_v12, %s14533_s21 }
 0xbce   : > { %v13476_v53 = vpop.f32.mrb[156].mxu0 }
 0xbcf   : > { %v11059_v18 = vadd.f32 %v13476_v53, %v11865_v15  ;;  %v11050_v34 = vpop.f32.mrb[157].mxu0 }
 0xbd0   : > { %v11051_v40 = vadd.f32 %v11865_v15, %v11050_v34  ;;  %v13477_v17 = vpop.f32.mrb[158].mxu0 }
 0xbd1   : > { %v11103_v59 = vmax.f32 %v11059_v18, 0.0  ;;  %v11062_v37 = vadd.f32 %v13477_v17, %v11865_v15  ;;  %v11053_v6 = vpop.f32.mrb[159].mxu0 }
 0xbd2   : > { %v11054_v10 = vadd.f32 %v11865_v15, %v11053_v6  ;;  %v11101_v30 = vmax.f32 %v11051_v40, 0.0 }
 0xbd3   : > { %v11104_v41 = vmax.f32 %v11062_v37, 0.0  ;;  %11141 = vrot.lane.b32.xlu0 %v11103_v59, %s14533_s21 }
 0xbd4   : > { %v11102_v60 = vmax.f32 %v11054_v10, 0.0 }
 0xbd5   : > { %11143 = vrot.lane.b32.xlu1 %v11104_v41, %s14533_s21 }
 0xbd7   : > { %11137 = vrot.lane.b32.xlu0 %v11101_v30, %s14533_s21 }
 0xbd9   : > { %11139 = vrot.lane.b32.xlu1 %v11102_v60, %s14533_s21 }
 0xbdd   : > { %v13480_v13 = vpop.f32.mrb[160].mxu0 }
 0xbde   : > { %v11075_v56 = vadd.f32 %v13480_v13, %v11865_v15  ;;  %v11066_v57 = vpop.f32.mrb[161].mxu0 }
 0xbdf   : > { %v11067_v33 = vadd.f32 %v11865_v15, %v11066_v57  ;;  %v13481_v62 = vpop.f32.mrb[162].mxu0 }
 0xbe0   : > { %v11107_v31 = vmax.f32 %v11075_v56, 0.0  ;;  %v11078_v55 = vadd.f32 %v13481_v62, %v11865_v15  ;;  %v11069_v0 = vpop.f32.mrb[163].mxu0 }
 0xbe1   : > { %v11070_v44 = vadd.f32 %v11865_v15, %v11069_v0  ;;  %v11105_v2 = vmax.f32 %v11067_v33, 0.0 }
 0xbe2   : > { %v11108_v36 = vmax.f32 %v11078_v55, 0.0  ;;  %11149 = vrot.lane.b32.xlu0 %v11107_v31, %s14533_s21 }
 0xbe3   : > { %v11106_v16 = vmax.f32 %v11070_v44, 0.0 }
 0xbe4   : > { %11151 = vrot.lane.b32.xlu1 %v11108_v36, %s14533_s21 }
 0xbe6   : > { %11145 = vrot.lane.b32.xlu0 %v11105_v2, %s14533_s21 }
 0xbe8   : > { %11147 = vrot.lane.b32.xlu1 %v11106_v16, %s14533_s21 }
 0xbec   : > { %v13484_v7 = vpop.f32.mrb[164].mxu0 }
 0xbed   : > { %v18304_v8 = vadd.f32 %v13484_v7, %v11865_v15  ;;  %v11082_v46 = vpop.f32.mrb[165].mxu0 }
 0xbee   : > { %v11083_v51 = vadd.f32 %v11865_v15, %v11082_v46  ;;  %v13485_v25 = vpop.f32.mrb[166].mxu0 }
 0xbef   : > { %v18306_v11 = vadd.f32 %v13485_v25, %v11865_v15  ;;  %v11085_v35 = vpop.f32.mrb[167].mxu0  ;;  %v11111_v0 = vmax.f32 %v18304_v8, 0.0 }
 0xbf0   : > { %v11109_v3 = vmax.f32 %v11083_v51, 0.0  ;;  %v11086_v9 = vadd.f32 %v11865_v15, %v11085_v35 }
 0xbf1   : > { %v11112_v44 = vmax.f32 %v18306_v11, 0.0 }
 0xbf2   : > { %v11110_v26 = vmax.f32 %v11086_v9, 0.0  ;;  %11153 = vrot.lane.b32.xlu0 %v11109_v3, %s14533_s21 }
 0xbf4   : > { %11155 = vrot.lane.b32.xlu1 %v11110_v26, %s14533_s21 }
 0xc33   : > { %v11134_v2 = vpop.permute.xlu0 %11133 }
 0xc35   : > { %v11136_v36 = vpop.permute.xlu1 %11135 }
 0xc37   : > { %v11130_v16 = vpop.permute.xlu0 %11129 }
 0xc39   : > { %v11132_v7 = vpop.permute.xlu1 %11131 }
 0xc45   : > { %v11142_v46 = vpop.permute.xlu0 %11141 }
 0xc47   : > { %v11144_v51 = vpop.permute.xlu1 %11143 }
 0xc49   : > { %v13454_v48 = vpop.f32.mrb[84].mxu1  ;;  %v11138_v25 = vpop.permute.xlu0 %11137 }
 0xc4a   : > { %v10535_v28 = vadd.f32 %v13454_v48, %v11864_v43  ;;  %v10447_v4 = vpop.f32.mrb[85].mxu1 }
 0xc4b   : > { %v13455_v21 = vpop.f32.mrb[86].mxu1  ;;  %v10533_v50 = vadd.f32 %v11864_v43, %v10447_v4  ;;  %v11140_v8 = vpop.permute.xlu1 %11139 }
 0xc4c   : > { %v10551_v24 = vmax.f32 %v10535_v28, 0.0  ;;  %v10536_v14 = vadd.f32 %v13455_v21, %v11864_v43  ;;  %v10450_v22 = vpop.f32.mrb[87].mxu1 }
 0xc4d   : > { %v10534_v54 = vadd.f32 %v11864_v43, %v10450_v22  ;;  %v10549_v1 = vmax.f32 %v10533_v50, 0.0 }
 0xc4e   : > { %v10552_v42 = vmax.f32 %v10536_v14, 0.0  ;;  %10585 = vrot.lane.b32.xlu0 %v10551_v24, %s14534_s26 }
 0xc4f   : > { %v10550_v39 = vmax.f32 %v10534_v54, 0.0 }
 0xc50   : > { %10587 = vrot.lane.b32.xlu1 %v10552_v42, %s14534_s26 }
 0xc51   : > { %v13458_v20 = vpop.f32.mrb[88].mxu1 }
 0xc52   : > { %v10539_v23 = vadd.f32 %v13458_v20, %v11864_v43  ;;  %10581 = vrot.lane.b32.xlu0 %v10549_v1, %s14534_s26  ;;  %v10463_v38 = vpop.f32.mrb[89].mxu1 }
 0xc53   : > { %v13459_v52 = vpop.f32.mrb[90].mxu1  ;;  %v10537_v5 = vadd.f32 %v11864_v43, %v10463_v38 }
 0xc54   : > { %v10555_v15 = vmax.f32 %v10539_v23, 0.0  ;;  %v10540_v47 = vadd.f32 %v13459_v52, %v11864_v43  ;;  %v10466_v58 = vpop.f32.mrb[91].mxu1  ;;  %10583 = vrot.lane.b32.xlu1 %v10550_v39, %s14534_s26  ;;  %v11150_v35 = vpop.permute.xlu0 %11149 }
 0xc55   : > { %v10538_v49 = vadd.f32 %v11864_v43, %v10466_v58  ;;  %v10553_v61 = vmax.f32 %v10537_v5, 0.0 }
 0xc56   : > { %v10556_v29 = vmax.f32 %v10540_v47, 0.0  ;;  %10593 = vrot.lane.b32.xlu0 %v10555_v15, %s14534_s26  ;;  %v11152_v11 = vpop.permute.xlu1 %11151 }
 0xc57   : > { %v10554_v19 = vmax.f32 %v10538_v49, 0.0 }
 0xc58   : > { %10595 = vrot.lane.b32.xlu1 %v10556_v29, %s14534_s26  ;;  %v11146_v3 = vpop.permute.xlu0 %11145 }
 0xc59   : > { %v13462_v45 = vpop.f32.mrb[92].mxu1 }
 0xc5a   : > { %v10543_v32 = vadd.f32 %v13462_v45, %v11864_v43  ;;  %10589 = vrot.lane.b32.xlu0 %v10553_v61, %s14534_s26  ;;  %v10479_v63 = vpop.f32.mrb[93].mxu1  ;;  %v11148_v9 = vpop.permute.xlu1 %11147 }
 0xc5b   : > { %v13463_v27 = vpop.f32.mrb[94].mxu1  ;;  %v10541_v53 = vadd.f32 %v11864_v43, %v10479_v63 }
 0xc5c   : > { %v10559_v12 = vmax.f32 %v10543_v32, 0.0  ;;  %v10544_v18 = vadd.f32 %v13463_v27, %v11864_v43  ;;  %v10482_v34 = vpop.f32.mrb[95].mxu1  ;;  %10591 = vrot.lane.b32.xlu1 %v10554_v19, %s14534_s26 }
 0xc5d   : > { %v10542_v17 = vadd.f32 %v11864_v43, %v10482_v34  ;;  %v10557_v59 = vmax.f32 %v10541_v53, 0.0 }
 0xc5e   : > { %v10560_v40 = vmax.f32 %v10544_v18, 0.0  ;;  %10601 = vrot.lane.b32.xlu0 %v10559_v12, %s14534_s26 }
 0xc5f   : > { %v10558_v6 = vmax.f32 %v10542_v17, 0.0 }
 0xc60   : > { %10603 = vrot.lane.b32.xlu1 %v10560_v40, %s14534_s26 }
 0xc61   : > { %v13466_v37 = vpop.f32.mrb[96].mxu1 }
 0xc62   : > { %v10547_v10 = vadd.f32 %v13466_v37, %v11864_v43  ;;  %10597 = vrot.lane.b32.xlu0 %v10557_v59, %s14534_s26  ;;  %v10495_v30 = vpop.f32.mrb[97].mxu1 }
 0xc63   : > { %v13467_v41 = vpop.f32.mrb[98].mxu1  ;;  %v10545_v13 = vadd.f32 %v11864_v43, %v10495_v30 }
 0xc64   : > { %v10563_v60 = vmax.f32 %v10547_v10, 0.0  ;;  %v10548_v56 = vadd.f32 %v13467_v41, %v11864_v43  ;;  %v10498_v57 = vpop.f32.mrb[99].mxu1  ;;  %10599 = vrot.lane.b32.xlu1 %v10558_v6, %s14534_s26  ;;  %v11154_v26 = vpop.permute.xlu0 %11153 }
 0xc65   : > { %v10546_v62 = vadd.f32 %v11864_v43, %v10498_v57  ;;  %v10561_v31 = vmax.f32 %v10545_v13, 0.0 }
 0xc66   : > { %v10564_v33 = vmax.f32 %v10548_v56, 0.0  ;;  %10609 = vrot.lane.b32.xlu0 %v10563_v60, %s14534_s26  ;;  %v11156_v43 = vpop.permute.xlu1 %11155 }
 0xc67   : > { %v10562_v55 = vmax.f32 %v10546_v62, 0.0 }
 0xc68   : > { %10611 = vrot.lane.b32.xlu1 %v10564_v33, %s14534_s26 }
 0xc6a   : > { %10605 = vrot.lane.b32.xlu0 %v10561_v31, %s14534_s26 }
 0xc6c   : > { %10607 = vrot.lane.b32.xlu1 %v10562_v55, %s14534_s26 }
 0xc6e   : > { %11157 = vrot.lane.b32.xlu0 %v11111_v0, %s14533_s21 }
 0xc70   : > { %11159 = vrot.lane.b32.xlu1 %v11112_v44, %s14533_s21  ;;  %s11208_s21 = sadd.s32 %s11883_s1, %s11877_s19  ;;  %s19413_s1 = smov %s19412_s0 }
 0xc71   : > { %s11878_s29 = sshll.u32 %s11208_s21, 7  ;;  %s18409_s19 = scalar_lea.sflag [#allocation3], %s553_s20 }
 0xc72   : > { %s18403_s26 = scalar_lea.hbm %s19412_s0, %s11878_s29  ;;  %s14434_s21 = scalar_lea.vmem %s18396_s18, 2048 }
 0xc73   : > { %p14435_p13 = scmp.ne.s32.totalorder %s18396_s18, %s14434_s21  ;;  %p14442_p4 = scmp.lt.s32.totalorder %s14440_s3, %s14434_s21 }
 0xc75   : > { %p14436_p0 = pnand %p14435_p13, %p14678_p3  ;;  %p14443_p5 = por %p14442_p4, %p14441_p2 }
 0xc77   : > { %p14437_p1 = pneg %p14436_p0 }
 0xc79   : > { %p14444_p6 = pnand %p14443_p5, %p14437_p1 }
 0xcc0   : > { %v10586_v48 = vpop.permute.xlu0 %10585 }
 0xcc1   : > { %10632 = vst.msk [vmem:[%s14999_s17 + $0x10] sm:$0xff] %vm10629_vm8, %v10586_v48 }
 0xcc2   : > { %11180 = vst.msk [vmem:[%s14999_s17 + $0x10] sm:$0xff] %vm11177_vm13, %v11134_v2  ;;  %v10588_v28 = vpop.permute.xlu1 %10587 }
 0xcc3   : > { %10633 = vst.msk [vmem:[%s14999_s17 + $0x18] sm:$0xff] %vm10629_vm8, %v10588_v28 }
 0xcc4   : > { %11181 = vst.msk [vmem:[%s14999_s17 + $0x18] sm:$0xff] %vm11177_vm13, %v11136_v36  ;;  %v10582_v4 = vpop.permute.xlu0 %10581 }
 0xcc5   : > { %10630 = vst.msk [vmem:[%s14999_s17] sm:$0xff] %vm10629_vm8, %v10582_v4 }
 0xcc6   : > { %11178 = vst.msk [vmem:[%s14999_s17] sm:$0xff] %vm11177_vm13, %v11130_v16  ;;  %v10584_v21 = vpop.permute.xlu1 %10583 }
 0xcc7   : > { %10631 = vst.msk [vmem:[%s14999_s17 + $0x8] sm:$0xff] %vm10629_vm8, %v10584_v21 }
 0xcc8   : > { %11179 = vst.msk [vmem:[%s14999_s17 + $0x8] sm:$0xff] %vm11177_vm13, %v11132_v7  ;;  %v10594_v24 = vpop.permute.xlu0 %10593 }
 0xcc9   : > { %10636 = vst.msk [vmem:[%s14999_s17 + $0x30] sm:$0xff] %vm10629_vm8, %v10594_v24 }
 0xcca   : > { %11184 = vst.msk [vmem:[%s14999_s17 + $0x30] sm:$0xff] %vm11177_vm13, %v11142_v46  ;;  %v10596_v50 = vpop.permute.xlu1 %10595 }
 0xccb   : > { %10637 = vst.msk [vmem:[%s14999_s17 + $0x38] sm:$0xff] %vm10629_vm8, %v10596_v50 }
 0xccc   : > { %11185 = vst.msk [vmem:[%s14999_s17 + $0x38] sm:$0xff] %vm11177_vm13, %v11144_v51  ;;  %v10590_v14 = vpop.permute.xlu0 %10589 }
 0xccd   : > { %10634 = vst.msk [vmem:[%s14999_s17 + $0x20] sm:$0xff] %vm10629_vm8, %v10590_v14 }
 0xcce   : > { %11182 = vst.msk [vmem:[%s14999_s17 + $0x20] sm:$0xff] %vm11177_vm13, %v11138_v25  ;;  %v10592_v22 = vpop.permute.xlu1 %10591 }
 0xccf   : > { %10635 = vst.msk [vmem:[%s14999_s17 + $0x28] sm:$0xff] %vm10629_vm8, %v10592_v22 }
 0xcd0   : > { %11183 = vst.msk [vmem:[%s14999_s17 + $0x28] sm:$0xff] %vm11177_vm13, %v11140_v8  ;;  %v10602_v42 = vpop.permute.xlu0 %10601 }
 0xcd1   : > { %10640 = vst.msk [vmem:[%s14999_s17 + $0x50] sm:$0xff] %vm10629_vm8, %v10602_v42 }
 0xcd2   : > { %11188 = vst.msk [vmem:[%s14999_s17 + $0x50] sm:$0xff] %vm11177_vm13, %v11150_v35  ;;  %v10604_v54 = vpop.permute.xlu1 %10603 }
 0xcd3   : > { %10641 = vst.msk [vmem:[%s14999_s17 + $0x58] sm:$0xff] %vm10629_vm8, %v10604_v54 }
 0xcd4   : > { %11189 = vst.msk [vmem:[%s14999_s17 + $0x58] sm:$0xff] %vm11177_vm13, %v11152_v11  ;;  %v10598_v1 = vpop.permute.xlu0 %10597 }
 0xcd5   : > { %10638 = vst.msk [vmem:[%s14999_s17 + $0x40] sm:$0xff] %vm10629_vm8, %v10598_v1 }
 0xcd6   : > { %11186 = vst.msk [vmem:[%s14999_s17 + $0x40] sm:$0xff] %vm11177_vm13, %v11146_v3  ;;  %v10600_v20 = vpop.permute.xlu1 %10599 }
 0xcd7   : > { %10639 = vst.msk [vmem:[%s14999_s17 + $0x48] sm:$0xff] %vm10629_vm8, %v10600_v20 }
 0xcd8   : > { %11187 = vst.msk [vmem:[%s14999_s17 + $0x48] sm:$0xff] %vm11177_vm13, %v11148_v9  ;;  %v10610_v39 = vpop.permute.xlu0 %10609 }
 0xcd9   : > { %10644 = vst.msk [vmem:[%s14999_s17 + $0x70] sm:$0xff] %vm10629_vm8, %v10610_v39 }
 0xcda   : > { %v10612_v23 = vpop.permute.xlu1 %10611 }
 0xcdb   : > { %10645 = vst.msk [vmem:[%s14999_s17 + $0x78] sm:$0xff] %vm10629_vm8, %v10612_v23 }
 0xcdc   : > { %v10606_v38 = vpop.permute.xlu0 %10605 }
 0xcdd   : > { %10642 = vst.msk [vmem:[%s14999_s17 + $0x60] sm:$0xff] %vm10629_vm8, %v10606_v38 }
 0xcde   : > { %11190 = vst.msk [vmem:[%s14999_s17 + $0x60] sm:$0xff] %vm11177_vm13, %v11154_v26  ;;  %v10608_v52 = vpop.permute.xlu1 %10607 }
 0xcdf   : > { %10643 = vst.msk [vmem:[%s14999_s17 + $0x68] sm:$0xff] %vm10629_vm8, %v10608_v52 }
 0xce0   : > { %11191 = vst.msk [vmem:[%s14999_s17 + $0x68] sm:$0xff] %vm11177_vm13, %v11156_v43  ;;  %v11158_v15 = vpop.permute.xlu0 %11157 }
 0xce1   : > { %11192 = vst.msk [vmem:[%s14999_s17 + $0x70] sm:$0xff] %vm11177_vm13, %v11158_v15 }
 0xce2   : > { %v11160_v5 = vpop.permute.xlu1 %11159 }
 0xce3   : > { %11193 = vst.msk [vmem:[%s14999_s17 + $0x78] sm:$0xff] %vm11177_vm13, %v11160_v5 }
 0xce4   : > { %14447 = shalt.err (!%p14444_p6)
}
 0xce5   : > { %s14448_s20 = scalar_lea.hbm %s18403_s26, 2048  ;;  %s14452_s14 = scalar_lea.hbm %s19413_s1, 8192 }
 0xce6   : > { %p14449_p7 = scmp.ne.s32.totalorder %s18403_s26, %s14448_s20  ;;  %p14453_p11 = scmp.lt.u32.totalorder %s18403_s26, %s19413_s1 }
 0xce7   : > { %p14454_p12 = scmp.lt.u32.totalorder %s14452_s14, %s14448_s20  ;;  %p14456_p0 = scmp.lt.u32.totalorder %s14448_s20, %s18403_s26 }
 0xce8   : > { %p14450_p9 = pnand %p14449_p7, %p14678_p3 }
 0xce9   : > { %p14455_p13 = por %p14454_p12, %p14453_p11 }
 0xcea   : > { %p14451_p10 = pneg %p14450_p9 }
 0xceb   : > { %p14457_p1 = por %p14456_p0, %p14455_p13 }
 0xced   : > { %p14458_p2 = pnand %p14457_p1, %p14451_p10 }
 0xcef   : > { %14461 = shalt.err (!%p14458_p2)
}
 0xcf0   : > { %s14536_s3 = smov 128   ;;  %s19414_s28 = smov 8  }
 0xcf1   : > { %14326 = dma.vmem_to_hbm [thread:$0]  (%p14678_p3), %s18396_s18, 2048, %s18403_s26, %s18409_s19, %s14536_s3, %s14536_s3, %s19414_s28  }
 0xcf2 PF: > { %p14332_p4 = scmp.ge.s32.totalorder %s14528_s30, 2  ;;  %s11226_s0 = sand.u32 1, %s14500_s24  }
 0xcf3   : > { %s11227_s21 = scalar_lea.sflag [#allocation3], %s11226_s0 }
 0xcf4   : > { %p14329_p5 = pnand %p14332_p4, %p14687_p8 }
 0xcf6   : > { %14495 = dma.done.wait (!%p14329_p5), %s11227_s21, 2048  }
 0xcf7   : > { %14497 = vsyncadd (!%p14329_p5), %s11227_s21, 4294965248  ;;  %s30_s30 = sadd.s32 1, %s14528_s30   ;;  %s19415_s22 = sld [smem:[#allocation5_spill]] }
 0xcf8   : > { %p27_p6 = scmp.ge.s32.totalorder %s30_s30, 6   ;;  %s19416_s26 = sld [smem:[#allocation10_spill]] }
 0xcf9   : > { %s19417_s27 = sld [smem:[#allocation6_spill]]  ;;  %s19418_s28 = sld [smem:[#allocation7_spill]] }
 0xcfa   : > { %s19419_s29 = sld [smem:[#allocation8_spill]]  ;;  %s19420_s0 = sld [smem:[#allocation9_spill]] }
 0xcfb   : > { %s19421_s24 = smov %s14504_s25  ;;  %29 = sbr.rel (!%p27_p6) target bundleno = 12 (0xc), region = 160 }
 0xcfd   : > { %s19422_s25 = smov %s19415_s22 }
 0xd02   :  { %11232 = vsyncpa [#allocation3], 1 }
 0xd03   :  { %11234 = vsyncpa [#allocation3 + $0x1], 1 }

</bundles_post_ra>
